<compile_context>
chip_gen: v7x
topology: tpu7x:2x2x1
jax: 0.10.0
libtpu: 0.0.40
codegen_flags: <defaults>
</compile_context>

<pallas_src>
import functools

import jax
import jax.numpy as jnp
from jax.experimental import pallas as pl
from jax.experimental.pallas import tpu as pltpu


def dif_points_kernel(feat_ref, pts_ref, w1_ref, b1_ref, w2_ref, b2_ref,
                      out_ref, hid_ref, *, W, H, num_views, sel_dtype,
                      slope=0.01):
    """One grid step == (batch element, tile of TN points).

    feat_ref : (1, M, C, W*H) bf16 VMEM  channels-first flattened feature maps
    pts_ref  : (1, 2*M, TN)   f32  VMEM  coords; row 2v = x_v, row 2v+1 = y_v
    w1/b1/w2/b2 : SMEM scalars of the MLP([M, M//2, 1]) view mixer (1x1 convs)
    out_ref  : (1, C, TN)     f32  VMEM  combined per-point features
    hid_ref  : (M//2, C, TN)  f32  VMEM  scratch accumulators (first mixer layer)
    """
    WH = W * H
    TN = pts_ref.shape[2]
    m_half = w1_ref.shape[0]

    # row index over the flattened W*H axis (sublane axis of selT); hoisted
    # out of the view loop (loop-invariant).
    row_ids = jax.lax.broadcasted_iota(jnp.int32, (WH, TN), 0)
    zero_sel = jnp.zeros((), sel_dtype)

    def leaky(z):
        return jnp.where(z >= 0.0, z, slope * z)

    pts_all = pts_ref[0]                       # (2*M, TN) lane-dense rows

    for v in range(num_views):
        x = pts_all[2 * v:2 * v + 1, :]        # grid x -> width  axis (size W)
        y = pts_all[2 * v + 1:2 * v + 2, :]    # grid y -> height axis (size H)
        # align_corners=True mapping from [-1, 1] to pixel coordinates
        ix = (x + 1.0) * (0.5 * (W - 1))
        iy = (y + 1.0) * (0.5 * (H - 1))
        x0f = jnp.floor(ix)
        y0f = jnp.floor(iy)
        x0 = x0f.astype(jnp.int32)
        y0 = y0f.astype(jnp.int32)
        x1 = x0 + 1
        y1 = y0 + 1
        tx = ix - x0f
        ty = iy - y0f
        mtx = 1.0 - tx
        mty = 1.0 - ty

        # zero padding: out-of-bounds corners get weight 0 on the cheap (1, TN)
        # vectors, before anything touches a (WH, TN) tile.
        def corner_w(xi, yi, wgt):
            valid = (xi >= 0) & (xi < W) & (yi >= 0) & (yi < H)
            return jnp.where(valid, wgt, 0.0).astype(sel_dtype)

        w00 = corner_w(x0, y0, mtx * mty)
        w01 = corner_w(x0, y1, mtx * ty)
        w10 = corner_w(x1, y0, tx * mty)
        w11 = corner_w(x1, y1, tx * ty)

        # Delta-index build: the 4 corner flat indices are f00 + {0, 1, H, H+1}
        # (pairwise distinct for H >= 2), so one subtraction plus four
        # scalar-constant compares builds the transposed selection matrix, and
        # each row matches at most one corner (no overwrite hazard).
        f00 = x0 * H + y0                      # (1, TN) int32 (may be OOB; ok)
        d = row_ids - f00                      # (WH, TN) int32
        selT = jnp.where(d == 0, w00, zero_sel)
        selT = jnp.where(d == 1, w01, selT)
        selT = jnp.where(d == H, w10, selT)
        selT = jnp.where(d == H + 1, w11, selT)

        # gather-as-matmul on the MXU (bf16 operands, f32 accumulate):
        # (C, W*H) @ (W*H, TN) -> (C, TN)
        sample = jnp.dot(feat_ref[0, v], selT.astype(jnp.bfloat16),
                         preferred_element_type=jnp.float32)

        # first mixer layer folded into the view loop, accumulated in VMEM
        # scratch: hidden_j += w1[j, v] * sample
        for j in range(m_half):
            if v == 0:
                hid_ref[j] = w1_ref[j, v] * sample
            else:
                hid_ref[j] = hid_ref[j] + w1_ref[j, v] * sample

    # second mixer layer: 1x1 conv over the hidden "view" axis + LeakyReLU
    out = jnp.zeros_like(hid_ref[0])
    for j in range(m_half):
        out = out + w2_ref[0, j] * leaky(hid_ref[j] + b1_ref[j])
    # TODO(synk): emit bf16 here if the (undefined) DensityNetwork head accepts
    # it — halves output HBM writeback.
    out_ref[0] = leaky(out + b2_ref[0])


def _sel_dtype_for_device():
    """bf16 selT build only on chips with a bf16 VALU (v6e / v7x); f32 otherwise."""
    try:
        kind = jax.devices()[0].device_kind.lower()
    except Exception:
        return jnp.float32
    return jnp.bfloat16 if ("v6" in kind or "v7" in kind) else jnp.float32


def dif_forward_points(proj_feats, proj_points, mixer_params, *, tn=256):
    """proj_feats: (B, M, C, W, H) f32 (PyTorch layout), proj_points: (B, M, N, 2).

    Returns p_feats with PyTorch layout (B, C, N) — forward_points'
    combine=='mlp' output (before the DensityNetwork head).
    """
    B, M, C, W, H = proj_feats.shape
    N = proj_points.shape[2]
    # delta-index selT build needs the corner deltas {0, 1, H, H+1} distinct
    assert H >= 2, "H must be >= 2 for the delta-index bilinear select"

    # channels-first pure reshape (no HBM transpose); bf16 halves HBM feature
    # traffic and feeds the MXU at native rate.  flat index = x * H + y.
    feat_flat = proj_feats.reshape(B, M, C, W * H).astype(jnp.bfloat16)
    # flat lane-dense coordinate rows: (B, 2*M, N); row 2v = x_v, row 2v+1 = y_v
    pts = jnp.transpose(proj_points, (0, 1, 3, 2)).reshape(B, 2 * M, N)

    n_pad = (-N) % tn
    if n_pad:
        pts = jnp.pad(pts, ((0, 0), (0, 0), (0, n_pad)))
    n_padded = N + n_pad

    w1, b1, w2, b2 = mixer_params
    m_half = w1.shape[0]
    sel_dtype = _sel_dtype_for_device()
    kernel = functools.partial(dif_points_kernel, W=W, H=H, num_views=M,
                               sel_dtype=sel_dtype)

    out = pl.pallas_call(
        kernel,
        out_shape=jax.ShapeDtypeStruct((B, C, n_padded), jnp.float32),
        grid=(B, n_padded // tn),
        in_specs=[
            # feature block is independent of the (innermost) N axis -> fetched
            # once per batch element and re-used across all point tiles.
            pl.BlockSpec((1, M, C, W * H), lambda b, n: (b, 0, 0, 0)),
            pl.BlockSpec((1, 2 * M, tn), lambda b, n: (b, 0, n)),
            pl.BlockSpec(memory_space=pltpu.MemorySpace.SMEM),
            pl.BlockSpec(memory_space=pltpu.MemorySpace.SMEM),
            pl.BlockSpec(memory_space=pltpu.MemorySpace.SMEM),
            pl.BlockSpec(memory_space=pltpu.MemorySpace.SMEM),
        ],
        out_specs=pl.BlockSpec((1, C, tn), lambda b, n: (b, 0, n)),
        scratch_shapes=[pltpu.VMEM((m_half, C, tn), jnp.float32)],
        compiler_params=pltpu.CompilerParams(
            # B is the leading parallel axis -> megacore split preserves the
            # per-batch feature-block reuse on each core (v7x).
            dimension_semantics=("parallel", "parallel"),
            # <1 MiB used today; re-budget vs v7x's 64 MiB if C / W*H grow.
            vmem_limit_bytes=32 * 1024 * 1024),
    )(feat_flat, pts, w1, b1, w2, b2)
    # TODO(synk): at production N the consumer should read the padded
    # (B, C, n_padded) buffer directly to avoid this extra HBM slice pass.
    return out[:, :, :N]  # (B, C, N)


def reference_forward_points(proj_feats, proj_points, mixer_params, slope=0.01,
                             weight_dtype=jnp.float32):
    """Pure-JAX replica of PyTorch index_2d + MLP view mixer, for verification.

    weight_dtype lets the reference round the bilinear weights the same way the
    kernel does (bf16 MXU operands), so the comparison isolates indexing/mixing
    correctness rather than bf16 rounding.
    """
    B, M, C, W, H = proj_feats.shape

    def rnd(w):
        return w.astype(weight_dtype).astype(jnp.float32)

    def sample_one(feat, pts):  # feat (C, W, H), pts (N, 2)
        x, y = pts[:, 0], pts[:, 1]
        ix = (x + 1.0) * 0.5 * (W - 1)
        iy = (y + 1.0) * 0.5 * (H - 1)
        x0 = jnp.floor(ix).astype(jnp.int32)
        y0 = jnp.floor(iy).astype(jnp.int32)
        x1, y1 = x0 + 1, y0 + 1
        tx, ty = ix - jnp.floor(ix), iy - jnp.floor(iy)

        def get(xi, yi):
            valid = (xi >= 0) & (xi < W) & (yi >= 0) & (yi < H)
            vals = feat[:, jnp.clip(xi, 0, W - 1), jnp.clip(yi, 0, H - 1)]  # (C, N)
            return jnp.where(valid[None, :], vals, 0.0)

        return (get(x0, y0) * rnd((1 - tx) * (1 - ty))[None]
                + get(x0, y1) * rnd((1 - tx) * ty)[None]
                + get(x1, y0) * rnd(tx * (1 - ty))[None]
                + get(x1, y1) * rnd(tx * ty)[None])  # (C, N)

    sampled = jax.vmap(jax.vmap(sample_one))(proj_feats, proj_points)  # (B, M, C, N)
    w1, b1, w2, b2 = mixer_params

    def leaky(z):
        return jnp.where(z >= 0.0, z, slope * z)

    h = leaky(jnp.einsum('jm,bmcn->bjcn', w1, sampled) + b1[None, :, None, None])
    o = leaky(jnp.einsum('kj,bjcn->bkcn', w2, h) + b2[None, :, None, None])
    return o[:, 0]  # (B, C, N)


if __name__ == "__main__":
    key = jax.random.PRNGKey(0)
    # batch, views, mid_ch, feat W/H, points (N not a multiple of the tile to
    # exercise the pad/slice path of the N-tiled grid)
    B, M, C, W, H, N = 2, 4, 32, 16, 16, 200
    k1, k2, k3, k4, k5, k6 = jax.random.split(key, 6)

    # TODO(synk): UNet3Plus image encoder source is not provided; its per-view
    # output feature maps are synthesized directly here instead of being
    # computed from `projs`.
    proj_feats = jax.random.normal(k1, (B, M, C, W, H), jnp.float32)
    proj_points = jax.random.uniform(k2, (B, M, N, 2), jnp.float32,
                                     minval=-1.1, maxval=1.1)

    # view_mixer = MLP([M, M//2, 1]) -> two 1x1 convs (+ LeakyReLU 0.01)
    w1 = jax.random.normal(k3, (M // 2, M), jnp.float32) * 0.5
    b1 = jax.random.normal(k4, (M // 2,), jnp.float32) * 0.1
    w2 = jax.random.normal(k5, (1, M // 2), jnp.float32) * 0.5
    b2 = jax.random.normal(k6, (1,), jnp.float32) * 0.1
    mixer_params = (w1, b1, w2, b2)

    # TODO(synk): DensityNetwork / SurfaceClassifier heads are not defined in
    # the provided source; the kernel output is p_feats fed into that head.
    p_feats = dif_forward_points(proj_feats, proj_points, mixer_params)
    p_feats = jax.block_until_ready(p_feats)
    assert p_feats.shape == (B, C, N)

    # Verify against the reference run with the same operand precision as the
    # kernel (bf16-rounded features and bf16 bilinear weights, f32 accumulate),
    # which isolates indexing / view-mixing correctness.
    feats_rounded = proj_feats.astype(jnp.bfloat16).astype(jnp.float32)
    ref = reference_forward_points(feats_rounded, proj_points, mixer_params,
                                   weight_dtype=jnp.bfloat16)
    max_err = float(jnp.max(jnp.abs(p_feats - ref)))
    if not jnp.allclose(p_feats, ref, atol=1e-2, rtol=1e-2):
        raise AssertionError(f"kernel/reference mismatch, max abs err={max_err}")
    print("KERNEL_OK")
</pallas_src>

<mosaic_0001>
module attributes {stable_mosaic.version = 11 : i64} {
  func.func @dif_points_kernel(%arg0: i32, %arg1: i32, %arg2: memref<1x4x32x256xbf16, #tpu.memory_space<vmem>>, %arg3: memref<1x8x256xf32, #tpu.memory_space<vmem>>, %arg4: memref<2x4xf32, #tpu.memory_space<smem>>, %arg5: memref<2xf32, #tpu.memory_space<smem>>, %arg6: memref<1x2xf32, #tpu.memory_space<smem>>, %arg7: memref<1xf32, #tpu.memory_space<smem>>, %arg8: memref<1x32x256xf32, #tpu.memory_space<vmem>>, %arg9: memref<2x32x256xf32, #tpu.memory_space<vmem>>) attributes {dimension_semantics = [#tpu.dimension_semantics<parallel>, #tpu.dimension_semantics<parallel>], iteration_bounds = array<i64: 2, 1>, scalar_prefetch = 0 : i64, scratch_operands = 1 : i64, tpu.core_type = #tpu.core_type<tc>, window_params = [{transform_indices = @transform_0, window_bounds = array<i64: 1, 4, 32, 256>}, {transform_indices = @transform_1, window_bounds = array<i64: 1, 8, 256>}, {transform_indices = @transform_2, window_bounds = array<i64: 2, 4>}, {transform_indices = @transform_3, window_bounds = array<i64: 2>}, {transform_indices = @transform_4, window_bounds = array<i64: 1, 2>}, {transform_indices = @transform_5, window_bounds = array<i64: 1>}, {transform_indices = @transform_6, window_bounds = array<i64: 1, 32, 256>}]} {
    %0 = tpu.iota {dimensions = array<i32: 0>} : vector<256x256xi32>
    %c0 = arith.constant 0 : index
    %c0_0 = arith.constant 0 : index
    %c0_1 = arith.constant 0 : index
    %1 = vector.load %arg3[%c0, %c0_0, %c0_1] : memref<1x8x256xf32, #tpu.memory_space<vmem>>, vector<1x8x256xf32>
    %2 = vector.shape_cast %1 : vector<1x8x256xf32> to vector<8x256xf32>
    %3 = vector.extract_strided_slice %2 {offsets = [0, 0], sizes = [1, 256], strides = [1, 1]} : vector<8x256xf32> to vector<1x256xf32>
    %4 = vector.extract_strided_slice %2 {offsets = [1, 0], sizes = [1, 256], strides = [1, 1]} : vector<8x256xf32> to vector<1x256xf32>
    %cst = arith.constant 1.000000e+00 : f32
    %5 = vector.broadcast %cst : f32 to vector<1x256xf32>
    %6 = arith.addf %3, %5 : vector<1x256xf32>
    %cst_2 = arith.constant 7.500000e+00 : f32
    %7 = vector.broadcast %cst_2 : f32 to vector<1x256xf32>
    %8 = arith.mulf %6, %7 : vector<1x256xf32>
    %cst_3 = arith.constant 1.000000e+00 : f32
    %9 = vector.broadcast %cst_3 : f32 to vector<1x256xf32>
    %10 = arith.addf %4, %9 : vector<1x256xf32>
    %cst_4 = arith.constant 7.500000e+00 : f32
    %11 = vector.broadcast %cst_4 : f32 to vector<1x256xf32>
    %12 = arith.mulf %10, %11 : vector<1x256xf32>
    %13 = math.floor %8 : vector<1x256xf32>
    %14 = math.floor %12 : vector<1x256xf32>
    %15 = arith.fptosi %13 : vector<1x256xf32> to vector<1x256xi32>
    %16 = arith.fptosi %14 : vector<1x256xf32> to vector<1x256xi32>
    %c1_i32 = arith.constant 1 : i32
    %17 = vector.broadcast %c1_i32 : i32 to vector<1x256xi32>
    %18 = arith.addi %15, %17 : vector<1x256xi32>
    %c1_i32_5 = arith.constant 1 : i32
    %19 = vector.broadcast %c1_i32_5 : i32 to vector<1x256xi32>
    %20 = arith.addi %16, %19 : vector<1x256xi32>
    %21 = arith.subf %8, %13 : vector<1x256xf32>
    %22 = arith.subf %12, %14 : vector<1x256xf32>
    %cst_6 = arith.constant 1.000000e+00 : f32
    %23 = vector.broadcast %cst_6 : f32 to vector<1x256xf32>
    %24 = arith.subf %23, %21 : vector<1x256xf32>
    %cst_7 = arith.constant 1.000000e+00 : f32
    %25 = vector.broadcast %cst_7 : f32 to vector<1x256xf32>
    %26 = arith.subf %25, %22 : vector<1x256xf32>
    %27 = arith.mulf %24, %26 : vector<1x256xf32>
    %c0_i32 = arith.constant 0 : i32
    %28 = vector.broadcast %c0_i32 : i32 to vector<1x256xi32>
    %29 = arith.cmpi sge, %15, %28 : vector<1x256xi32>
    %c16_i32 = arith.constant 16 : i32
    %30 = vector.broadcast %c16_i32 : i32 to vector<1x256xi32>
    %31 = arith.cmpi slt, %15, %30 : vector<1x256xi32>
    %32 = arith.andi %29, %31 : vector<1x256xi1>
    %c0_i32_8 = arith.constant 0 : i32
    %33 = vector.broadcast %c0_i32_8 : i32 to vector<1x256xi32>
    %34 = arith.cmpi sge, %16, %33 : vector<1x256xi32>
    %35 = arith.andi %32, %34 : vector<1x256xi1>
    %c16_i32_9 = arith.constant 16 : i32
    %36 = vector.broadcast %c16_i32_9 : i32 to vector<1x256xi32>
    %37 = arith.cmpi slt, %16, %36 : vector<1x256xi32>
    %38 = arith.andi %35, %37 : vector<1x256xi1>
    %cst_10 = arith.constant 0.000000e+00 : f32
    %39 = vector.broadcast %cst_10 : f32 to vector<1x256xf32>
    %40 = arith.select %38, %27, %39 : vector<1x256xi1>, vector<1x256xf32>
    %41 = arith.mulf %24, %22 : vector<1x256xf32>
    %c0_i32_11 = arith.constant 0 : i32
    %42 = vector.broadcast %c0_i32_11 : i32 to vector<1x256xi32>
    %43 = arith.cmpi sge, %15, %42 : vector<1x256xi32>
    %c16_i32_12 = arith.constant 16 : i32
    %44 = vector.broadcast %c16_i32_12 : i32 to vector<1x256xi32>
    %45 = arith.cmpi slt, %15, %44 : vector<1x256xi32>
    %46 = arith.andi %43, %45 : vector<1x256xi1>
    %c0_i32_13 = arith.constant 0 : i32
    %47 = vector.broadcast %c0_i32_13 : i32 to vector<1x256xi32>
    %48 = arith.cmpi sge, %20, %47 : vector<1x256xi32>
    %49 = arith.andi %46, %48 : vector<1x256xi1>
    %c16_i32_14 = arith.constant 16 : i32
    %50 = vector.broadcast %c16_i32_14 : i32 to vector<1x256xi32>
    %51 = arith.cmpi slt, %20, %50 : vector<1x256xi32>
    %52 = arith.andi %49, %51 : vector<1x256xi1>
    %cst_15 = arith.constant 0.000000e+00 : f32
    %53 = vector.broadcast %cst_15 : f32 to vector<1x256xf32>
    %54 = arith.select %52, %41, %53 : vector<1x256xi1>, vector<1x256xf32>
    %55 = arith.mulf %21, %26 : vector<1x256xf32>
    %c0_i32_16 = arith.constant 0 : i32
    %56 = vector.broadcast %c0_i32_16 : i32 to vector<1x256xi32>
    %57 = arith.cmpi sge, %18, %56 : vector<1x256xi32>
    %c16_i32_17 = arith.constant 16 : i32
    %58 = vector.broadcast %c16_i32_17 : i32 to vector<1x256xi32>
    %59 = arith.cmpi slt, %18, %58 : vector<1x256xi32>
    %60 = arith.andi %57, %59 : vector<1x256xi1>
    %c0_i32_18 = arith.constant 0 : i32
    %61 = vector.broadcast %c0_i32_18 : i32 to vector<1x256xi32>
    %62 = arith.cmpi sge, %16, %61 : vector<1x256xi32>
    %63 = arith.andi %60, %62 : vector<1x256xi1>
    %c16_i32_19 = arith.constant 16 : i32
    %64 = vector.broadcast %c16_i32_19 : i32 to vector<1x256xi32>
    %65 = arith.cmpi slt, %16, %64 : vector<1x256xi32>
    %66 = arith.andi %63, %65 : vector<1x256xi1>
    %cst_20 = arith.constant 0.000000e+00 : f32
    %67 = vector.broadcast %cst_20 : f32 to vector<1x256xf32>
    %68 = arith.select %66, %55, %67 : vector<1x256xi1>, vector<1x256xf32>
    %69 = arith.mulf %21, %22 : vector<1x256xf32>
    %c0_i32_21 = arith.constant 0 : i32
    %70 = vector.broadcast %c0_i32_21 : i32 to vector<1x256xi32>
    %71 = arith.cmpi sge, %18, %70 : vector<1x256xi32>
    %c16_i32_22 = arith.constant 16 : i32
    %72 = vector.broadcast %c16_i32_22 : i32 to vector<1x256xi32>
    %73 = arith.cmpi slt, %18, %72 : vector<1x256xi32>
    %74 = arith.andi %71, %73 : vector<1x256xi1>
    %c0_i32_23 = arith.constant 0 : i32
    %75 = vector.broadcast %c0_i32_23 : i32 to vector<1x256xi32>
    %76 = arith.cmpi sge, %20, %75 : vector<1x256xi32>
    %77 = arith.andi %74, %76 : vector<1x256xi1>
    %c16_i32_24 = arith.constant 16 : i32
    %78 = vector.broadcast %c16_i32_24 : i32 to vector<1x256xi32>
    %79 = arith.cmpi slt, %20, %78 : vector<1x256xi32>
    %80 = arith.andi %77, %79 : vector<1x256xi1>
    %cst_25 = arith.constant 0.000000e+00 : f32
    %81 = vector.broadcast %cst_25 : f32 to vector<1x256xf32>
    %82 = arith.select %80, %69, %81 : vector<1x256xi1>, vector<1x256xf32>
    %c16_i32_26 = arith.constant 16 : i32
    %83 = vector.broadcast %c16_i32_26 : i32 to vector<1x256xi32>
    %84 = arith.muli %15, %83 : vector<1x256xi32>
    %85 = arith.addi %84, %16 : vector<1x256xi32>
    %86 = vector.broadcast %85 : vector<1x256xi32> to vector<256x256xi32>
    %87 = arith.subi %0, %86 : vector<256x256xi32>
    %c0_i32_27 = arith.constant 0 : i32
    %88 = vector.broadcast %c0_i32_27 : i32 to vector<256x256xi32>
    %89 = arith.cmpi eq, %87, %88 : vector<256x256xi32>
    %cst_28 = arith.constant 0.000000e+00 : f32
    %90 = vector.shape_cast %40 : vector<1x256xf32> to vector<1x256xf32>
    %91 = vector.broadcast %90 : vector<1x256xf32> to vector<256x256xf32>
    %92 = vector.broadcast %cst_28 : f32 to vector<256x256xf32>
    %93 = arith.select %89, %91, %92 : vector<256x256xi1>, vector<256x256xf32>
    %c1_i32_29 = arith.constant 1 : i32
    %94 = vector.broadcast %c1_i32_29 : i32 to vector<256x256xi32>
    %95 = arith.cmpi eq, %87, %94 : vector<256x256xi32>
    %96 = vector.shape_cast %54 : vector<1x256xf32> to vector<1x256xf32>
    %97 = vector.broadcast %96 : vector<1x256xf32> to vector<256x256xf32>
    %98 = arith.select %95, %97, %93 : vector<256x256xi1>, vector<256x256xf32>
    %c16_i32_30 = arith.constant 16 : i32
    %99 = vector.broadcast %c16_i32_30 : i32 to vector<256x256xi32>
    %100 = arith.cmpi eq, %87, %99 : vector<256x256xi32>
    %101 = vector.shape_cast %68 : vector<1x256xf32> to vector<1x256xf32>
    %102 = vector.broadcast %101 : vector<1x256xf32> to vector<256x256xf32>
    %103 = arith.select %100, %102, %98 : vector<256x256xi1>, vector<256x256xf32>
    %c17_i32 = arith.constant 17 : i32
    %104 = vector.broadcast %c17_i32 : i32 to vector<256x256xi32>
    %105 = arith.cmpi eq, %87, %104 : vector<256x256xi32>
    %106 = vector.shape_cast %82 : vector<1x256xf32> to vector<1x256xf32>
    %107 = vector.broadcast %106 : vector<1x256xf32> to vector<256x256xf32>
    %108 = arith.select %105, %107, %103 : vector<256x256xi1>, vector<256x256xf32>
    %c0_31 = arith.constant 0 : index
    %c0_32 = arith.constant 0 : index
    %c0_33 = arith.constant 0 : index
    %c0_34 = arith.constant 0 : index
    %109 = vector.load %arg2[%c0_31, %c0_32, %c0_33, %c0_34] : memref<1x4x32x256xbf16, #tpu.memory_space<vmem>>, vector<1x1x32x256xbf16>
    %110 = vector.shape_cast %109 : vector<1x1x32x256xbf16> to vector<32x256xbf16>
    %111 = arith.truncf %108 : vector<256x256xf32> to vector<256x256xbf16>
    %cst_35 = arith.constant dense<0.000000e+00> : vector<32x256xf32>
    %112 = tpu.matmul %110, %111, %cst_35 {dimension_numbers = #tpu.dot_dimension_numbers<[1], [0], [0], [1], [0, 0, 1, 1], [], []>} : vector<32x256xbf16>, vector<256x256xbf16>, vector<32x256xf32> -> vector<32x256xf32>
    %c0_36 = arith.constant 0 : index
    %c0_37 = arith.constant 0 : index
    %113 = memref.load %arg4[%c0_36, %c0_37] : memref<2x4xf32, #tpu.memory_space<smem>>
    %114 = vector.broadcast %113 : f32 to vector<32x256xf32>
    %115 = arith.mulf %114, %112 : vector<32x256xf32>
    %c0_38 = arith.constant 0 : index
    %c0_39 = arith.constant 0 : index
    %c0_40 = arith.constant 0 : index
    %116 = vector.load %arg9[%c0_38, %c0_39, %c0_40] : memref<2x32x256xf32, #tpu.memory_space<vmem>>, vector<1x32x256xf32>
    %117 = vector.shape_cast %116 : vector<1x32x256xf32> to vector<32x256xf32>
    %118 = vector.shape_cast %115 : vector<32x256xf32> to vector<1x32x256xf32>
    tpu.vector_store %arg9[%c0_38, %c0_39, %c0_40], %118 {strides = array<i32>} : memref<2x32x256xf32, #tpu.memory_space<vmem>>, vector<1x32x256xf32>,
    %c1 = arith.constant 1 : index
    %c0_41 = arith.constant 0 : index
    %119 = memref.load %arg4[%c1, %c0_41] : memref<2x4xf32, #tpu.memory_space<smem>>
    %120 = vector.broadcast %119 : f32 to vector<32x256xf32>
    %121 = arith.mulf %120, %112 : vector<32x256xf32>
    %c1_42 = arith.constant 1 : index
    %c0_43 = arith.constant 0 : index
    %c0_44 = arith.constant 0 : index
    %122 = vector.load %arg9[%c1_42, %c0_43, %c0_44] : memref<2x32x256xf32, #tpu.memory_space<vmem>>, vector<1x32x256xf32>
    %123 = vector.shape_cast %122 : vector<1x32x256xf32> to vector<32x256xf32>
    %124 = vector.shape_cast %121 : vector<32x256xf32> to vector<1x32x256xf32>
    tpu.vector_store %arg9[%c1_42, %c0_43, %c0_44], %124 {strides = array<i32>} : memref<2x32x256xf32, #tpu.memory_space<vmem>>, vector<1x32x256xf32>,
    %125 = vector.extract_strided_slice %2 {offsets = [2, 0], sizes = [1, 256], strides = [1, 1]} : vector<8x256xf32> to vector<1x256xf32>
    %126 = vector.extract_strided_slice %2 {offsets = [3, 0], sizes = [1, 256], strides = [1, 1]} : vector<8x256xf32> to vector<1x256xf32>
    %cst_45 = arith.constant 1.000000e+00 : f32
    %127 = vector.broadcast %cst_45 : f32 to vector<1x256xf32>
    %128 = arith.addf %125, %127 : vector<1x256xf32>
    %cst_46 = arith.constant 7.500000e+00 : f32
    %129 = vector.broadcast %cst_46 : f32 to vector<1x256xf32>
    %130 = arith.mulf %128, %129 : vector<1x256xf32>
    %cst_47 = arith.constant 1.000000e+00 : f32
    %131 = vector.broadcast %cst_47 : f32 to vector<1x256xf32>
    %132 = arith.addf %126, %131 : vector<1x256xf32>
    %cst_48 = arith.constant 7.500000e+00 : f32
    %133 = vector.broadcast %cst_48 : f32 to vector<1x256xf32>
    %134 = arith.mulf %132, %133 : vector<1x256xf32>
    %135 = math.floor %130 : vector<1x256xf32>
    %136 = math.floor %134 : vector<1x256xf32>
    %137 = arith.fptosi %135 : vector<1x256xf32> to vector<1x256xi32>
    %138 = arith.fptosi %136 : vector<1x256xf32> to vector<1x256xi32>
    %c1_i32_49 = arith.constant 1 : i32
    %139 = vector.broadcast %c1_i32_49 : i32 to vector<1x256xi32>
    %140 = arith.addi %137, %139 : vector<1x256xi32>
    %c1_i32_50 = arith.constant 1 : i32
    %141 = vector.broadcast %c1_i32_50 : i32 to vector<1x256xi32>
    %142 = arith.addi %138, %141 : vector<1x256xi32>
    %143 = arith.subf %130, %135 : vector<1x256xf32>
    %144 = arith.subf %134, %136 : vector<1x256xf32>
    %cst_51 = arith.constant 1.000000e+00 : f32
    %145 = vector.broadcast %cst_51 : f32 to vector<1x256xf32>
    %146 = arith.subf %145, %143 : vector<1x256xf32>
    %cst_52 = arith.constant 1.000000e+00 : f32
    %147 = vector.broadcast %cst_52 : f32 to vector<1x256xf32>
    %148 = arith.subf %147, %144 : vector<1x256xf32>
    %149 = arith.mulf %146, %148 : vector<1x256xf32>
    %c0_i32_53 = arith.constant 0 : i32
    %150 = vector.broadcast %c0_i32_53 : i32 to vector<1x256xi32>
    %151 = arith.cmpi sge, %137, %150 : vector<1x256xi32>
    %c16_i32_54 = arith.constant 16 : i32
    %152 = vector.broadcast %c16_i32_54 : i32 to vector<1x256xi32>
    %153 = arith.cmpi slt, %137, %152 : vector<1x256xi32>
    %154 = arith.andi %151, %153 : vector<1x256xi1>
    %c0_i32_55 = arith.constant 0 : i32
    %155 = vector.broadcast %c0_i32_55 : i32 to vector<1x256xi32>
    %156 = arith.cmpi sge, %138, %155 : vector<1x256xi32>
    %157 = arith.andi %154, %156 : vector<1x256xi1>
    %c16_i32_56 = arith.constant 16 : i32
    %158 = vector.broadcast %c16_i32_56 : i32 to vector<1x256xi32>
    %159 = arith.cmpi slt, %138, %158 : vector<1x256xi32>
    %160 = arith.andi %157, %159 : vector<1x256xi1>
    %cst_57 = arith.constant 0.000000e+00 : f32
    %161 = vector.broadcast %cst_57 : f32 to vector<1x256xf32>
    %162 = arith.select %160, %149, %161 : vector<1x256xi1>, vector<1x256xf32>
    %163 = arith.mulf %146, %144 : vector<1x256xf32>
    %c0_i32_58 = arith.constant 0 : i32
    %164 = vector.broadcast %c0_i32_58 : i32 to vector<1x256xi32>
    %165 = arith.cmpi sge, %137, %164 : vector<1x256xi32>
    %c16_i32_59 = arith.constant 16 : i32
    %166 = vector.broadcast %c16_i32_59 : i32 to vector<1x256xi32>
    %167 = arith.cmpi slt, %137, %166 : vector<1x256xi32>
    %168 = arith.andi %165, %167 : vector<1x256xi1>
    %c0_i32_60 = arith.constant 0 : i32
    %169 = vector.broadcast %c0_i32_60 : i32 to vector<1x256xi32>
    %170 = arith.cmpi sge, %142, %169 : vector<1x256xi32>
    %171 = arith.andi %168, %170 : vector<1x256xi1>
    %c16_i32_61 = arith.constant 16 : i32
    %172 = vector.broadcast %c16_i32_61 : i32 to vector<1x256xi32>
    %173 = arith.cmpi slt, %142, %172 : vector<1x256xi32>
    %174 = arith.andi %171, %173 : vector<1x256xi1>
    %cst_62 = arith.constant 0.000000e+00 : f32
    %175 = vector.broadcast %cst_62 : f32 to vector<1x256xf32>
    %176 = arith.select %174, %163, %175 : vector<1x256xi1>, vector<1x256xf32>
    %177 = arith.mulf %143, %148 : vector<1x256xf32>
    %c0_i32_63 = arith.constant 0 : i32
    %178 = vector.broadcast %c0_i32_63 : i32 to vector<1x256xi32>
    %179 = arith.cmpi sge, %140, %178 : vector<1x256xi32>
    %c16_i32_64 = arith.constant 16 : i32
    %180 = vector.broadcast %c16_i32_64 : i32 to vector<1x256xi32>
    %181 = arith.cmpi slt, %140, %180 : vector<1x256xi32>
    %182 = arith.andi %179, %181 : vector<1x256xi1>
    %c0_i32_65 = arith.constant 0 : i32
    %183 = vector.broadcast %c0_i32_65 : i32 to vector<1x256xi32>
    %184 = arith.cmpi sge, %138, %183 : vector<1x256xi32>
    %185 = arith.andi %182, %184 : vector<1x256xi1>
    %c16_i32_66 = arith.constant 16 : i32
    %186 = vector.broadcast %c16_i32_66 : i32 to vector<1x256xi32>
    %187 = arith.cmpi slt, %138, %186 : vector<1x256xi32>
    %188 = arith.andi %185, %187 : vector<1x256xi1>
    %cst_67 = arith.constant 0.000000e+00 : f32
    %189 = vector.broadcast %cst_67 : f32 to vector<1x256xf32>
    %190 = arith.select %188, %177, %189 : vector<1x256xi1>, vector<1x256xf32>
    %191 = arith.mulf %143, %144 : vector<1x256xf32>
    %c0_i32_68 = arith.constant 0 : i32
    %192 = vector.broadcast %c0_i32_68 : i32 to vector<1x256xi32>
    %193 = arith.cmpi sge, %140, %192 : vector<1x256xi32>
    %c16_i32_69 = arith.constant 16 : i32
    %194 = vector.broadcast %c16_i32_69 : i32 to vector<1x256xi32>
    %195 = arith.cmpi slt, %140, %194 : vector<1x256xi32>
    %196 = arith.andi %193, %195 : vector<1x256xi1>
    %c0_i32_70 = arith.constant 0 : i32
    %197 = vector.broadcast %c0_i32_70 : i32 to vector<1x256xi32>
    %198 = arith.cmpi sge, %142, %197 : vector<1x256xi32>
    %199 = arith.andi %196, %198 : vector<1x256xi1>
    %c16_i32_71 = arith.constant 16 : i32
    %200 = vector.broadcast %c16_i32_71 : i32 to vector<1x256xi32>
    %201 = arith.cmpi slt, %142, %200 : vector<1x256xi32>
    %202 = arith.andi %199, %201 : vector<1x256xi1>
    %cst_72 = arith.constant 0.000000e+00 : f32
    %203 = vector.broadcast %cst_72 : f32 to vector<1x256xf32>
    %204 = arith.select %202, %191, %203 : vector<1x256xi1>, vector<1x256xf32>
    %c16_i32_73 = arith.constant 16 : i32
    %205 = vector.broadcast %c16_i32_73 : i32 to vector<1x256xi32>
    %206 = arith.muli %137, %205 : vector<1x256xi32>
    %207 = arith.addi %206, %138 : vector<1x256xi32>
    %208 = vector.broadcast %207 : vector<1x256xi32> to vector<256x256xi32>
    %209 = arith.subi %0, %208 : vector<256x256xi32>
    %c0_i32_74 = arith.constant 0 : i32
    %210 = vector.broadcast %c0_i32_74 : i32 to vector<256x256xi32>
    %211 = arith.cmpi eq, %209, %210 : vector<256x256xi32>
    %cst_75 = arith.constant 0.000000e+00 : f32
    %212 = vector.shape_cast %162 : vector<1x256xf32> to vector<1x256xf32>
    %213 = vector.broadcast %212 : vector<1x256xf32> to vector<256x256xf32>
    %214 = vector.broadcast %cst_75 : f32 to vector<256x256xf32>
    %215 = arith.select %211, %213, %214 : vector<256x256xi1>, vector<256x256xf32>
    %c1_i32_76 = arith.constant 1 : i32
    %216 = vector.broadcast %c1_i32_76 : i32 to vector<256x256xi32>
    %217 = arith.cmpi eq, %209, %216 : vector<256x256xi32>
    %218 = vector.shape_cast %176 : vector<1x256xf32> to vector<1x256xf32>
    %219 = vector.broadcast %218 : vector<1x256xf32> to vector<256x256xf32>
    %220 = arith.select %217, %219, %215 : vector<256x256xi1>, vector<256x256xf32>
    %c16_i32_77 = arith.constant 16 : i32
    %221 = vector.broadcast %c16_i32_77 : i32 to vector<256x256xi32>
    %222 = arith.cmpi eq, %209, %221 : vector<256x256xi32>
    %223 = vector.shape_cast %190 : vector<1x256xf32> to vector<1x256xf32>
    %224 = vector.broadcast %223 : vector<1x256xf32> to vector<256x256xf32>
    %225 = arith.select %222, %224, %220 : vector<256x256xi1>, vector<256x256xf32>
    %c17_i32_78 = arith.constant 17 : i32
    %226 = vector.broadcast %c17_i32_78 : i32 to vector<256x256xi32>
    %227 = arith.cmpi eq, %209, %226 : vector<256x256xi32>
    %228 = vector.shape_cast %204 : vector<1x256xf32> to vector<1x256xf32>
    %229 = vector.broadcast %228 : vector<1x256xf32> to vector<256x256xf32>
    %230 = arith.select %227, %229, %225 : vector<256x256xi1>, vector<256x256xf32>
    %c0_79 = arith.constant 0 : index
    %c1_80 = arith.constant 1 : index
    %c0_81 = arith.constant 0 : index
    %c0_82 = arith.constant 0 : index
    %231 = vector.load %arg2[%c0_79, %c1_80, %c0_81, %c0_82] : memref<1x4x32x256xbf16, #tpu.memory_space<vmem>>, vector<1x1x32x256xbf16>
    %232 = vector.shape_cast %231 : vector<1x1x32x256xbf16> to vector<32x256xbf16>
    %233 = arith.truncf %230 : vector<256x256xf32> to vector<256x256xbf16>
    %cst_83 = arith.constant dense<0.000000e+00> : vector<32x256xf32>
    %234 = tpu.matmul %232, %233, %cst_83 {dimension_numbers = #tpu.dot_dimension_numbers<[1], [0], [0], [1], [0, 0, 1, 1], [], []>} : vector<32x256xbf16>, vector<256x256xbf16>, vector<32x256xf32> -> vector<32x256xf32>
    %c0_84 = arith.constant 0 : index
    %c0_85 = arith.constant 0 : index
    %c0_86 = arith.constant 0 : index
    %235 = vector.load %arg9[%c0_84, %c0_85, %c0_86] : memref<2x32x256xf32, #tpu.memory_space<vmem>>, vector<1x32x256xf32>
    %236 = vector.shape_cast %235 : vector<1x32x256xf32> to vector<32x256xf32>
    %c0_87 = arith.constant 0 : index
    %c1_88 = arith.constant 1 : index
    %237 = memref.load %arg4[%c0_87, %c1_88] : memref<2x4xf32, #tpu.memory_space<smem>>
    %238 = vector.broadcast %237 : f32 to vector<32x256xf32>
    %239 = arith.mulf %238, %234 : vector<32x256xf32>
    %240 = arith.addf %236, %239 : vector<32x256xf32>
    %c0_89 = arith.constant 0 : index
    %c0_90 = arith.constant 0 : index
    %c0_91 = arith.constant 0 : index
    %241 = vector.load %arg9[%c0_89, %c0_90, %c0_91] : memref<2x32x256xf32, #tpu.memory_space<vmem>>, vector<1x32x256xf32>
    %242 = vector.shape_cast %241 : vector<1x32x256xf32> to vector<32x256xf32>
    %243 = vector.shape_cast %240 : vector<32x256xf32> to vector<1x32x256xf32>
    tpu.vector_store %arg9[%c0_89, %c0_90, %c0_91], %243 {strides = array<i32>} : memref<2x32x256xf32, #tpu.memory_space<vmem>>, vector<1x32x256xf32>,
    %c1_92 = arith.constant 1 : index
    %c0_93 = arith.constant 0 : index
    %c0_94 = arith.constant 0 : index
    %244 = vector.load %arg9[%c1_92, %c0_93, %c0_94] : memref<2x32x256xf32, #tpu.memory_space<vmem>>, vector<1x32x256xf32>
    %245 = vector.shape_cast %244 : vector<1x32x256xf32> to vector<32x256xf32>
    %c1_95 = arith.constant 1 : index
    %c1_96 = arith.constant 1 : index
    %246 = memref.load %arg4[%c1_95, %c1_96] : memref<2x4xf32, #tpu.memory_space<smem>>
    %247 = vector.broadcast %246 : f32 to vector<32x256xf32>
    %248 = arith.mulf %247, %234 : vector<32x256xf32>
    %249 = arith.addf %245, %248 : vector<32x256xf32>
    %c1_97 = arith.constant 1 : index
    %c0_98 = arith.constant 0 : index
    %c0_99 = arith.constant 0 : index
    %250 = vector.load %arg9[%c1_97, %c0_98, %c0_99] : memref<2x32x256xf32, #tpu.memory_space<vmem>>, vector<1x32x256xf32>
    %251 = vector.shape_cast %250 : vector<1x32x256xf32> to vector<32x256xf32>
    %252 = vector.shape_cast %249 : vector<32x256xf32> to vector<1x32x256xf32>
    tpu.vector_store %arg9[%c1_97, %c0_98, %c0_99], %252 {strides = array<i32>} : memref<2x32x256xf32, #tpu.memory_space<vmem>>, vector<1x32x256xf32>,
    %253 = vector.extract_strided_slice %2 {offsets = [4, 0], sizes = [1, 256], strides = [1, 1]} : vector<8x256xf32> to vector<1x256xf32>
    %254 = vector.extract_strided_slice %2 {offsets = [5, 0], sizes = [1, 256], strides = [1, 1]} : vector<8x256xf32> to vector<1x256xf32>
    %cst_100 = arith.constant 1.000000e+00 : f32
    %255 = vector.broadcast %cst_100 : f32 to vector<1x256xf32>
    %256 = arith.addf %253, %255 : vector<1x256xf32>
    %cst_101 = arith.constant 7.500000e+00 : f32
    %257 = vector.broadcast %cst_101 : f32 to vector<1x256xf32>
    %258 = arith.mulf %256, %257 : vector<1x256xf32>
    %cst_102 = arith.constant 1.000000e+00 : f32
    %259 = vector.broadcast %cst_102 : f32 to vector<1x256xf32>
    %260 = arith.addf %254, %259 : vector<1x256xf32>
    %cst_103 = arith.constant 7.500000e+00 : f32
    %261 = vector.broadcast %cst_103 : f32 to vector<1x256xf32>
    %262 = arith.mulf %260, %261 : vector<1x256xf32>
    %263 = math.floor %258 : vector<1x256xf32>
    %264 = math.floor %262 : vector<1x256xf32>
    %265 = arith.fptosi %263 : vector<1x256xf32> to vector<1x256xi32>
    %266 = arith.fptosi %264 : vector<1x256xf32> to vector<1x256xi32>
    %c1_i32_104 = arith.constant 1 : i32
    %267 = vector.broadcast %c1_i32_104 : i32 to vector<1x256xi32>
    %268 = arith.addi %265, %267 : vector<1x256xi32>
    %c1_i32_105 = arith.constant 1 : i32
    %269 = vector.broadcast %c1_i32_105 : i32 to vector<1x256xi32>
    %270 = arith.addi %266, %269 : vector<1x256xi32>
    %271 = arith.subf %258, %263 : vector<1x256xf32>
    %272 = arith.subf %262, %264 : vector<1x256xf32>
    %cst_106 = arith.constant 1.000000e+00 : f32
    %273 = vector.broadcast %cst_106 : f32 to vector<1x256xf32>
    %274 = arith.subf %273, %271 : vector<1x256xf32>
    %cst_107 = arith.constant 1.000000e+00 : f32
    %275 = vector.broadcast %cst_107 : f32 to vector<1x256xf32>
    %276 = arith.subf %275, %272 : vector<1x256xf32>
    %277 = arith.mulf %274, %276 : vector<1x256xf32>
    %c0_i32_108 = arith.constant 0 : i32
    %278 = vector.broadcast %c0_i32_108 : i32 to vector<1x256xi32>
    %279 = arith.cmpi sge, %265, %278 : vector<1x256xi32>
    %c16_i32_109 = arith.constant 16 : i32
    %280 = vector.broadcast %c16_i32_109 : i32 to vector<1x256xi32>
    %281 = arith.cmpi slt, %265, %280 : vector<1x256xi32>
    %282 = arith.andi %279, %281 : vector<1x256xi1>
    %c0_i32_110 = arith.constant 0 : i32
    %283 = vector.broadcast %c0_i32_110 : i32 to vector<1x256xi32>
    %284 = arith.cmpi sge, %266, %283 : vector<1x256xi32>
    %285 = arith.andi %282, %284 : vector<1x256xi1>
    %c16_i32_111 = arith.constant 16 : i32
    %286 = vector.broadcast %c16_i32_111 : i32 to vector<1x256xi32>
    %287 = arith.cmpi slt, %266, %286 : vector<1x256xi32>
    %288 = arith.andi %285, %287 : vector<1x256xi1>
    %cst_112 = arith.constant 0.000000e+00 : f32
    %289 = vector.broadcast %cst_112 : f32 to vector<1x256xf32>
    %290 = arith.select %288, %277, %289 : vector<1x256xi1>, vector<1x256xf32>
    %291 = arith.mulf %274, %272 : vector<1x256xf32>
    %c0_i32_113 = arith.constant 0 : i32
    %292 = vector.broadcast %c0_i32_113 : i32 to vector<1x256xi32>
    %293 = arith.cmpi sge, %265, %292 : vector<1x256xi32>
    %c16_i32_114 = arith.constant 16 : i32
    %294 = vector.broadcast %c16_i32_114 : i32 to vector<1x256xi32>
    %295 = arith.cmpi slt, %265, %294 : vector<1x256xi32>
    %296 = arith.andi %293, %295 : vector<1x256xi1>
    %c0_i32_115 = arith.constant 0 : i32
    %297 = vector.broadcast %c0_i32_115 : i32 to vector<1x256xi32>
    %298 = arith.cmpi sge, %270, %297 : vector<1x256xi32>
    %299 = arith.andi %296, %298 : vector<1x256xi1>
    %c16_i32_116 = arith.constant 16 : i32
    %300 = vector.broadcast %c16_i32_116 : i32 to vector<1x256xi32>
    %301 = arith.cmpi slt, %270, %300 : vector<1x256xi32>
    %302 = arith.andi %299, %301 : vector<1x256xi1>
    %cst_117 = arith.constant 0.000000e+00 : f32
    %303 = vector.broadcast %cst_117 : f32 to vector<1x256xf32>
    %304 = arith.select %302, %291, %303 : vector<1x256xi1>, vector<1x256xf32>
    %305 = arith.mulf %271, %276 : vector<1x256xf32>
    %c0_i32_118 = arith.constant 0 : i32
    %306 = vector.broadcast %c0_i32_118 : i32 to vector<1x256xi32>
    %307 = arith.cmpi sge, %268, %306 : vector<1x256xi32>
    %c16_i32_119 = arith.constant 16 : i32
    %308 = vector.broadcast %c16_i32_119 : i32 to vector<1x256xi32>
    %309 = arith.cmpi slt, %268, %308 : vector<1x256xi32>
    %310 = arith.andi %307, %309 : vector<1x256xi1>
    %c0_i32_120 = arith.constant 0 : i32
    %311 = vector.broadcast %c0_i32_120 : i32 to vector<1x256xi32>
    %312 = arith.cmpi sge, %266, %311 : vector<1x256xi32>
    %313 = arith.andi %310, %312 : vector<1x256xi1>
    %c16_i32_121 = arith.constant 16 : i32
    %314 = vector.broadcast %c16_i32_121 : i32 to vector<1x256xi32>
    %315 = arith.cmpi slt, %266, %314 : vector<1x256xi32>
    %316 = arith.andi %313, %315 : vector<1x256xi1>
    %cst_122 = arith.constant 0.000000e+00 : f32
    %317 = vector.broadcast %cst_122 : f32 to vector<1x256xf32>
    %318 = arith.select %316, %305, %317 : vector<1x256xi1>, vector<1x256xf32>
    %319 = arith.mulf %271, %272 : vector<1x256xf32>
    %c0_i32_123 = arith.constant 0 : i32
    %320 = vector.broadcast %c0_i32_123 : i32 to vector<1x256xi32>
    %321 = arith.cmpi sge, %268, %320 : vector<1x256xi32>
    %c16_i32_124 = arith.constant 16 : i32
    %322 = vector.broadcast %c16_i32_124 : i32 to vector<1x256xi32>
    %323 = arith.cmpi slt, %268, %322 : vector<1x256xi32>
    %324 = arith.andi %321, %323 : vector<1x256xi1>
    %c0_i32_125 = arith.constant 0 : i32
    %325 = vector.broadcast %c0_i32_125 : i32 to vector<1x256xi32>
    %326 = arith.cmpi sge, %270, %325 : vector<1x256xi32>
    %327 = arith.andi %324, %326 : vector<1x256xi1>
    %c16_i32_126 = arith.constant 16 : i32
    %328 = vector.broadcast %c16_i32_126 : i32 to vector<1x256xi32>
    %329 = arith.cmpi slt, %270, %328 : vector<1x256xi32>
    %330 = arith.andi %327, %329 : vector<1x256xi1>
    %cst_127 = arith.constant 0.000000e+00 : f32
    %331 = vector.broadcast %cst_127 : f32 to vector<1x256xf32>
    %332 = arith.select %330, %319, %331 : vector<1x256xi1>, vector<1x256xf32>
    %c16_i32_128 = arith.constant 16 : i32
    %333 = vector.broadcast %c16_i32_128 : i32 to vector<1x256xi32>
    %334 = arith.muli %265, %333 : vector<1x256xi32>
    %335 = arith.addi %334, %266 : vector<1x256xi32>
    %336 = vector.broadcast %335 : vector<1x256xi32> to vector<256x256xi32>
    %337 = arith.subi %0, %336 : vector<256x256xi32>
    %c0_i32_129 = arith.constant 0 : i32
    %338 = vector.broadcast %c0_i32_129 : i32 to vector<256x256xi32>
    %339 = arith.cmpi eq, %337, %338 : vector<256x256xi32>
    %cst_130 = arith.constant 0.000000e+00 : f32
    %340 = vector.shape_cast %290 : vector<1x256xf32> to vector<1x256xf32>
    %341 = vector.broadcast %340 : vector<1x256xf32> to vector<256x256xf32>
    %342 = vector.broadcast %cst_130 : f32 to vector<256x256xf32>
    %343 = arith.select %339, %341, %342 : vector<256x256xi1>, vector<256x256xf32>
    %c1_i32_131 = arith.constant 1 : i32
    %344 = vector.broadcast %c1_i32_131 : i32 to vector<256x256xi32>
    %345 = arith.cmpi eq, %337, %344 : vector<256x256xi32>
    %346 = vector.shape_cast %304 : vector<1x256xf32> to vector<1x256xf32>
    %347 = vector.broadcast %346 : vector<1x256xf32> to vector<256x256xf32>
    %348 = arith.select %345, %347, %343 : vector<256x256xi1>, vector<256x256xf32>
    %c16_i32_132 = arith.constant 16 : i32
    %349 = vector.broadcast %c16_i32_132 : i32 to vector<256x256xi32>
    %350 = arith.cmpi eq, %337, %349 : vector<256x256xi32>
    %351 = vector.shape_cast %318 : vector<1x256xf32> to vector<1x256xf32>
    %352 = vector.broadcast %351 : vector<1x256xf32> to vector<256x256xf32>
    %353 = arith.select %350, %352, %348 : vector<256x256xi1>, vector<256x256xf32>
    %c17_i32_133 = arith.constant 17 : i32
    %354 = vector.broadcast %c17_i32_133 : i32 to vector<256x256xi32>
    %355 = arith.cmpi eq, %337, %354 : vector<256x256xi32>
    %356 = vector.shape_cast %332 : vector<1x256xf32> to vector<1x256xf32>
    %357 = vector.broadcast %356 : vector<1x256xf32> to vector<256x256xf32>
    %358 = arith.select %355, %357, %353 : vector<256x256xi1>, vector<256x256xf32>
    %c0_134 = arith.constant 0 : index
    %c2 = arith.constant 2 : index
    %c0_135 = arith.constant 0 : index
    %c0_136 = arith.constant 0 : index
    %359 = vector.load %arg2[%c0_134, %c2, %c0_135, %c0_136] : memref<1x4x32x256xbf16, #tpu.memory_space<vmem>>, vector<1x1x32x256xbf16>
    %360 = vector.shape_cast %359 : vector<1x1x32x256xbf16> to vector<32x256xbf16>
    %361 = arith.truncf %358 : vector<256x256xf32> to vector<256x256xbf16>
    %cst_137 = arith.constant dense<0.000000e+00> : vector<32x256xf32>
    %362 = tpu.matmul %360, %361, %cst_137 {dimension_numbers = #tpu.dot_dimension_numbers<[1], [0], [0], [1], [0, 0, 1, 1], [], []>} : vector<32x256xbf16>, vector<256x256xbf16>, vector<32x256xf32> -> vector<32x256xf32>
    %c0_138 = arith.constant 0 : index
    %c0_139 = arith.constant 0 : index
    %c0_140 = arith.constant 0 : index
    %363 = vector.load %arg9[%c0_138, %c0_139, %c0_140] : memref<2x32x256xf32, #tpu.memory_space<vmem>>, vector<1x32x256xf32>
    %364 = vector.shape_cast %363 : vector<1x32x256xf32> to vector<32x256xf32>
    %c0_141 = arith.constant 0 : index
    %c2_142 = arith.constant 2 : index
    %365 = memref.load %arg4[%c0_141, %c2_142] : memref<2x4xf32, #tpu.memory_space<smem>>
    %366 = vector.broadcast %365 : f32 to vector<32x256xf32>
    %367 = arith.mulf %366, %362 : vector<32x256xf32>
    %368 = arith.addf %364, %367 : vector<32x256xf32>
    %c0_143 = arith.constant 0 : index
    %c0_144 = arith.constant 0 : index
    %c0_145 = arith.constant 0 : index
    %369 = vector.load %arg9[%c0_143, %c0_144, %c0_145] : memref<2x32x256xf32, #tpu.memory_space<vmem>>, vector<1x32x256xf32>
    %370 = vector.shape_cast %369 : vector<1x32x256xf32> to vector<32x256xf32>
    %371 = vector.shape_cast %368 : vector<32x256xf32> to vector<1x32x256xf32>
    tpu.vector_store %arg9[%c0_143, %c0_144, %c0_145], %371 {strides = array<i32>} : memref<2x32x256xf32, #tpu.memory_space<vmem>>, vector<1x32x256xf32>,
    %c1_146 = arith.constant 1 : index
    %c0_147 = arith.constant 0 : index
    %c0_148 = arith.constant 0 : index
    %372 = vector.load %arg9[%c1_146, %c0_147, %c0_148] : memref<2x32x256xf32, #tpu.memory_space<vmem>>, vector<1x32x256xf32>
    %373 = vector.shape_cast %372 : vector<1x32x256xf32> to vector<32x256xf32>
    %c1_149 = arith.constant 1 : index
    %c2_150 = arith.constant 2 : index
    %374 = memref.load %arg4[%c1_149, %c2_150] : memref<2x4xf32, #tpu.memory_space<smem>>
    %375 = vector.broadcast %374 : f32 to vector<32x256xf32>
    %376 = arith.mulf %375, %362 : vector<32x256xf32>
    %377 = arith.addf %373, %376 : vector<32x256xf32>
    %c1_151 = arith.constant 1 : index
    %c0_152 = arith.constant 0 : index
    %c0_153 = arith.constant 0 : index
    %378 = vector.load %arg9[%c1_151, %c0_152, %c0_153] : memref<2x32x256xf32, #tpu.memory_space<vmem>>, vector<1x32x256xf32>
    %379 = vector.shape_cast %378 : vector<1x32x256xf32> to vector<32x256xf32>
    %380 = vector.shape_cast %377 : vector<32x256xf32> to vector<1x32x256xf32>
    tpu.vector_store %arg9[%c1_151, %c0_152, %c0_153], %380 {strides = array<i32>} : memref<2x32x256xf32, #tpu.memory_space<vmem>>, vector<1x32x256xf32>,
    %381 = vector.extract_strided_slice %2 {offsets = [6, 0], sizes = [1, 256], strides = [1, 1]} : vector<8x256xf32> to vector<1x256xf32>
    %382 = vector.extract_strided_slice %2 {offsets = [7, 0], sizes = [1, 256], strides = [1, 1]} : vector<8x256xf32> to vector<1x256xf32>
    %cst_154 = arith.constant 1.000000e+00 : f32
    %383 = vector.broadcast %cst_154 : f32 to vector<1x256xf32>
    %384 = arith.addf %381, %383 : vector<1x256xf32>
    %cst_155 = arith.constant 7.500000e+00 : f32
    %385 = vector.broadcast %cst_155 : f32 to vector<1x256xf32>
    %386 = arith.mulf %384, %385 : vector<1x256xf32>
    %cst_156 = arith.constant 1.000000e+00 : f32
    %387 = vector.broadcast %cst_156 : f32 to vector<1x256xf32>
    %388 = arith.addf %382, %387 : vector<1x256xf32>
    %cst_157 = arith.constant 7.500000e+00 : f32
    %389 = vector.broadcast %cst_157 : f32 to vector<1x256xf32>
    %390 = arith.mulf %388, %389 : vector<1x256xf32>
    %391 = math.floor %386 : vector<1x256xf32>
    %392 = math.floor %390 : vector<1x256xf32>
    %393 = arith.fptosi %391 : vector<1x256xf32> to vector<1x256xi32>
    %394 = arith.fptosi %392 : vector<1x256xf32> to vector<1x256xi32>
    %c1_i32_158 = arith.constant 1 : i32
    %395 = vector.broadcast %c1_i32_158 : i32 to vector<1x256xi32>
    %396 = arith.addi %393, %395 : vector<1x256xi32>
    %c1_i32_159 = arith.constant 1 : i32
    %397 = vector.broadcast %c1_i32_159 : i32 to vector<1x256xi32>
    %398 = arith.addi %394, %397 : vector<1x256xi32>
    %399 = arith.subf %386, %391 : vector<1x256xf32>
    %400 = arith.subf %390, %392 : vector<1x256xf32>
    %cst_160 = arith.constant 1.000000e+00 : f32
    %401 = vector.broadcast %cst_160 : f32 to vector<1x256xf32>
    %402 = arith.subf %401, %399 : vector<1x256xf32>
    %cst_161 = arith.constant 1.000000e+00 : f32
    %403 = vector.broadcast %cst_161 : f32 to vector<1x256xf32>
    %404 = arith.subf %403, %400 : vector<1x256xf32>
    %405 = arith.mulf %402, %404 : vector<1x256xf32>
    %c0_i32_162 = arith.constant 0 : i32
    %406 = vector.broadcast %c0_i32_162 : i32 to vector<1x256xi32>
    %407 = arith.cmpi sge, %393, %406 : vector<1x256xi32>
    %c16_i32_163 = arith.constant 16 : i32
    %408 = vector.broadcast %c16_i32_163 : i32 to vector<1x256xi32>
    %409 = arith.cmpi slt, %393, %408 : vector<1x256xi32>
    %410 = arith.andi %407, %409 : vector<1x256xi1>
    %c0_i32_164 = arith.constant 0 : i32
    %411 = vector.broadcast %c0_i32_164 : i32 to vector<1x256xi32>
    %412 = arith.cmpi sge, %394, %411 : vector<1x256xi32>
    %413 = arith.andi %410, %412 : vector<1x256xi1>
    %c16_i32_165 = arith.constant 16 : i32
    %414 = vector.broadcast %c16_i32_165 : i32 to vector<1x256xi32>
    %415 = arith.cmpi slt, %394, %414 : vector<1x256xi32>
    %416 = arith.andi %413, %415 : vector<1x256xi1>
    %cst_166 = arith.constant 0.000000e+00 : f32
    %417 = vector.broadcast %cst_166 : f32 to vector<1x256xf32>
    %418 = arith.select %416, %405, %417 : vector<1x256xi1>, vector<1x256xf32>
    %419 = arith.mulf %402, %400 : vector<1x256xf32>
    %c0_i32_167 = arith.constant 0 : i32
    %420 = vector.broadcast %c0_i32_167 : i32 to vector<1x256xi32>
    %421 = arith.cmpi sge, %393, %420 : vector<1x256xi32>
    %c16_i32_168 = arith.constant 16 : i32
    %422 = vector.broadcast %c16_i32_168 : i32 to vector<1x256xi32>
    %423 = arith.cmpi slt, %393, %422 : vector<1x256xi32>
    %424 = arith.andi %421, %423 : vector<1x256xi1>
    %c0_i32_169 = arith.constant 0 : i32
    %425 = vector.broadcast %c0_i32_169 : i32 to vector<1x256xi32>
    %426 = arith.cmpi sge, %398, %425 : vector<1x256xi32>
    %427 = arith.andi %424, %426 : vector<1x256xi1>
    %c16_i32_170 = arith.constant 16 : i32
    %428 = vector.broadcast %c16_i32_170 : i32 to vector<1x256xi32>
    %429 = arith.cmpi slt, %398, %428 : vector<1x256xi32>
    %430 = arith.andi %427, %429 : vector<1x256xi1>
    %cst_171 = arith.constant 0.000000e+00 : f32
    %431 = vector.broadcast %cst_171 : f32 to vector<1x256xf32>
    %432 = arith.select %430, %419, %431 : vector<1x256xi1>, vector<1x256xf32>
    %433 = arith.mulf %399, %404 : vector<1x256xf32>
    %c0_i32_172 = arith.constant 0 : i32
    %434 = vector.broadcast %c0_i32_172 : i32 to vector<1x256xi32>
    %435 = arith.cmpi sge, %396, %434 : vector<1x256xi32>
    %c16_i32_173 = arith.constant 16 : i32
    %436 = vector.broadcast %c16_i32_173 : i32 to vector<1x256xi32>
    %437 = arith.cmpi slt, %396, %436 : vector<1x256xi32>
    %438 = arith.andi %435, %437 : vector<1x256xi1>
    %c0_i32_174 = arith.constant 0 : i32
    %439 = vector.broadcast %c0_i32_174 : i32 to vector<1x256xi32>
    %440 = arith.cmpi sge, %394, %439 : vector<1x256xi32>
    %441 = arith.andi %438, %440 : vector<1x256xi1>
    %c16_i32_175 = arith.constant 16 : i32
    %442 = vector.broadcast %c16_i32_175 : i32 to vector<1x256xi32>
    %443 = arith.cmpi slt, %394, %442 : vector<1x256xi32>
    %444 = arith.andi %441, %443 : vector<1x256xi1>
    %cst_176 = arith.constant 0.000000e+00 : f32
    %445 = vector.broadcast %cst_176 : f32 to vector<1x256xf32>
    %446 = arith.select %444, %433, %445 : vector<1x256xi1>, vector<1x256xf32>
    %447 = arith.mulf %399, %400 : vector<1x256xf32>
    %c0_i32_177 = arith.constant 0 : i32
    %448 = vector.broadcast %c0_i32_177 : i32 to vector<1x256xi32>
    %449 = arith.cmpi sge, %396, %448 : vector<1x256xi32>
    %c16_i32_178 = arith.constant 16 : i32
    %450 = vector.broadcast %c16_i32_178 : i32 to vector<1x256xi32>
    %451 = arith.cmpi slt, %396, %450 : vector<1x256xi32>
    %452 = arith.andi %449, %451 : vector<1x256xi1>
    %c0_i32_179 = arith.constant 0 : i32
    %453 = vector.broadcast %c0_i32_179 : i32 to vector<1x256xi32>
    %454 = arith.cmpi sge, %398, %453 : vector<1x256xi32>
    %455 = arith.andi %452, %454 : vector<1x256xi1>
    %c16_i32_180 = arith.constant 16 : i32
    %456 = vector.broadcast %c16_i32_180 : i32 to vector<1x256xi32>
    %457 = arith.cmpi slt, %398, %456 : vector<1x256xi32>
    %458 = arith.andi %455, %457 : vector<1x256xi1>
    %cst_181 = arith.constant 0.000000e+00 : f32
    %459 = vector.broadcast %cst_181 : f32 to vector<1x256xf32>
    %460 = arith.select %458, %447, %459 : vector<1x256xi1>, vector<1x256xf32>
    %c16_i32_182 = arith.constant 16 : i32
    %461 = vector.broadcast %c16_i32_182 : i32 to vector<1x256xi32>
    %462 = arith.muli %393, %461 : vector<1x256xi32>
    %463 = arith.addi %462, %394 : vector<1x256xi32>
    %464 = vector.broadcast %463 : vector<1x256xi32> to vector<256x256xi32>
    %465 = arith.subi %0, %464 : vector<256x256xi32>
    %c0_i32_183 = arith.constant 0 : i32
    %466 = vector.broadcast %c0_i32_183 : i32 to vector<256x256xi32>
    %467 = arith.cmpi eq, %465, %466 : vector<256x256xi32>
    %cst_184 = arith.constant 0.000000e+00 : f32
    %468 = vector.shape_cast %418 : vector<1x256xf32> to vector<1x256xf32>
    %469 = vector.broadcast %468 : vector<1x256xf32> to vector<256x256xf32>
    %470 = vector.broadcast %cst_184 : f32 to vector<256x256xf32>
    %471 = arith.select %467, %469, %470 : vector<256x256xi1>, vector<256x256xf32>
    %c1_i32_185 = arith.constant 1 : i32
    %472 = vector.broadcast %c1_i32_185 : i32 to vector<256x256xi32>
    %473 = arith.cmpi eq, %465, %472 : vector<256x256xi32>
    %474 = vector.shape_cast %432 : vector<1x256xf32> to vector<1x256xf32>
    %475 = vector.broadcast %474 : vector<1x256xf32> to vector<256x256xf32>
    %476 = arith.select %473, %475, %471 : vector<256x256xi1>, vector<256x256xf32>
    %c16_i32_186 = arith.constant 16 : i32
    %477 = vector.broadcast %c16_i32_186 : i32 to vector<256x256xi32>
    %478 = arith.cmpi eq, %465, %477 : vector<256x256xi32>
    %479 = vector.shape_cast %446 : vector<1x256xf32> to vector<1x256xf32>
    %480 = vector.broadcast %479 : vector<1x256xf32> to vector<256x256xf32>
    %481 = arith.select %478, %480, %476 : vector<256x256xi1>, vector<256x256xf32>
    %c17_i32_187 = arith.constant 17 : i32
    %482 = vector.broadcast %c17_i32_187 : i32 to vector<256x256xi32>
    %483 = arith.cmpi eq, %465, %482 : vector<256x256xi32>
    %484 = vector.shape_cast %460 : vector<1x256xf32> to vector<1x256xf32>
    %485 = vector.broadcast %484 : vector<1x256xf32> to vector<256x256xf32>
    %486 = arith.select %483, %485, %481 : vector<256x256xi1>, vector<256x256xf32>
    %c0_188 = arith.constant 0 : index
    %c3 = arith.constant 3 : index
    %c0_189 = arith.constant 0 : index
    %c0_190 = arith.constant 0 : index
    %487 = vector.load %arg2[%c0_188, %c3, %c0_189, %c0_190] : memref<1x4x32x256xbf16, #tpu.memory_space<vmem>>, vector<1x1x32x256xbf16>
    %488 = vector.shape_cast %487 : vector<1x1x32x256xbf16> to vector<32x256xbf16>
    %489 = arith.truncf %486 : vector<256x256xf32> to vector<256x256xbf16>
    %cst_191 = arith.constant dense<0.000000e+00> : vector<32x256xf32>
    %490 = tpu.matmul %488, %489, %cst_191 {dimension_numbers = #tpu.dot_dimension_numbers<[1], [0], [0], [1], [0, 0, 1, 1], [], []>} : vector<32x256xbf16>, vector<256x256xbf16>, vector<32x256xf32> -> vector<32x256xf32>
    %c0_192 = arith.constant 0 : index
    %c0_193 = arith.constant 0 : index
    %c0_194 = arith.constant 0 : index
    %491 = vector.load %arg9[%c0_192, %c0_193, %c0_194] : memref<2x32x256xf32, #tpu.memory_space<vmem>>, vector<1x32x256xf32>
    %492 = vector.shape_cast %491 : vector<1x32x256xf32> to vector<32x256xf32>
    %c0_195 = arith.constant 0 : index
    %c3_196 = arith.constant 3 : index
    %493 = memref.load %arg4[%c0_195, %c3_196] : memref<2x4xf32, #tpu.memory_space<smem>>
    %494 = vector.broadcast %493 : f32 to vector<32x256xf32>
    %495 = arith.mulf %494, %490 : vector<32x256xf32>
    %496 = arith.addf %492, %495 : vector<32x256xf32>
    %c0_197 = arith.constant 0 : index
    %c0_198 = arith.constant 0 : index
    %c0_199 = arith.constant 0 : index
    %497 = vector.load %arg9[%c0_197, %c0_198, %c0_199] : memref<2x32x256xf32, #tpu.memory_space<vmem>>, vector<1x32x256xf32>
    %498 = vector.shape_cast %497 : vector<1x32x256xf32> to vector<32x256xf32>
    %499 = vector.shape_cast %496 : vector<32x256xf32> to vector<1x32x256xf32>
    tpu.vector_store %arg9[%c0_197, %c0_198, %c0_199], %499 {strides = array<i32>} : memref<2x32x256xf32, #tpu.memory_space<vmem>>, vector<1x32x256xf32>,
    %c1_200 = arith.constant 1 : index
    %c0_201 = arith.constant 0 : index
    %c0_202 = arith.constant 0 : index
    %500 = vector.load %arg9[%c1_200, %c0_201, %c0_202] : memref<2x32x256xf32, #tpu.memory_space<vmem>>, vector<1x32x256xf32>
    %501 = vector.shape_cast %500 : vector<1x32x256xf32> to vector<32x256xf32>
    %c1_203 = arith.constant 1 : index
    %c3_204 = arith.constant 3 : index
    %502 = memref.load %arg4[%c1_203, %c3_204] : memref<2x4xf32, #tpu.memory_space<smem>>
    %503 = vector.broadcast %502 : f32 to vector<32x256xf32>
    %504 = arith.mulf %503, %490 : vector<32x256xf32>
    %505 = arith.addf %501, %504 : vector<32x256xf32>
    %c1_205 = arith.constant 1 : index
    %c0_206 = arith.constant 0 : index
    %c0_207 = arith.constant 0 : index
    %506 = vector.load %arg9[%c1_205, %c0_206, %c0_207] : memref<2x32x256xf32, #tpu.memory_space<vmem>>, vector<1x32x256xf32>
    %507 = vector.shape_cast %506 : vector<1x32x256xf32> to vector<32x256xf32>
    %508 = vector.shape_cast %505 : vector<32x256xf32> to vector<1x32x256xf32>
    tpu.vector_store %arg9[%c1_205, %c0_206, %c0_207], %508 {strides = array<i32>} : memref<2x32x256xf32, #tpu.memory_space<vmem>>, vector<1x32x256xf32>,
    %cst_208 = arith.constant 0.000000e+00 : f32
    %509 = vector.broadcast %cst_208 : f32 to vector<32x256xf32>
    %c0_209 = arith.constant 0 : index
    %c0_210 = arith.constant 0 : index
    %510 = memref.load %arg6[%c0_209, %c0_210] : memref<1x2xf32, #tpu.memory_space<smem>>
    %c0_211 = arith.constant 0 : index
    %c0_212 = arith.constant 0 : index
    %c0_213 = arith.constant 0 : index
    %511 = vector.load %arg9[%c0_211, %c0_212, %c0_213] : memref<2x32x256xf32, #tpu.memory_space<vmem>>, vector<1x32x256xf32>
    %512 = vector.shape_cast %511 : vector<1x32x256xf32> to vector<32x256xf32>
    %c0_214 = arith.constant 0 : index
    %513 = memref.load %arg5[%c0_214] : memref<2xf32, #tpu.memory_space<smem>>
    %514 = vector.broadcast %513 : f32 to vector<32x256xf32>
    %515 = arith.addf %512, %514 : vector<32x256xf32>
    %cst_215 = arith.constant 0.000000e+00 : f32
    %516 = vector.broadcast %cst_215 : f32 to vector<32x256xf32>
    %517 = arith.cmpf oge, %515, %516 : vector<32x256xf32>
    %cst_216 = arith.constant 0.00999999977 : f32
    %518 = vector.broadcast %cst_216 : f32 to vector<32x256xf32>
    %519 = arith.mulf %518, %515 : vector<32x256xf32>
    %520 = arith.select %517, %515, %519 : vector<32x256xi1>, vector<32x256xf32>
    %521 = vector.broadcast %510 : f32 to vector<32x256xf32>
    %522 = arith.mulf %521, %520 : vector<32x256xf32>
    %523 = arith.addf %509, %522 : vector<32x256xf32>
    %c0_217 = arith.constant 0 : index
    %c1_218 = arith.constant 1 : index
    %524 = memref.load %arg6[%c0_217, %c1_218] : memref<1x2xf32, #tpu.memory_space<smem>>
    %c1_219 = arith.constant 1 : index
    %c0_220 = arith.constant 0 : index
    %c0_221 = arith.constant 0 : index
    %525 = vector.load %arg9[%c1_219, %c0_220, %c0_221] : memref<2x32x256xf32, #tpu.memory_space<vmem>>, vector<1x32x256xf32>
    %526 = vector.shape_cast %525 : vector<1x32x256xf32> to vector<32x256xf32>
    %c1_222 = arith.constant 1 : index
    %527 = memref.load %arg5[%c1_222] : memref<2xf32, #tpu.memory_space<smem>>
    %528 = vector.broadcast %527 : f32 to vector<32x256xf32>
    %529 = arith.addf %526, %528 : vector<32x256xf32>
    %cst_223 = arith.constant 0.000000e+00 : f32
    %530 = vector.broadcast %cst_223 : f32 to vector<32x256xf32>
    %531 = arith.cmpf oge, %529, %530 : vector<32x256xf32>
    %cst_224 = arith.constant 0.00999999977 : f32
    %532 = vector.broadcast %cst_224 : f32 to vector<32x256xf32>
    %533 = arith.mulf %532, %529 : vector<32x256xf32>
    %534 = arith.select %531, %529, %533 : vector<32x256xi1>, vector<32x256xf32>
    %535 = vector.broadcast %524 : f32 to vector<32x256xf32>
    %536 = arith.mulf %535, %534 : vector<32x256xf32>
    %537 = arith.addf %523, %536 : vector<32x256xf32>
    %c0_225 = arith.constant 0 : index
    %538 = memref.load %arg7[%c0_225] : memref<1xf32, #tpu.memory_space<smem>>
    %539 = vector.broadcast %538 : f32 to vector<32x256xf32>
    %540 = arith.addf %537, %539 : vector<32x256xf32>
    %cst_226 = arith.constant 0.000000e+00 : f32
    %541 = vector.broadcast %cst_226 : f32 to vector<32x256xf32>
    %542 = arith.cmpf oge, %540, %541 : vector<32x256xf32>
    %cst_227 = arith.constant 0.00999999977 : f32
    %543 = vector.broadcast %cst_227 : f32 to vector<32x256xf32>
    %544 = arith.mulf %543, %540 : vector<32x256xf32>
    %545 = arith.select %542, %540, %544 : vector<32x256xi1>, vector<32x256xf32>
    %c0_228 = arith.constant 0 : index
    %c0_229 = arith.constant 0 : index
    %c0_230 = arith.constant 0 : index
    %546 = vector.load %arg8[%c0_228, %c0_229, %c0_230] : memref<1x32x256xf32, #tpu.memory_space<vmem>>, vector<1x32x256xf32>
    %547 = vector.shape_cast %546 : vector<1x32x256xf32> to vector<32x256xf32>
    %548 = vector.shape_cast %545 : vector<32x256xf32> to vector<1x32x256xf32>
    tpu.vector_store %arg8[%c0_228, %c0_229, %c0_230], %548 {strides = array<i32>} : memref<1x32x256xf32, #tpu.memory_space<vmem>>, vector<1x32x256xf32>,
    return
  }
  func.func @transform_0(%arg0: i32, %arg1: i32) -> (i32, i32, i32, i32) {
    %c0_i32 = arith.constant 0 : i32
    %c0_i32_0 = arith.constant 0 : i32
    %c0_i32_1 = arith.constant 0 : i32
    %c0_i32_2 = arith.constant 0 : i32
    return %arg0, %c0_i32, %c0_i32_0, %c0_i32_1 : i32, i32, i32, i32
  }
  func.func @transform_1(%arg0: i32, %arg1: i32) -> (i32, i32, i32) {
    %c0_i32 = arith.constant 0 : i32
    %c0_i32_0 = arith.constant 0 : i32
    return %arg0, %c0_i32, %arg1 : i32, i32, i32
  }
  func.func @transform_2(%arg0: i32, %arg1: i32) -> (i32, i32) {
    %c0_i32 = arith.constant 0 : i32
    %c0_i32_0 = arith.constant 0 : i32
    %c0_i32_1 = arith.constant 0 : i32
    return %c0_i32, %c0_i32_0 : i32, i32
  }
  func.func @transform_3(%arg0: i32, %arg1: i32) -> i32 {
    %c0_i32 = arith.constant 0 : i32
    %c0_i32_0 = arith.constant 0 : i32
    return %c0_i32 : i32
  }
  func.func @transform_4(%arg0: i32, %arg1: i32) -> (i32, i32) {
    %c0_i32 = arith.constant 0 : i32
    %c0_i32_0 = arith.constant 0 : i32
    %c0_i32_1 = arith.constant 0 : i32
    return %c0_i32, %c0_i32_0 : i32, i32
  }
  func.func @transform_5(%arg0: i32, %arg1: i32) -> i32 {
    %c0_i32 = arith.constant 0 : i32
    %c0_i32_0 = arith.constant 0 : i32
    return %c0_i32 : i32
  }
  func.func @transform_6(%arg0: i32, %arg1: i32) -> (i32, i32, i32) {
    %c0_i32 = arith.constant 0 : i32
    %c0_i32_0 = arith.constant 0 : i32
    return %arg0, %c0_i32, %arg1 : i32, i32, i32
  }
}

</mosaic_0001>

<bundles_post_ra>
// kernel: tpu_custom_call.1
= control target key start
LH: loop header
LB: loop body
LE: loop exit
PB: predicated region body
PF: predicated region fallthrough
CT: control target
= control target key end

     0   :  { %s6993_s0 = inlined_call_operand.hbm [shape: bf16[2,4,32,256], index: 0, kind: input, shape index: {}]   ;;  %s6994_s1 = inlined_call_operand.hbm [shape: f32[2,8,256], index: 1, kind: input, shape index: {}]   ;;  %s6995_s2 = inlined_call_operand.vmem [shape: f32[2,4], index: 2, kind: input, shape index: {}]   ;;  %s6996_s3 = inlined_call_operand.vmem [shape: f32[2], index: 3, kind: input, shape index: {}]   ;;  %s6997_s4 = inlined_call_operand.vmem [shape: f32[1,2], index: 4, kind: input, shape index: {}]   ;;  %s6998_s5 = inlined_call_operand.<no memory space> [shape: f32[1], index: 5, kind: input, shape index: {}]   ;;  %s6999_s6 = inlined_call_operand.hbm [shape: f32[2,32,256], index: 6, kind: output, shape index: {}]  }
   0x1   :  { %7035 = sst [smem:[#allocation35_spill]] %s6993_s0 }
   0x2   :  { %7036 = sst [smem:[#allocation36_spill]] %s6995_s2 }
   0x3   :  { %7037 = sst [smem:[#allocation37_spill]] %s6996_s3 }
   0x4   :  { %7038 = sst [smem:[#allocation38_spill]] %s6997_s4 }
   0x5   :  { %11 = sst [smem:[#allocation3]] %s6998_s5 }
   0x6   :  { %12 = vsyncpa [#allocation5], 0 }
   0x7   :  { %14 = vsyncpa [#allocation5 + $0x1], 0 }
   0x8   :  { %15 = vsyncpa [#allocation9], 0 }
   0x9   :  { %17 = vsyncpa [#allocation9 + $0x1], 0 }
   0xa   :  { %18 = vsyncpa [#allocation7], 0 }
   0xb   :  { %19 = vsyncpa [#allocation12], 0 }
   0xc   :  { %20 = vsyncpa [#allocation6], 0 }
   0xd   :  { %22 = vsyncpa [#allocation6 + $0x1], 0  ;;  %s4412_s23 = smov 0   ;;  %s4414_s24 = smov 0  }
   0xe   :  { %s4416_s25 = smov 0   ;;  %s4418_s26 = smov 0  }
   0xf   :  { %s4420_s27 = smov 0   ;;  %s4422_s28 = smov 0  }
  0x10 LB: > { %s3966_s5 = sadd.s32 4294967295, %s4361_s28   ;;  %s3967_s29 = sadd.s32 4294967294, %s4361_s28   ;;  %s4361_s28 = sphi %s4422_s28, %s28_s28   ;;  %s4357_s27 = sphi %s4420_s27, %s7116_s27   ;;  %s4353_s26 = sphi %s4418_s26, %s7115_s26   ;;  %s4349_s25 = sphi %s4416_s25, %s7114_s25   ;;  %s4345_s24 = sphi %s4414_s24, %s7113_s24   ;;  %s4341_s23 = sphi %s4412_s23, %s7112_s23  }
  0x11   : > { %s47_s30 = sadd.s32 1, %s4349_s25  ;;  %p54_p0 = scmp.ne.s32.totalorder %s4349_s25, %s4345_s24 }
  0x12   : > { %p55_p1 = scmp.eq.s32.totalorder %s4361_s28, 0  ;;  %p60_p2 = scmp.ne.s32.totalorder %s4345_s24, %s4341_s23 }
  0x13   : > { %p4450_p3 = scmp.eq.s32.totalorder %s3966_s5, 0  ;;  %p198_p4 = scmp.eq.s32.totalorder %s3966_s5, 1 }
  0x14   : > { %p4454_p5 = por %p55_p1, %p54_p0  ;;  %p204_p6 = scmp.eq.s32.totalorder %s3967_s29, 1 }
  0x15   : > { %s7039_s7 = scalar_select %p4450_p3, 1, 0 }
  0x16   : > { %s7040_s8 = scalar_select %p4454_p5, 1, 0 }
  0x17   : > { %p4460_p7 = por %p4450_p3, %p60_p2  ;;  %p4464_p8 = por %p198_p4, %p54_p0 }
  0x18   : > { %p4468_p9 = por %p204_p6, %p60_p2  ;;  %p3968_p10 = scmp.ge.s32.totalorder %s4361_s28, 1 }
  0x19   : > { %s7041_s9 = scalar_select %p4460_p7, 1, 0 }
  0x1a   : > { %s7042_s10 = scalar_select %p4464_p8, 1, 0 }
  0x1b   : > { %s7043_s11 = scalar_select %p4468_p9, 1, 0 }
  0x1c   : > { %p211_p11 = scmp.lt.s32.totalorder %s4361_s28, 3  ;;  %s7044_s3 = sld [smem:[#allocation37_spill]] }
  0x1d   : > { %s7046_s2 = sld [smem:[#allocation36_spill]]  ;;  %s7048_s4 = sld [smem:[#allocation38_spill]] }
  0x1e   : > { %p4477_p12 = pnand %p3968_p10, %p211_p11 }
  0x20   : > { %s7045_s15 = scalar_select %p4477_p12, 1, 0 }
  0x21   : > { %p4053_p0 = pneg %p4477_p12 }
  0x22   : > { %s235_s14 = sshll.u32 %s7044_s3, 4  ;;  %s236_s14 = int_to_ptr.vmem [resolvable:$true] %s235_s14 }
  0x23   : > { %s224_s18 = sshll.u32 %s7046_s2, 4  ;;  %p4489_p1 = pnand %p4053_p0, %p4450_p3  ;;  %s225_s18 = int_to_ptr.vmem [resolvable:$true] %s224_s18 }
  0x24   : > { %s246_s22 = sshll.u32 %s7048_s4, 4  ;;  %s4162_s5 = scalar_lea.vmem %s236_s14, 16  ;;  %s4496_s22 = int_to_ptr.vmem [resolvable:$true] %s246_s22 }
  0x25   : > { %p4163_p2 = scmp.ne.s32.totalorder %s236_s14, %s4162_s5  ;;  %p4164_p4 = pneg %p4489_p1 }
  0x26   : > { %p4170_p11 = scmp.lt.s32.totalorder %s236_s14, %s236_s14  ;;  %p4171_p0 = scmp.lt.s32.totalorder %s4162_s5, %s4162_s5 }
  0x27   : > { %p4165_p6 = pnand %p4164_p4, %p4163_p2 }
  0x28   : > { %p4172_p13 = por %p4171_p0, %p4170_p11 }
  0x29   : > { %p4166_p10 = pneg %p4165_p6 }
  0x2b   : > { %p4173_p9 = pnand %p4172_p13, %p4166_p10 }
  0x2d   : > { %4176 = shalt.err (!%p4173_p9)
}
  0x2e   : > { %s4363_s29 = smov [#allocation11]   ;;  %s4177_s12 = scalar_lea.vmem %s225_s18, 32 }
  0x2f   : > { %4059 = dma.vmem_to_smem (!%p4489_p1), %s236_s14, 16, %s4363_s29, [#allocation12]  }
  0x30   : > { %p4178_p8 = scmp.ne.s32.totalorder %s225_s18, %s4177_s12  ;;  %p4185_p12 = scmp.lt.s32.totalorder %s225_s18, %s225_s18 }
  0x31   : > { %p4186_p5 = scmp.lt.s32.totalorder %s4177_s12, %s4177_s12 }
  0x32   : > { %p4180_p3 = pnand %p4178_p8, %p4164_p4 }
  0x33   : > { %p4187_p2 = por %p4186_p5, %p4185_p12 }
  0x34   : > { %p4181_p7 = pneg %p4180_p3 }
  0x36   : > { %p4188_p6 = pnand %p4187_p2, %p4181_p7 }
  0x38   : > { %4191 = shalt.err (!%p4188_p6)
}
  0x39   : > { %s4364_s13 = smov [#allocation10]   ;;  %s4192_s14 = scalar_lea.vmem %s4496_s22, 16 }
  0x3a   : > { %4056 = dma.vmem_to_smem (!%p4489_p1), %s225_s18, 32, %s4364_s13, [#allocation7]  }
  0x3b   : > { %p4193_p9 = scmp.ne.s32.totalorder %s4496_s22, %s4192_s14  ;;  %p4200_p3 = scmp.lt.s32.totalorder %s4496_s22, %s4496_s22 }
  0x3c   : > { %p4201_p10 = scmp.lt.s32.totalorder %s4192_s14, %s4192_s14 }
  0x3d   : > { %p4195_p13 = pnand %p4193_p9, %p4164_p4 }
  0x3e   : > { %p4202_p5 = por %p4201_p10, %p4200_p3 }
  0x3f   : > { %p4196_p8 = pneg %p4195_p13 }
  0x41   : > { %p4203_p7 = pnand %p4202_p5, %p4196_p8 }
  0x43   : > { %4206 = shalt.err (!%p4203_p7)
}
  0x44   : > { %s4365_s16 = smov [#allocation13]   ;;  %p4077_p12 = scmp.lt.s32.totalorder %s4361_s28, 2 }
  0x45   : > { %4062 = dma.vmem_to_smem (!%p4489_p1), %s4496_s22, 16, %s4365_s16, [#allocation12]  }
  0x46   : > { %s4522_s17 = sand.u32 1, %s4349_s25   ;;  %s40_s18 = sadd.s32 1, %s4357_s27 }
  0x47   : > { %p42_p4 = scmp.ge.s32.totalorder %s40_s18, 2  ;;  %s3973_s20 = sshll.u32 %s4522_s17, 7 }
  0x48   : > { %s4028_s19 = sshll.u32 %s4357_s27, 11  ;;  %s7049_s0 = sld [smem:[#allocation35_spill]] }
  0x49   : > { %s7118_s18 = smov (%p42_p4, %s40_s18), 0  ;;  %s264_s22 = scalar_lea.vmem [#allocation4], %s3973_s20 }
  0x4a   : > { %s271_s12 = sshll.u32 %s264_s22, 4  ;;  %s44_s13 = ssub.s32 %s4357_s27, %s7118_s18  ;;  %s4536_s12 = int_to_ptr.vmem [resolvable:$true] %s271_s12 }
  0x4b   : > { %p45_p1 = scmp.eq.s32.totalorder %s44_s13, 0  ;;  %p7050_p11 = scmp.ne.s32.totalorder %s7040_s8, 0 }
  0x4d   : > { %p4542_p0 = pnand %p4077_p12, %p7050_p11 }
  0x4e   : > { %s4532_s29 = scalar_lea.hbm %s7049_s0, %s4028_s19  ;;  %s261_s19 = scalar_lea.sflag [#allocation5], %s4522_s17 }
  0x4f   : > { %s4549_s16 = scalar_select %p45_p1, %s4349_s25, %s47_s30  }
  0x50   : > { %s4207_s21 = scalar_lea.hbm %s4532_s29, 2048  ;;  %p4209_p6 = pneg %p4542_p0 }
  0x51   : > { %p4208_p2 = scmp.ne.s32.totalorder %s4532_s29, %s4207_s21  ;;  %s4212_s5 = scalar_lea.hbm %s7049_s0, 4096 }
  0x52   : > { %p4213_p8 = scmp.lt.u32.totalorder %s4532_s29, %s7049_s0  ;;  %p4214_p3 = scmp.lt.u32.totalorder %s4212_s5, %s4207_s21 }
  0x53   : > { %p4210_p9 = pnand %p4209_p6, %p4208_p2  ;;  %p4216_p5 = scmp.lt.u32.totalorder %s4207_s21, %s4532_s29 }
  0x54   : > { %p4215_p10 = por %p4214_p3, %p4213_p8 }
  0x55   : > { %p4211_p13 = pneg %p4210_p9 }
  0x56   : > { %p4217_p7 = por %p4216_p5, %p4215_p10 }
  0x58   : > { %p4218_p12 = pnand %p4217_p7, %p4211_p13 }
  0x5a   : > { %4221 = shalt.err (!%p4218_p12)
}
  0x5b   : > { %s4222_s30 = scalar_lea.vmem %s4536_s12, 2048  ;;  %s4366_s8 = smov [#allocation4]  }
  0x5c   : > { %p4223_p4 = scmp.ne.s32.totalorder %s4536_s12, %s4222_s30  ;;  %s4227_s20 = sshll.u32 %s4366_s8, 4  ;;  %s4228_s20 = int_to_ptr.vmem [resolvable:$false] %s4227_s20 }
  0x5d   : > { %s4229_s22 = scalar_lea.vmem %s4228_s20, 4096  ;;  %p4230_p2 = scmp.lt.s32.totalorder %s4536_s12, %s4228_s20 }
  0x5e   : > { %p4225_p1 = pnand %p4223_p4, %p4209_p6  ;;  %p4231_p9 = scmp.lt.s32.totalorder %s4229_s22, %s4222_s30 }
  0x60   : > { %p4226_p11 = pneg %p4225_p1  ;;  %p4232_p8 = por %p4231_p9, %p4230_p2 }
  0x62   : > { %p4233_p3 = pnand %p4232_p8, %p4226_p11 }
  0x64   : > { %4236 = shalt.err (!%p4233_p3)
}
  0x65   : > { %s4367_s21 = smov 128   ;;  %s4368_s5 = smov 8  }
  0x66   : > { %4066 = dma.hbm_to_vmem [thread:$0]  (!%p4542_p0), %s4532_s29, 2048, %s4536_s12, %s261_s19, %s4367_s21, %s4367_s21, %s4368_s5  }
  0x67   : > { %s3976_s13 = sshll.u32 %s4522_s17, 4  ;;  %s4029_s8 = sshll.u32 %s4357_s27, 8 }
  0x68   : > { %s4584_s22 = scalar_lea.hbm %s6994_s1, %s4029_s8  ;;  %s285_s0 = scalar_lea.vmem [#allocation8], %s3976_s13 }
  0x69   : > { %s295_s2 = sshll.u32 %s285_s0, 4  ;;  %s282_s3 = scalar_lea.sflag [#allocation9], %s4522_s17  ;;  %s296_s2 = int_to_ptr.vmem [resolvable:$true] %s295_s2 }
  0x6a   : > { %s4237_s4 = scalar_lea.hbm %s4584_s22, 256  ;;  %s4242_s19 = scalar_lea.hbm %s6994_s1, 512 }
  0x6b   : > { %p4238_p13 = scmp.ne.s32.totalorder %s4584_s22, %s4237_s4  ;;  %p4243_p7 = scmp.lt.u32.totalorder %s4584_s22, %s6994_s1 }
  0x6c   : > { %p4244_p12 = scmp.lt.u32.totalorder %s4242_s19, %s4237_s4  ;;  %p4246_p1 = scmp.lt.u32.totalorder %s4237_s4, %s4584_s22 }
  0x6d   : > { %p4240_p10 = pnand %p4238_p13, %p4209_p6 }
  0x6e   : > { %p4245_p4 = por %p4244_p12, %p4243_p7 }
  0x6f   : > { %p4241_p5 = pneg %p4240_p10 }
  0x70   : > { %p4247_p11 = por %p4246_p1, %p4245_p4 }
  0x72   : > { %p4248_p2 = pnand %p4247_p11, %p4241_p5 }
  0x74   : > { %4251 = shalt.err (!%p4248_p2)
}
  0x75   : > { %s4252_s0 = scalar_lea.vmem %s296_s2, 256  ;;  %s4369_s17 = smov [#allocation8]  }
  0x76   : > { %p4253_p9 = scmp.ne.s32.totalorder %s296_s2, %s4252_s0  ;;  %s4257_s13 = sshll.u32 %s4369_s17, 4  ;;  %s4258_s13 = int_to_ptr.vmem [resolvable:$false] %s4257_s13 }
  0x77   : > { %s4259_s8 = scalar_lea.vmem %s4258_s13, 512  ;;  %p4260_p13 = scmp.lt.s32.totalorder %s296_s2, %s4258_s13 }
  0x78   : > { %p4255_p8 = pnand %p4253_p9, %p4209_p6  ;;  %p4261_p10 = scmp.lt.s32.totalorder %s4259_s8, %s4252_s0 }
  0x7a   : > { %p4256_p3 = pneg %p4255_p8  ;;  %p4262_p7 = por %p4261_p10, %p4260_p13 }
  0x7c   : > { %p4263_p12 = pnand %p4262_p7, %p4256_p3 }
  0x7e   : > { %4266 = shalt.err (!%p4263_p12)
}
  0x7f   : > { %4069 = dma.hbm_to_vmem [thread:$0]  (!%p4542_p0), %s4584_s22, 256, %s296_s2, %s282_s3  }
  0x80   : > { %p7052_p5 = scmp.ne.s32.totalorder %s7045_s15, 0 }
  0x82   : > { %304 = sbr.rel (%p7052_p5) target bundleno = 1087 (0x43f), region = 44 }
  0x89   : > { %s4609_s4 = sand.u32 1, %s4345_s24   ;;  %p7053_p6 = scmp.ne.s32.totalorder %s7041_s9, 0 }
  0x8a   : > { %s3980_s20 = sshll.u32 %s4609_s4, 7  ;;  %s307_s30 = scalar_lea.sflag [#allocation5], %s4609_s4 }
  0x8b   : > { %s4613_s29 = scalar_lea.vmem [#allocation4], %s3980_s20 }
  0x8c   : > { %4320 = dma.done.wait (%p7053_p6), %s307_s30, 2048  }
  0x8d   : > { %4322 = vsyncadd (%p7053_p6), %s307_s30, 4294965248  ;;  %s3981_s2 = sshll.u32 %s4609_s4, 4  ;;  %s316_s3 = scalar_lea.sflag [#allocation9], %s4609_s4 }
  0x8e   : > { %s319_s15 = scalar_lea.vmem [#allocation8], %s3981_s2 }
  0x8f   : > { %4324 = dma.done.wait (%p7053_p6), %s316_s3, 256  }
  0x90   : > { %4326 = vsyncadd (%p7053_p6), %s316_s3, 4294967040  ;;  %p7054_p0 = scmp.ne.s32.totalorder %s7039_s7, 0 }
  0x92   : > { %4328 = dma.done.wait (%p7054_p0), [#allocation7], 32  }
  0x93   : > { %4330 = vsyncadd (%p7054_p0), [#allocation7], 4294967264 }
  0x94   : > { %4332 = dma.done.wait (%p7054_p0), [#allocation12], 32  }
  0x95   : > { %4334 = vsyncadd (%p7054_p0), [#allocation12], 4294967264 }
  0x96   : > { %336 = sfence }
  0x97   : > { %v368_v0 = vlaneseq  ;;  %v402_v1 = vld [vmem:[%s319_s15 + $0x8] sm:$0xff]  ;;  %v401_v2 = vld [vmem:[%s319_s15] sm:$0xff]  ;;  %v4370_v35 = vmov 0   ;;  %s6654_s7 = sld [smem:[#allocation10]]  ;;  %s6670_s14 = sld [smem:[#allocation10 + $0x1]] }
  0x98   : > { %v404_v3 = vadd.f32 1.0, %v402_v1  ;;  %v403_v4 = vadd.f32 1.0, %v401_v2  ;;  %s6658_s9 = sld [smem:[#allocation10 + $0x80]]  ;;  %s6674_s22 = sld [smem:[#allocation10 + $0x81]] }
  0x99   : > { %v4633_v5 = vshrl.u32 %v368_v0, 7  ;;  %s4009_s12 = sld [smem:[#allocation10 + $0x2]]  ;;  %s4019_s21 = sld [smem:[#allocation10 + $0x3]] }
  0x9a   : > { %v406_v6 = vmul.f32 7.5, %v404_v3  ;;  %v405_v7 = vmul.f32 7.5, %v403_v4  ;;  %s4010_s19 = sld [smem:[#allocation10 + $0x82]]  ;;  %s4020_s5 = sld [smem:[#allocation10 + $0x83]] }
  0x9b   : > { %v4636_v8 = vadd.s32 8, %v4633_v5  ;;  %v4639_v10 = vsub.s32 0, %v4633_v5  ;;  %v4642_v11 = vsub.s32 2, %v4633_v5  ;;  %v4645_v13 = vadd.s32 16, %v4633_v5  ;;  %s3656_s0 = sld [smem:[#allocation11]]  ;;  %s4022_s13 = sld [smem:[#allocation11 + $0x1]] }
  0x9c   : > { %v408_v9 = vfloor.f32 %v406_v6  ;;  %v407_v12 = vfloor.f32 %v405_v7  ;;  %v4648_v14 = vadd.s32 24, %v4633_v5  ;;  %v4651_v15 = vadd.s32 32, %v4633_v5  ;;  %s3647_s17 = sld [smem:[#allocation13]]  ;;  %s6794_s8 = sld [smem:[#allocation13 + $0x1]] }
  0x9d   : > { %v4654_v16 = vadd.s32 40, %v4633_v5  ;;  %v4659_v21 = vadd.s32 48, %v4633_v5  ;;  %v4662_v22 = vadd.s32 56, %v4633_v5  ;;  %v4665_v23 = vadd.s32 64, %v4633_v5  ;;  %s6796_s20 = sld [smem:[#allocation3]]  ;;  %s3985_s30 = sshll.u32 %s4609_s4, 6 }
  0x9e   : > { %v4033_v17 = vtrunc.f32 %v408_v9  ;;  %v414_v18 = vsub.f32 %v406_v6, %v408_v9  ;;  %v4031_v19 = vtrunc.f32 %v407_v12  ;;  %v4656_v20 = vsub.f32 %v405_v7, %v407_v12  ;;  %s4030_s2 = sshll.u32 %s4353_s26, 10  ;;  %s3810_s26 = scalar_lea.sflag [#allocation6], %s4609_s4 }
  0x9f   : > { %v4668_v24 = vadd.s32 72, %v4633_v5  ;;  %v4671_v28 = vadd.s32 80, %v4633_v5  ;;  %v4680_v32 = vadd.s32 88, %v4633_v5  ;;  %p7109_p1 = scmp.ne.s32.totalorder %s7042_s10, 0 }
  0xa0   : > { %v4034_v25 = vcvt.f32.s32 %v4033_v17  ;;  %v416_v26 = vsub.f32 1.0, %v414_v18  ;;  %v452_v27 = vrot.slane %v414_v18, 1  ;;  %v4673_v29 = vcvt.f32.s32 %v4031_v19 }
  0xa1   : > { %v4676_v30 = vsub.f32 1.0, %v4656_v20  ;;  %v451_v31 = vrot.slane %v4656_v20, 1 }
  0xa2   : > { %v412_v33 = vadd.s32 1, %v4034_v25  ;;  %v420_v34 = vrot.slane %v416_v26, 1  ;;  %vm426_vm0 = vcmp.ge.s32.totalorder %v4034_v25, 0  ;;  %vm428_vm1 = vcmp.lt.s32.totalorder %v4034_v25, 16 }
  0xa3   : > { %v432_v36 = vsel %vm426_vm0, 1, %v4370_v35  ;;  %v440_v37 = vsel %vm428_vm1, 1, %v4370_v35  ;;  %v456_v38 = vmul.f32 %v452_v27, %v416_v26  ;;  %v490_v39 = vmul.f32 %v452_v27, %v414_v18  ;;  %vm4684_vm2 = vmand %vm426_vm0, %vm428_vm1 }
  0xa4   : > { %v424_v40 = vmul.f32 %v420_v34, %v416_v26  ;;  %v434_v42 = vrot.slane %v432_v36, 1  ;;  %v442_v43 = vrot.slane %v440_v37, 1  ;;  %vm458_vm3 = vcmp.ge.s32.totalorder %v412_v33, 0 }
  0xa5   : > { %v460_v44 = vsel %vm458_vm3, 1, %v4370_v35  ;;  %vm468_vm4 = vcmp.lt.s32.totalorder %v412_v33, 16  ;;  %v480_v45 = vmul.f32 %v420_v34, %v414_v18  ;;  %v498_v46 = vmul.u32 16, %v4034_v25 }
  0xa6   : > { %vm4689_vm5 = vcmp.ne.s32.totalorder %v434_v42, 0  ;;  %vm4693_vm6 = vcmp.ne.s32.totalorder %v442_v43, 0  ;;  %v462_v49 = vrot.slane %v460_v44, 1  ;;  %v470_v50 = vsel %vm468_vm4, 1, %v4370_v35  ;;  %vm4698_vm7 = vmand %vm458_vm3, %vm468_vm4 }
  0xa7   : > { %vm438_vm8 = vmand %vm4684_vm2, %vm4689_vm5  ;;  %v472_v52 = vrot.slane %v470_v50, 1  ;;  %v500_v53 = vrot.slane %v4034_v25, 1  ;;  %v4707_v54 = vadd.s32 1, %v4673_v29  ;;  %v419_v55 = vrot.slane %v4676_v30, 1 }
  0xa8   : > { %vm446_vm9 = vmand %vm438_vm8, %vm4693_vm6  ;;  %vm4712_vm10 = vcmp.ne.s32.totalorder %v462_v49, 0  ;;  %vm425_vm11 = vcmp.ge.s32.totalorder %v4673_v29, 0  ;;  %vm427_vm12 = vcmp.lt.s32.totalorder %v4673_v29, 16  ;;  %v4721_v57 = vmul.f32 %v451_v31, %v4676_v30 }
  0xa9   : > { %v4723_v58 = vsel %vm446_vm9, %v424_v40, 0.0  ;;  %vm466_vm13 = vmand %vm4684_vm2, %vm4712_vm10  ;;  %vm4729_vm14 = vcmp.ne.s32.totalorder %v472_v52, 0  ;;  %v4733_v60 = vadd.s32 %v500_v53, %v498_v46  ;;  %v4738_v61 = vmul.f32 %v419_v55, %v4676_v30 }
  0xaa   : > { %vm476_vm15 = vmand %vm466_vm13, %vm4729_vm14  ;;  %v4744_v62 = vrot.slane %v4723_v58, %v4639_v10  ;;  %v4748_v63 = vrot.slane %v4723_v58, %v4642_v11  ;;  %v431_v0 = vsel %vm425_vm11, 1, %v4370_v35  ;;  %v439_v1 = vsel %vm427_vm12, 1, %v4370_v35 }
  0xab   : > { %v4756_v2 = vsel %vm476_vm15, %v456_v38, 0.0  ;;  %vm484_vm0 = vmand %vm4698_vm7, %vm4689_vm5  ;;  %v4764_v3 = vrot.slane %v4733_v60, %v4639_v10  ;;  %v4768_v4 = vrot.slane %v4733_v60, %v4642_v11  ;;  %v433_v6 = vrot.slane %v431_v0, 1 }
  0xac   : > { %vm486_vm1 = vmand %vm484_vm0, %vm4693_vm6  ;;  %v4774_v7 = vrot.slane %v4756_v2, %v4639_v10  ;;  %v4778_v9 = vrot.slane %v4756_v2, %v4642_v11  ;;  %v441_v12 = vrot.slane %v439_v1, 1  ;;  %vm457_vm2 = vcmp.ge.s32.totalorder %v4707_v54, 0 }
  0xad   : > { %v4781_v17 = vsel %vm486_vm1, %v480_v45, 0.0  ;;  %vm492_vm3 = vmand %vm4698_vm7, %vm4712_vm10  ;;  %v512_v18 = vsub.s32 %v4633_v5, %v4764_v3  ;;  %v514_v19 = vsub.s32 %v4636_v8, %v4764_v3  ;;  %v1274_v25 = vsub.s32 %v4633_v5, %v4768_v4 }
  0xae   : > { %vm494_vm4 = vmand %vm492_vm3, %vm4729_vm14  ;;  %v4797_v26 = vrot.slane %v4781_v17, %v4639_v10  ;;  %v1276_v27 = vsub.s32 %v4636_v8, %v4768_v4  ;;  %v4803_v33 = vrot.slane %v4781_v17, %v4642_v11  ;;  %vm4805_vm5 = vcmp.ne.s32.totalorder %v433_v6, 0 }
  0xaf   : > { %v4809_v36 = vsel %vm494_vm4, %v490_v39, 0.0  ;;  %vm576_vm6 = vcmp.eq.s32.totalorder %v512_v18, 0  ;;  %vm578_vm7 = vcmp.eq.s32.totalorder %v514_v19, 0  ;;  %vm712_vm8 = vcmp.eq.s32.totalorder %v512_v18, 1  ;;  %vm4825_vm0 = vmand %vm425_vm11, %vm427_vm12 }
  0xb0   : > { %v648_v37 = vsel %vm576_vm6, %v4744_v62, 0.0  ;;  %v650_v38 = vsel %vm578_vm7, %v4744_v62, 0.0  ;;  %vm714_vm9 = vcmp.eq.s32.totalorder %v514_v19, 1  ;;  %vm848_vm10 = vcmp.eq.s32.totalorder %v512_v18, 16  ;;  %vm437_vm12 = vmand %vm4825_vm0, %vm4805_vm5 }
  0xb1   : > { %v784_v40 = vsel %vm712_vm8, %v4774_v7, %v648_v37  ;;  %v786_v41 = vsel %vm714_vm9, %v4774_v7, %v650_v38  ;;  %vm850_vm13 = vcmp.eq.s32.totalorder %v514_v19, 16  ;;  %vm984_vm14 = vcmp.eq.s32.totalorder %v512_v18, 17 }
  0xb2   : > { %v920_v42 = vsel %vm848_vm10, %v4797_v26, %v784_v40  ;;  %v922_v39 = vsel %vm850_vm13, %v4797_v26, %v786_v41  ;;  %vm986_vm15 = vcmp.eq.s32.totalorder %v514_v19, 17  ;;  %v4819_v43 = vrot.slane %v4809_v36, %v4639_v10 }
  0xb3   : > { %vm1338_vm1 = vcmp.eq.s32.totalorder %v1274_v25, 0  ;;  %vm1340_vm3 = vcmp.eq.s32.totalorder %v1276_v27, 0  ;;  %vm1474_vm4 = vcmp.eq.s32.totalorder %v1274_v25, 1  ;;  %vm1476_vm6 = vcmp.eq.s32.totalorder %v1276_v27, 1 }
  0xb4   : > { %v1056_v45 = vsel %vm984_vm14, %v4819_v43, %v920_v42  ;;  %v1058_v46 = vsel %vm986_vm15, %v4819_v43, %v922_v39  ;;  %v1410_v47 = vsel %vm1338_vm1, %v4748_v63, 0.0  ;;  %v1412_v48 = vsel %vm1340_vm3, %v4748_v63, 0.0 }
  0xb5   : > { %v1124_v49 = vpack.c.bf16 %v1058_v46, %v1056_v45  ;;  %v1546_v50 = vsel %vm1474_vm4, %v4778_v9, %v1410_v47  ;;  %v1548_v51 = vsel %vm1476_vm6, %v4778_v9, %v1412_v48  ;;  %vm1610_vm11 = vcmp.eq.s32.totalorder %v1274_v25, 16 }
  0xb6   : > { %vm1612_vm7 = vcmp.eq.s32.totalorder %v1276_v27, 16  ;;  %v1682_v52 = vsel %vm1610_vm11, %v4803_v33, %v1546_v50  ;;  %vm1746_vm8 = vcmp.eq.s32.totalorder %v1274_v25, 17  ;;  %vm1748_vm9 = vcmp.eq.s32.totalorder %v1276_v27, 17 }
  0xb7   : > { %1175 = vmatprep.subr.bf16.mxu0 %v1124_v49  ;;  %v1684_v53 = vsel %vm1612_vm7, %v4803_v33, %v1548_v51  ;;  %v4843_v56 = vrot.slane %v4809_v36, %v4642_v11  ;;  %vm4845_vm10 = vcmp.ne.s32.totalorder %v441_v12, 0  ;;  %v459_v0 = vsel %vm457_vm2, 1, %v4370_v35 }
  0xb8   : > { %vm445_vm13 = vmand %vm437_vm12, %vm4845_vm10  ;;  %v461_v1 = vrot.slane %v459_v0, 1  ;;  %vm467_vm14 = vcmp.lt.s32.totalorder %v4707_v54, 16  ;;  %v479_v6 = vmul.f32 %v419_v55, %v4656_v20  ;;  %v489_v12 = vmul.f32 %v451_v31, %v4656_v20 }
  0xb9   : > { %v1818_v18 = vsel %vm1746_vm8, %v4843_v56, %v1682_v52  ;;  %v1820_v19 = vsel %vm1748_vm9, %v4843_v56, %v1684_v53  ;;  %v4864_v25 = vsel %vm445_vm13, %v4738_v61, 0.0  ;;  %v469_v27 = vsel %vm467_vm14, 1, %v4370_v35  ;;  %vm4869_vm15 = vmand %vm457_vm2, %vm467_vm14 }
  0xba   : > { %v1887_v30 = vpack.c.bf16 %v1820_v19, %v1818_v18  ;;  %vm4873_vm1 = vcmp.ne.s32.totalorder %v461_v1, 0  ;;  %v471_v20 = vrot.slane %v469_v27, 1  ;;  %vm483_vm3 = vmand %vm4869_vm15, %vm4805_vm5  ;;  %v497_v31 = vmul.u32 16, %v4673_v29 }
  0xbb   : > { %vm465_vm2 = vmand %vm4825_vm0, %vm4873_vm1  ;;  %v499_v35 = vrot.slane %v4673_v29, 1  ;;  %v4889_v54 = vrot.slane %v4864_v25, %v4639_v10  ;;  %v4893_v61 = vrot.slane %v4864_v25, %v4642_v11  ;;  %v4897_v34 = vsub.s32 %v4645_v13, %v4764_v3 }
  0xbc   : > { %1938 = vmatprep.subr.bf16.mxu1 %v1887_v30  ;;  %vm4899_vm5 = vcmp.ne.s32.totalorder %v471_v20, 0  ;;  %vm485_vm0 = vmand %vm483_vm3, %vm4845_vm10  ;;  %v4907_v29 = vsub.s32 %v4648_v14, %v4764_v3  ;;  %v4911_v40 = vsub.s32 %v4645_v13, %v4768_v4  ;;  %v4915_v41 = vsub.s32 %v4648_v14, %v4768_v4 }
  0xbd   : > { %vm475_vm4 = vmand %vm465_vm2, %vm4899_vm5  ;;  %v4919_v42 = vsel %vm485_vm0, %v479_v6, 0.0  ;;  %v4921_v39 = vadd.s32 %v499_v35, %v497_v31  ;;  %vm580_vm6 = vcmp.eq.s32.totalorder %v4897_v34, 0  ;;  %vm716_vm11 = vcmp.eq.s32.totalorder %v4897_v34, 1 }
  0xbe   : > { %v4926_v44 = vsel %vm475_vm4, %v4721_v57, 0.0  ;;  %vm491_vm12 = vmand %vm4869_vm15, %vm4873_vm1  ;;  %v4934_v45 = vrot.slane %v4919_v42, %v4639_v10  ;;  %v4938_v46 = vrot.slane %v4919_v42, %v4642_v11  ;;  %vm582_vm7 = vcmp.eq.s32.totalorder %v4907_v29, 0 }
  0xbf   : > { %vm493_vm8 = vmand %vm491_vm12, %vm4899_vm5  ;;  %v4945_v57 = vrot.slane %v4921_v39, %v4639_v10  ;;  %v4949_v47 = vrot.slane %v4926_v44, %v4639_v10  ;;  %v4953_v48 = vrot.slane %v4921_v39, %v4642_v11  ;;  %v4957_v49 = vrot.slane %v4926_v44, %v4642_v11 }
  0xc0   : > { %v4959_v50 = vsel %vm493_vm8, %v489_v12, 0.0  ;;  %v652_v51 = vsel %vm580_vm6, %v4744_v62, 0.0  ;;  %v654_v52 = vsel %vm582_vm7, %v4744_v62, 0.0  ;;  %vm718_vm9 = vcmp.eq.s32.totalorder %v4907_v29, 1 }
  0xc1   : > { %v511_v53 = vsub.s32 %v4633_v5, %v4945_v57  ;;  %v513_v59 = vsub.s32 %v4636_v8, %v4945_v57  ;;  %v4970_v0 = vrot.slane %v4959_v50, %v4639_v10  ;;  %v1273_v1 = vsub.s32 %v4633_v5, %v4953_v48 }
  0xc2   : > { %v1275_v6 = vsub.s32 %v4636_v8, %v4953_v48  ;;  %v4978_v12 = vrot.slane %v4959_v50, %v4642_v11  ;;  %v788_v18 = vsel %vm716_vm11, %v4774_v7, %v652_v51  ;;  %v790_v19 = vsel %vm718_vm9, %v4774_v7, %v654_v52 }
  0xc3   : > { %vm575_vm10 = vcmp.eq.s32.totalorder %v511_v53, 0  ;;  %vm577_vm13 = vcmp.eq.s32.totalorder %v513_v59, 0  ;;  %vm711_vm14 = vcmp.eq.s32.totalorder %v511_v53, 1  ;;  %vm713_vm15 = vcmp.eq.s32.totalorder %v513_v59, 1 }
  0xc4   : > { %v647_v10 = vsel %vm575_vm10, %v4889_v54, 0.0  ;;  %v649_v27 = vsel %vm577_vm13, %v4889_v54, 0.0  ;;  %vm847_vm1 = vcmp.eq.s32.totalorder %v511_v53, 16  ;;  %vm849_vm3 = vcmp.eq.s32.totalorder %v513_v59, 16 }
  0xc5   : > { %v783_v37 = vsel %vm711_vm14, %v4949_v47, %v647_v10  ;;  %v785_v11 = vsel %vm713_vm15, %v4949_v47, %v649_v27  ;;  %vm983_vm2 = vcmp.eq.s32.totalorder %v511_v53, 17  ;;  %vm985_vm5 = vcmp.eq.s32.totalorder %v513_v59, 17 }
  0xc6   : > { %v919_v30 = vsel %vm847_vm1, %v4934_v45, %v783_v37  ;;  %v921_v55 = vsel %vm849_vm3, %v4934_v45, %v785_v11  ;;  %vm1337_vm0 = vcmp.eq.s32.totalorder %v1273_v1, 0  ;;  %vm1339_vm4 = vcmp.eq.s32.totalorder %v1275_v6, 0 }
  0xc7   : > { %v1055_v20 = vsel %vm983_vm2, %v4970_v0, %v919_v30  ;;  %v1057_v31 = vsel %vm985_vm5, %v4970_v0, %v921_v55  ;;  %v1409_v35 = vsel %vm1337_vm0, %v4893_v61, 0.0  ;;  %v1411_v38 = vsel %vm1339_vm4, %v4893_v61, 0.0 }
  0xc8   : > { %v1123_v51 = vpack.c.bf16 %v1057_v31, %v1055_v20  ;;  %vm1473_vm6 = vcmp.eq.s32.totalorder %v1273_v1, 1  ;;  %vm1475_vm11 = vcmp.eq.s32.totalorder %v1275_v6, 1  ;;  %vm1609_vm12 = vcmp.eq.s32.totalorder %v1273_v1, 16 }
  0xc9   : > { %v1545_v52 = vsel %vm1473_vm6, %v4957_v49, %v1409_v35  ;;  %v1547_v53 = vsel %vm1475_vm11, %v4957_v49, %v1411_v38  ;;  %vm1611_vm7 = vcmp.eq.s32.totalorder %v1275_v6, 16  ;;  %vm1745_vm8 = vcmp.eq.s32.totalorder %v1273_v1, 17 }
  0xca   : > { %1176 = vmatpush1.bf16.msra.mxu0 %v1123_v51  ;;  %v1681_v59 = vsel %vm1609_vm12, %v4938_v46, %v1545_v52  ;;  %v1683_v10 = vsel %vm1611_vm7, %v4938_v46, %v1547_v53  ;;  %vm1747_vm9 = vcmp.eq.s32.totalorder %v1275_v6, 17  ;;  %vm852_vm10 = vcmp.eq.s32.totalorder %v4897_v34, 16 }
  0xcb   : > { %v1817_v27 = vsel %vm1745_vm8, %v4978_v12, %v1681_v59  ;;  %v1819_v37 = vsel %vm1747_vm9, %v4978_v12, %v1683_v10  ;;  %vm854_vm13 = vcmp.eq.s32.totalorder %v4907_v29, 16  ;;  %v924_v11 = vsel %vm852_vm10, %v4797_v26, %v788_v18 }
  0xcc   : > { %v1886_v30 = vpack.c.bf16 %v1819_v37, %v1817_v27  ;;  %v926_v55 = vsel %vm854_vm13, %v4797_v26, %v790_v19  ;;  %vm988_vm14 = vcmp.eq.s32.totalorder %v4897_v34, 17  ;;  %vm990_vm15 = vcmp.eq.s32.totalorder %v4907_v29, 17 }
  0xcd   : > { %v1060_v1 = vsel %vm988_vm14, %v4819_v43, %v924_v11  ;;  %v1062_v6 = vsel %vm990_vm15, %v4819_v43, %v926_v55  ;;  %vm1342_vm1 = vcmp.eq.s32.totalorder %v4911_v40, 0  ;;  %vm1344_vm3 = vcmp.eq.s32.totalorder %v4915_v41, 0 }
  0xce   : > { %1939 = vmatpush1.bf16.msra.mxu1 %v1886_v30  ;;  %v1126_v20 = vpack.c.bf16 %v1062_v6, %v1060_v1  ;;  %v1414_v31 = vsel %vm1342_vm1, %v4748_v63, 0.0  ;;  %v1416_v18 = vsel %vm1344_vm3, %v4748_v63, 0.0  ;;  %vm1478_vm2 = vcmp.eq.s32.totalorder %v4911_v40, 1 }
  0xcf   : > { %vm1480_vm5 = vcmp.eq.s32.totalorder %v4915_v41, 1  ;;  %v1550_v34 = vsel %vm1478_vm2, %v4778_v9, %v1414_v31  ;;  %vm1614_vm0 = vcmp.eq.s32.totalorder %v4911_v40, 16  ;;  %vm1616_vm4 = vcmp.eq.s32.totalorder %v4915_v41, 16 }
  0xd0   : > { %1177 = vmatprep.subr.bf16.mxu0 %v1126_v20  ;;  %v1552_v29 = vsel %vm1480_vm5, %v4778_v9, %v1416_v18  ;;  %v1686_v19 = vsel %vm1614_vm0, %v4803_v33, %v1550_v34  ;;  %vm1750_vm6 = vcmp.eq.s32.totalorder %v4911_v40, 17  ;;  %vm1752_vm11 = vcmp.eq.s32.totalorder %v4915_v41, 17 }
  0xd1   : > { %v1688_v35 = vsel %vm1616_vm4, %v4803_v33, %v1552_v29  ;;  %v1822_v38 = vsel %vm1750_vm6, %v4843_v56, %v1686_v19  ;;  %v515_v51 = vsub.s32 %v4645_v13, %v4945_v57  ;;  %v517_v52 = vsub.s32 %v4648_v14, %v4945_v57 }
  0xd2   : > { %v1824_v53 = vsel %vm1752_vm11, %v4843_v56, %v1688_v35  ;;  %v1277_v59 = vsub.s32 %v4645_v13, %v4953_v48  ;;  %v1279_v40 = vsub.s32 %v4648_v14, %v4953_v48  ;;  %v520_v41 = vsub.s32 %v4651_v15, %v4764_v3 }
  0xd3   : > { %v1889_v10 = vpack.c.bf16 %v1824_v53, %v1822_v38  ;;  %vm579_vm12 = vcmp.eq.s32.totalorder %v515_v51, 0  ;;  %vm581_vm7 = vcmp.eq.s32.totalorder %v517_v52, 0  ;;  %vm715_vm8 = vcmp.eq.s32.totalorder %v515_v51, 1 }
  0xd4   : > { %v651_v27 = vsel %vm579_vm12, %v4889_v54, 0.0  ;;  %v653_v37 = vsel %vm581_vm7, %v4889_v54, 0.0  ;;  %vm717_vm9 = vcmp.eq.s32.totalorder %v517_v52, 1  ;;  %vm851_vm10 = vcmp.eq.s32.totalorder %v515_v51, 16 }
  0xd5   : > { %1940 = vmatprep.subr.bf16.mxu1 %v1889_v10  ;;  %v787_v11 = vsel %vm715_vm8, %v4949_v47, %v651_v27  ;;  %v789_v30 = vsel %vm717_vm9, %v4949_v47, %v653_v37  ;;  %vm853_vm13 = vcmp.eq.s32.totalorder %v517_v52, 16  ;;  %vm987_vm14 = vcmp.eq.s32.totalorder %v515_v51, 17 }
  0xd6   : > { %v923_v55 = vsel %vm851_vm10, %v4934_v45, %v787_v11  ;;  %v925_v1 = vsel %vm853_vm13, %v4934_v45, %v789_v30  ;;  %vm989_vm15 = vcmp.eq.s32.totalorder %v517_v52, 17  ;;  %vm1341_vm1 = vcmp.eq.s32.totalorder %v1277_v59, 0 }
  0xd7   : > { %v1059_v6 = vsel %vm987_vm14, %v4970_v0, %v923_v55  ;;  %v1061_v20 = vsel %vm989_vm15, %v4970_v0, %v925_v1  ;;  %vm1343_vm3 = vcmp.eq.s32.totalorder %v1279_v40, 0  ;;  %v1413_v31 = vsel %vm1341_vm1, %v4893_v61, 0.0 }
  0xd8   : > { %v1125_v18 = vpack.c.bf16 %v1061_v20, %v1059_v6  ;;  %v1415_v34 = vsel %vm1343_vm3, %v4893_v61, 0.0  ;;  %vm1477_vm2 = vcmp.eq.s32.totalorder %v1277_v59, 1  ;;  %vm1479_vm5 = vcmp.eq.s32.totalorder %v1279_v40, 1 }
  0xd9   : > { %v1549_v29 = vsel %vm1477_vm2, %v4957_v49, %v1413_v31  ;;  %v1551_v19 = vsel %vm1479_vm5, %v4957_v49, %v1415_v34  ;;  %vm1613_vm0 = vcmp.eq.s32.totalorder %v1277_v59, 16  ;;  %vm1615_vm4 = vcmp.eq.s32.totalorder %v1279_v40, 16 }
  0xda   : > { %1178 = vmatpush1.bf16.msra.mxu0 %v1125_v18  ;;  %v1685_v35 = vsel %vm1613_vm0, %v4938_v46, %v1549_v29  ;;  %v1687_v38 = vsel %vm1615_vm4, %v4938_v46, %v1551_v19  ;;  %vm1749_vm6 = vcmp.eq.s32.totalorder %v1277_v59, 17  ;;  %vm1751_vm11 = vcmp.eq.s32.totalorder %v1279_v40, 17 }
  0xdb   : > { %v1821_v51 = vsel %vm1749_vm6, %v4978_v12, %v1685_v35  ;;  %v1823_v52 = vsel %vm1751_vm11, %v4978_v12, %v1687_v38  ;;  %v522_v53 = vsub.s32 %v4654_v16, %v4764_v3  ;;  %vm584_vm12 = vcmp.eq.s32.totalorder %v520_v41, 0 }
  0xdc   : > { %v1888_v10 = vpack.c.bf16 %v1823_v52, %v1821_v51  ;;  %v656_v27 = vsel %vm584_vm12, %v4744_v62, 0.0  ;;  %vm720_vm7 = vcmp.eq.s32.totalorder %v520_v41, 1  ;;  %vm856_vm8 = vcmp.eq.s32.totalorder %v520_v41, 16 }
  0xdd   : > { %vm586_vm9 = vcmp.eq.s32.totalorder %v522_v53, 0  ;;  %vm722_vm10 = vcmp.eq.s32.totalorder %v522_v53, 1  ;;  %v792_v37 = vsel %vm720_vm7, %v4774_v7, %v656_v27  ;;  %vm858_vm13 = vcmp.eq.s32.totalorder %v522_v53, 16 }
  0xde   : > { %1941 = vmatpush1.bf16.msra.mxu1 %v1888_v10  ;;  %v658_v59 = vsel %vm586_vm9, %v4744_v62, 0.0  ;;  %v928_v40 = vsel %vm856_vm8, %v4797_v26, %v792_v37  ;;  %vm992_vm14 = vcmp.eq.s32.totalorder %v520_v41, 17  ;;  %vm994_vm15 = vcmp.eq.s32.totalorder %v522_v53, 17 }
  0xdf   : > { %v794_v11 = vsel %vm722_vm10, %v4774_v7, %v658_v59  ;;  %v1064_v30 = vsel %vm992_vm14, %v4819_v43, %v928_v40  ;;  %v1282_v55 = vsub.s32 %v4651_v15, %v4768_v4  ;;  %v1284_v1 = vsub.s32 %v4654_v16, %v4768_v4 }
  0xe0   : > { %v930_v6 = vsel %vm858_vm13, %v4797_v26, %v794_v11  ;;  %v519_v20 = vsub.s32 %v4651_v15, %v4945_v57  ;;  %v521_v31 = vsub.s32 %v4654_v16, %v4945_v57  ;;  %v1281_v41 = vsub.s32 %v4651_v15, %v4953_v48 }
  0xe1   : > { %v1066_v18 = vsel %vm994_vm15, %v4819_v43, %v930_v6  ;;  %vm1346_vm1 = vcmp.eq.s32.totalorder %v1282_v55, 0  ;;  %vm1348_vm3 = vcmp.eq.s32.totalorder %v1284_v1, 0  ;;  %vm1482_vm2 = vcmp.eq.s32.totalorder %v1282_v55, 1 }
  0xe2   : > { %v1128_v34 = vpack.c.bf16 %v1066_v18, %v1064_v30  ;;  %v1418_v29 = vsel %vm1346_vm1, %v4748_v63, 0.0  ;;  %v1420_v19 = vsel %vm1348_vm3, %v4748_v63, 0.0  ;;  %vm1484_vm5 = vcmp.eq.s32.totalorder %v1284_v1, 1 }
  0xe3   : > { %v1554_v35 = vsel %vm1482_vm2, %v4778_v9, %v1418_v29  ;;  %v1556_v38 = vsel %vm1484_vm5, %v4778_v9, %v1420_v19  ;;  %vm1618_vm0 = vcmp.eq.s32.totalorder %v1282_v55, 16  ;;  %vm1620_vm4 = vcmp.eq.s32.totalorder %v1284_v1, 16 }
  0xe4   : > { %1179 = vmatprep.subr.bf16.mxu0 %v1128_v34  ;;  %v1690_v51 = vsel %vm1618_vm0, %v4803_v33, %v1554_v35  ;;  %v1692_v52 = vsel %vm1620_vm4, %v4803_v33, %v1556_v38  ;;  %vm1754_vm6 = vcmp.eq.s32.totalorder %v1282_v55, 17  ;;  %vm1756_vm11 = vcmp.eq.s32.totalorder %v1284_v1, 17 }
  0xe5   : > { %v1826_v53 = vsel %vm1754_vm6, %v4843_v56, %v1690_v51  ;;  %v1828_v10 = vsel %vm1756_vm11, %v4843_v56, %v1692_v52  ;;  %vm583_vm12 = vcmp.eq.s32.totalorder %v519_v20, 0  ;;  %vm585_vm7 = vcmp.eq.s32.totalorder %v521_v31, 0 }
  0xe6   : > { %v1891_v27 = vpack.c.bf16 %v1828_v10, %v1826_v53  ;;  %v655_v37 = vsel %vm583_vm12, %v4889_v54, 0.0  ;;  %v657_v59 = vsel %vm585_vm7, %v4889_v54, 0.0  ;;  %vm719_vm8 = vcmp.eq.s32.totalorder %v519_v20, 1 }
  0xe7   : > { %vm721_vm9 = vcmp.eq.s32.totalorder %v521_v31, 1  ;;  %v791_v40 = vsel %vm719_vm8, %v4949_v47, %v655_v37  ;;  %vm855_vm10 = vcmp.eq.s32.totalorder %v519_v20, 16  ;;  %vm857_vm13 = vcmp.eq.s32.totalorder %v521_v31, 16 }
  0xe8   : > { %1942 = vmatprep.subr.bf16.mxu1 %v1891_v27  ;;  %v793_v11 = vsel %vm721_vm9, %v4949_v47, %v657_v59  ;;  %v927_v30 = vsel %vm855_vm10, %v4934_v45, %v791_v40  ;;  %vm991_vm14 = vcmp.eq.s32.totalorder %v519_v20, 17  ;;  %vm993_vm15 = vcmp.eq.s32.totalorder %v521_v31, 17 }
  0xe9   : > { %v929_v55 = vsel %vm857_vm13, %v4934_v45, %v793_v11  ;;  %v1063_v1 = vsel %vm991_vm14, %v4970_v0, %v927_v30  ;;  %v1283_v6 = vsub.s32 %v4654_v16, %v4953_v48  ;;  %vm1345_vm1 = vcmp.eq.s32.totalorder %v1281_v41, 0 }
  0xea   : > { %v1065_v18 = vsel %vm993_vm15, %v4970_v0, %v929_v55  ;;  %v1417_v34 = vsel %vm1345_vm1, %v4893_v61, 0.0  ;;  %vm1481_vm3 = vcmp.eq.s32.totalorder %v1281_v41, 1  ;;  %vm1617_vm2 = vcmp.eq.s32.totalorder %v1281_v41, 16 }
  0xeb   : > { %v1127_v29 = vpack.c.bf16 %v1065_v18, %v1063_v1  ;;  %vm1347_vm5 = vcmp.eq.s32.totalorder %v1283_v6, 0  ;;  %vm1483_vm0 = vcmp.eq.s32.totalorder %v1283_v6, 1  ;;  %v1553_v20 = vsel %vm1481_vm3, %v4957_v49, %v1417_v34 }
  0xec   : > { %v1419_v31 = vsel %vm1347_vm5, %v4893_v61, 0.0  ;;  %vm1619_vm4 = vcmp.eq.s32.totalorder %v1283_v6, 16  ;;  %v1689_v19 = vsel %vm1617_vm2, %v4938_v46, %v1553_v20  ;;  %vm1753_vm6 = vcmp.eq.s32.totalorder %v1281_v41, 17 }
  0xed   : > { %1180 = vmatpush1.bf16.msra.mxu0 %v1127_v29  ;;  %v1555_v35 = vsel %vm1483_vm0, %v4957_v49, %v1419_v31  ;;  %vm1755_vm11 = vcmp.eq.s32.totalorder %v1283_v6, 17  ;;  %v1825_v38 = vsel %vm1753_vm6, %v4978_v12, %v1689_v19  ;;  %v524_v51 = vsub.s32 %v4659_v21, %v4764_v3 }
  0xee   : > { %v1691_v52 = vsel %vm1619_vm4, %v4938_v46, %v1555_v35  ;;  %v526_v53 = vsub.s32 %v4662_v22, %v4764_v3  ;;  %v1286_v10 = vsub.s32 %v4659_v21, %v4768_v4  ;;  %v1288_v41 = vsub.s32 %v4662_v22, %v4768_v4 }
  0xef   : > { %v1827_v27 = vsel %vm1755_vm11, %v4978_v12, %v1691_v52  ;;  %vm588_vm12 = vcmp.eq.s32.totalorder %v524_v51, 0  ;;  %vm724_vm7 = vcmp.eq.s32.totalorder %v524_v51, 1  ;;  %vm860_vm8 = vcmp.eq.s32.totalorder %v524_v51, 16 }
  0xf0   : > { %v1890_v37 = vpack.c.bf16 %v1827_v27, %v1825_v38  ;;  %vm590_vm9 = vcmp.eq.s32.totalorder %v526_v53, 0  ;;  %v660_v59 = vsel %vm588_vm12, %v4744_v62, 0.0  ;;  %vm726_vm10 = vcmp.eq.s32.totalorder %v526_v53, 1 }
  0xf1   : > { %v662_v40 = vsel %vm590_vm9, %v4744_v62, 0.0  ;;  %v796_v11 = vsel %vm724_vm7, %v4774_v7, %v660_v59  ;;  %vm862_vm13 = vcmp.eq.s32.totalorder %v526_v53, 16  ;;  %vm996_vm14 = vcmp.eq.s32.totalorder %v524_v51, 17 }
  0xf2   : > { %1943 = vmatpush1.bf16.msra.mxu1 %v1890_v37  ;;  %v798_v30 = vsel %vm726_vm10, %v4774_v7, %v662_v40  ;;  %v932_v55 = vsel %vm860_vm8, %v4797_v26, %v796_v11  ;;  %vm998_vm15 = vcmp.eq.s32.totalorder %v526_v53, 17  ;;  %vm1350_vm1 = vcmp.eq.s32.totalorder %v1286_v10, 0 }
  0xf3   : > { %v934_v1 = vsel %vm862_vm13, %v4797_v26, %v798_v30  ;;  %v1068_v6 = vsel %vm996_vm14, %v4819_v43, %v932_v55  ;;  %vm1352_vm3 = vcmp.eq.s32.totalorder %v1288_v41, 0  ;;  %v1422_v18 = vsel %vm1350_vm1, %v4748_v63, 0.0 }
  0xf4   : > { %v1070_v34 = vsel %vm998_vm15, %v4819_v43, %v934_v1  ;;  %v1424_v29 = vsel %vm1352_vm3, %v4748_v63, 0.0  ;;  %vm1486_vm2 = vcmp.eq.s32.totalorder %v1286_v10, 1  ;;  %vm1488_vm5 = vcmp.eq.s32.totalorder %v1288_v41, 1 }
  0xf5   : > { %v1130_v20 = vpack.c.bf16 %v1070_v34, %v1068_v6  ;;  %v1558_v31 = vsel %vm1486_vm2, %v4778_v9, %v1422_v18  ;;  %v1560_v19 = vsel %vm1488_vm5, %v4778_v9, %v1424_v29  ;;  %vm1622_vm0 = vcmp.eq.s32.totalorder %v1286_v10, 16 }
  0xf6   : > { %vm1624_vm4 = vcmp.eq.s32.totalorder %v1288_v41, 16  ;;  %v1694_v35 = vsel %vm1622_vm0, %v4803_v33, %v1558_v31  ;;  %vm1758_vm6 = vcmp.eq.s32.totalorder %v1286_v10, 17  ;;  %vm1760_vm11 = vcmp.eq.s32.totalorder %v1288_v41, 17 }
  0xf7   : > { %1181 = vmatprep.subr.bf16.mxu0 %v1130_v20  ;;  %v1696_v38 = vsel %vm1624_vm4, %v4803_v33, %v1560_v19  ;;  %v1830_v51 = vsel %vm1758_vm6, %v4843_v56, %v1694_v35  ;;  %v523_v52 = vsub.s32 %v4659_v21, %v4945_v57  ;;  %v525_v53 = vsub.s32 %v4662_v22, %v4945_v57 }
  0xf8   : > { %v1832_v27 = vsel %vm1760_vm11, %v4843_v56, %v1696_v38  ;;  %v1285_v37 = vsub.s32 %v4659_v21, %v4953_v48  ;;  %v1287_v10 = vsub.s32 %v4662_v22, %v4953_v48  ;;  %v528_v41 = vsub.s32 %v4665_v23, %v4764_v3 }
  0xf9   : > { %v1893_v59 = vpack.c.bf16 %v1832_v27, %v1830_v51  ;;  %vm587_vm12 = vcmp.eq.s32.totalorder %v523_v52, 0  ;;  %vm589_vm7 = vcmp.eq.s32.totalorder %v525_v53, 0  ;;  %vm723_vm8 = vcmp.eq.s32.totalorder %v523_v52, 1 }
  0xfa   : > { %v659_v40 = vsel %vm587_vm12, %v4889_v54, 0.0  ;;  %v661_v11 = vsel %vm589_vm7, %v4889_v54, 0.0  ;;  %vm725_vm9 = vcmp.eq.s32.totalorder %v525_v53, 1  ;;  %vm859_vm10 = vcmp.eq.s32.totalorder %v523_v52, 16 }
  0xfb   : > { %1944 = vmatprep.subr.bf16.mxu1 %v1893_v59  ;;  %v795_v30 = vsel %vm723_vm8, %v4949_v47, %v659_v40  ;;  %v797_v55 = vsel %vm725_vm9, %v4949_v47, %v661_v11  ;;  %vm861_vm13 = vcmp.eq.s32.totalorder %v525_v53, 16  ;;  %vm995_vm14 = vcmp.eq.s32.totalorder %v523_v52, 17 }
  0xfc   : > { %v931_v1 = vsel %vm859_vm10, %v4934_v45, %v795_v30  ;;  %v933_v6 = vsel %vm861_vm13, %v4934_v45, %v797_v55  ;;  %vm997_vm15 = vcmp.eq.s32.totalorder %v525_v53, 17  ;;  %vm1349_vm1 = vcmp.eq.s32.totalorder %v1285_v37, 0 }
  0xfd   : > { %v1067_v18 = vsel %vm995_vm14, %v4970_v0, %v931_v1  ;;  %v1069_v34 = vsel %vm997_vm15, %v4970_v0, %v933_v6  ;;  %vm1351_vm3 = vcmp.eq.s32.totalorder %v1287_v10, 0  ;;  %v1421_v29 = vsel %vm1349_vm1, %v4893_v61, 0.0 }
  0xfe   : > { %v1129_v20 = vpack.c.bf16 %v1069_v34, %v1067_v18  ;;  %v1423_v31 = vsel %vm1351_vm3, %v4893_v61, 0.0  ;;  %vm1485_vm2 = vcmp.eq.s32.totalorder %v1285_v37, 1  ;;  %vm1487_vm5 = vcmp.eq.s32.totalorder %v1287_v10, 1 }
  0xff   : > { %v1557_v19 = vsel %vm1485_vm2, %v4957_v49, %v1421_v29  ;;  %v1559_v35 = vsel %vm1487_vm5, %v4957_v49, %v1423_v31  ;;  %vm1621_vm0 = vcmp.eq.s32.totalorder %v1285_v37, 16  ;;  %vm1623_vm4 = vcmp.eq.s32.totalorder %v1287_v10, 16 }
 0x100   : > { %1182 = vmatpush1.bf16.msra.mxu0 %v1129_v20  ;;  %v1693_v38 = vsel %vm1621_vm0, %v4938_v46, %v1557_v19  ;;  %v1695_v51 = vsel %vm1623_vm4, %v4938_v46, %v1559_v35  ;;  %vm1757_vm6 = vcmp.eq.s32.totalorder %v1285_v37, 17  ;;  %vm1759_vm11 = vcmp.eq.s32.totalorder %v1287_v10, 17 }
 0x101   : > { %v1829_v52 = vsel %vm1757_vm6, %v4978_v12, %v1693_v38  ;;  %v1831_v53 = vsel %vm1759_vm11, %v4978_v12, %v1695_v51  ;;  %v530_v27 = vsub.s32 %v4668_v24, %v4764_v3  ;;  %vm592_vm12 = vcmp.eq.s32.totalorder %v528_v41, 0 }
 0x102   : > { %v1892_v59 = vpack.c.bf16 %v1831_v53, %v1829_v52  ;;  %v664_v40 = vsel %vm592_vm12, %v4744_v62, 0.0  ;;  %vm728_vm7 = vcmp.eq.s32.totalorder %v528_v41, 1  ;;  %vm864_vm8 = vcmp.eq.s32.totalorder %v528_v41, 16 }
 0x103   : > { %vm594_vm9 = vcmp.eq.s32.totalorder %v530_v27, 0  ;;  %vm730_vm10 = vcmp.eq.s32.totalorder %v530_v27, 1  ;;  %v800_v11 = vsel %vm728_vm7, %v4774_v7, %v664_v40  ;;  %vm866_vm13 = vcmp.eq.s32.totalorder %v530_v27, 16 }
 0x104   : > { %1945 = vmatpush1.bf16.msra.mxu1 %v1892_v59  ;;  %v666_v37 = vsel %vm594_vm9, %v4744_v62, 0.0  ;;  %v936_v10 = vsel %vm864_vm8, %v4797_v26, %v800_v11  ;;  %vm1000_vm14 = vcmp.eq.s32.totalorder %v528_v41, 17  ;;  %vm1002_vm15 = vcmp.eq.s32.totalorder %v530_v27, 17 }
 0x105   : > { %v802_v30 = vsel %vm730_vm10, %v4774_v7, %v666_v37  ;;  %v1072_v55 = vsel %vm1000_vm14, %v4819_v43, %v936_v10  ;;  %v1290_v1 = vsub.s32 %v4665_v23, %v4768_v4  ;;  %v1292_v6 = vsub.s32 %v4668_v24, %v4768_v4 }
 0x106   : > { %v938_v18 = vsel %vm866_vm13, %v4797_v26, %v802_v30  ;;  %v527_v34 = vsub.s32 %v4665_v23, %v4945_v57  ;;  %v529_v29 = vsub.s32 %v4668_v24, %v4945_v57  ;;  %v1289_v41 = vsub.s32 %v4665_v23, %v4953_v48 }
 0x107   : > { %v1074_v20 = vsel %vm1002_vm15, %v4819_v43, %v938_v18  ;;  %vm1354_vm1 = vcmp.eq.s32.totalorder %v1290_v1, 0  ;;  %vm1356_vm3 = vcmp.eq.s32.totalorder %v1292_v6, 0  ;;  %vm1490_vm2 = vcmp.eq.s32.totalorder %v1290_v1, 1 }
 0x108   : > { %v1132_v31 = vpack.c.bf16 %v1074_v20, %v1072_v55  ;;  %v1426_v19 = vsel %vm1354_vm1, %v4748_v63, 0.0  ;;  %v1428_v35 = vsel %vm1356_vm3, %v4748_v63, 0.0  ;;  %vm1492_vm5 = vcmp.eq.s32.totalorder %v1292_v6, 1 }
 0x109   : > { %v1562_v38 = vsel %vm1490_vm2, %v4778_v9, %v1426_v19  ;;  %v1564_v51 = vsel %vm1492_vm5, %v4778_v9, %v1428_v35  ;;  %vm1626_vm0 = vcmp.eq.s32.totalorder %v1290_v1, 16  ;;  %vm1628_vm4 = vcmp.eq.s32.totalorder %v1292_v6, 16 }
 0x10a   : > { %1183 = vmatprep.subr.bf16.mxu0 %v1132_v31  ;;  %v1698_v52 = vsel %vm1626_vm0, %v4803_v33, %v1562_v38  ;;  %v1700_v53 = vsel %vm1628_vm4, %v4803_v33, %v1564_v51  ;;  %vm1762_vm6 = vcmp.eq.s32.totalorder %v1290_v1, 17  ;;  %vm1764_vm11 = vcmp.eq.s32.totalorder %v1292_v6, 17 }
 0x10b   : > { %v1834_v27 = vsel %vm1762_vm6, %v4843_v56, %v1698_v52  ;;  %v1836_v59 = vsel %vm1764_vm11, %v4843_v56, %v1700_v53  ;;  %vm591_vm12 = vcmp.eq.s32.totalorder %v527_v34, 0  ;;  %vm593_vm7 = vcmp.eq.s32.totalorder %v529_v29, 0 }
 0x10c   : > { %v1895_v40 = vpack.c.bf16 %v1836_v59, %v1834_v27  ;;  %v663_v11 = vsel %vm591_vm12, %v4889_v54, 0.0  ;;  %v665_v37 = vsel %vm593_vm7, %v4889_v54, 0.0  ;;  %vm727_vm8 = vcmp.eq.s32.totalorder %v527_v34, 1 }
 0x10d   : > { %vm729_vm9 = vcmp.eq.s32.totalorder %v529_v29, 1  ;;  %v799_v10 = vsel %vm727_vm8, %v4949_v47, %v663_v11  ;;  %vm863_vm10 = vcmp.eq.s32.totalorder %v527_v34, 16  ;;  %vm865_vm13 = vcmp.eq.s32.totalorder %v529_v29, 16 }
 0x10e   : > { %1946 = vmatprep.subr.bf16.mxu1 %v1895_v40  ;;  %v801_v30 = vsel %vm729_vm9, %v4949_v47, %v665_v37  ;;  %v935_v55 = vsel %vm863_vm10, %v4934_v45, %v799_v10  ;;  %vm999_vm14 = vcmp.eq.s32.totalorder %v527_v34, 17  ;;  %vm1001_vm15 = vcmp.eq.s32.totalorder %v529_v29, 17 }
 0x10f   : > { %v937_v1 = vsel %vm865_vm13, %v4934_v45, %v801_v30  ;;  %v1071_v6 = vsel %vm999_vm14, %v4970_v0, %v935_v55  ;;  %v1291_v18 = vsub.s32 %v4668_v24, %v4953_v48  ;;  %vm1353_vm1 = vcmp.eq.s32.totalorder %v1289_v41, 0 }
 0x110   : > { %v1073_v20 = vsel %vm1001_vm15, %v4970_v0, %v937_v1  ;;  %v1425_v31 = vsel %vm1353_vm1, %v4893_v61, 0.0  ;;  %vm1489_vm3 = vcmp.eq.s32.totalorder %v1289_v41, 1  ;;  %vm1625_vm2 = vcmp.eq.s32.totalorder %v1289_v41, 16 }
 0x111   : > { %v1131_v19 = vpack.c.bf16 %v1073_v20, %v1071_v6  ;;  %vm1355_vm5 = vcmp.eq.s32.totalorder %v1291_v18, 0  ;;  %vm1491_vm0 = vcmp.eq.s32.totalorder %v1291_v18, 1  ;;  %v1561_v34 = vsel %vm1489_vm3, %v4957_v49, %v1425_v31 }
 0x112   : > { %v1427_v29 = vsel %vm1355_vm5, %v4893_v61, 0.0  ;;  %vm1627_vm4 = vcmp.eq.s32.totalorder %v1291_v18, 16  ;;  %v1697_v35 = vsel %vm1625_vm2, %v4938_v46, %v1561_v34  ;;  %vm1761_vm6 = vcmp.eq.s32.totalorder %v1289_v41, 17 }
 0x113   : > { %1184 = vmatpush1.bf16.msra.mxu0 %v1131_v19  ;;  %v1563_v38 = vsel %vm1491_vm0, %v4957_v49, %v1427_v29  ;;  %vm1763_vm11 = vcmp.eq.s32.totalorder %v1291_v18, 17  ;;  %v1833_v51 = vsel %vm1761_vm6, %v4978_v12, %v1697_v35  ;;  %v532_v52 = vsub.s32 %v4671_v28, %v4764_v3 }
 0x114   : > { %v1699_v53 = vsel %vm1627_vm4, %v4938_v46, %v1563_v38  ;;  %v534_v27 = vsub.s32 %v4680_v32, %v4764_v3  ;;  %v1294_v59 = vsub.s32 %v4671_v28, %v4768_v4  ;;  %v1296_v41 = vsub.s32 %v4680_v32, %v4768_v4 }
 0x115   : > { %v1835_v40 = vsel %vm1763_vm11, %v4978_v12, %v1699_v53  ;;  %vm596_vm12 = vcmp.eq.s32.totalorder %v532_v52, 0  ;;  %vm732_vm7 = vcmp.eq.s32.totalorder %v532_v52, 1  ;;  %vm868_vm8 = vcmp.eq.s32.totalorder %v532_v52, 16 }
 0x116   : > { %v1894_v11 = vpack.c.bf16 %v1835_v40, %v1833_v51  ;;  %vm598_vm9 = vcmp.eq.s32.totalorder %v534_v27, 0  ;;  %v668_v37 = vsel %vm596_vm12, %v4744_v62, 0.0  ;;  %vm734_vm10 = vcmp.eq.s32.totalorder %v534_v27, 1 }
 0x117   : > { %v670_v10 = vsel %vm598_vm9, %v4744_v62, 0.0  ;;  %v804_v30 = vsel %vm732_vm7, %v4774_v7, %v668_v37  ;;  %vm870_vm13 = vcmp.eq.s32.totalorder %v534_v27, 16  ;;  %vm1004_vm14 = vcmp.eq.s32.totalorder %v532_v52, 17 }
 0x118   : > { %1947 = vmatpush1.bf16.msra.mxu1 %v1894_v11  ;;  %v806_v55 = vsel %vm734_vm10, %v4774_v7, %v670_v10  ;;  %v940_v1 = vsel %vm868_vm8, %v4797_v26, %v804_v30  ;;  %vm1006_vm15 = vcmp.eq.s32.totalorder %v534_v27, 17  ;;  %vm1358_vm1 = vcmp.eq.s32.totalorder %v1294_v59, 0 }
 0x119   : > { %v942_v6 = vsel %vm870_vm13, %v4797_v26, %v806_v55  ;;  %v1076_v18 = vsel %vm1004_vm14, %v4819_v43, %v940_v1  ;;  %vm1360_vm3 = vcmp.eq.s32.totalorder %v1296_v41, 0  ;;  %v1430_v20 = vsel %vm1358_vm1, %v4748_v63, 0.0 }
 0x11a   : > { %v1078_v31 = vsel %vm1006_vm15, %v4819_v43, %v942_v6  ;;  %v1432_v19 = vsel %vm1360_vm3, %v4748_v63, 0.0  ;;  %vm1494_vm2 = vcmp.eq.s32.totalorder %v1294_v59, 1  ;;  %vm1496_vm5 = vcmp.eq.s32.totalorder %v1296_v41, 1 }
 0x11b   : > { %v1134_v34 = vpack.c.bf16 %v1078_v31, %v1076_v18  ;;  %v1566_v29 = vsel %vm1494_vm2, %v4778_v9, %v1430_v20  ;;  %v1568_v35 = vsel %vm1496_vm5, %v4778_v9, %v1432_v19  ;;  %vm1630_vm0 = vcmp.eq.s32.totalorder %v1294_v59, 16 }
 0x11c   : > { %vm1632_vm4 = vcmp.eq.s32.totalorder %v1296_v41, 16  ;;  %v1702_v38 = vsel %vm1630_vm0, %v4803_v33, %v1566_v29  ;;  %vm1766_vm6 = vcmp.eq.s32.totalorder %v1294_v59, 17  ;;  %vm1768_vm11 = vcmp.eq.s32.totalorder %v1296_v41, 17 }
 0x11d   : > { %1185 = vmatprep.subr.bf16.mxu0 %v1134_v34  ;;  %v1704_v51 = vsel %vm1632_vm4, %v4803_v33, %v1568_v35  ;;  %v1838_v52 = vsel %vm1766_vm6, %v4843_v56, %v1702_v38  ;;  %v531_v53 = vsub.s32 %v4671_v28, %v4945_v57  ;;  %v533_v27 = vsub.s32 %v4680_v32, %v4945_v57 }
 0x11e   : > { %v1840_v40 = vsel %vm1768_vm11, %v4843_v56, %v1704_v51  ;;  %v1293_v11 = vsub.s32 %v4671_v28, %v4953_v48  ;;  %v1295_v59 = vsub.s32 %v4680_v32, %v4953_v48  ;;  %v5225_v41 = vadd.s32 96, %v4633_v5 }
 0x11f   : > { %v1897_v37 = vpack.c.bf16 %v1840_v40, %v1838_v52  ;;  %vm595_vm12 = vcmp.eq.s32.totalorder %v531_v53, 0  ;;  %vm597_vm7 = vcmp.eq.s32.totalorder %v533_v27, 0  ;;  %vm731_vm8 = vcmp.eq.s32.totalorder %v531_v53, 1 }
 0x120   : > { %7079 = vst [vmem:[#allocation20_spill] sm:$0xff] %v5225_v41  ;;  %v667_v10 = vsel %vm595_vm12, %v4889_v54, 0.0  ;;  %v669_v30 = vsel %vm597_vm7, %v4889_v54, 0.0  ;;  %vm733_vm9 = vcmp.eq.s32.totalorder %v533_v27, 1  ;;  %vm867_vm10 = vcmp.eq.s32.totalorder %v531_v53, 16 }
 0x121   : > { %1948 = vmatprep.subr.bf16.mxu1 %v1897_v37  ;;  %v803_v55 = vsel %vm731_vm8, %v4949_v47, %v667_v10  ;;  %v805_v1 = vsel %vm733_vm9, %v4949_v47, %v669_v30  ;;  %vm869_vm13 = vcmp.eq.s32.totalorder %v533_v27, 16  ;;  %vm1003_vm14 = vcmp.eq.s32.totalorder %v531_v53, 17 }
 0x122   : > { %v939_v6 = vsel %vm867_vm10, %v4934_v45, %v803_v55  ;;  %v941_v18 = vsel %vm869_vm13, %v4934_v45, %v805_v1  ;;  %vm1005_vm15 = vcmp.eq.s32.totalorder %v533_v27, 17  ;;  %vm1357_vm1 = vcmp.eq.s32.totalorder %v1293_v11, 0 }
 0x123   : > { %v1075_v20 = vsel %vm1003_vm14, %v4970_v0, %v939_v6  ;;  %v1077_v31 = vsel %vm1005_vm15, %v4970_v0, %v941_v18  ;;  %vm1359_vm3 = vcmp.eq.s32.totalorder %v1295_v59, 0  ;;  %v1429_v19 = vsel %vm1357_vm1, %v4893_v61, 0.0 }
 0x124   : > { %v1133_v34 = vpack.c.bf16 %v1077_v31, %v1075_v20  ;;  %v1431_v29 = vsel %vm1359_vm3, %v4893_v61, 0.0  ;;  %vm1493_vm2 = vcmp.eq.s32.totalorder %v1293_v11, 1  ;;  %vm1495_vm5 = vcmp.eq.s32.totalorder %v1295_v59, 1 }
 0x125   : > { %v1565_v35 = vsel %vm1493_vm2, %v4957_v49, %v1429_v19  ;;  %v1567_v38 = vsel %vm1495_vm5, %v4957_v49, %v1431_v29  ;;  %vm1629_vm0 = vcmp.eq.s32.totalorder %v1293_v11, 16  ;;  %vm1631_vm4 = vcmp.eq.s32.totalorder %v1295_v59, 16 }
 0x126   : > { %1186 = vmatpush1.bf16.msra.mxu0 %v1133_v34  ;;  %v1701_v51 = vsel %vm1629_vm0, %v4938_v46, %v1565_v35  ;;  %v1703_v52 = vsel %vm1631_vm4, %v4938_v46, %v1567_v38  ;;  %vm1765_vm6 = vcmp.eq.s32.totalorder %v1293_v11, 17  ;;  %vm1767_vm11 = vcmp.eq.s32.totalorder %v1295_v59, 17 }
 0x127   : > { %v1837_v53 = vsel %vm1765_vm6, %v4978_v12, %v1701_v51  ;;  %v1839_v27 = vsel %vm1767_vm11, %v4978_v12, %v1703_v52  ;;  %v5244_v40 = vadd.s32 104, %v4633_v5  ;;  %v536_v37 = vsub.s32 %v5225_v41, %v4764_v3 }
 0x128   : > { %v1896_v10 = vpack.c.bf16 %v1839_v27, %v1837_v53  ;;  %v1298_v30 = vsub.s32 %v5225_v41, %v4768_v4  ;;  %v535_v55 = vsub.s32 %v5225_v41, %v4945_v57  ;;  %v5254_v11 = vsub.s32 %v5225_v41, %v4953_v48 }
 0x129   : > { %7080 = vst [vmem:[#allocation21_spill] sm:$0xff] %v5244_v40  ;;  %v538_v59 = vsub.s32 %v5244_v40, %v4764_v3  ;;  %vm600_vm12 = vcmp.eq.s32.totalorder %v536_v37, 0  ;;  %vm736_vm7 = vcmp.eq.s32.totalorder %v536_v37, 1  ;;  %vm872_vm8 = vcmp.eq.s32.totalorder %v536_v37, 16 }
 0x12a   : > { %1949 = vmatpush1.bf16.msra.mxu1 %v1896_v10  ;;  %v672_v1 = vsel %vm600_vm12, %v4744_v62, 0.0  ;;  %vm1008_vm9 = vcmp.eq.s32.totalorder %v536_v37, 17  ;;  %v1300_v6 = vsub.s32 %v5244_v40, %v4768_v4  ;;  %vm1362_vm10 = vcmp.eq.s32.totalorder %v1298_v30, 0 }
 0x12b   : > { %vm602_vm13 = vcmp.eq.s32.totalorder %v538_v59, 0  ;;  %vm738_vm14 = vcmp.eq.s32.totalorder %v538_v59, 1  ;;  %v808_v18 = vsel %vm736_vm7, %v4774_v7, %v672_v1  ;;  %vm874_vm15 = vcmp.eq.s32.totalorder %v538_v59, 16 }
 0x12c   : > { %v674_v20 = vsel %vm602_vm13, %v4744_v62, 0.0  ;;  %v944_v31 = vsel %vm872_vm8, %v4797_v26, %v808_v18  ;;  %vm1010_vm1 = vcmp.eq.s32.totalorder %v538_v59, 17  ;;  %vm1364_vm3 = vcmp.eq.s32.totalorder %v1300_v6, 0 }
 0x12d   : > { %v810_v19 = vsel %vm738_vm14, %v4774_v7, %v674_v20  ;;  %v1080_v34 = vsel %vm1008_vm9, %v4819_v43, %v944_v31  ;;  %v1434_v29 = vsel %vm1362_vm10, %v4748_v63, 0.0  ;;  %v1436_v35 = vsel %vm1364_vm3, %v4748_v63, 0.0 }
 0x12e   : > { %v946_v38 = vsel %vm874_vm15, %v4797_v26, %v810_v19  ;;  %vm1498_vm2 = vcmp.eq.s32.totalorder %v1298_v30, 1  ;;  %vm1500_vm5 = vcmp.eq.s32.totalorder %v1300_v6, 1  ;;  %vm1634_vm0 = vcmp.eq.s32.totalorder %v1298_v30, 16 }
 0x12f   : > { %v1082_v51 = vsel %vm1010_vm1, %v4819_v43, %v946_v38  ;;  %v1570_v52 = vsel %vm1498_vm2, %v4778_v9, %v1434_v29  ;;  %v1572_v53 = vsel %vm1500_vm5, %v4778_v9, %v1436_v35  ;;  %vm1636_vm4 = vcmp.eq.s32.totalorder %v1300_v6, 16 }
 0x130   : > { %v1136_v27 = vpack.c.bf16 %v1082_v51, %v1080_v34  ;;  %v1706_v37 = vsel %vm1634_vm0, %v4803_v33, %v1570_v52  ;;  %v1708_v10 = vsel %vm1636_vm4, %v4803_v33, %v1572_v53  ;;  %vm1770_vm6 = vcmp.eq.s32.totalorder %v1298_v30, 17 }
 0x131   : > { %vm1772_vm11 = vcmp.eq.s32.totalorder %v1300_v6, 17  ;;  %v1842_v59 = vsel %vm1770_vm6, %v4843_v56, %v1706_v37  ;;  %v537_v1 = vsub.s32 %v5244_v40, %v4945_v57  ;;  %vm599_vm12 = vcmp.eq.s32.totalorder %v535_v55, 0 }
 0x132   : > { %1187 = vmatprep.subr.bf16.mxu0 %v1136_v27  ;;  %v1844_v18 = vsel %vm1772_vm11, %v4843_v56, %v1708_v10  ;;  %v671_v20 = vsel %vm599_vm12, %v4889_v54, 0.0  ;;  %vm735_vm7 = vcmp.eq.s32.totalorder %v535_v55, 1  ;;  %vm871_vm8 = vcmp.eq.s32.totalorder %v535_v55, 16 }
 0x133   : > { %v1899_v31 = vpack.c.bf16 %v1844_v18, %v1842_v59  ;;  %vm601_vm9 = vcmp.eq.s32.totalorder %v537_v1, 0  ;;  %vm737_vm10 = vcmp.eq.s32.totalorder %v537_v1, 1  ;;  %v807_v19 = vsel %vm735_vm7, %v4949_v47, %v671_v20 }
 0x134   : > { %v673_v30 = vsel %vm601_vm9, %v4889_v54, 0.0  ;;  %vm873_vm13 = vcmp.eq.s32.totalorder %v537_v1, 16  ;;  %v943_v6 = vsel %vm871_vm8, %v4934_v45, %v807_v19  ;;  %vm1007_vm14 = vcmp.eq.s32.totalorder %v535_v55, 17 }
 0x135   : > { %1950 = vmatprep.subr.bf16.mxu1 %v1899_v31  ;;  %v809_v34 = vsel %vm737_vm10, %v4949_v47, %v673_v30  ;;  %vm1009_vm15 = vcmp.eq.s32.totalorder %v537_v1, 17  ;;  %v1079_v29 = vsel %vm1007_vm14, %v4970_v0, %v943_v6  ;;  %v1299_v35 = vsub.s32 %v5244_v40, %v4953_v48 }
 0x136   : > { %v945_v38 = vsel %vm873_vm13, %v4934_v45, %v809_v34  ;;  %vm1361_vm1 = vcmp.eq.s32.totalorder %v5254_v11, 0  ;;  %vm1497_vm3 = vcmp.eq.s32.totalorder %v5254_v11, 1  ;;  %vm1633_vm2 = vcmp.eq.s32.totalorder %v5254_v11, 16 }
 0x137   : > { %v1081_v51 = vsel %vm1009_vm15, %v4970_v0, %v945_v38  ;;  %vm1363_vm5 = vcmp.eq.s32.totalorder %v1299_v35, 0  ;;  %v1433_v55 = vsel %vm1361_vm1, %v4893_v61, 0.0  ;;  %vm1499_vm0 = vcmp.eq.s32.totalorder %v1299_v35, 1 }
 0x138   : > { %v1135_v52 = vpack.c.bf16 %v1081_v51, %v1079_v29  ;;  %v1435_v53 = vsel %vm1363_vm5, %v4893_v61, 0.0  ;;  %v1569_v27 = vsel %vm1497_vm3, %v4957_v49, %v1433_v55  ;;  %vm1635_vm4 = vcmp.eq.s32.totalorder %v1299_v35, 16 }
 0x139   : > { %v1571_v37 = vsel %vm1499_vm0, %v4957_v49, %v1435_v53  ;;  %v1705_v10 = vsel %vm1633_vm2, %v4938_v46, %v1569_v27  ;;  %vm1769_vm6 = vcmp.eq.s32.totalorder %v5254_v11, 17  ;;  %vm1771_vm11 = vcmp.eq.s32.totalorder %v1299_v35, 17 }
 0x13a   : > { %1188 = vmatpush1.bf16.msra.mxu0 %v1135_v52  ;;  %v1707_v59 = vsel %vm1635_vm4, %v4938_v46, %v1571_v37  ;;  %v1841_v1 = vsel %vm1769_vm6, %v4978_v12, %v1705_v10  ;;  %v5300_v18 = vadd.s32 112, %v4633_v5  ;;  %v5303_v20 = vadd.s32 120, %v4633_v5 }
 0x13b   : > { %v1843_v31 = vsel %vm1771_vm11, %v4978_v12, %v1707_v59  ;;  %v5307_v19 = vadd.s32 128, %v4633_v5  ;;  %v5310_v30 = vadd.s32 136, %v4633_v5  ;;  %v5313_v11 = vadd.s32 144, %v4633_v5 }
 0x13c   : > { %7081 = vst [vmem:[#allocation22_spill] sm:$0xff] %v5300_v18  ;;  %7082 = vst [vmem:[#allocation23_spill] sm:$0xff] %v5303_v20  ;;  %v1898_v6 = vpack.c.bf16 %v1843_v31, %v1841_v1  ;;  %v540_v34 = vsub.s32 %v5300_v18, %v4764_v3  ;;  %v542_v29 = vsub.s32 %v5303_v20, %v4764_v3 }
 0x13d   : > { %7083 = vst [vmem:[#allocation24_spill] sm:$0xff] %v5307_v19  ;;  %7084 = vst [vmem:[#allocation25_spill] sm:$0xff] %v5310_v30  ;;  %v1302_v35 = vsub.s32 %v5300_v18, %v4768_v4  ;;  %v1304_v38 = vsub.s32 %v5303_v20, %v4768_v4  ;;  %v539_v51 = vsub.s32 %v5300_v18, %v4945_v57 }
 0x13e   : > { %7085 = vst [vmem:[#allocation26_spill] sm:$0xff] %v5313_v11  ;;  %v541_v55 = vsub.s32 %v5303_v20, %v4945_v57  ;;  %v5329_v52 = vsub.s32 %v5300_v18, %v4953_v48  ;;  %1951 = vmatpush1.bf16.msra.mxu1 %v1898_v6  ;;  %vm604_vm12 = vcmp.eq.s32.totalorder %v540_v34, 0  ;;  %vm606_vm7 = vcmp.eq.s32.totalorder %v542_v29, 0 }
 0x13f   : > { %vm740_vm8 = vcmp.eq.s32.totalorder %v540_v34, 1  ;;  %vm742_vm9 = vcmp.eq.s32.totalorder %v542_v29, 1  ;;  %v676_v53 = vsel %vm604_vm12, %v4744_v62, 0.0  ;;  %v678_v27 = vsel %vm606_vm7, %v4744_v62, 0.0 }
 0x140   : > { %vm876_vm10 = vcmp.eq.s32.totalorder %v540_v34, 16  ;;  %vm878_vm13 = vcmp.eq.s32.totalorder %v542_v29, 16  ;;  %v812_v37 = vsel %vm740_vm8, %v4774_v7, %v676_v53  ;;  %v814_v10 = vsel %vm742_vm9, %v4774_v7, %v678_v27 }
 0x141   : > { %vm1012_vm14 = vcmp.eq.s32.totalorder %v540_v34, 17  ;;  %vm1014_vm15 = vcmp.eq.s32.totalorder %v542_v29, 17  ;;  %v948_v59 = vsel %vm876_vm10, %v4797_v26, %v812_v37  ;;  %v950_v1 = vsel %vm878_vm13, %v4797_v26, %v814_v10 }
 0x142   : > { %vm1366_vm1 = vcmp.eq.s32.totalorder %v1302_v35, 0  ;;  %vm1368_vm3 = vcmp.eq.s32.totalorder %v1304_v38, 0  ;;  %v1084_v31 = vsel %vm1012_vm14, %v4819_v43, %v948_v59  ;;  %v1086_v6 = vsel %vm1014_vm15, %v4819_v43, %v950_v1 }
 0x143   : > { %v1438_v18 = vsel %vm1366_vm1, %v4748_v63, 0.0  ;;  %v1440_v40 = vsel %vm1368_vm3, %v4748_v63, 0.0  ;;  %v1138_v41 = vpack.c.bf16 %v1086_v6, %v1084_v31  ;;  %vm1502_vm2 = vcmp.eq.s32.totalorder %v1302_v35, 1 }
 0x144   : > { %vm1504_vm5 = vcmp.eq.s32.totalorder %v1304_v38, 1  ;;  %vm1638_vm0 = vcmp.eq.s32.totalorder %v1302_v35, 16  ;;  %v1574_v34 = vsel %vm1502_vm2, %v4778_v9, %v1438_v18  ;;  %vm1640_vm4 = vcmp.eq.s32.totalorder %v1304_v38, 16 }
 0x145   : > { %v1576_v29 = vsel %vm1504_vm5, %v4778_v9, %v1440_v40  ;;  %vm1774_vm6 = vcmp.eq.s32.totalorder %v1302_v35, 17  ;;  %1189 = vmatprep.subr.bf16.mxu0 %v1138_v41  ;;  %v1710_v53 = vsel %vm1638_vm0, %v4803_v33, %v1574_v34  ;;  %vm1776_vm11 = vcmp.eq.s32.totalorder %v1304_v38, 17 }
 0x146   : > { %v1712_v27 = vsel %vm1640_vm4, %v4803_v33, %v1576_v29  ;;  %vm603_vm12 = vcmp.eq.s32.totalorder %v539_v51, 0  ;;  %v1846_v37 = vsel %vm1774_vm6, %v4843_v56, %v1710_v53  ;;  %vm605_vm7 = vcmp.eq.s32.totalorder %v541_v55, 0 }
 0x147   : > { %v1848_v10 = vsel %vm1776_vm11, %v4843_v56, %v1712_v27  ;;  %v675_v59 = vsel %vm603_vm12, %v4889_v54, 0.0  ;;  %v677_v18 = vsel %vm605_vm7, %v4889_v54, 0.0  ;;  %vm739_vm8 = vcmp.eq.s32.totalorder %v539_v51, 1 }
 0x148   : > { %v1901_v1 = vpack.c.bf16 %v1848_v10, %v1846_v37  ;;  %vm741_vm9 = vcmp.eq.s32.totalorder %v541_v55, 1  ;;  %v811_v41 = vsel %vm739_vm8, %v4949_v47, %v675_v59  ;;  %vm875_vm10 = vcmp.eq.s32.totalorder %v539_v51, 16 }
 0x149   : > { %v813_v40 = vsel %vm741_vm9, %v4949_v47, %v677_v18  ;;  %vm877_vm13 = vcmp.eq.s32.totalorder %v541_v55, 16  ;;  %v947_v35 = vsel %vm875_vm10, %v4934_v45, %v811_v41  ;;  %vm1011_vm14 = vcmp.eq.s32.totalorder %v539_v51, 17 }
 0x14a   : > { %1952 = vmatprep.subr.bf16.mxu1 %v1901_v1  ;;  %v949_v38 = vsel %vm877_vm13, %v4934_v45, %v813_v40  ;;  %vm1013_vm15 = vcmp.eq.s32.totalorder %v541_v55, 17  ;;  %v1083_v31 = vsel %vm1011_vm14, %v4970_v0, %v947_v35  ;;  %v1303_v34 = vsub.s32 %v5303_v20, %v4953_v48 }
 0x14b   : > { %v1085_v6 = vsel %vm1013_vm15, %v4970_v0, %v949_v38  ;;  %vm1365_vm1 = vcmp.eq.s32.totalorder %v5329_v52, 0  ;;  %vm1501_vm3 = vcmp.eq.s32.totalorder %v5329_v52, 1  ;;  %vm1637_vm2 = vcmp.eq.s32.totalorder %v5329_v52, 16 }
 0x14c   : > { %v1137_v29 = vpack.c.bf16 %v1085_v6, %v1083_v31  ;;  %v1437_v53 = vsel %vm1365_vm1, %v4893_v61, 0.0  ;;  %vm1367_vm5 = vcmp.eq.s32.totalorder %v1303_v34, 0  ;;  %vm1503_vm0 = vcmp.eq.s32.totalorder %v1303_v34, 1 }
 0x14d   : > { %v1573_v51 = vsel %vm1501_vm3, %v4957_v49, %v1437_v53  ;;  %vm1639_vm4 = vcmp.eq.s32.totalorder %v1303_v34, 16  ;;  %v1439_v55 = vsel %vm1367_vm5, %v4893_v61, 0.0  ;;  %vm1773_vm6 = vcmp.eq.s32.totalorder %v5329_v52, 17 }
 0x14e   : > { %1190 = vmatpush1.bf16.msra.mxu0 %v1137_v29  ;;  %v1709_v27 = vsel %vm1637_vm2, %v4938_v46, %v1573_v51  ;;  %vm1775_vm11 = vcmp.eq.s32.totalorder %v1303_v34, 17  ;;  %v1575_v37 = vsel %vm1503_vm0, %v4957_v49, %v1439_v55  ;;  %v544_v59 = vsub.s32 %v5307_v19, %v4764_v3 }
 0x14f   : > { %v1845_v10 = vsel %vm1773_vm6, %v4978_v12, %v1709_v27  ;;  %v546_v1 = vsub.s32 %v5310_v30, %v4764_v3  ;;  %v1711_v18 = vsel %vm1639_vm4, %v4938_v46, %v1575_v37  ;;  %v1306_v41 = vsub.s32 %v5307_v19, %v4768_v4 }
 0x150   : > { %v1308_v40 = vsub.s32 %v5310_v30, %v4768_v4  ;;  %v543_v52 = vsub.s32 %v5307_v19, %v4945_v57  ;;  %v1847_v35 = vsel %vm1775_vm11, %v4978_v12, %v1711_v18  ;;  %vm608_vm12 = vcmp.eq.s32.totalorder %v544_v59, 0 }
 0x151   : > { %vm610_vm7 = vcmp.eq.s32.totalorder %v546_v1, 0  ;;  %vm744_vm8 = vcmp.eq.s32.totalorder %v544_v59, 1  ;;  %v1900_v38 = vpack.c.bf16 %v1847_v35, %v1845_v10  ;;  %v680_v31 = vsel %vm608_vm12, %v4744_v62, 0.0 }
 0x152   : > { %v682_v6 = vsel %vm610_vm7, %v4744_v62, 0.0  ;;  %vm746_vm9 = vcmp.eq.s32.totalorder %v546_v1, 1  ;;  %v816_v34 = vsel %vm744_vm8, %v4774_v7, %v680_v31  ;;  %vm880_vm10 = vcmp.eq.s32.totalorder %v544_v59, 16 }
 0x153   : > { %v818_v29 = vsel %vm746_vm9, %v4774_v7, %v682_v6  ;;  %vm882_vm13 = vcmp.eq.s32.totalorder %v546_v1, 16  ;;  %1953 = vmatpush1.bf16.msra.mxu1 %v1900_v38  ;;  %v952_v53 = vsel %vm880_vm10, %v4797_v26, %v816_v34  ;;  %vm1016_vm14 = vcmp.eq.s32.totalorder %v544_v59, 17 }
 0x154   : > { %v954_v51 = vsel %vm882_vm13, %v4797_v26, %v818_v29  ;;  %vm1018_vm15 = vcmp.eq.s32.totalorder %v546_v1, 17  ;;  %v1088_v55 = vsel %vm1016_vm14, %v4819_v43, %v952_v53  ;;  %vm1370_vm1 = vcmp.eq.s32.totalorder %v1306_v41, 0 }
 0x155   : > { %v1090_v27 = vsel %vm1018_vm15, %v4819_v43, %v954_v51  ;;  %vm1372_vm3 = vcmp.eq.s32.totalorder %v1308_v40, 0  ;;  %v1442_v10 = vsel %vm1370_vm1, %v4748_v63, 0.0  ;;  %vm1506_vm2 = vcmp.eq.s32.totalorder %v1306_v41, 1 }
 0x156   : > { %v1140_v37 = vpack.c.bf16 %v1090_v27, %v1088_v55  ;;  %v1444_v18 = vsel %vm1372_vm3, %v4748_v63, 0.0  ;;  %vm1508_vm5 = vcmp.eq.s32.totalorder %v1308_v40, 1  ;;  %v1578_v35 = vsel %vm1506_vm2, %v4778_v9, %v1442_v10 }
 0x157   : > { %vm1642_vm0 = vcmp.eq.s32.totalorder %v1306_v41, 16  ;;  %vm1644_vm4 = vcmp.eq.s32.totalorder %v1308_v40, 16  ;;  %v1580_v59 = vsel %vm1508_vm5, %v4778_v9, %v1444_v18  ;;  %vm1778_vm6 = vcmp.eq.s32.totalorder %v1306_v41, 17 }
 0x158   : > { %1191 = vmatprep.subr.bf16.mxu0 %v1140_v37  ;;  %v1714_v1 = vsel %vm1642_vm0, %v4803_v33, %v1578_v35  ;;  %vm1780_vm11 = vcmp.eq.s32.totalorder %v1308_v40, 17  ;;  %v1716_v38 = vsel %vm1644_vm4, %v4803_v33, %v1580_v59  ;;  %v545_v6 = vsub.s32 %v5310_v30, %v4945_v57 }
 0x159   : > { %v1850_v31 = vsel %vm1778_vm6, %v4843_v56, %v1714_v1  ;;  %vm607_vm12 = vcmp.eq.s32.totalorder %v543_v52, 0  ;;  %v1852_v34 = vsel %vm1780_vm11, %v4843_v56, %v1716_v38  ;;  %vm743_vm7 = vcmp.eq.s32.totalorder %v543_v52, 1 }
 0x15a   : > { %v679_v29 = vsel %vm607_vm12, %v4889_v54, 0.0  ;;  %vm879_vm8 = vcmp.eq.s32.totalorder %v543_v52, 16  ;;  %v1903_v53 = vpack.c.bf16 %v1852_v34, %v1850_v31  ;;  %vm609_vm9 = vcmp.eq.s32.totalorder %v545_v6, 0 }
 0x15b   : > { %vm745_vm10 = vcmp.eq.s32.totalorder %v545_v6, 1  ;;  %v815_v41 = vsel %vm743_vm7, %v4949_v47, %v679_v29  ;;  %v681_v40 = vsel %vm609_vm9, %v4889_v54, 0.0  ;;  %vm881_vm13 = vcmp.eq.s32.totalorder %v545_v6, 16 }
 0x15c   : > { %v951_v51 = vsel %vm879_vm8, %v4934_v45, %v815_v41  ;;  %vm1015_vm14 = vcmp.eq.s32.totalorder %v543_v52, 17  ;;  %1954 = vmatprep.subr.bf16.mxu1 %v1903_v53  ;;  %v817_v55 = vsel %vm745_vm10, %v4949_v47, %v681_v40  ;;  %vm1017_vm15 = vcmp.eq.s32.totalorder %v545_v6, 17 }
 0x15d   : > { %v1087_v27 = vsel %vm1015_vm14, %v4970_v0, %v951_v51  ;;  %v1305_v37 = vsub.s32 %v5307_v19, %v4953_v48  ;;  %v953_v10 = vsel %vm881_vm13, %v4934_v45, %v817_v55  ;;  %v1307_v18 = vsub.s32 %v5310_v30, %v4953_v48 }
 0x15e   : > { %v5409_v35 = vadd.s32 152, %v4633_v5  ;;  %v548_v52 = vsub.s32 %v5313_v11, %v4764_v3  ;;  %v1089_v59 = vsel %vm1017_vm15, %v4970_v0, %v953_v10 }
 0x15f   : > { %vm1369_vm1 = vcmp.eq.s32.totalorder %v1305_v37, 0  ;;  %vm1505_vm3 = vcmp.eq.s32.totalorder %v1305_v37, 1  ;;  %vm1641_vm2 = vcmp.eq.s32.totalorder %v1305_v37, 16  ;;  %v1139_v1 = vpack.c.bf16 %v1089_v59, %v1087_v27 }
 0x160   : > { %7086 = vst [vmem:[#allocation27_spill] sm:$0xff] %v5409_v35  ;;  %vm1371_vm5 = vcmp.eq.s32.totalorder %v1307_v18, 0  ;;  %v1441_v38 = vsel %vm1369_vm1, %v4893_v61, 0.0  ;;  %vm1507_vm0 = vcmp.eq.s32.totalorder %v1307_v18, 1  ;;  %vm1643_vm4 = vcmp.eq.s32.totalorder %v1307_v18, 16 }
 0x161   : > { %v1443_v31 = vsel %vm1371_vm5, %v4893_v61, 0.0  ;;  %v1577_v6 = vsel %vm1505_vm3, %v4957_v49, %v1441_v38  ;;  %vm1777_vm6 = vcmp.eq.s32.totalorder %v1305_v37, 17  ;;  %1192 = vmatpush1.bf16.msra.mxu0 %v1139_v1  ;;  %vm1779_vm11 = vcmp.eq.s32.totalorder %v1307_v18, 17 }
 0x162   : > { %v1579_v34 = vsel %vm1507_vm0, %v4957_v49, %v1443_v31  ;;  %v1713_v29 = vsel %vm1641_vm2, %v4938_v46, %v1577_v6  ;;  %v550_v53 = vsub.s32 %v5409_v35, %v4764_v3  ;;  %vm612_vm12 = vcmp.eq.s32.totalorder %v548_v52, 0 }
 0x163   : > { %v1715_v41 = vsel %vm1643_vm4, %v4938_v46, %v1579_v34  ;;  %v1849_v40 = vsel %vm1777_vm6, %v4978_v12, %v1713_v29  ;;  %vm748_vm7 = vcmp.eq.s32.totalorder %v548_v52, 1  ;;  %v684_v55 = vsel %vm612_vm12, %v4744_v62, 0.0 }
 0x164   : > { %v1851_v51 = vsel %vm1779_vm11, %v4978_v12, %v1715_v41  ;;  %vm614_vm8 = vcmp.eq.s32.totalorder %v550_v53, 0  ;;  %vm750_vm9 = vcmp.eq.s32.totalorder %v550_v53, 1  ;;  %v820_v10 = vsel %vm748_vm7, %v4774_v7, %v684_v55 }
 0x165   : > { %v1902_v27 = vpack.c.bf16 %v1851_v51, %v1849_v40  ;;  %v686_v37 = vsel %vm614_vm8, %v4744_v62, 0.0  ;;  %vm884_vm10 = vcmp.eq.s32.totalorder %v548_v52, 16  ;;  %vm886_vm13 = vcmp.eq.s32.totalorder %v550_v53, 16 }
 0x166   : > { %v822_v18 = vsel %vm750_vm9, %v4774_v7, %v686_v37  ;;  %v956_v59 = vsel %vm884_vm10, %v4797_v26, %v820_v10  ;;  %vm1020_vm14 = vcmp.eq.s32.totalorder %v548_v52, 17  ;;  %vm1022_vm15 = vcmp.eq.s32.totalorder %v550_v53, 17 }
 0x167   : > { %1955 = vmatpush1.bf16.msra.mxu1 %v1902_v27  ;;  %v958_v1 = vsel %vm886_vm13, %v4797_v26, %v822_v18  ;;  %v1092_v38 = vsel %vm1020_vm14, %v4819_v43, %v956_v59  ;;  %v1310_v31 = vsub.s32 %v5313_v11, %v4768_v4  ;;  %v1312_v34 = vsub.s32 %v5409_v35, %v4768_v4 }
 0x168   : > { %v1094_v6 = vsel %vm1022_vm15, %v4819_v43, %v958_v1  ;;  %v547_v29 = vsub.s32 %v5313_v11, %v4945_v57  ;;  %v549_v52 = vsub.s32 %v5409_v35, %v4945_v57 }
 0x169   : > { %v1142_v41 = vpack.c.bf16 %v1094_v6, %v1092_v38  ;;  %vm1374_vm1 = vcmp.eq.s32.totalorder %v1310_v31, 0  ;;  %vm1510_vm3 = vcmp.eq.s32.totalorder %v1310_v31, 1  ;;  %vm1646_vm2 = vcmp.eq.s32.totalorder %v1310_v31, 16 }
 0x16a   : > { %vm1376_vm5 = vcmp.eq.s32.totalorder %v1312_v34, 0  ;;  %v1446_v53 = vsel %vm1374_vm1, %v4748_v63, 0.0  ;;  %vm1512_vm0 = vcmp.eq.s32.totalorder %v1312_v34, 1  ;;  %vm1648_vm4 = vcmp.eq.s32.totalorder %v1312_v34, 16 }
 0x16b   : > { %1193 = vmatprep.subr.bf16.mxu0 %v1142_v41  ;;  %v1448_v40 = vsel %vm1376_vm5, %v4748_v63, 0.0  ;;  %v1582_v51 = vsel %vm1510_vm3, %v4778_v9, %v1446_v53  ;;  %vm1782_vm6 = vcmp.eq.s32.totalorder %v1310_v31, 17  ;;  %vm1784_vm11 = vcmp.eq.s32.totalorder %v1312_v34, 17  ;;  %v4140_v34 = vld [vmem:[%s4613_s29 + $0x4] ss:$8 sps:$4 sm:$0xff]  }
 0x16c   : > { %v1584_v55 = vsel %vm1512_vm0, %v4778_v9, %v1448_v40  ;;  %v1718_v27 = vsel %vm1646_vm2, %v4803_v33, %v1582_v51  ;;  %vm611_vm12 = vcmp.eq.s32.totalorder %v547_v29, 0  ;;  %vm613_vm7 = vcmp.eq.s32.totalorder %v549_v52, 0  ;;  %v4143_v40 = vld [vmem:[%s4613_s29 + $0x24] ss:$8 sps:$4 sm:$0xff]   ;;  %1207 = vmatprep.mubr.bf16.mxu0 %v4140_v34 }
 0x16d   : > { %v1720_v37 = vsel %vm1648_vm4, %v4803_v33, %v1584_v55  ;;  %v1854_v10 = vsel %vm1782_vm6, %v4843_v56, %v1718_v27  ;;  %v683_v18 = vsel %vm611_vm12, %v4889_v54, 0.0  ;;  %v685_v59 = vsel %vm613_vm7, %v4889_v54, 0.0  ;;  %1970 = vmatprep.mubr.bf16.mxu1 %v4143_v40 }
 0x16e   : > { %v1856_v1 = vsel %vm1784_vm11, %v4843_v56, %v1720_v37  ;;  %vm747_vm8 = vcmp.eq.s32.totalorder %v547_v29, 1  ;;  %vm749_vm9 = vcmp.eq.s32.totalorder %v549_v52, 1  ;;  %vm883_vm10 = vcmp.eq.s32.totalorder %v547_v29, 16 }
 0x16f   : > { %v1905_v38 = vpack.c.bf16 %v1856_v1, %v1854_v10  ;;  %v819_v31 = vsel %vm747_vm8, %v4949_v47, %v683_v18  ;;  %v821_v6 = vsel %vm749_vm9, %v4949_v47, %v685_v59  ;;  %vm885_vm13 = vcmp.eq.s32.totalorder %v549_v52, 16 }
 0x170   : > { %v955_v41 = vsel %vm883_vm10, %v4934_v45, %v819_v31  ;;  %v957_v53 = vsel %vm885_vm13, %v4934_v45, %v821_v6  ;;  %vm1019_vm14 = vcmp.eq.s32.totalorder %v547_v29, 17  ;;  %vm1021_vm15 = vcmp.eq.s32.totalorder %v549_v52, 17 }
 0x171   : > { %1956 = vmatprep.subr.bf16.mxu1 %v1905_v38  ;;  %v1091_v51 = vsel %vm1019_vm14, %v4970_v0, %v955_v41  ;;  %v1093_v55 = vsel %vm1021_vm15, %v4970_v0, %v957_v53  ;;  %v1309_v27 = vsub.s32 %v5313_v11, %v4953_v48  ;;  %v1311_v37 = vsub.s32 %v5409_v35, %v4953_v48 }
 0x172   : > { %v1141_v10 = vpack.c.bf16 %v1093_v55, %v1091_v51  ;;  %v5463_v18 = vadd.s32 160, %v4633_v5  ;;  %v5466_v59 = vadd.s32 168, %v4633_v5  ;;  %v5469_v29 = vadd.s32 176, %v4633_v5 }
 0x173   : > { %vm1373_vm1 = vcmp.eq.s32.totalorder %v1309_v27, 0  ;;  %vm1375_vm3 = vcmp.eq.s32.totalorder %v1311_v37, 0  ;;  %vm1509_vm2 = vcmp.eq.s32.totalorder %v1309_v27, 1  ;;  %vm1511_vm5 = vcmp.eq.s32.totalorder %v1311_v37, 1 }
 0x174   : > { %7087 = vst [vmem:[#allocation28_spill] sm:$0xff] %v5463_v18  ;;  %7088 = vst [vmem:[#allocation29_spill] sm:$0xff] %v5466_v59  ;;  %1194 = vmatpush1.bf16.msra.mxu0 %v1141_v10  ;;  %v1445_v52 = vsel %vm1373_vm1, %v4893_v61, 0.0  ;;  %v1447_v1 = vsel %vm1375_vm3, %v4893_v61, 0.0  ;;  %vm1645_vm0 = vcmp.eq.s32.totalorder %v1309_v27, 16  ;;  %vm1647_vm4 = vcmp.eq.s32.totalorder %v1311_v37, 16 }
 0x175   : > { %7089 = vst [vmem:[#allocation30_spill] sm:$0xff] %v5469_v29  ;;  %v1581_v38 = vsel %vm1509_vm2, %v4957_v49, %v1445_v52  ;;  %v1583_v31 = vsel %vm1511_vm5, %v4957_v49, %v1447_v1  ;;  %vm1781_vm6 = vcmp.eq.s32.totalorder %v1309_v27, 17  ;;  %vm1783_vm11 = vcmp.eq.s32.totalorder %v1311_v37, 17 }
 0x176   : > { %v1717_v6 = vsel %vm1645_vm0, %v4938_v46, %v1581_v38  ;;  %v1719_v34 = vsel %vm1647_vm4, %v4938_v46, %v1583_v31  ;;  %v552_v41 = vsub.s32 %v5463_v18, %v4764_v3  ;;  %v554_v53 = vsub.s32 %v5466_v59, %v4764_v3 }
 0x177   : > { %v1853_v40 = vsel %vm1781_vm6, %v4978_v12, %v1717_v6  ;;  %v1855_v51 = vsel %vm1783_vm11, %v4978_v12, %v1719_v34  ;;  %v1314_v55 = vsub.s32 %v5463_v18, %v4768_v4  ;;  %v1316_v27 = vsub.s32 %v5466_v59, %v4768_v4 }
 0x178   : > { %v1904_v37 = vpack.c.bf16 %v1855_v51, %v1853_v40  ;;  %vm616_vm12 = vcmp.eq.s32.totalorder %v552_v41, 0  ;;  %vm618_vm7 = vcmp.eq.s32.totalorder %v554_v53, 0  ;;  %vm752_vm8 = vcmp.eq.s32.totalorder %v552_v41, 1 }
 0x179   : > { %v688_v10 = vsel %vm616_vm12, %v4744_v62, 0.0  ;;  %v690_v52 = vsel %vm618_vm7, %v4744_v62, 0.0  ;;  %vm754_vm9 = vcmp.eq.s32.totalorder %v554_v53, 1  ;;  %vm888_vm10 = vcmp.eq.s32.totalorder %v552_v41, 16 }
 0x17a   : > { %1957 = vmatpush1.bf16.msra.mxu1 %v1904_v37  ;;  %v824_v1 = vsel %vm752_vm8, %v4774_v7, %v688_v10  ;;  %v826_v38 = vsel %vm754_vm9, %v4774_v7, %v690_v52  ;;  %vm890_vm13 = vcmp.eq.s32.totalorder %v554_v53, 16  ;;  %vm1024_vm14 = vcmp.eq.s32.totalorder %v552_v41, 17 }
 0x17b   : > { %v960_v31 = vsel %vm888_vm10, %v4797_v26, %v824_v1  ;;  %v962_v6 = vsel %vm890_vm13, %v4797_v26, %v826_v38  ;;  %vm1026_vm15 = vcmp.eq.s32.totalorder %v554_v53, 17  ;;  %vm1378_vm1 = vcmp.eq.s32.totalorder %v1314_v55, 0 }
 0x17c   : > { %v1096_v34 = vsel %vm1024_vm14, %v4819_v43, %v960_v31  ;;  %v1098_v40 = vsel %vm1026_vm15, %v4819_v43, %v962_v6  ;;  %vm1380_vm3 = vcmp.eq.s32.totalorder %v1316_v27, 0  ;;  %v1450_v51 = vsel %vm1378_vm1, %v4748_v63, 0.0 }
 0x17d   : > { %v1144_v37 = vpack.c.bf16 %v1098_v40, %v1096_v34  ;;  %v1452_v10 = vsel %vm1380_vm3, %v4748_v63, 0.0  ;;  %vm1514_vm2 = vcmp.eq.s32.totalorder %v1314_v55, 1  ;;  %vm1516_vm5 = vcmp.eq.s32.totalorder %v1316_v27, 1 }
 0x17e   : > { %v1586_v41 = vsel %vm1514_vm2, %v4778_v9, %v1450_v51  ;;  %v1588_v52 = vsel %vm1516_vm5, %v4778_v9, %v1452_v10  ;;  %vm1650_vm0 = vcmp.eq.s32.totalorder %v1314_v55, 16  ;;  %vm1652_vm4 = vcmp.eq.s32.totalorder %v1316_v27, 16 }
 0x17f   : > { %1195 = vmatprep.subr.bf16.mxu0 %v1144_v37  ;;  %v1722_v53 = vsel %vm1650_vm0, %v4803_v33, %v1586_v41  ;;  %v1724_v1 = vsel %vm1652_vm4, %v4803_v33, %v1588_v52  ;;  %vm1786_vm6 = vcmp.eq.s32.totalorder %v1314_v55, 17  ;;  %vm1788_vm11 = vcmp.eq.s32.totalorder %v1316_v27, 17 }
 0x180   : > { %v1858_v38 = vsel %vm1786_vm6, %v4843_v56, %v1722_v53  ;;  %v1860_v31 = vsel %vm1788_vm11, %v4843_v56, %v1724_v1  ;;  %v551_v6 = vsub.s32 %v5463_v18, %v4945_v57  ;;  %v553_v34 = vsub.s32 %v5466_v59, %v4945_v57 }
 0x181   : > { %v1907_v40 = vpack.c.bf16 %v1860_v31, %v1858_v38  ;;  %v1313_v51 = vsub.s32 %v5463_v18, %v4953_v48  ;;  %v1315_v37 = vsub.s32 %v5466_v59, %v4953_v48  ;;  %v5512_v55 = vadd.s32 184, %v4633_v5 }
 0x182   : > { %vm615_vm12 = vcmp.eq.s32.totalorder %v551_v6, 0  ;;  %vm617_vm7 = vcmp.eq.s32.totalorder %v553_v34, 0  ;;  %vm751_vm8 = vcmp.eq.s32.totalorder %v551_v6, 1  ;;  %vm753_vm9 = vcmp.eq.s32.totalorder %v553_v34, 1 }
 0x183   : > { %7090 = vst [vmem:[#allocation31_spill] sm:$0xff] %v5512_v55  ;;  %1958 = vmatprep.subr.bf16.mxu1 %v1907_v40  ;;  %v687_v27 = vsel %vm615_vm12, %v4889_v54, 0.0  ;;  %v689_v10 = vsel %vm617_vm7, %v4889_v54, 0.0  ;;  %vm887_vm10 = vcmp.eq.s32.totalorder %v551_v6, 16  ;;  %vm889_vm13 = vcmp.eq.s32.totalorder %v553_v34, 16 }
 0x184   : > { %v823_v41 = vsel %vm751_vm8, %v4949_v47, %v687_v27  ;;  %v825_v52 = vsel %vm753_vm9, %v4949_v47, %v689_v10  ;;  %vm1023_vm14 = vcmp.eq.s32.totalorder %v551_v6, 17  ;;  %vm1025_vm15 = vcmp.eq.s32.totalorder %v553_v34, 17 }
 0x185   : > { %v959_v53 = vsel %vm887_vm10, %v4934_v45, %v823_v41  ;;  %v961_v1 = vsel %vm889_vm13, %v4934_v45, %v825_v52  ;;  %vm1377_vm1 = vcmp.eq.s32.totalorder %v1313_v51, 0  ;;  %vm1379_vm3 = vcmp.eq.s32.totalorder %v1315_v37, 0 }
 0x186   : > { %v1095_v38 = vsel %vm1023_vm14, %v4970_v0, %v959_v53  ;;  %v1097_v31 = vsel %vm1025_vm15, %v4970_v0, %v961_v1  ;;  %v1449_v40 = vsel %vm1377_vm1, %v4893_v61, 0.0  ;;  %v1451_v59 = vsel %vm1379_vm3, %v4893_v61, 0.0 }
 0x187   : > { %v1143_v18 = vpack.c.bf16 %v1097_v31, %v1095_v38  ;;  %vm1513_vm2 = vcmp.eq.s32.totalorder %v1313_v51, 1  ;;  %vm1515_vm5 = vcmp.eq.s32.totalorder %v1315_v37, 1  ;;  %vm1649_vm0 = vcmp.eq.s32.totalorder %v1313_v51, 16 }
 0x188   : > { %v1585_v6 = vsel %vm1513_vm2, %v4957_v49, %v1449_v40  ;;  %v1587_v34 = vsel %vm1515_vm5, %v4957_v49, %v1451_v59  ;;  %vm1651_vm4 = vcmp.eq.s32.totalorder %v1315_v37, 16  ;;  %vm1785_vm6 = vcmp.eq.s32.totalorder %v1313_v51, 17 }
 0x189   : > { %1196 = vmatpush1.bf16.msra.mxu0 %v1143_v18  ;;  %v1721_v27 = vsel %vm1649_vm0, %v4938_v46, %v1585_v6  ;;  %v1723_v10 = vsel %vm1651_vm4, %v4938_v46, %v1587_v34  ;;  %vm1787_vm11 = vcmp.eq.s32.totalorder %v1315_v37, 17  ;;  %v556_v41 = vsub.s32 %v5469_v29, %v4764_v3 }
 0x18a   : > { %v1857_v52 = vsel %vm1785_vm6, %v4978_v12, %v1721_v27  ;;  %v1859_v53 = vsel %vm1787_vm11, %v4978_v12, %v1723_v10  ;;  %v558_v1 = vsub.s32 %v5512_v55, %v4764_v3  ;;  %v1318_v59 = vsub.s32 %v5469_v29, %v4768_v4 }
 0x18b   : > { %v1906_v51 = vpack.c.bf16 %v1859_v53, %v1857_v52  ;;  %vm620_vm12 = vcmp.eq.s32.totalorder %v556_v41, 0  ;;  %vm756_vm7 = vcmp.eq.s32.totalorder %v556_v41, 1  ;;  %vm892_vm8 = vcmp.eq.s32.totalorder %v556_v41, 16 }
 0x18c   : > { %vm622_vm9 = vcmp.eq.s32.totalorder %v558_v1, 0  ;;  %v692_v18 = vsel %vm620_vm12, %v4744_v62, 0.0  ;;  %vm758_vm10 = vcmp.eq.s32.totalorder %v558_v1, 1  ;;  %vm894_vm13 = vcmp.eq.s32.totalorder %v558_v1, 16 }
 0x18d   : > { %1959 = vmatpush1.bf16.msra.mxu1 %v1906_v51  ;;  %v694_v37 = vsel %vm622_vm9, %v4744_v62, 0.0  ;;  %v828_v38 = vsel %vm756_vm7, %v4774_v7, %v692_v18  ;;  %vm1028_vm14 = vcmp.eq.s32.totalorder %v556_v41, 17  ;;  %vm1030_vm15 = vcmp.eq.s32.totalorder %v558_v1, 17 }
 0x18e   : > { %v830_v31 = vsel %vm758_vm10, %v4774_v7, %v694_v37  ;;  %v964_v40 = vsel %vm892_vm8, %v4797_v26, %v828_v38  ;;  %v1320_v6 = vsub.s32 %v5512_v55, %v4768_v4  ;;  %vm1382_vm1 = vcmp.eq.s32.totalorder %v1318_v59, 0 }
 0x18f   : > { %v966_v34 = vsel %vm894_vm13, %v4797_v26, %v830_v31  ;;  %v1100_v27 = vsel %vm1028_vm14, %v4819_v43, %v964_v40  ;;  %v1454_v10 = vsel %vm1382_vm1, %v4748_v63, 0.0  ;;  %vm1518_vm3 = vcmp.eq.s32.totalorder %v1318_v59, 1 }
 0x190   : > { %v1102_v52 = vsel %vm1030_vm15, %v4819_v43, %v966_v34  ;;  %vm1384_vm2 = vcmp.eq.s32.totalorder %v1320_v6, 0  ;;  %vm1520_vm5 = vcmp.eq.s32.totalorder %v1320_v6, 1  ;;  %v1590_v41 = vsel %vm1518_vm3, %v4778_v9, %v1454_v10 }
 0x191   : > { %v1146_v53 = vpack.c.bf16 %v1102_v52, %v1100_v27  ;;  %v1456_v1 = vsel %vm1384_vm2, %v4748_v63, 0.0  ;;  %vm1654_vm0 = vcmp.eq.s32.totalorder %v1318_v59, 16  ;;  %vm1656_vm4 = vcmp.eq.s32.totalorder %v1320_v6, 16 }
 0x192   : > { %v1592_v51 = vsel %vm1520_vm5, %v4778_v9, %v1456_v1  ;;  %v1726_v18 = vsel %vm1654_vm0, %v4803_v33, %v1590_v41  ;;  %vm1790_vm6 = vcmp.eq.s32.totalorder %v1318_v59, 17  ;;  %vm1792_vm11 = vcmp.eq.s32.totalorder %v1320_v6, 17 }
 0x193   : > { %1197 = vmatprep.subr.bf16.mxu0 %v1146_v53  ;;  %v1728_v37 = vsel %vm1656_vm4, %v4803_v33, %v1592_v51  ;;  %v1862_v38 = vsel %vm1790_vm6, %v4843_v56, %v1726_v18  ;;  %v555_v31 = vsub.s32 %v5469_v29, %v4945_v57  ;;  %v557_v40 = vsub.s32 %v5512_v55, %v4945_v57 }
 0x194   : > { %v1864_v34 = vsel %vm1792_vm11, %v4843_v56, %v1728_v37  ;;  %v1317_v27 = vsub.s32 %v5469_v29, %v4953_v48  ;;  %v1319_v59 = vsub.s32 %v5512_v55, %v4953_v48  ;;  %v5563_v6 = vadd.s32 192, %v4633_v5 }
 0x195   : > { %v1909_v10 = vpack.c.bf16 %v1864_v34, %v1862_v38  ;;  %vm619_vm12 = vcmp.eq.s32.totalorder %v555_v31, 0  ;;  %vm621_vm7 = vcmp.eq.s32.totalorder %v557_v40, 0  ;;  %vm755_vm8 = vcmp.eq.s32.totalorder %v555_v31, 1 }
 0x196   : > { %7091 = vst [vmem:[#allocation32_spill] sm:$0xff] %v5563_v6  ;;  %v691_v52 = vsel %vm619_vm12, %v4889_v54, 0.0  ;;  %v693_v41 = vsel %vm621_vm7, %v4889_v54, 0.0  ;;  %vm757_vm9 = vcmp.eq.s32.totalorder %v557_v40, 1  ;;  %vm891_vm10 = vcmp.eq.s32.totalorder %v555_v31, 16 }
 0x197   : > { %1960 = vmatprep.subr.bf16.mxu1 %v1909_v10  ;;  %v827_v53 = vsel %vm755_vm8, %v4949_v47, %v691_v52  ;;  %v829_v1 = vsel %vm757_vm9, %v4949_v47, %v693_v41  ;;  %vm893_vm13 = vcmp.eq.s32.totalorder %v557_v40, 16  ;;  %vm1027_vm14 = vcmp.eq.s32.totalorder %v555_v31, 17 }
 0x198   : > { %v963_v51 = vsel %vm891_vm10, %v4934_v45, %v827_v53  ;;  %v965_v18 = vsel %vm893_vm13, %v4934_v45, %v829_v1  ;;  %vm1029_vm15 = vcmp.eq.s32.totalorder %v557_v40, 17  ;;  %vm1381_vm1 = vcmp.eq.s32.totalorder %v1317_v27, 0 }
 0x199   : > { %v1099_v37 = vsel %vm1027_vm14, %v4970_v0, %v963_v51  ;;  %v1101_v38 = vsel %vm1029_vm15, %v4970_v0, %v965_v18  ;;  %vm1383_vm3 = vcmp.eq.s32.totalorder %v1319_v59, 0  ;;  %v1453_v34 = vsel %vm1381_vm1, %v4893_v61, 0.0 }
 0x19a   : > { %v1145_v10 = vpack.c.bf16 %v1101_v38, %v1099_v37  ;;  %v1455_v52 = vsel %vm1383_vm3, %v4893_v61, 0.0  ;;  %vm1517_vm2 = vcmp.eq.s32.totalorder %v1317_v27, 1  ;;  %vm1519_vm5 = vcmp.eq.s32.totalorder %v1319_v59, 1 }
 0x19b   : > { %v1589_v31 = vsel %vm1517_vm2, %v4957_v49, %v1453_v34  ;;  %v1591_v41 = vsel %vm1519_vm5, %v4957_v49, %v1455_v52  ;;  %vm1653_vm0 = vcmp.eq.s32.totalorder %v1317_v27, 16  ;;  %vm1655_vm4 = vcmp.eq.s32.totalorder %v1319_v59, 16 }
 0x19c   : > { %1198 = vmatpush1.bf16.msra.mxu0 %v1145_v10  ;;  %v1725_v40 = vsel %vm1653_vm0, %v4938_v46, %v1589_v31  ;;  %v1727_v53 = vsel %vm1655_vm4, %v4938_v46, %v1591_v41  ;;  %vm1789_vm6 = vcmp.eq.s32.totalorder %v1317_v27, 17  ;;  %vm1791_vm11 = vcmp.eq.s32.totalorder %v1319_v59, 17 }
 0x19d   : > { %v1861_v1 = vsel %vm1789_vm6, %v4978_v12, %v1725_v40  ;;  %v1863_v51 = vsel %vm1791_vm11, %v4978_v12, %v1727_v53  ;;  %v5582_v18 = vadd.s32 200, %v4633_v5  ;;  %v560_v37 = vsub.s32 %v5563_v6, %v4764_v3 }
 0x19e   : > { %v1908_v38 = vpack.c.bf16 %v1863_v51, %v1861_v1  ;;  %v1322_v34 = vsub.s32 %v5563_v6, %v4768_v4  ;;  %v559_v10 = vsub.s32 %v5563_v6, %v4945_v57  ;;  %v5592_v27 = vsub.s32 %v5563_v6, %v4953_v48 }
 0x19f   : > { %7092 = vst [vmem:[#allocation33_spill] sm:$0xff] %v5582_v18  ;;  %v562_v59 = vsub.s32 %v5582_v18, %v4764_v3  ;;  %vm624_vm12 = vcmp.eq.s32.totalorder %v560_v37, 0  ;;  %vm760_vm7 = vcmp.eq.s32.totalorder %v560_v37, 1  ;;  %vm896_vm8 = vcmp.eq.s32.totalorder %v560_v37, 16 }
 0x1a0   : > { %1961 = vmatpush1.bf16.msra.mxu1 %v1908_v38  ;;  %v696_v52 = vsel %vm624_vm12, %v4744_v62, 0.0  ;;  %vm1032_vm9 = vcmp.eq.s32.totalorder %v560_v37, 17  ;;  %v1324_v31 = vsub.s32 %v5582_v18, %v4768_v4  ;;  %vm1386_vm10 = vcmp.eq.s32.totalorder %v1322_v34, 0 }
 0x1a1   : > { %vm626_vm13 = vcmp.eq.s32.totalorder %v562_v59, 0  ;;  %vm762_vm14 = vcmp.eq.s32.totalorder %v562_v59, 1  ;;  %v832_v41 = vsel %vm760_vm7, %v4774_v7, %v696_v52  ;;  %vm898_vm15 = vcmp.eq.s32.totalorder %v562_v59, 16 }
 0x1a2   : > { %v698_v40 = vsel %vm626_vm13, %v4744_v62, 0.0  ;;  %v968_v53 = vsel %vm896_vm8, %v4797_v26, %v832_v41  ;;  %vm1034_vm1 = vcmp.eq.s32.totalorder %v562_v59, 17  ;;  %vm1388_vm3 = vcmp.eq.s32.totalorder %v1324_v31, 0 }
 0x1a3   : > { %v834_v1 = vsel %vm762_vm14, %v4774_v7, %v698_v40  ;;  %v1104_v51 = vsel %vm1032_vm9, %v4819_v43, %v968_v53  ;;  %v1458_v37 = vsel %vm1386_vm10, %v4748_v63, 0.0  ;;  %v1460_v38 = vsel %vm1388_vm3, %v4748_v63, 0.0 }
 0x1a4   : > { %v970_v6 = vsel %vm898_vm15, %v4797_v26, %v834_v1  ;;  %vm1522_vm2 = vcmp.eq.s32.totalorder %v1322_v34, 1  ;;  %vm1524_vm5 = vcmp.eq.s32.totalorder %v1324_v31, 1  ;;  %vm1658_vm0 = vcmp.eq.s32.totalorder %v1322_v34, 16 }
 0x1a5   : > { %v1106_v52 = vsel %vm1034_vm1, %v4819_v43, %v970_v6  ;;  %v1594_v55 = vsel %vm1522_vm2, %v4778_v9, %v1458_v37  ;;  %v1596_v59 = vsel %vm1524_vm5, %v4778_v9, %v1460_v38  ;;  %vm1660_vm4 = vcmp.eq.s32.totalorder %v1324_v31, 16 }
 0x1a6   : > { %v1148_v41 = vpack.c.bf16 %v1106_v52, %v1104_v51  ;;  %v1730_v40 = vsel %vm1658_vm0, %v4803_v33, %v1594_v55  ;;  %v1732_v53 = vsel %vm1660_vm4, %v4803_v33, %v1596_v59  ;;  %vm1794_vm6 = vcmp.eq.s32.totalorder %v1322_v34, 17 }
 0x1a7   : > { %vm1796_vm11 = vcmp.eq.s32.totalorder %v1324_v31, 17  ;;  %v1866_v29 = vsel %vm1794_vm6, %v4843_v56, %v1730_v40  ;;  %v561_v1 = vsub.s32 %v5582_v18, %v4945_v57  ;;  %vm623_vm12 = vcmp.eq.s32.totalorder %v559_v10, 0 }
 0x1a8   : > { %1199 = vmatprep.subr.bf16.mxu0 %v1148_v41  ;;  %v1868_v6 = vsel %vm1796_vm11, %v4843_v56, %v1732_v53  ;;  %v695_v37 = vsel %vm623_vm12, %v4889_v54, 0.0  ;;  %vm759_vm7 = vcmp.eq.s32.totalorder %v559_v10, 1  ;;  %vm895_vm8 = vcmp.eq.s32.totalorder %v559_v10, 16 }
 0x1a9   : > { %v1911_v51 = vpack.c.bf16 %v1868_v6, %v1866_v29  ;;  %vm625_vm9 = vcmp.eq.s32.totalorder %v561_v1, 0  ;;  %vm761_vm10 = vcmp.eq.s32.totalorder %v561_v1, 1  ;;  %v831_v55 = vsel %vm759_vm7, %v4949_v47, %v695_v37 }
 0x1aa   : > { %v697_v34 = vsel %vm625_vm9, %v4889_v54, 0.0  ;;  %vm897_vm13 = vcmp.eq.s32.totalorder %v561_v1, 16  ;;  %v967_v31 = vsel %vm895_vm8, %v4934_v45, %v831_v55  ;;  %vm1031_vm14 = vcmp.eq.s32.totalorder %v559_v10, 17 }
 0x1ab   : > { %1962 = vmatprep.subr.bf16.mxu1 %v1911_v51  ;;  %v833_v38 = vsel %vm761_vm10, %v4949_v47, %v697_v34  ;;  %vm1033_vm15 = vcmp.eq.s32.totalorder %v561_v1, 17  ;;  %v1103_v52 = vsel %vm1031_vm14, %v4970_v0, %v967_v31  ;;  %v1323_v59 = vsub.s32 %v5582_v18, %v4953_v48 }
 0x1ac   : > { %v969_v29 = vsel %vm897_vm13, %v4934_v45, %v833_v38  ;;  %vm1385_vm1 = vcmp.eq.s32.totalorder %v5592_v27, 0  ;;  %vm1521_vm3 = vcmp.eq.s32.totalorder %v5592_v27, 1  ;;  %vm1657_vm2 = vcmp.eq.s32.totalorder %v5592_v27, 16 }
 0x1ad   : > { %v1105_v41 = vsel %vm1033_vm15, %v4970_v0, %v969_v29  ;;  %vm1387_vm5 = vcmp.eq.s32.totalorder %v1323_v59, 0  ;;  %v1457_v10 = vsel %vm1385_vm1, %v4893_v61, 0.0  ;;  %vm1523_vm0 = vcmp.eq.s32.totalorder %v1323_v59, 1 }
 0x1ae   : > { %v1147_v40 = vpack.c.bf16 %v1105_v41, %v1103_v52  ;;  %v1459_v53 = vsel %vm1387_vm5, %v4893_v61, 0.0  ;;  %v1593_v1 = vsel %vm1521_vm3, %v4957_v49, %v1457_v10  ;;  %vm1659_vm4 = vcmp.eq.s32.totalorder %v1323_v59, 16 }
 0x1af   : > { %v1595_v6 = vsel %vm1523_vm0, %v4957_v49, %v1459_v53  ;;  %v1729_v37 = vsel %vm1657_vm2, %v4938_v46, %v1593_v1  ;;  %vm1793_vm6 = vcmp.eq.s32.totalorder %v5592_v27, 17  ;;  %vm1795_vm11 = vcmp.eq.s32.totalorder %v1323_v59, 17 }
 0x1b0   : > { %1200 = vmatpush1.bf16.msra.mxu0 %v1147_v40  ;;  %v1731_v51 = vsel %vm1659_vm4, %v4938_v46, %v1595_v6  ;;  %v1865_v55 = vsel %vm1793_vm6, %v4978_v12, %v1729_v37  ;;  %v5638_v34 = vadd.s32 208, %v4633_v5  ;;  %v5641_v31 = vadd.s32 216, %v4633_v5 }
 0x1b1   : > { %v1867_v38 = vsel %vm1795_vm11, %v4978_v12, %v1731_v51  ;;  %v5645_v52 = vadd.s32 224, %v4633_v5  ;;  %v5648_v29 = vadd.s32 232, %v4633_v5  ;;  %v5651_v27 = vadd.s32 240, %v4633_v5 }
 0x1b2   : > { %7093 = vst [vmem:[#allocation34_spill] sm:$0xff] %v5638_v34  ;;  %v1910_v59 = vpack.c.bf16 %v1867_v38, %v1865_v55  ;;  %v564_v41 = vsub.s32 %v5638_v34, %v4764_v3  ;;  %v566_v10 = vsub.s32 %v5641_v31, %v4764_v3  ;;  %v1326_v40 = vsub.s32 %v5638_v34, %v4768_v4 }
 0x1b3   : > { %v1328_v53 = vsub.s32 %v5641_v31, %v4768_v4  ;;  %v563_v1 = vsub.s32 %v5638_v34, %v4945_v57  ;;  %v565_v6 = vsub.s32 %v5641_v31, %v4945_v57  ;;  %v5667_v37 = vsub.s32 %v5638_v34, %v4953_v48 }
 0x1b4   : > { %1963 = vmatpush1.bf16.msra.mxu1 %v1910_v59  ;;  %vm628_vm12 = vcmp.eq.s32.totalorder %v564_v41, 0  ;;  %vm630_vm7 = vcmp.eq.s32.totalorder %v566_v10, 0  ;;  %vm764_vm8 = vcmp.eq.s32.totalorder %v564_v41, 1  ;;  %vm766_vm9 = vcmp.eq.s32.totalorder %v566_v10, 1 }
 0x1b5   : > { %v700_v51 = vsel %vm628_vm12, %v4744_v62, 0.0  ;;  %v702_v55 = vsel %vm630_vm7, %v4744_v62, 0.0  ;;  %vm900_vm10 = vcmp.eq.s32.totalorder %v564_v41, 16  ;;  %vm902_vm13 = vcmp.eq.s32.totalorder %v566_v10, 16 }
 0x1b6   : > { %v836_v38 = vsel %vm764_vm8, %v4774_v7, %v700_v51  ;;  %v838_v18 = vsel %vm766_vm9, %v4774_v7, %v702_v55  ;;  %vm1036_vm14 = vcmp.eq.s32.totalorder %v564_v41, 17  ;;  %vm1038_vm15 = vcmp.eq.s32.totalorder %v566_v10, 17 }
 0x1b7   : > { %v972_v34 = vsel %vm900_vm10, %v4797_v26, %v836_v38  ;;  %v974_v59 = vsel %vm902_vm13, %v4797_v26, %v838_v18  ;;  %vm1390_vm1 = vcmp.eq.s32.totalorder %v1326_v40, 0  ;;  %vm1392_vm3 = vcmp.eq.s32.totalorder %v1328_v53, 0 }
 0x1b8   : > { %v1108_v35 = vsel %vm1036_vm14, %v4819_v43, %v972_v34  ;;  %v1110_v11 = vsel %vm1038_vm15, %v4819_v43, %v974_v59  ;;  %v1462_v30 = vsel %vm1390_vm1, %v4748_v63, 0.0  ;;  %v1464_v19 = vsel %vm1392_vm3, %v4748_v63, 0.0 }
 0x1b9   : > { %v1150_v20 = vpack.c.bf16 %v1110_v11, %v1108_v35  ;;  %vm1526_vm2 = vcmp.eq.s32.totalorder %v1326_v40, 1  ;;  %vm1528_vm5 = vcmp.eq.s32.totalorder %v1328_v53, 1  ;;  %vm1662_vm0 = vcmp.eq.s32.totalorder %v1326_v40, 16 }
 0x1ba   : > { %v1598_v41 = vsel %vm1526_vm2, %v4778_v9, %v1462_v30  ;;  %v1600_v10 = vsel %vm1528_vm5, %v4778_v9, %v1464_v19  ;;  %vm1664_vm4 = vcmp.eq.s32.totalorder %v1328_v53, 16  ;;  %vm1798_vm6 = vcmp.eq.s32.totalorder %v1326_v40, 17 }
 0x1bb   : > { %1201 = vmatprep.subr.bf16.mxu0 %v1150_v20  ;;  %v1734_v18 = vsel %vm1662_vm0, %v4803_v33, %v1598_v41  ;;  %v1736_v34 = vsel %vm1664_vm4, %v4803_v33, %v1600_v10  ;;  %vm1800_vm11 = vcmp.eq.s32.totalorder %v1328_v53, 17  ;;  %vm627_vm12 = vcmp.eq.s32.totalorder %v563_v1, 0 }
 0x1bc   : > { %v1870_v51 = vsel %vm1798_vm6, %v4843_v56, %v1734_v18  ;;  %v1872_v11 = vsel %vm1800_vm11, %v4843_v56, %v1736_v34  ;;  %vm629_vm7 = vcmp.eq.s32.totalorder %v565_v6, 0  ;;  %v699_v35 = vsel %vm627_vm12, %v4889_v54, 0.0 }
 0x1bd   : > { %v1913_v55 = vpack.c.bf16 %v1872_v11, %v1870_v51  ;;  %v701_v30 = vsel %vm629_vm7, %v4889_v54, 0.0  ;;  %vm763_vm8 = vcmp.eq.s32.totalorder %v563_v1, 1  ;;  %vm765_vm9 = vcmp.eq.s32.totalorder %v565_v6, 1 }
 0x1be   : > { %v835_v20 = vsel %vm763_vm8, %v4949_v47, %v699_v35  ;;  %v837_v19 = vsel %vm765_vm9, %v4949_v47, %v701_v30  ;;  %vm899_vm10 = vcmp.eq.s32.totalorder %v563_v1, 16  ;;  %vm901_vm13 = vcmp.eq.s32.totalorder %v565_v6, 16 }
 0x1bf   : > { %1964 = vmatprep.subr.bf16.mxu1 %v1913_v55  ;;  %v971_v40 = vsel %vm899_vm10, %v4934_v45, %v835_v20  ;;  %v973_v53 = vsel %vm901_vm13, %v4934_v45, %v837_v19  ;;  %vm1035_vm14 = vcmp.eq.s32.totalorder %v563_v1, 17  ;;  %vm1037_vm15 = vcmp.eq.s32.totalorder %v565_v6, 17 }
 0x1c0   : > { %v1107_v38 = vsel %vm1035_vm14, %v4970_v0, %v971_v40  ;;  %v1109_v59 = vsel %vm1037_vm15, %v4970_v0, %v973_v53  ;;  %v1327_v41 = vsub.s32 %v5641_v31, %v4953_v48  ;;  %vm1389_vm1 = vcmp.eq.s32.totalorder %v5667_v37, 0 }
 0x1c1   : > { %v1149_v10 = vpack.c.bf16 %v1109_v59, %v1107_v38  ;;  %v1461_v18 = vsel %vm1389_vm1, %v4893_v61, 0.0  ;;  %vm1525_vm3 = vcmp.eq.s32.totalorder %v5667_v37, 1  ;;  %vm1661_vm2 = vcmp.eq.s32.totalorder %v5667_v37, 16 }
 0x1c2   : > { %vm1391_vm5 = vcmp.eq.s32.totalorder %v1327_v41, 0  ;;  %vm1527_vm0 = vcmp.eq.s32.totalorder %v1327_v41, 1  ;;  %v1597_v1 = vsel %vm1525_vm3, %v4957_v49, %v1461_v18  ;;  %vm1663_vm4 = vcmp.eq.s32.totalorder %v1327_v41, 16 }
 0x1c3   : > { %1202 = vmatpush1.bf16.msra.mxu0 %v1149_v10  ;;  %v1463_v6 = vsel %vm1391_vm5, %v4893_v61, 0.0  ;;  %v1733_v34 = vsel %vm1661_vm2, %v4938_v46, %v1597_v1  ;;  %vm1797_vm6 = vcmp.eq.s32.totalorder %v5667_v37, 17  ;;  %vm1799_vm11 = vcmp.eq.s32.totalorder %v1327_v41, 17 }
 0x1c4   : > { %v1599_v51 = vsel %vm1527_vm0, %v4957_v49, %v1463_v6  ;;  %v1869_v11 = vsel %vm1797_vm6, %v4978_v12, %v1733_v34  ;;  %v568_v35 = vsub.s32 %v5645_v52, %v4764_v3  ;;  %v570_v55 = vsub.s32 %v5648_v29, %v4764_v3 }
 0x1c5   : > { %v1735_v30 = vsel %vm1663_vm4, %v4938_v46, %v1599_v51  ;;  %v1330_v20 = vsub.s32 %v5645_v52, %v4768_v4  ;;  %v1332_v19 = vsub.s32 %v5648_v29, %v4768_v4  ;;  %v567_v37 = vsub.s32 %v5645_v52, %v4945_v57 }
 0x1c6   : > { %v1871_v40 = vsel %vm1799_vm11, %v4978_v12, %v1735_v30  ;;  %vm632_vm12 = vcmp.eq.s32.totalorder %v568_v35, 0  ;;  %vm634_vm7 = vcmp.eq.s32.totalorder %v570_v55, 0  ;;  %vm768_vm8 = vcmp.eq.s32.totalorder %v568_v35, 1 }
 0x1c7   : > { %v1912_v53 = vpack.c.bf16 %v1871_v40, %v1869_v11  ;;  %v704_v38 = vsel %vm632_vm12, %v4744_v62, 0.0  ;;  %v706_v59 = vsel %vm634_vm7, %v4744_v62, 0.0  ;;  %vm770_vm9 = vcmp.eq.s32.totalorder %v570_v55, 1 }
 0x1c8   : > { %v840_v41 = vsel %vm768_vm8, %v4774_v7, %v704_v38  ;;  %v842_v10 = vsel %vm770_vm9, %v4774_v7, %v706_v59  ;;  %vm904_vm10 = vcmp.eq.s32.totalorder %v568_v35, 16  ;;  %vm906_vm13 = vcmp.eq.s32.totalorder %v570_v55, 16 }
 0x1c9   : > { %1965 = vmatpush1.bf16.msra.mxu1 %v1912_v53  ;;  %v976_v18 = vsel %vm904_vm10, %v4797_v26, %v840_v41  ;;  %v978_v1 = vsel %vm906_vm13, %v4797_v26, %v842_v10  ;;  %vm1040_vm14 = vcmp.eq.s32.totalorder %v568_v35, 17  ;;  %vm1042_vm15 = vcmp.eq.s32.totalorder %v570_v55, 17 }
 0x1ca   : > { %v1112_v6 = vsel %vm1040_vm14, %v4819_v43, %v976_v18  ;;  %v1114_v34 = vsel %vm1042_vm15, %v4819_v43, %v978_v1  ;;  %vm1394_vm1 = vcmp.eq.s32.totalorder %v1330_v20, 0  ;;  %vm1396_vm3 = vcmp.eq.s32.totalorder %v1332_v19, 0 }
 0x1cb   : > { %v1152_v51 = vpack.c.bf16 %v1114_v34, %v1112_v6  ;;  %v1466_v11 = vsel %vm1394_vm1, %v4748_v63, 0.0  ;;  %v1468_v30 = vsel %vm1396_vm3, %v4748_v63, 0.0  ;;  %vm1530_vm2 = vcmp.eq.s32.totalorder %v1330_v20, 1 }
 0x1cc   : > { %vm1532_vm5 = vcmp.eq.s32.totalorder %v1332_v19, 1  ;;  %v1602_v40 = vsel %vm1530_vm2, %v4778_v9, %v1466_v11  ;;  %vm1666_vm0 = vcmp.eq.s32.totalorder %v1330_v20, 16  ;;  %vm1668_vm4 = vcmp.eq.s32.totalorder %v1332_v19, 16 }
 0x1cd   : > { %1203 = vmatprep.subr.bf16.mxu0 %v1152_v51  ;;  %v1604_v35 = vsel %vm1532_vm5, %v4778_v9, %v1468_v30  ;;  %v1738_v55 = vsel %vm1666_vm0, %v4803_v33, %v1602_v40  ;;  %vm1802_vm6 = vcmp.eq.s32.totalorder %v1330_v20, 17  ;;  %vm1804_vm11 = vcmp.eq.s32.totalorder %v1332_v19, 17 }
 0x1ce   : > { %v1740_v53 = vsel %vm1668_vm4, %v4803_v33, %v1604_v35  ;;  %v1874_v38 = vsel %vm1802_vm6, %v4843_v56, %v1738_v55  ;;  %v569_v59 = vsub.s32 %v5648_v29, %v4945_v57  ;;  %vm631_vm12 = vcmp.eq.s32.totalorder %v567_v37, 0 }
 0x1cf   : > { %v1876_v41 = vsel %vm1804_vm11, %v4843_v56, %v1740_v53  ;;  %v703_v10 = vsel %vm631_vm12, %v4889_v54, 0.0  ;;  %vm767_vm7 = vcmp.eq.s32.totalorder %v567_v37, 1  ;;  %vm903_vm8 = vcmp.eq.s32.totalorder %v567_v37, 16 }
 0x1d0   : > { %v1915_v18 = vpack.c.bf16 %v1876_v41, %v1874_v38  ;;  %vm633_vm9 = vcmp.eq.s32.totalorder %v569_v59, 0  ;;  %vm769_vm10 = vcmp.eq.s32.totalorder %v569_v59, 1  ;;  %v839_v20 = vsel %vm767_vm7, %v4949_v47, %v703_v10 }
 0x1d1   : > { %v705_v19 = vsel %vm633_vm9, %v4889_v54, 0.0  ;;  %vm905_vm13 = vcmp.eq.s32.totalorder %v569_v59, 16  ;;  %v975_v1 = vsel %vm903_vm8, %v4934_v45, %v839_v20  ;;  %vm1039_vm14 = vcmp.eq.s32.totalorder %v567_v37, 17 }
 0x1d2   : > { %1966 = vmatprep.subr.bf16.mxu1 %v1915_v18  ;;  %v841_v6 = vsel %vm769_vm10, %v4949_v47, %v705_v19  ;;  %vm1041_vm15 = vcmp.eq.s32.totalorder %v569_v59, 17  ;;  %v1111_v34 = vsel %vm1039_vm14, %v4970_v0, %v975_v1  ;;  %v1329_v51 = vsub.s32 %v5645_v52, %v4953_v48 }
 0x1d3   : > { %v977_v11 = vsel %vm905_vm13, %v4934_v45, %v841_v6  ;;  %v1331_v30 = vsub.s32 %v5648_v29, %v4953_v48  ;;  %v5747_v40 = vadd.s32 248, %v4633_v5  ;;  %v572_v37 = vsub.s32 %v5651_v27, %v4764_v3 }
 0x1d4   : > { %v1113_v35 = vsel %vm1041_vm15, %v4970_v0, %v977_v11  ;;  %vm1393_vm1 = vcmp.eq.s32.totalorder %v1329_v51, 0  ;;  %vm1529_vm3 = vcmp.eq.s32.totalorder %v1329_v51, 1  ;;  %vm1665_vm2 = vcmp.eq.s32.totalorder %v1329_v51, 16 }
 0x1d5   : > { %v1151_v55 = vpack.c.bf16 %v1113_v35, %v1111_v34  ;;  %vm1395_vm5 = vcmp.eq.s32.totalorder %v1331_v30, 0  ;;  %v1465_v53 = vsel %vm1393_vm1, %v4893_v61, 0.0  ;;  %vm1531_vm0 = vcmp.eq.s32.totalorder %v1331_v30, 1 }
 0x1d6   : > { %v1467_v38 = vsel %vm1395_vm5, %v4893_v61, 0.0  ;;  %v1601_v59 = vsel %vm1529_vm3, %v4957_v49, %v1465_v53  ;;  %vm1667_vm4 = vcmp.eq.s32.totalorder %v1331_v30, 16  ;;  %vm1801_vm6 = vcmp.eq.s32.totalorder %v1329_v51, 17 }
 0x1d7   : > { %1204 = vmatpush1.bf16.msra.mxu0 %v1151_v55  ;;  %v1603_v41 = vsel %vm1531_vm0, %v4957_v49, %v1467_v38  ;;  %v1737_v10 = vsel %vm1665_vm2, %v4938_v46, %v1601_v59  ;;  %vm1803_vm11 = vcmp.eq.s32.totalorder %v1331_v30, 17  ;;  %v574_v18 = vsub.s32 %v5747_v40, %v4764_v3 }
 0x1d8   : > { %v1739_v20 = vsel %vm1667_vm4, %v4938_v46, %v1603_v41  ;;  %v1873_v19 = vsel %vm1801_vm6, %v4978_v12, %v1737_v10  ;;  %vm636_vm12 = vcmp.eq.s32.totalorder %v572_v37, 0  ;;  %vm772_vm7 = vcmp.eq.s32.totalorder %v572_v37, 1 }
 0x1d9   : > { %v1875_v1 = vsel %vm1803_vm11, %v4978_v12, %v1739_v20  ;;  %vm638_vm8 = vcmp.eq.s32.totalorder %v574_v18, 0  ;;  %v708_v6 = vsel %vm636_vm12, %v4744_v62, 0.0  ;;  %vm774_vm9 = vcmp.eq.s32.totalorder %v574_v18, 1 }
 0x1da   : > { %v1914_v34 = vpack.c.bf16 %v1875_v1, %v1873_v19  ;;  %v710_v51 = vsel %vm638_vm8, %v4744_v62, 0.0  ;;  %v844_v11 = vsel %vm772_vm7, %v4774_v7, %v708_v6  ;;  %vm908_vm10 = vcmp.eq.s32.totalorder %v572_v37, 16 }
 0x1db   : > { %v846_v3 = vsel %vm774_vm9, %v4774_v7, %v710_v51  ;;  %vm910_vm13 = vcmp.eq.s32.totalorder %v574_v18, 16  ;;  %v980_v30 = vsel %vm908_vm10, %v4797_v26, %v844_v11  ;;  %vm1044_vm14 = vcmp.eq.s32.totalorder %v572_v37, 17 }
 0x1dc   : > { %1967 = vmatpush1.bf16.msra.mxu1 %v1914_v34  ;;  %v982_v35 = vsel %vm910_vm13, %v4797_v26, %v846_v3  ;;  %vm1046_vm15 = vcmp.eq.s32.totalorder %v574_v18, 17  ;;  %v1116_v55 = vsel %vm1044_vm14, %v4819_v43, %v980_v30  ;;  %v1334_v53 = vsub.s32 %v5651_v27, %v4768_v4 }
 0x1dd   : > { %v1118_v62 = vsel %vm1046_vm15, %v4819_v43, %v982_v35  ;;  %v1336_v38 = vsub.s32 %v5747_v40, %v4768_v4  ;;  %v571_v7 = vsub.s32 %v5651_v27, %v4945_v57  ;;  %v573_v37 = vsub.s32 %v5747_v40, %v4945_v57 }
 0x1de   : > { %v1154_v59 = vpack.c.bf16 %v1118_v62, %v1116_v55  ;;  %vm1398_vm1 = vcmp.eq.s32.totalorder %v1334_v53, 0  ;;  %vm1534_vm3 = vcmp.eq.s32.totalorder %v1334_v53, 1  ;;  %vm1670_vm2 = vcmp.eq.s32.totalorder %v1334_v53, 16 }
 0x1df   : > { %vm1400_vm5 = vcmp.eq.s32.totalorder %v1336_v38, 0  ;;  %v1470_v26 = vsel %vm1398_vm1, %v4748_v63, 0.0  ;;  %vm1536_vm0 = vcmp.eq.s32.totalorder %v1336_v38, 1  ;;  %vm1672_vm4 = vcmp.eq.s32.totalorder %v1336_v38, 16 }
 0x1e0   : > { %1205 = vmatprep.subr.bf16.mxu0 %v1154_v59  ;;  %v1472_v43 = vsel %vm1400_vm5, %v4748_v63, 0.0  ;;  %v1606_v4 = vsel %vm1534_vm3, %v4778_v9, %v1470_v26  ;;  %vm1806_vm6 = vcmp.eq.s32.totalorder %v1334_v53, 17  ;;  %vm1808_vm11 = vcmp.eq.s32.totalorder %v1336_v38, 17 }
 0x1e1   : > { %v1608_v41 = vsel %vm1536_vm0, %v4778_v9, %v1472_v43  ;;  %v1742_v57 = vsel %vm1670_vm2, %v4803_v33, %v1606_v4  ;;  %vm635_vm12 = vcmp.eq.s32.totalorder %v571_v7, 0  ;;  %vm637_vm7 = vcmp.eq.s32.totalorder %v573_v37, 0 }
 0x1e2   : > { %v1744_v10 = vsel %vm1672_vm4, %v4803_v33, %v1608_v41  ;;  %v1878_v18 = vsel %vm1806_vm6, %v4843_v56, %v1742_v57  ;;  %v707_v20 = vsel %vm635_vm12, %v4889_v54, 0.0  ;;  %v709_v19 = vsel %vm637_vm7, %v4889_v54, 0.0 }
 0x1e3   : > { %v1880_v63 = vsel %vm1808_vm11, %v4843_v56, %v1744_v10  ;;  %vm771_vm8 = vcmp.eq.s32.totalorder %v571_v7, 1  ;;  %vm773_vm9 = vcmp.eq.s32.totalorder %v573_v37, 1  ;;  %vm907_vm10 = vcmp.eq.s32.totalorder %v571_v7, 16 }
 0x1e4   : > { %v1917_v1 = vpack.c.bf16 %v1880_v63, %v1878_v18  ;;  %v843_v9 = vsel %vm771_vm8, %v4949_v47, %v707_v20  ;;  %v845_v6 = vsel %vm773_vm9, %v4949_v47, %v709_v19  ;;  %vm909_vm13 = vcmp.eq.s32.totalorder %v573_v37, 16 }
 0x1e5   : > { %v979_v34 = vsel %vm907_vm10, %v4934_v45, %v843_v9  ;;  %v981_v33 = vsel %vm909_vm13, %v4934_v45, %v845_v6  ;;  %vm1043_vm14 = vcmp.eq.s32.totalorder %v571_v7, 17  ;;  %vm1045_vm15 = vcmp.eq.s32.totalorder %v573_v37, 17  ;;  %v4138_v45 = vld [vmem:[%s4613_s29] ss:$8 sps:$4 sm:$0xff]  }
 0x1e6   : > { %1968 = vmatprep.subr.bf16.mxu1 %v1917_v1  ;;  %v1115_v54 = vsel %vm1043_vm14, %v4970_v0, %v979_v34  ;;  %v1117_v56 = vsel %vm1045_vm15, %v4970_v0, %v981_v33  ;;  %v1333_v51 = vsub.s32 %v5651_v27, %v4953_v48  ;;  %v1335_v11 = vsub.s32 %v5747_v40, %v4953_v48 }
 0x1e7   : > { %v1153_v47 = vpack.c.bf16 %v1117_v56, %v1115_v54  ;;  %v5799_v3 = vsub.s32 4, %v4633_v5  ;;  %v5802_v30 = vsub.s32 6, %v4633_v5 }
 0x1e8   : > { %vm1397_vm1 = vcmp.eq.s32.totalorder %v1333_v51, 0  ;;  %vm1399_vm3 = vcmp.eq.s32.totalorder %v1335_v11, 0  ;;  %vm1533_vm2 = vcmp.eq.s32.totalorder %v1333_v51, 1  ;;  %vm1535_vm5 = vcmp.eq.s32.totalorder %v1335_v11, 1 }
 0x1e9   : > { %1206 = vmatpush1.bf16.msra.mxu0 %v1153_v47  ;;  %v1469_v0 = vsel %vm1397_vm1, %v4893_v61, 0.0  ;;  %v1471_v35 = vsel %vm1399_vm3, %v4893_v61, 0.0  ;;  %vm1669_vm0 = vcmp.eq.s32.totalorder %v1333_v51, 16  ;;  %vm1671_vm4 = vcmp.eq.s32.totalorder %v1335_v11, 16 }
 0x1ea   : > { %v1605_v48 = vsel %vm1533_vm2, %v4957_v49, %v1469_v0  ;;  %v1607_v55 = vsel %vm1535_vm5, %v4957_v49, %v1471_v35  ;;  %vm1805_vm6 = vcmp.eq.s32.totalorder %v1333_v51, 17  ;;  %vm1807_vm11 = vcmp.eq.s32.totalorder %v1335_v11, 17 }
 0x1eb   : > { %v1741_v53 = vsel %vm1669_vm0, %v4938_v46, %v1605_v48  ;;  %v1743_v62 = vsel %vm1671_vm4, %v4938_v46, %v1607_v55  ;;  %v5813_v38 = vrot.slane %v4733_v60, %v5799_v3  ;;  %v5817_v61 = vrot.slane %v4723_v58, %v5799_v3 }
 0x1ec   : > { %v1877_v7 = vsel %vm1805_vm6, %v4978_v12, %v1741_v53  ;;  %v1879_v37 = vsel %vm1807_vm11, %v4978_v12, %v1743_v62  ;;  %1208 = vmatmul.mubr.bf16.vlgmr.msra.gmra.mrb[0].mxu0 %v4138_v45  ;;  %v5823_v49 = vrot.slane %v4756_v2, %v5799_v3  ;;  %v5827_v46 = vrot.slane %v4781_v17, %v5799_v3  ;;  %v4141_v12 = vld [vmem:[%s4613_s29 + $0x20] ss:$8 sps:$4 sm:$0xff]  }
 0x1ed   : > { %v1916_v59 = vpack.c.bf16 %v1879_v37, %v1877_v7  ;;  %v2068_v26 = vsub.s32 %v4633_v5, %v5813_v38  ;;  %v2070_v43 = vsub.s32 %v4636_v8, %v5813_v38  ;;  %v5835_v4 = vrot.slane %v4809_v36, %v5799_v3 }
 0x1ee   : > { %v5840_v41 = vrot.slane %v4733_v60, %v5802_v30  ;;  %v5844_v57 = vrot.slane %v4723_v58, %v5802_v30  ;;  %v5848_v10 = vrot.slane %v4756_v2, %v5802_v30  ;;  %v5852_v18 = vrot.slane %v4781_v17, %v5802_v30 }
 0x1ef   : > { %1969 = vmatpush1.bf16.msra.mxu1 %v1916_v59  ;;  %vm2132_vm12 = vcmp.eq.s32.totalorder %v2068_v26, 0  ;;  %vm2134_vm7 = vcmp.eq.s32.totalorder %v2070_v43, 0  ;;  %vm2268_vm8 = vcmp.eq.s32.totalorder %v2068_v26, 1  ;;  %vm2270_vm9 = vcmp.eq.s32.totalorder %v2070_v43, 1 }
 0x1f0   : > { %v2204_v60 = vsel %vm2132_vm12, %v5817_v61, 0.0  ;;  %v2206_v20 = vsel %vm2134_vm7, %v5817_v61, 0.0  ;;  %vm2404_vm10 = vcmp.eq.s32.totalorder %v2068_v26, 16  ;;  %vm2406_vm13 = vcmp.eq.s32.totalorder %v2070_v43, 16 }
 0x1f1   : > { %v2340_v58 = vsel %vm2268_vm8, %v5823_v49, %v2204_v60  ;;  %v2342_v2 = vsel %vm2270_vm9, %v5823_v49, %v2206_v20  ;;  %vm2540_vm14 = vcmp.eq.s32.totalorder %v2068_v26, 17  ;;  %vm2542_vm15 = vcmp.eq.s32.totalorder %v2070_v43, 17 }
 0x1f2   : > { %1971 = vmatmul.mubr.bf16.vlgmr.msra.gmra.mrb[0].mxu1 %v4141_v12  ;;  %v2476_v17 = vsel %vm2404_vm10, %v5827_v46, %v2340_v58  ;;  %v2478_v19 = vsel %vm2406_vm13, %v5827_v46, %v2342_v2  ;;  %v2862_v63 = vsub.s32 %v4633_v5, %v5840_v41  ;;  %v2864_v1 = vsub.s32 %v4636_v8, %v5840_v41 }
 0x1f3   : > { %v2612_v9 = vsel %vm2540_vm14, %v5835_v4, %v2476_v17  ;;  %v2614_v6 = vsel %vm2542_vm15, %v5835_v4, %v2478_v19  ;;  %v5868_v34 = vrot.slane %v4809_v36, %v5802_v30  ;;  %v5872_v33 = vrot.slane %v4921_v39, %v5799_v3 }
 0x1f4   : > { %v2681_v54 = vpack.c.bf16 %v2614_v6, %v2612_v9  ;;  %vm2926_vm1 = vcmp.eq.s32.totalorder %v2862_v63, 0  ;;  %vm2928_vm3 = vcmp.eq.s32.totalorder %v2864_v1, 0  ;;  %vm3062_vm2 = vcmp.eq.s32.totalorder %v2862_v63, 1 }
 0x1f5   : > { %v2998_v56 = vsel %vm2926_vm1, %v5844_v57, 0.0  ;;  %v3000_v51 = vsel %vm2928_vm3, %v5844_v57, 0.0  ;;  %vm3064_vm5 = vcmp.eq.s32.totalorder %v2864_v1, 1  ;;  %vm3198_vm0 = vcmp.eq.s32.totalorder %v2862_v63, 16 }
 0x1f6   : > { %2732 = vmatprep.subr.bf16.mxu0 %v2681_v54  ;;  %v3134_v11 = vsel %vm3062_vm2, %v5848_v10, %v2998_v56  ;;  %v3136_v36 = vsel %vm3064_vm5, %v5848_v10, %v3000_v51  ;;  %vm3200_vm4 = vcmp.eq.s32.totalorder %v2864_v1, 16  ;;  %vm3334_vm6 = vcmp.eq.s32.totalorder %v2862_v63, 17 }
 0x1f7   : > { %v3270_v47 = vsel %vm3198_vm0, %v5852_v18, %v3134_v11  ;;  %v3272_v45 = vsel %vm3200_vm4, %v5852_v18, %v3136_v36  ;;  %vm3336_vm11 = vcmp.eq.s32.totalorder %v2864_v1, 17  ;;  %v2067_v0 = vsub.s32 %v4633_v5, %v5872_v33 }
 0x1f8   : > { %v3406_v35 = vsel %vm3334_vm6, %v5868_v34, %v3270_v47  ;;  %v3408_v48 = vsel %vm3336_vm11, %v5868_v34, %v3272_v45  ;;  %v2069_v55 = vsub.s32 %v4636_v8, %v5872_v33  ;;  %v5888_v53 = vrot.slane %v4864_v25, %v5799_v3 }
 0x1f9   : > { %v3475_v62 = vpack.c.bf16 %v3408_v48, %v3406_v35  ;;  %vm2131_vm12 = vcmp.eq.s32.totalorder %v2067_v0, 0  ;;  %vm2267_vm7 = vcmp.eq.s32.totalorder %v2067_v0, 1  ;;  %v5892_v7 = vrot.slane %v4926_v44, %v5799_v3 }
 0x1fa   : > { %vm2133_vm8 = vcmp.eq.s32.totalorder %v2069_v55, 0  ;;  %v2203_v37 = vsel %vm2131_vm12, %v5888_v53, 0.0  ;;  %vm2269_vm9 = vcmp.eq.s32.totalorder %v2069_v55, 1  ;;  %vm2403_vm10 = vcmp.eq.s32.totalorder %v2067_v0, 16 }
 0x1fb   : > { %3526 = vmatprep.subr.bf16.mxu1 %v3475_v62  ;;  %v2205_v59 = vsel %vm2133_vm8, %v5888_v53, 0.0  ;;  %v2339_v26 = vsel %vm2267_vm7, %v5892_v7, %v2203_v37  ;;  %vm2405_vm13 = vcmp.eq.s32.totalorder %v2069_v55, 16  ;;  %v5899_v43 = vrot.slane %v4919_v42, %v5799_v3 }
 0x1fc   : > { %v2341_v12 = vsel %vm2269_vm9, %v5892_v7, %v2205_v59  ;;  %vm2539_vm14 = vcmp.eq.s32.totalorder %v2067_v0, 17  ;;  %vm2541_vm15 = vcmp.eq.s32.totalorder %v2069_v55, 17  ;;  %v5904_v60 = vrot.slane %v4959_v50, %v5799_v3 }
 0x1fd   : > { %v2475_v20 = vsel %vm2403_vm10, %v5899_v43, %v2339_v26  ;;  %v2477_v58 = vsel %vm2405_vm13, %v5899_v43, %v2341_v12  ;;  %v5910_v2 = vrot.slane %v4921_v39, %v5802_v30  ;;  %v5914_v17 = vrot.slane %v4864_v25, %v5802_v30 }
 0x1fe   : > { %v2611_v19 = vsel %vm2539_vm14, %v5904_v60, %v2475_v20  ;;  %v2613_v63 = vsel %vm2541_vm15, %v5904_v60, %v2477_v58  ;;  %v5920_v3 = vrot.slane %v4926_v44, %v5802_v30  ;;  %v5924_v1 = vrot.slane %v4919_v42, %v5802_v30 }
 0x1ff   : > { %v2680_v9 = vpack.c.bf16 %v2613_v63, %v2611_v19  ;;  %v2861_v39 = vsub.s32 %v4633_v5, %v5910_v2  ;;  %v2863_v25 = vsub.s32 %v4636_v8, %v5910_v2  ;;  %v5932_v6 = vrot.slane %v4959_v50, %v5802_v30 }
 0x200   : > { %v2072_v54 = vsub.s32 %v4645_v13, %v5813_v38  ;;  %v2074_v44 = vsub.s32 %v4648_v14, %v5813_v38  ;;  %v2866_v42 = vsub.s32 %v4645_v13, %v5840_v41  ;;  %v2868_v56 = vsub.s32 %v4648_v14, %v5840_v41 }
 0x201   : > { %2733 = vmatpush1.bf16.msra.mxu0 %v2680_v9  ;;  %vm2925_vm1 = vcmp.eq.s32.totalorder %v2861_v39, 0  ;;  %vm2927_vm3 = vcmp.eq.s32.totalorder %v2863_v25, 0  ;;  %vm3061_vm2 = vcmp.eq.s32.totalorder %v2861_v39, 1  ;;  %vm3063_vm5 = vcmp.eq.s32.totalorder %v2863_v25, 1 }
 0x202   : > { %v2997_v5 = vsel %vm2925_vm1, %v5914_v17, 0.0  ;;  %v2999_v8 = vsel %vm2927_vm3, %v5914_v17, 0.0  ;;  %vm3197_vm0 = vcmp.eq.s32.totalorder %v2861_v39, 16  ;;  %vm3199_vm4 = vcmp.eq.s32.totalorder %v2863_v25, 16 }
 0x203   : > { %v3133_v50 = vsel %vm3061_vm2, %v5920_v3, %v2997_v5  ;;  %v3135_v30 = vsel %vm3063_vm5, %v5920_v3, %v2999_v8  ;;  %vm3333_vm6 = vcmp.eq.s32.totalorder %v2861_v39, 17  ;;  %vm3335_vm11 = vcmp.eq.s32.totalorder %v2863_v25, 17 }
 0x204   : > { %v3269_v51 = vsel %vm3197_vm0, %v5924_v1, %v3133_v50  ;;  %v3271_v11 = vsel %vm3199_vm4, %v5924_v1, %v3135_v30  ;;  %vm2136_vm12 = vcmp.eq.s32.totalorder %v2072_v54, 0  ;;  %vm2138_vm7 = vcmp.eq.s32.totalorder %v2074_v44, 0 }
 0x205   : > { %v3405_v36 = vsel %vm3333_vm6, %v5932_v6, %v3269_v51  ;;  %v3407_v47 = vsel %vm3335_vm11, %v5932_v6, %v3271_v11  ;;  %v2208_v45 = vsel %vm2136_vm12, %v5817_v61, 0.0  ;;  %v2210_v0 = vsel %vm2138_vm7, %v5817_v61, 0.0 }
 0x206   : > { %v3474_v35 = vpack.c.bf16 %v3407_v47, %v3405_v36  ;;  %vm2272_vm8 = vcmp.eq.s32.totalorder %v2072_v54, 1  ;;  %vm2274_vm9 = vcmp.eq.s32.totalorder %v2074_v44, 1  ;;  %vm2408_vm10 = vcmp.eq.s32.totalorder %v2072_v54, 16 }
 0x207   : > { %v2344_v48 = vsel %vm2272_vm8, %v5823_v49, %v2208_v45  ;;  %v2346_v55 = vsel %vm2274_vm9, %v5823_v49, %v2210_v0  ;;  %vm2410_vm13 = vcmp.eq.s32.totalorder %v2074_v44, 16  ;;  %vm2544_vm14 = vcmp.eq.s32.totalorder %v2072_v54, 17 }
 0x208   : > { %3527 = vmatpush1.bf16.msra.mxu1 %v3474_v35  ;;  %v2480_v62 = vsel %vm2408_vm10, %v5827_v46, %v2344_v48  ;;  %v2482_v37 = vsel %vm2410_vm13, %v5827_v46, %v2346_v55  ;;  %vm2546_vm15 = vcmp.eq.s32.totalorder %v2074_v44, 17  ;;  %vm2930_vm1 = vcmp.eq.s32.totalorder %v2866_v42, 0 }
 0x209   : > { %v2616_v59 = vsel %vm2544_vm14, %v5835_v4, %v2480_v62  ;;  %v2618_v26 = vsel %vm2546_vm15, %v5835_v4, %v2482_v37  ;;  %vm2932_vm3 = vcmp.eq.s32.totalorder %v2868_v56, 0  ;;  %v3002_v12 = vsel %vm2930_vm1, %v5844_v57, 0.0 }
 0x20a   : > { %v2683_v20 = vpack.c.bf16 %v2618_v26, %v2616_v59  ;;  %v3004_v58 = vsel %vm2932_vm3, %v5844_v57, 0.0  ;;  %vm3066_vm2 = vcmp.eq.s32.totalorder %v2866_v42, 1  ;;  %vm3068_vm5 = vcmp.eq.s32.totalorder %v2868_v56, 1 }
 0x20b   : > { %v3138_v19 = vsel %vm3066_vm2, %v5848_v10, %v3002_v12  ;;  %v3140_v63 = vsel %vm3068_vm5, %v5848_v10, %v3004_v58  ;;  %vm3202_vm0 = vcmp.eq.s32.totalorder %v2866_v42, 16  ;;  %vm3204_vm4 = vcmp.eq.s32.totalorder %v2868_v56, 16 }
 0x20c   : > { %2734 = vmatprep.subr.bf16.mxu0 %v2683_v20  ;;  %v3274_v9 = vsel %vm3202_vm0, %v5852_v18, %v3138_v19  ;;  %v3276_v39 = vsel %vm3204_vm4, %v5852_v18, %v3140_v63  ;;  %vm3338_vm6 = vcmp.eq.s32.totalorder %v2866_v42, 17  ;;  %vm3340_vm11 = vcmp.eq.s32.totalorder %v2868_v56, 17 }
 0x20d   : > { %v3410_v25 = vsel %vm3338_vm6, %v5868_v34, %v3274_v9  ;;  %v3412_v54 = vsel %vm3340_vm11, %v5868_v34, %v3276_v39  ;;  %v2071_v44 = vsub.s32 %v4645_v13, %v5872_v33  ;;  %v2073_v5 = vsub.s32 %v4648_v14, %v5872_v33 }
 0x20e   : > { %v3477_v8 = vpack.c.bf16 %v3412_v54, %v3410_v25  ;;  %v2865_v50 = vsub.s32 %v4645_v13, %v5910_v2  ;;  %v2867_v30 = vsub.s32 %v4648_v14, %v5910_v2  ;;  %v2076_v42 = vsub.s32 %v4651_v15, %v5813_v38 }
 0x20f   : > { %vm2135_vm12 = vcmp.eq.s32.totalorder %v2071_v44, 0  ;;  %vm2137_vm7 = vcmp.eq.s32.totalorder %v2073_v5, 0  ;;  %vm2271_vm8 = vcmp.eq.s32.totalorder %v2071_v44, 1  ;;  %vm2273_vm9 = vcmp.eq.s32.totalorder %v2073_v5, 1 }
 0x210   : > { %3528 = vmatprep.subr.bf16.mxu1 %v3477_v8  ;;  %v2207_v56 = vsel %vm2135_vm12, %v5888_v53, 0.0  ;;  %v2209_v51 = vsel %vm2137_vm7, %v5888_v53, 0.0  ;;  %vm2407_vm10 = vcmp.eq.s32.totalorder %v2071_v44, 16  ;;  %vm2409_vm13 = vcmp.eq.s32.totalorder %v2073_v5, 16 }
 0x211   : > { %v2343_v11 = vsel %vm2271_vm8, %v5892_v7, %v2207_v56  ;;  %v2345_v13 = vsel %vm2273_vm9, %v5892_v7, %v2209_v51  ;;  %vm2543_vm14 = vcmp.eq.s32.totalorder %v2071_v44, 17  ;;  %vm2545_vm15 = vcmp.eq.s32.totalorder %v2073_v5, 17 }
 0x212   : > { %v2479_v14 = vsel %vm2407_vm10, %v5899_v43, %v2343_v11  ;;  %v2481_v36 = vsel %vm2409_vm13, %v5899_v43, %v2345_v13  ;;  %vm2929_vm1 = vcmp.eq.s32.totalorder %v2865_v50, 0  ;;  %vm2931_vm3 = vcmp.eq.s32.totalorder %v2867_v30, 0 }
 0x213   : > { %v2615_v47 = vsel %vm2543_vm14, %v5904_v60, %v2479_v14  ;;  %v2617_v45 = vsel %vm2545_vm15, %v5904_v60, %v2481_v36  ;;  %v3001_v0 = vsel %vm2929_vm1, %v5914_v17, 0.0  ;;  %v3003_v35 = vsel %vm2931_vm3, %v5914_v17, 0.0 }
 0x214   : > { %v2682_v48 = vpack.c.bf16 %v2617_v45, %v2615_v47  ;;  %vm3065_vm2 = vcmp.eq.s32.totalorder %v2865_v50, 1  ;;  %vm3067_vm5 = vcmp.eq.s32.totalorder %v2867_v30, 1  ;;  %vm3201_vm0 = vcmp.eq.s32.totalorder %v2865_v50, 16 }
 0x215   : > { %v3137_v55 = vsel %vm3065_vm2, %v5920_v3, %v3001_v0  ;;  %v3139_v62 = vsel %vm3067_vm5, %v5920_v3, %v3003_v35  ;;  %vm3203_vm4 = vcmp.eq.s32.totalorder %v2867_v30, 16  ;;  %vm3337_vm6 = vcmp.eq.s32.totalorder %v2865_v50, 17 }
 0x216   : > { %2735 = vmatpush1.bf16.msra.mxu0 %v2682_v48  ;;  %v3273_v37 = vsel %vm3201_vm0, %v5924_v1, %v3137_v55  ;;  %v3275_v59 = vsel %vm3203_vm4, %v5924_v1, %v3139_v62  ;;  %vm3339_vm11 = vcmp.eq.s32.totalorder %v2867_v30, 17  ;;  %v2078_v26 = vsub.s32 %v4654_v16, %v5813_v38 }
 0x217   : > { %v3409_v12 = vsel %vm3337_vm6, %v5932_v6, %v3273_v37  ;;  %v3411_v20 = vsel %vm3339_vm11, %v5932_v6, %v3275_v59  ;;  %vm2140_vm12 = vcmp.eq.s32.totalorder %v2076_v42, 0  ;;  %vm2276_vm7 = vcmp.eq.s32.totalorder %v2076_v42, 1 }
 0x218   : > { %v3476_v58 = vpack.c.bf16 %v3411_v20, %v3409_v12  ;;  %vm2142_vm8 = vcmp.eq.s32.totalorder %v2078_v26, 0  ;;  %v2212_v19 = vsel %vm2140_vm12, %v5817_v61, 0.0  ;;  %vm2278_vm9 = vcmp.eq.s32.totalorder %v2078_v26, 1 }
 0x219   : > { %v2214_v63 = vsel %vm2142_vm8, %v5817_v61, 0.0  ;;  %v2348_v9 = vsel %vm2276_vm7, %v5823_v49, %v2212_v19  ;;  %vm2412_vm10 = vcmp.eq.s32.totalorder %v2076_v42, 16  ;;  %vm2414_vm13 = vcmp.eq.s32.totalorder %v2078_v26, 16 }
 0x21a   : > { %3529 = vmatpush1.bf16.msra.mxu1 %v3476_v58  ;;  %v2350_v39 = vsel %vm2278_vm9, %v5823_v49, %v2214_v63  ;;  %v2484_v25 = vsel %vm2412_vm10, %v5827_v46, %v2348_v9  ;;  %vm2548_vm14 = vcmp.eq.s32.totalorder %v2076_v42, 17  ;;  %vm2550_vm15 = vcmp.eq.s32.totalorder %v2078_v26, 17 }
 0x21b   : > { %v2486_v54 = vsel %vm2414_vm13, %v5827_v46, %v2350_v39  ;;  %v2620_v44 = vsel %vm2548_vm14, %v5835_v4, %v2484_v25  ;;  %v2870_v5 = vsub.s32 %v4651_v15, %v5840_v41  ;;  %v2872_v8 = vsub.s32 %v4654_v16, %v5840_v41 }
 0x21c   : > { %v2622_v50 = vsel %vm2550_vm15, %v5835_v4, %v2486_v54  ;;  %v2075_v30 = vsub.s32 %v4651_v15, %v5872_v33  ;;  %v2077_v56 = vsub.s32 %v4654_v16, %v5872_v33  ;;  %v2869_v42 = vsub.s32 %v4651_v15, %v5910_v2 }
 0x21d   : > { %v2685_v51 = vpack.c.bf16 %v2622_v50, %v2620_v44  ;;  %vm2934_vm1 = vcmp.eq.s32.totalorder %v2870_v5, 0  ;;  %vm2936_vm3 = vcmp.eq.s32.totalorder %v2872_v8, 0  ;;  %vm3070_vm2 = vcmp.eq.s32.totalorder %v2870_v5, 1 }
 0x21e   : > { %v3006_v11 = vsel %vm2934_vm1, %v5844_v57, 0.0  ;;  %v3008_v13 = vsel %vm2936_vm3, %v5844_v57, 0.0  ;;  %vm3072_vm5 = vcmp.eq.s32.totalorder %v2872_v8, 1  ;;  %vm3206_vm0 = vcmp.eq.s32.totalorder %v2870_v5, 16 }
 0x21f   : > { %2736 = vmatprep.subr.bf16.mxu0 %v2685_v51  ;;  %v3142_v14 = vsel %vm3070_vm2, %v5848_v10, %v3006_v11  ;;  %v3144_v36 = vsel %vm3072_vm5, %v5848_v10, %v3008_v13  ;;  %vm3208_vm4 = vcmp.eq.s32.totalorder %v2872_v8, 16  ;;  %vm3342_vm6 = vcmp.eq.s32.totalorder %v2870_v5, 17 }
 0x220   : > { %v3278_v47 = vsel %vm3206_vm0, %v5852_v18, %v3142_v14  ;;  %v3280_v15 = vsel %vm3208_vm4, %v5852_v18, %v3144_v36  ;;  %vm3344_vm11 = vcmp.eq.s32.totalorder %v2872_v8, 17  ;;  %vm2139_vm12 = vcmp.eq.s32.totalorder %v2075_v30, 0 }
 0x221   : > { %v3414_v45 = vsel %vm3342_vm6, %v5868_v34, %v3278_v47  ;;  %v3416_v0 = vsel %vm3344_vm11, %v5868_v34, %v3280_v15  ;;  %vm2141_vm7 = vcmp.eq.s32.totalorder %v2077_v56, 0  ;;  %v2211_v35 = vsel %vm2139_vm12, %v5888_v53, 0.0 }
 0x222   : > { %v3479_v48 = vpack.c.bf16 %v3416_v0, %v3414_v45  ;;  %v2213_v55 = vsel %vm2141_vm7, %v5888_v53, 0.0  ;;  %vm2275_vm8 = vcmp.eq.s32.totalorder %v2075_v30, 1  ;;  %vm2277_vm9 = vcmp.eq.s32.totalorder %v2077_v56, 1 }
 0x223   : > { %v2347_v62 = vsel %vm2275_vm8, %v5892_v7, %v2211_v35  ;;  %v2349_v37 = vsel %vm2277_vm9, %v5892_v7, %v2213_v55  ;;  %vm2411_vm10 = vcmp.eq.s32.totalorder %v2075_v30, 16  ;;  %vm2413_vm13 = vcmp.eq.s32.totalorder %v2077_v56, 16 }
 0x224   : > { %3530 = vmatprep.subr.bf16.mxu1 %v3479_v48  ;;  %v2483_v59 = vsel %vm2411_vm10, %v5899_v43, %v2347_v62  ;;  %v2485_v26 = vsel %vm2413_vm13, %v5899_v43, %v2349_v37  ;;  %vm2547_vm14 = vcmp.eq.s32.totalorder %v2075_v30, 17  ;;  %vm2549_vm15 = vcmp.eq.s32.totalorder %v2077_v56, 17 }
 0x225   : > { %v2619_v12 = vsel %vm2547_vm14, %v5904_v60, %v2483_v59  ;;  %v2621_v20 = vsel %vm2549_vm15, %v5904_v60, %v2485_v26  ;;  %v2871_v58 = vsub.s32 %v4654_v16, %v5910_v2  ;;  %vm2933_vm1 = vcmp.eq.s32.totalorder %v2869_v42, 0 }
 0x226   : > { %v2684_v19 = vpack.c.bf16 %v2621_v20, %v2619_v12  ;;  %v3005_v63 = vsel %vm2933_vm1, %v5914_v17, 0.0  ;;  %vm3069_vm3 = vcmp.eq.s32.totalorder %v2869_v42, 1  ;;  %vm3205_vm2 = vcmp.eq.s32.totalorder %v2869_v42, 16 }
 0x227   : > { %vm2935_vm5 = vcmp.eq.s32.totalorder %v2871_v58, 0  ;;  %vm3071_vm0 = vcmp.eq.s32.totalorder %v2871_v58, 1  ;;  %v3141_v9 = vsel %vm3069_vm3, %v5920_v3, %v3005_v63  ;;  %vm3207_vm4 = vcmp.eq.s32.totalorder %v2871_v58, 16 }
 0x228   : > { %2737 = vmatpush1.bf16.msra.mxu0 %v2684_v19  ;;  %v3007_v39 = vsel %vm2935_vm5, %v5914_v17, 0.0  ;;  %v3277_v25 = vsel %vm3205_vm2, %v5924_v1, %v3141_v9  ;;  %vm3341_vm6 = vcmp.eq.s32.totalorder %v2869_v42, 17  ;;  %vm3343_vm11 = vcmp.eq.s32.totalorder %v2871_v58, 17 }
 0x229   : > { %v3143_v16 = vsel %vm3071_vm0, %v5920_v3, %v3007_v39  ;;  %v3413_v54 = vsel %vm3341_vm6, %v5932_v6, %v3277_v25  ;;  %v2080_v44 = vsub.s32 %v4659_v21, %v5813_v38  ;;  %v2082_v5 = vsub.s32 %v4662_v22, %v5813_v38 }
 0x22a   : > { %v3279_v8 = vsel %vm3207_vm4, %v5924_v1, %v3143_v16  ;;  %v2874_v50 = vsub.s32 %v4659_v21, %v5840_v41  ;;  %v2876_v30 = vsub.s32 %v4662_v22, %v5840_v41  ;;  %v2079_v56 = vsub.s32 %v4659_v21, %v5872_v33 }
 0x22b   : > { %v3415_v42 = vsel %vm3343_vm11, %v5932_v6, %v3279_v8  ;;  %vm2144_vm12 = vcmp.eq.s32.totalorder %v2080_v44, 0  ;;  %vm2146_vm7 = vcmp.eq.s32.totalorder %v2082_v5, 0  ;;  %vm2280_vm8 = vcmp.eq.s32.totalorder %v2080_v44, 1 }
 0x22c   : > { %v3478_v51 = vpack.c.bf16 %v3415_v42, %v3413_v54  ;;  %v2216_v11 = vsel %vm2144_vm12, %v5817_v61, 0.0  ;;  %v2218_v13 = vsel %vm2146_vm7, %v5817_v61, 0.0  ;;  %vm2282_vm9 = vcmp.eq.s32.totalorder %v2082_v5, 1 }
 0x22d   : > { %v2352_v14 = vsel %vm2280_vm8, %v5823_v49, %v2216_v11  ;;  %v2354_v36 = vsel %vm2282_vm9, %v5823_v49, %v2218_v13  ;;  %vm2416_vm10 = vcmp.eq.s32.totalorder %v2080_v44, 16  ;;  %vm2418_vm13 = vcmp.eq.s32.totalorder %v2082_v5, 16 }
 0x22e   : > { %3531 = vmatpush1.bf16.msra.mxu1 %v3478_v51  ;;  %v2488_v47 = vsel %vm2416_vm10, %v5827_v46, %v2352_v14  ;;  %v2490_v15 = vsel %vm2418_vm13, %v5827_v46, %v2354_v36  ;;  %vm2552_vm14 = vcmp.eq.s32.totalorder %v2080_v44, 17  ;;  %vm2554_vm15 = vcmp.eq.s32.totalorder %v2082_v5, 17 }
 0x22f   : > { %v2624_v45 = vsel %vm2552_vm14, %v5835_v4, %v2488_v47  ;;  %v2626_v0 = vsel %vm2554_vm15, %v5835_v4, %v2490_v15  ;;  %vm2938_vm1 = vcmp.eq.s32.totalorder %v2874_v50, 0  ;;  %vm2940_vm3 = vcmp.eq.s32.totalorder %v2876_v30, 0 }
 0x230   : > { %v2687_v35 = vpack.c.bf16 %v2626_v0, %v2624_v45  ;;  %v3010_v48 = vsel %vm2938_vm1, %v5844_v57, 0.0  ;;  %v3012_v55 = vsel %vm2940_vm3, %v5844_v57, 0.0  ;;  %vm3074_vm2 = vcmp.eq.s32.totalorder %v2874_v50, 1 }
 0x231   : > { %vm3076_vm5 = vcmp.eq.s32.totalorder %v2876_v30, 1  ;;  %v3146_v62 = vsel %vm3074_vm2, %v5848_v10, %v3010_v48  ;;  %vm3210_vm0 = vcmp.eq.s32.totalorder %v2874_v50, 16  ;;  %vm3212_vm4 = vcmp.eq.s32.totalorder %v2876_v30, 16 }
 0x232   : > { %2738 = vmatprep.subr.bf16.mxu0 %v2687_v35  ;;  %v3148_v37 = vsel %vm3076_vm5, %v5848_v10, %v3012_v55  ;;  %v3282_v59 = vsel %vm3210_vm0, %v5852_v18, %v3146_v62  ;;  %vm3346_vm6 = vcmp.eq.s32.totalorder %v2874_v50, 17  ;;  %vm3348_vm11 = vcmp.eq.s32.totalorder %v2876_v30, 17 }
 0x233   : > { %v3284_v26 = vsel %vm3212_vm4, %v5852_v18, %v3148_v37  ;;  %v3418_v12 = vsel %vm3346_vm6, %v5868_v34, %v3282_v59  ;;  %v2081_v20 = vsub.s32 %v4662_v22, %v5872_v33  ;;  %vm2143_vm12 = vcmp.eq.s32.totalorder %v2079_v56, 0 }
 0x234   : > { %v3420_v58 = vsel %vm3348_vm11, %v5868_v34, %v3284_v26  ;;  %v2215_v19 = vsel %vm2143_vm12, %v5888_v53, 0.0  ;;  %vm2279_vm7 = vcmp.eq.s32.totalorder %v2079_v56, 1  ;;  %vm2415_vm8 = vcmp.eq.s32.totalorder %v2079_v56, 16 }
 0x235   : > { %v3481_v63 = vpack.c.bf16 %v3420_v58, %v3418_v12  ;;  %vm2145_vm9 = vcmp.eq.s32.totalorder %v2081_v20, 0  ;;  %vm2281_vm10 = vcmp.eq.s32.totalorder %v2081_v20, 1  ;;  %v2351_v9 = vsel %vm2279_vm7, %v5892_v7, %v2215_v19 }
 0x236   : > { %v2217_v39 = vsel %vm2145_vm9, %v5888_v53, 0.0  ;;  %vm2417_vm13 = vcmp.eq.s32.totalorder %v2081_v20, 16  ;;  %v2487_v25 = vsel %vm2415_vm8, %v5899_v43, %v2351_v9  ;;  %vm2551_vm14 = vcmp.eq.s32.totalorder %v2079_v56, 17 }
 0x237   : > { %3532 = vmatprep.subr.bf16.mxu1 %v3481_v63  ;;  %v2353_v16 = vsel %vm2281_vm10, %v5892_v7, %v2217_v39  ;;  %vm2553_vm15 = vcmp.eq.s32.totalorder %v2081_v20, 17  ;;  %v2623_v54 = vsel %vm2551_vm14, %v5904_v60, %v2487_v25  ;;  %v2873_v44 = vsub.s32 %v4659_v21, %v5910_v2 }
 0x238   : > { %v2489_v5 = vsel %vm2417_vm13, %v5899_v43, %v2353_v16  ;;  %v2875_v8 = vsub.s32 %v4662_v22, %v5910_v2  ;;  %v2084_v50 = vsub.s32 %v4665_v23, %v5813_v38  ;;  %v2086_v30 = vsub.s32 %v4668_v24, %v5813_v38 }
 0x239   : > { %v2625_v56 = vsel %vm2553_vm15, %v5904_v60, %v2489_v5  ;;  %vm2937_vm1 = vcmp.eq.s32.totalorder %v2873_v44, 0  ;;  %vm3073_vm3 = vcmp.eq.s32.totalorder %v2873_v44, 1  ;;  %vm3209_vm2 = vcmp.eq.s32.totalorder %v2873_v44, 16 }
 0x23a   : > { %v2686_v42 = vpack.c.bf16 %v2625_v56, %v2623_v54  ;;  %vm2939_vm5 = vcmp.eq.s32.totalorder %v2875_v8, 0  ;;  %v3009_v21 = vsel %vm2937_vm1, %v5914_v17, 0.0  ;;  %vm3075_vm0 = vcmp.eq.s32.totalorder %v2875_v8, 1 }
 0x23b   : > { %v3011_v51 = vsel %vm2939_vm5, %v5914_v17, 0.0  ;;  %v3145_v22 = vsel %vm3073_vm3, %v5920_v3, %v3009_v21  ;;  %vm3211_vm4 = vcmp.eq.s32.totalorder %v2875_v8, 16  ;;  %vm3345_vm6 = vcmp.eq.s32.totalorder %v2873_v44, 17 }
 0x23c   : > { %2739 = vmatpush1.bf16.msra.mxu0 %v2686_v42  ;;  %v3147_v11 = vsel %vm3075_vm0, %v5920_v3, %v3011_v51  ;;  %v3281_v13 = vsel %vm3209_vm2, %v5924_v1, %v3145_v22  ;;  %vm3347_vm11 = vcmp.eq.s32.totalorder %v2875_v8, 17  ;;  %vm2148_vm12 = vcmp.eq.s32.totalorder %v2084_v50, 0 }
 0x23d   : > { %v3283_v14 = vsel %vm3211_vm4, %v5924_v1, %v3147_v11  ;;  %v3417_v36 = vsel %vm3345_vm6, %v5932_v6, %v3281_v13  ;;  %vm2150_vm7 = vcmp.eq.s32.totalorder %v2086_v30, 0  ;;  %v2220_v47 = vsel %vm2148_vm12, %v5817_v61, 0.0 }
 0x23e   : > { %v3419_v15 = vsel %vm3347_vm11, %v5932_v6, %v3283_v14  ;;  %v2222_v45 = vsel %vm2150_vm7, %v5817_v61, 0.0  ;;  %vm2284_vm8 = vcmp.eq.s32.totalorder %v2084_v50, 1  ;;  %vm2286_vm9 = vcmp.eq.s32.totalorder %v2086_v30, 1 }
 0x23f   : > { %v3480_v0 = vpack.c.bf16 %v3419_v15, %v3417_v36  ;;  %v2356_v35 = vsel %vm2284_vm8, %v5823_v49, %v2220_v47  ;;  %v2358_v48 = vsel %vm2286_vm9, %v5823_v49, %v2222_v45  ;;  %vm2420_vm10 = vcmp.eq.s32.totalorder %v2084_v50, 16 }
 0x240   : > { %vm2422_vm13 = vcmp.eq.s32.totalorder %v2086_v30, 16  ;;  %v2492_v55 = vsel %vm2420_vm10, %v5827_v46, %v2356_v35  ;;  %vm2556_vm14 = vcmp.eq.s32.totalorder %v2084_v50, 17  ;;  %vm2558_vm15 = vcmp.eq.s32.totalorder %v2086_v30, 17 }
 0x241   : > { %3533 = vmatpush1.bf16.msra.mxu1 %v3480_v0  ;;  %v2494_v62 = vsel %vm2422_vm13, %v5827_v46, %v2358_v48  ;;  %v2628_v37 = vsel %vm2556_vm14, %v5835_v4, %v2492_v55  ;;  %v2878_v59 = vsub.s32 %v4665_v23, %v5840_v41  ;;  %v2880_v26 = vsub.s32 %v4668_v24, %v5840_v41 }
 0x242   : > { %v2630_v12 = vsel %vm2558_vm15, %v5835_v4, %v2494_v62  ;;  %v2083_v20 = vsub.s32 %v4665_v23, %v5872_v33  ;;  %v2085_v58 = vsub.s32 %v4668_v24, %v5872_v33  ;;  %v2877_v19 = vsub.s32 %v4665_v23, %v5910_v2 }
 0x243   : > { %v2689_v63 = vpack.c.bf16 %v2630_v12, %v2628_v37  ;;  %vm2942_vm1 = vcmp.eq.s32.totalorder %v2878_v59, 0  ;;  %vm2944_vm3 = vcmp.eq.s32.totalorder %v2880_v26, 0  ;;  %vm3078_vm2 = vcmp.eq.s32.totalorder %v2878_v59, 1 }
 0x244   : > { %v3014_v9 = vsel %vm2942_vm1, %v5844_v57, 0.0  ;;  %v3016_v39 = vsel %vm2944_vm3, %v5844_v57, 0.0  ;;  %vm3080_vm5 = vcmp.eq.s32.totalorder %v2880_v26, 1  ;;  %vm3214_vm0 = vcmp.eq.s32.totalorder %v2878_v59, 16 }
 0x245   : > { %2740 = vmatprep.subr.bf16.mxu0 %v2689_v63  ;;  %v3150_v25 = vsel %vm3078_vm2, %v5848_v10, %v3014_v9  ;;  %v3152_v16 = vsel %vm3080_vm5, %v5848_v10, %v3016_v39  ;;  %vm3216_vm4 = vcmp.eq.s32.totalorder %v2880_v26, 16  ;;  %vm3350_vm6 = vcmp.eq.s32.totalorder %v2878_v59, 17 }
 0x246   : > { %v3286_v54 = vsel %vm3214_vm0, %v5852_v18, %v3150_v25  ;;  %v3288_v23 = vsel %vm3216_vm4, %v5852_v18, %v3152_v16  ;;  %vm3352_vm11 = vcmp.eq.s32.totalorder %v2880_v26, 17  ;;  %vm2147_vm12 = vcmp.eq.s32.totalorder %v2083_v20, 0 }
 0x247   : > { %v3422_v44 = vsel %vm3350_vm6, %v5868_v34, %v3286_v54  ;;  %v3424_v5 = vsel %vm3352_vm11, %v5868_v34, %v3288_v23  ;;  %vm2149_vm7 = vcmp.eq.s32.totalorder %v2085_v58, 0  ;;  %v2219_v8 = vsel %vm2147_vm12, %v5888_v53, 0.0 }
 0x248   : > { %v3483_v50 = vpack.c.bf16 %v3424_v5, %v3422_v44  ;;  %v2221_v30 = vsel %vm2149_vm7, %v5888_v53, 0.0  ;;  %vm2283_vm8 = vcmp.eq.s32.totalorder %v2083_v20, 1  ;;  %vm2285_vm9 = vcmp.eq.s32.totalorder %v2085_v58, 1 }
 0x249   : > { %v2355_v56 = vsel %vm2283_vm8, %v5892_v7, %v2219_v8  ;;  %v2357_v42 = vsel %vm2285_vm9, %v5892_v7, %v2221_v30  ;;  %vm2419_vm10 = vcmp.eq.s32.totalorder %v2083_v20, 16  ;;  %vm2421_vm13 = vcmp.eq.s32.totalorder %v2085_v58, 16 }
 0x24a   : > { %3534 = vmatprep.subr.bf16.mxu1 %v3483_v50  ;;  %v2491_v21 = vsel %vm2419_vm10, %v5899_v43, %v2355_v56  ;;  %v2493_v51 = vsel %vm2421_vm13, %v5899_v43, %v2357_v42  ;;  %vm2555_vm14 = vcmp.eq.s32.totalorder %v2083_v20, 17  ;;  %vm2557_vm15 = vcmp.eq.s32.totalorder %v2085_v58, 17 }
 0x24b   : > { %v2627_v22 = vsel %vm2555_vm14, %v5904_v60, %v2491_v21  ;;  %v2629_v11 = vsel %vm2557_vm15, %v5904_v60, %v2493_v51  ;;  %v2879_v13 = vsub.s32 %v4668_v24, %v5910_v2  ;;  %vm2941_vm1 = vcmp.eq.s32.totalorder %v2877_v19, 0 }
 0x24c   : > { %v2688_v14 = vpack.c.bf16 %v2629_v11, %v2627_v22  ;;  %v3013_v36 = vsel %vm2941_vm1, %v5914_v17, 0.0  ;;  %vm3077_vm3 = vcmp.eq.s32.totalorder %v2877_v19, 1  ;;  %vm3213_vm2 = vcmp.eq.s32.totalorder %v2877_v19, 16 }
 0x24d   : > { %vm2943_vm5 = vcmp.eq.s32.totalorder %v2879_v13, 0  ;;  %vm3079_vm0 = vcmp.eq.s32.totalorder %v2879_v13, 1  ;;  %v3149_v47 = vsel %vm3077_vm3, %v5920_v3, %v3013_v36  ;;  %vm3215_vm4 = vcmp.eq.s32.totalorder %v2879_v13, 16 }
 0x24e   : > { %2741 = vmatpush1.bf16.msra.mxu0 %v2688_v14  ;;  %v3015_v15 = vsel %vm2943_vm5, %v5914_v17, 0.0  ;;  %v3285_v45 = vsel %vm3213_vm2, %v5924_v1, %v3149_v47  ;;  %vm3349_vm6 = vcmp.eq.s32.totalorder %v2877_v19, 17  ;;  %vm3351_vm11 = vcmp.eq.s32.totalorder %v2879_v13, 17 }
 0x24f   : > { %v3151_v24 = vsel %vm3079_vm0, %v5920_v3, %v3015_v15  ;;  %v3421_v0 = vsel %vm3349_vm6, %v5932_v6, %v3285_v45  ;;  %v2088_v35 = vsub.s32 %v4671_v28, %v5813_v38  ;;  %v2090_v48 = vsub.s32 %v4680_v32, %v5813_v38 }
 0x250   : > { %v3287_v55 = vsel %vm3215_vm4, %v5924_v1, %v3151_v24  ;;  %v2882_v62 = vsub.s32 %v4671_v28, %v5840_v41  ;;  %v2884_v37 = vsub.s32 %v4680_v32, %v5840_v41  ;;  %v2087_v59 = vsub.s32 %v4671_v28, %v5872_v33 }
 0x251   : > { %v3423_v26 = vsel %vm3351_vm11, %v5932_v6, %v3287_v55  ;;  %vm2152_vm12 = vcmp.eq.s32.totalorder %v2088_v35, 0  ;;  %vm2154_vm7 = vcmp.eq.s32.totalorder %v2090_v48, 0  ;;  %vm2288_vm8 = vcmp.eq.s32.totalorder %v2088_v35, 1 }
 0x252   : > { %v3482_v12 = vpack.c.bf16 %v3423_v26, %v3421_v0  ;;  %v2224_v20 = vsel %vm2152_vm12, %v5817_v61, 0.0  ;;  %v2226_v58 = vsel %vm2154_vm7, %v5817_v61, 0.0  ;;  %vm2290_vm9 = vcmp.eq.s32.totalorder %v2090_v48, 1  ;;  %v7094_v0 = vld [vmem:[#allocation20_spill] sm:$0xff] }
 0x253   : > { %v2360_v19 = vsel %vm2288_vm8, %v5823_v49, %v2224_v20  ;;  %v2362_v63 = vsel %vm2290_vm9, %v5823_v49, %v2226_v58  ;;  %vm2424_vm10 = vcmp.eq.s32.totalorder %v2088_v35, 16  ;;  %vm2426_vm13 = vcmp.eq.s32.totalorder %v2090_v48, 16 }
 0x254   : > { %3535 = vmatpush1.bf16.msra.mxu1 %v3482_v12  ;;  %v2496_v9 = vsel %vm2424_vm10, %v5827_v46, %v2360_v19  ;;  %v2498_v39 = vsel %vm2426_vm13, %v5827_v46, %v2362_v63  ;;  %vm2560_vm14 = vcmp.eq.s32.totalorder %v2088_v35, 17  ;;  %vm2562_vm15 = vcmp.eq.s32.totalorder %v2090_v48, 17  ;;  %v7095_v48 = vld [vmem:[#allocation21_spill] sm:$0xff] }
 0x255   : > { %v2632_v25 = vsel %vm2560_vm14, %v5835_v4, %v2496_v9  ;;  %v2634_v16 = vsel %vm2562_vm15, %v5835_v4, %v2498_v39  ;;  %vm2946_vm1 = vcmp.eq.s32.totalorder %v2882_v62, 0  ;;  %vm2948_vm3 = vcmp.eq.s32.totalorder %v2884_v37, 0 }
 0x256   : > { %v2691_v54 = vpack.c.bf16 %v2634_v16, %v2632_v25  ;;  %v3018_v23 = vsel %vm2946_vm1, %v5844_v57, 0.0  ;;  %v3020_v44 = vsel %vm2948_vm3, %v5844_v57, 0.0  ;;  %vm3082_vm2 = vcmp.eq.s32.totalorder %v2882_v62, 1 }
 0x257   : > { %vm3084_vm5 = vcmp.eq.s32.totalorder %v2884_v37, 1  ;;  %v3154_v5 = vsel %vm3082_vm2, %v5848_v10, %v3018_v23  ;;  %vm3218_vm0 = vcmp.eq.s32.totalorder %v2882_v62, 16  ;;  %vm3220_vm4 = vcmp.eq.s32.totalorder %v2884_v37, 16 }
 0x258   : > { %2742 = vmatprep.subr.bf16.mxu0 %v2691_v54  ;;  %v3156_v8 = vsel %vm3084_vm5, %v5848_v10, %v3020_v44  ;;  %v3290_v50 = vsel %vm3218_vm0, %v5852_v18, %v3154_v5  ;;  %vm3354_vm6 = vcmp.eq.s32.totalorder %v2882_v62, 17  ;;  %vm3356_vm11 = vcmp.eq.s32.totalorder %v2884_v37, 17 }
 0x259   : > { %v3292_v30 = vsel %vm3220_vm4, %v5852_v18, %v3156_v8  ;;  %v3426_v56 = vsel %vm3354_vm6, %v5868_v34, %v3290_v50  ;;  %v2089_v42 = vsub.s32 %v4680_v32, %v5872_v33  ;;  %vm2151_vm12 = vcmp.eq.s32.totalorder %v2087_v59, 0 }
 0x25a   : > { %v3428_v21 = vsel %vm3356_vm11, %v5868_v34, %v3292_v30  ;;  %v2223_v51 = vsel %vm2151_vm12, %v5888_v53, 0.0  ;;  %vm2287_vm7 = vcmp.eq.s32.totalorder %v2087_v59, 1  ;;  %vm2423_vm8 = vcmp.eq.s32.totalorder %v2087_v59, 16 }
 0x25b   : > { %v3485_v22 = vpack.c.bf16 %v3428_v21, %v3426_v56  ;;  %vm2153_vm9 = vcmp.eq.s32.totalorder %v2089_v42, 0  ;;  %vm2289_vm10 = vcmp.eq.s32.totalorder %v2089_v42, 1  ;;  %v2359_v11 = vsel %vm2287_vm7, %v5892_v7, %v2223_v51 }
 0x25c   : > { %v2225_v13 = vsel %vm2153_vm9, %v5888_v53, 0.0  ;;  %vm2425_vm13 = vcmp.eq.s32.totalorder %v2089_v42, 16  ;;  %v2495_v14 = vsel %vm2423_vm8, %v5899_v43, %v2359_v11  ;;  %vm2559_vm14 = vcmp.eq.s32.totalorder %v2087_v59, 17 }
 0x25d   : > { %3536 = vmatprep.subr.bf16.mxu1 %v3485_v22  ;;  %v2361_v36 = vsel %vm2289_vm10, %v5892_v7, %v2225_v13  ;;  %vm2561_vm15 = vcmp.eq.s32.totalorder %v2089_v42, 17  ;;  %v2631_v47 = vsel %vm2559_vm14, %v5904_v60, %v2495_v14  ;;  %v2881_v15 = vsub.s32 %v4671_v28, %v5910_v2 }
 0x25e   : > { %v2497_v45 = vsel %vm2425_vm13, %v5899_v43, %v2361_v36  ;;  %v2883_v24 = vsub.s32 %v4680_v32, %v5910_v2  ;;  %v2092_v35 = vsub.s32 %v7094_v0, %v5813_v38  ;;  %v2094_v55 = vsub.s32 %v7095_v48, %v5813_v38 }
 0x25f   : > { %v2633_v62 = vsel %vm2561_vm15, %v5904_v60, %v2497_v45  ;;  %vm2945_vm1 = vcmp.eq.s32.totalorder %v2881_v15, 0  ;;  %vm3081_vm3 = vcmp.eq.s32.totalorder %v2881_v15, 1  ;;  %vm3217_vm2 = vcmp.eq.s32.totalorder %v2881_v15, 16 }
 0x260   : > { %v2690_v37 = vpack.c.bf16 %v2633_v62, %v2631_v47  ;;  %vm2947_vm5 = vcmp.eq.s32.totalorder %v2883_v24, 0  ;;  %v3017_v28 = vsel %vm2945_vm1, %v5914_v17, 0.0  ;;  %vm3083_vm0 = vcmp.eq.s32.totalorder %v2883_v24, 1  ;;  %v4144_v47 = vld [vmem:[%s4613_s29 + $0x14] ss:$8 sps:$4 sm:$0xff]  }
 0x261   : > { %v3019_v59 = vsel %vm2947_vm5, %v5914_v17, 0.0  ;;  %v3153_v32 = vsel %vm3081_vm3, %v5920_v3, %v3017_v28  ;;  %vm3219_vm4 = vcmp.eq.s32.totalorder %v2883_v24, 16  ;;  %vm3353_vm6 = vcmp.eq.s32.totalorder %v2881_v15, 17  ;;  %v4146_v15 = vld [vmem:[%s4613_s29 + $0x34] ss:$8 sps:$4 sm:$0xff]   ;;  %1217 = vmatprep.mubr.bf16.mxu0 %v4144_v47 }
 0x262   : > { %2743 = vmatpush1.bf16.msra.mxu0 %v2690_v37  ;;  %v3155_v26 = vsel %vm3083_vm0, %v5920_v3, %v3019_v59  ;;  %v3289_v12 = vsel %vm3217_vm2, %v5924_v1, %v3153_v32  ;;  %vm3355_vm11 = vcmp.eq.s32.totalorder %v2883_v24, 17  ;;  %vm2156_vm12 = vcmp.eq.s32.totalorder %v2092_v35, 0  ;;  %1980 = vmatprep.mubr.bf16.mxu1 %v4146_v15 }
 0x263   : > { %v3291_v20 = vsel %vm3219_vm4, %v5924_v1, %v3155_v26  ;;  %v3425_v58 = vsel %vm3353_vm6, %v5932_v6, %v3289_v12  ;;  %vm2158_vm7 = vcmp.eq.s32.totalorder %v2094_v55, 0  ;;  %v2228_v19 = vsel %vm2156_vm12, %v5817_v61, 0.0 }
 0x264   : > { %v3427_v63 = vsel %vm3355_vm11, %v5932_v6, %v3291_v20  ;;  %v2230_v9 = vsel %vm2158_vm7, %v5817_v61, 0.0  ;;  %vm2292_vm8 = vcmp.eq.s32.totalorder %v2092_v35, 1  ;;  %vm2294_vm9 = vcmp.eq.s32.totalorder %v2094_v55, 1 }
 0x265   : > { %v3484_v39 = vpack.c.bf16 %v3427_v63, %v3425_v58  ;;  %v2364_v25 = vsel %vm2292_vm8, %v5823_v49, %v2228_v19  ;;  %v2366_v16 = vsel %vm2294_vm9, %v5823_v49, %v2230_v9  ;;  %vm2428_vm10 = vcmp.eq.s32.totalorder %v2092_v35, 16 }
 0x266   : > { %vm2430_vm13 = vcmp.eq.s32.totalorder %v2094_v55, 16  ;;  %v2500_v54 = vsel %vm2428_vm10, %v5827_v46, %v2364_v25  ;;  %vm2564_vm14 = vcmp.eq.s32.totalorder %v2092_v35, 17  ;;  %vm2566_vm15 = vcmp.eq.s32.totalorder %v2094_v55, 17 }
 0x267   : > { %3537 = vmatpush1.bf16.msra.mxu1 %v3484_v39  ;;  %v2502_v23 = vsel %vm2430_vm13, %v5827_v46, %v2366_v16  ;;  %v2636_v44 = vsel %vm2564_vm14, %v5835_v4, %v2500_v54  ;;  %v2886_v5 = vsub.s32 %v7094_v0, %v5840_v41  ;;  %v2888_v8 = vsub.s32 %v7095_v48, %v5840_v41  ;;  %v7096_v16 = vld [vmem:[#allocation22_spill] sm:$0xff] }
 0x268   : > { %v2638_v50 = vsel %vm2566_vm15, %v5835_v4, %v2502_v23  ;;  %v2091_v30 = vsub.s32 %v7094_v0, %v5872_v33  ;;  %v2093_v56 = vsub.s32 %v7095_v48, %v5872_v33  ;;  %v2885_v42 = vsub.s32 %v7094_v0, %v5910_v2  ;;  %v7097_v23 = vld [vmem:[#allocation23_spill] sm:$0xff] }
 0x269   : > { %v2693_v21 = vpack.c.bf16 %v2638_v50, %v2636_v44  ;;  %vm2950_vm1 = vcmp.eq.s32.totalorder %v2886_v5, 0  ;;  %vm2952_vm3 = vcmp.eq.s32.totalorder %v2888_v8, 0  ;;  %vm3086_vm2 = vcmp.eq.s32.totalorder %v2886_v5, 1 }
 0x26a   : > { %v3022_v51 = vsel %vm2950_vm1, %v5844_v57, 0.0  ;;  %v3024_v22 = vsel %vm2952_vm3, %v5844_v57, 0.0  ;;  %vm3088_vm5 = vcmp.eq.s32.totalorder %v2888_v8, 1  ;;  %vm3222_vm0 = vcmp.eq.s32.totalorder %v2886_v5, 16 }
 0x26b   : > { %2744 = vmatprep.subr.bf16.mxu0 %v2693_v21  ;;  %v3158_v11 = vsel %vm3086_vm2, %v5848_v10, %v3022_v51  ;;  %v3160_v13 = vsel %vm3088_vm5, %v5848_v10, %v3024_v22  ;;  %vm3224_vm4 = vcmp.eq.s32.totalorder %v2888_v8, 16  ;;  %vm3358_vm6 = vcmp.eq.s32.totalorder %v2886_v5, 17  ;;  %v4149_v5 = vld [vmem:[%s4613_s29 + $0x30] ss:$8 sps:$4 sm:$0xff]  }
 0x26c   : > { %v3294_v14 = vsel %vm3222_vm0, %v5852_v18, %v3158_v11  ;;  %v3296_v36 = vsel %vm3224_vm4, %v5852_v18, %v3160_v13  ;;  %vm3360_vm11 = vcmp.eq.s32.totalorder %v2888_v8, 17  ;;  %vm2155_vm12 = vcmp.eq.s32.totalorder %v2091_v30, 0  ;;  %1981 = vmatmul.mubr.bf16.gmra.mrb[4].mxu1 %v4149_v5  ;;  %v7099_v5 = vld [vmem:[#allocation25_spill] sm:$0xff] }
 0x26d   : > { %v3430_v45 = vsel %vm3358_vm6, %v5868_v34, %v3294_v14  ;;  %v3432_v24 = vsel %vm3360_vm11, %v5868_v34, %v3296_v36  ;;  %vm2157_vm7 = vcmp.eq.s32.totalorder %v2093_v56, 0  ;;  %v2227_v0 = vsel %vm2155_vm12, %v5888_v53, 0.0 }
 0x26e   : > { %v3487_v35 = vpack.c.bf16 %v3432_v24, %v3430_v45  ;;  %v2229_v55 = vsel %vm2157_vm7, %v5888_v53, 0.0  ;;  %vm2291_vm8 = vcmp.eq.s32.totalorder %v2091_v30, 1  ;;  %vm2293_vm9 = vcmp.eq.s32.totalorder %v2093_v56, 1 }
 0x26f   : > { %v2363_v62 = vsel %vm2291_vm8, %v5892_v7, %v2227_v0  ;;  %v2365_v37 = vsel %vm2293_vm9, %v5892_v7, %v2229_v55  ;;  %vm2427_vm10 = vcmp.eq.s32.totalorder %v2091_v30, 16  ;;  %vm2429_vm13 = vcmp.eq.s32.totalorder %v2093_v56, 16 }
 0x270   : > { %3538 = vmatprep.subr.bf16.mxu1 %v3487_v35  ;;  %v2499_v28 = vsel %vm2427_vm10, %v5899_v43, %v2363_v62  ;;  %v2501_v59 = vsel %vm2429_vm13, %v5899_v43, %v2365_v37  ;;  %vm2563_vm14 = vcmp.eq.s32.totalorder %v2091_v30, 17  ;;  %vm2565_vm15 = vcmp.eq.s32.totalorder %v2093_v56, 17 }
 0x271   : > { %v2635_v32 = vsel %vm2563_vm14, %v5904_v60, %v2499_v28  ;;  %v2637_v26 = vsel %vm2565_vm15, %v5904_v60, %v2501_v59  ;;  %v2887_v12 = vsub.s32 %v7095_v48, %v5910_v2  ;;  %vm2949_vm1 = vcmp.eq.s32.totalorder %v2885_v42, 0  ;;  %v4148_v48 = vld [vmem:[%s4613_s29 + $0x10] ss:$8 sps:$4 sm:$0xff]  }
 0x272   : > { %v2692_v20 = vpack.c.bf16 %v2637_v26, %v2635_v32  ;;  %v3021_v58 = vsel %vm2949_vm1, %v5914_v17, 0.0  ;;  %vm3085_vm3 = vcmp.eq.s32.totalorder %v2885_v42, 1  ;;  %vm3221_vm2 = vcmp.eq.s32.totalorder %v2885_v42, 16  ;;  %1218 = vmatmul.mubr.bf16.gmra.mrb[4].mxu0 %v4148_v48 }
 0x273   : > { %vm2951_vm5 = vcmp.eq.s32.totalorder %v2887_v12, 0  ;;  %vm3087_vm0 = vcmp.eq.s32.totalorder %v2887_v12, 1  ;;  %v3157_v19 = vsel %vm3085_vm3, %v5920_v3, %v3021_v58  ;;  %vm3223_vm4 = vcmp.eq.s32.totalorder %v2887_v12, 16 }
 0x274   : > { %2745 = vmatpush1.bf16.msra.mxu0 %v2692_v20  ;;  %v3023_v63 = vsel %vm2951_vm5, %v5914_v17, 0.0  ;;  %v3293_v9 = vsel %vm3221_vm2, %v5924_v1, %v3157_v19  ;;  %vm3357_vm6 = vcmp.eq.s32.totalorder %v2885_v42, 17  ;;  %vm3359_vm11 = vcmp.eq.s32.totalorder %v2887_v12, 17 }
 0x275   : > { %v3159_v39 = vsel %vm3087_vm0, %v5920_v3, %v3023_v63  ;;  %v3429_v25 = vsel %vm3357_vm6, %v5932_v6, %v3293_v9  ;;  %v2096_v54 = vsub.s32 %v7096_v16, %v5813_v38  ;;  %v2098_v44 = vsub.s32 %v7097_v23, %v5813_v38 }
 0x276   : > { %v3295_v8 = vsel %vm3223_vm4, %v5924_v1, %v3159_v39  ;;  %v2890_v50 = vsub.s32 %v7096_v16, %v5840_v41  ;;  %v2892_v30 = vsub.s32 %v7097_v23, %v5840_v41  ;;  %v2095_v56 = vsub.s32 %v7096_v16, %v5872_v33 }
 0x277   : > { %v3431_v42 = vsel %vm3359_vm11, %v5932_v6, %v3295_v8  ;;  %vm2160_vm12 = vcmp.eq.s32.totalorder %v2096_v54, 0  ;;  %vm2162_vm7 = vcmp.eq.s32.totalorder %v2098_v44, 0  ;;  %vm2296_vm8 = vcmp.eq.s32.totalorder %v2096_v54, 1 }
 0x278   : > { %v3486_v21 = vpack.c.bf16 %v3431_v42, %v3429_v25  ;;  %v2232_v51 = vsel %vm2160_vm12, %v5817_v61, 0.0  ;;  %v2234_v22 = vsel %vm2162_vm7, %v5817_v61, 0.0  ;;  %vm2298_vm9 = vcmp.eq.s32.totalorder %v2098_v44, 1 }
 0x279   : > { %v2368_v11 = vsel %vm2296_vm8, %v5823_v49, %v2232_v51  ;;  %v2370_v13 = vsel %vm2298_vm9, %v5823_v49, %v2234_v22  ;;  %vm2432_vm10 = vcmp.eq.s32.totalorder %v2096_v54, 16  ;;  %vm2434_vm13 = vcmp.eq.s32.totalorder %v2098_v44, 16 }
 0x27a   : > { %3539 = vmatpush1.bf16.msra.mxu1 %v3486_v21  ;;  %v2504_v14 = vsel %vm2432_vm10, %v5827_v46, %v2368_v11  ;;  %v2506_v36 = vsel %vm2434_vm13, %v5827_v46, %v2370_v13  ;;  %vm2568_vm14 = vcmp.eq.s32.totalorder %v2096_v54, 17  ;;  %vm2570_vm15 = vcmp.eq.s32.totalorder %v2098_v44, 17  ;;  %v7098_v54 = vld [vmem:[#allocation24_spill] sm:$0xff] }
 0x27b   : > { %v2640_v47 = vsel %vm2568_vm14, %v5835_v4, %v2504_v14  ;;  %v2642_v15 = vsel %vm2570_vm15, %v5835_v4, %v2506_v36  ;;  %vm2954_vm1 = vcmp.eq.s32.totalorder %v2890_v50, 0  ;;  %vm2956_vm3 = vcmp.eq.s32.totalorder %v2892_v30, 0 }
 0x27c   : > { %v2695_v45 = vpack.c.bf16 %v2642_v15, %v2640_v47  ;;  %v3026_v24 = vsel %vm2954_vm1, %v5844_v57, 0.0  ;;  %v3028_v0 = vsel %vm2956_vm3, %v5844_v57, 0.0  ;;  %vm3090_vm2 = vcmp.eq.s32.totalorder %v2890_v50, 1 }
 0x27d   : > { %vm3092_vm5 = vcmp.eq.s32.totalorder %v2892_v30, 1  ;;  %v3162_v35 = vsel %vm3090_vm2, %v5848_v10, %v3026_v24  ;;  %vm3226_vm0 = vcmp.eq.s32.totalorder %v2890_v50, 16  ;;  %vm3228_vm4 = vcmp.eq.s32.totalorder %v2892_v30, 16 }
 0x27e   : > { %2746 = vmatprep.subr.bf16.mxu0 %v2695_v45  ;;  %v3164_v55 = vsel %vm3092_vm5, %v5848_v10, %v3028_v0  ;;  %v3298_v62 = vsel %vm3226_vm0, %v5852_v18, %v3162_v35  ;;  %vm3362_vm6 = vcmp.eq.s32.totalorder %v2890_v50, 17  ;;  %vm3364_vm11 = vcmp.eq.s32.totalorder %v2892_v30, 17 }
 0x27f   : > { %v3300_v37 = vsel %vm3228_vm4, %v5852_v18, %v3164_v55  ;;  %v3434_v28 = vsel %vm3362_vm6, %v5868_v34, %v3298_v62  ;;  %v2097_v59 = vsub.s32 %v7097_v23, %v5872_v33  ;;  %vm2159_vm12 = vcmp.eq.s32.totalorder %v2095_v56, 0 }
 0x280   : > { %v3436_v32 = vsel %vm3364_vm11, %v5868_v34, %v3300_v37  ;;  %v2231_v26 = vsel %vm2159_vm12, %v5888_v53, 0.0  ;;  %vm2295_vm7 = vcmp.eq.s32.totalorder %v2095_v56, 1  ;;  %vm2431_vm8 = vcmp.eq.s32.totalorder %v2095_v56, 16 }
 0x281   : > { %v3489_v12 = vpack.c.bf16 %v3436_v32, %v3434_v28  ;;  %vm2161_vm9 = vcmp.eq.s32.totalorder %v2097_v59, 0  ;;  %vm2297_vm10 = vcmp.eq.s32.totalorder %v2097_v59, 1  ;;  %v2367_v20 = vsel %vm2295_vm7, %v5892_v7, %v2231_v26 }
 0x282   : > { %v2233_v58 = vsel %vm2161_vm9, %v5888_v53, 0.0  ;;  %vm2433_vm13 = vcmp.eq.s32.totalorder %v2097_v59, 16  ;;  %v2503_v19 = vsel %vm2431_vm8, %v5899_v43, %v2367_v20  ;;  %vm2567_vm14 = vcmp.eq.s32.totalorder %v2095_v56, 17 }
 0x283   : > { %3540 = vmatprep.subr.bf16.mxu1 %v3489_v12  ;;  %v2369_v63 = vsel %vm2297_vm10, %v5892_v7, %v2233_v58  ;;  %vm2569_vm15 = vcmp.eq.s32.totalorder %v2097_v59, 17  ;;  %v2639_v9 = vsel %vm2567_vm14, %v5904_v60, %v2503_v19  ;;  %v2889_v48 = vsub.s32 %v7096_v16, %v5910_v2 }
 0x284   : > { %v2505_v39 = vsel %vm2433_vm13, %v5899_v43, %v2369_v63  ;;  %v2891_v25 = vsub.s32 %v7097_v23, %v5910_v2  ;;  %v2100_v44 = vsub.s32 %v7098_v54, %v5813_v38  ;;  %v2102_v8 = vsub.s32 %v7099_v5, %v5813_v38 }
 0x285   : > { %v2641_v50 = vsel %vm2569_vm15, %v5904_v60, %v2505_v39  ;;  %vm2953_vm1 = vcmp.eq.s32.totalorder %v2889_v48, 0  ;;  %vm3089_vm3 = vcmp.eq.s32.totalorder %v2889_v48, 1  ;;  %vm3225_vm2 = vcmp.eq.s32.totalorder %v2889_v48, 16 }
 0x286   : > { %v2694_v30 = vpack.c.bf16 %v2641_v50, %v2639_v9  ;;  %vm2955_vm5 = vcmp.eq.s32.totalorder %v2891_v25, 0  ;;  %v3025_v16 = vsel %vm2953_vm1, %v5914_v17, 0.0  ;;  %vm3091_vm0 = vcmp.eq.s32.totalorder %v2891_v25, 1 }
 0x287   : > { %v3027_v56 = vsel %vm2955_vm5, %v5914_v17, 0.0  ;;  %v3161_v23 = vsel %vm3089_vm3, %v5920_v3, %v3025_v16  ;;  %vm3227_vm4 = vcmp.eq.s32.totalorder %v2891_v25, 16  ;;  %vm3361_vm6 = vcmp.eq.s32.totalorder %v2889_v48, 17 }
 0x288   : > { %2747 = vmatpush1.bf16.msra.mxu0 %v2694_v30  ;;  %v3163_v42 = vsel %vm3091_vm0, %v5920_v3, %v3027_v56  ;;  %v3297_v21 = vsel %vm3225_vm2, %v5924_v1, %v3161_v23  ;;  %vm3363_vm11 = vcmp.eq.s32.totalorder %v2891_v25, 17  ;;  %vm2164_vm12 = vcmp.eq.s32.totalorder %v2100_v44, 0 }
 0x289   : > { %v3299_v51 = vsel %vm3227_vm4, %v5924_v1, %v3163_v42  ;;  %v3433_v22 = vsel %vm3361_vm6, %v5932_v6, %v3297_v21  ;;  %vm2166_vm7 = vcmp.eq.s32.totalorder %v2102_v8, 0  ;;  %v2236_v11 = vsel %vm2164_vm12, %v5817_v61, 0.0 }
 0x28a   : > { %v3435_v13 = vsel %vm3363_vm11, %v5932_v6, %v3299_v51  ;;  %v2238_v14 = vsel %vm2166_vm7, %v5817_v61, 0.0  ;;  %vm2300_vm8 = vcmp.eq.s32.totalorder %v2100_v44, 1  ;;  %vm2302_vm9 = vcmp.eq.s32.totalorder %v2102_v8, 1 }
 0x28b   : > { %v3488_v36 = vpack.c.bf16 %v3435_v13, %v3433_v22  ;;  %v2372_v47 = vsel %vm2300_vm8, %v5823_v49, %v2236_v11  ;;  %v2374_v15 = vsel %vm2302_vm9, %v5823_v49, %v2238_v14  ;;  %vm2436_vm10 = vcmp.eq.s32.totalorder %v2100_v44, 16  ;;  %v7100_v14 = vld [vmem:[#allocation26_spill] sm:$0xff] }
 0x28c   : > { %vm2438_vm13 = vcmp.eq.s32.totalorder %v2102_v8, 16  ;;  %v2508_v45 = vsel %vm2436_vm10, %v5827_v46, %v2372_v47  ;;  %vm2572_vm14 = vcmp.eq.s32.totalorder %v2100_v44, 17  ;;  %vm2574_vm15 = vcmp.eq.s32.totalorder %v2102_v8, 17  ;;  %v7101_v47 = vld [vmem:[#allocation27_spill] sm:$0xff] }
 0x28d   : > { %3541 = vmatpush1.bf16.msra.mxu1 %v3488_v36  ;;  %v2510_v24 = vsel %vm2438_vm13, %v5827_v46, %v2374_v15  ;;  %v2644_v0 = vsel %vm2572_vm14, %v5835_v4, %v2508_v45  ;;  %v2894_v35 = vsub.s32 %v7098_v54, %v5840_v41  ;;  %v2896_v55 = vsub.s32 %v7099_v5, %v5840_v41 }
 0x28e   : > { %v2646_v62 = vsel %vm2574_vm15, %v5835_v4, %v2510_v24  ;;  %v2099_v37 = vsub.s32 %v7098_v54, %v5872_v33  ;;  %v2101_v28 = vsub.s32 %v7099_v5, %v5872_v33  ;;  %v2893_v59 = vsub.s32 %v7098_v54, %v5910_v2 }
 0x28f   : > { %v2697_v32 = vpack.c.bf16 %v2646_v62, %v2644_v0  ;;  %vm2958_vm1 = vcmp.eq.s32.totalorder %v2894_v35, 0  ;;  %vm2960_vm3 = vcmp.eq.s32.totalorder %v2896_v55, 0  ;;  %vm3094_vm2 = vcmp.eq.s32.totalorder %v2894_v35, 1 }
 0x290   : > { %v3030_v26 = vsel %vm2958_vm1, %v5844_v57, 0.0  ;;  %v3032_v12 = vsel %vm2960_vm3, %v5844_v57, 0.0  ;;  %vm3096_vm5 = vcmp.eq.s32.totalorder %v2896_v55, 1  ;;  %vm3230_vm0 = vcmp.eq.s32.totalorder %v2894_v35, 16 }
 0x291   : > { %2748 = vmatprep.subr.bf16.mxu0 %v2697_v32  ;;  %v3166_v20 = vsel %vm3094_vm2, %v5848_v10, %v3030_v26  ;;  %v3168_v58 = vsel %vm3096_vm5, %v5848_v10, %v3032_v12  ;;  %vm3232_vm4 = vcmp.eq.s32.totalorder %v2896_v55, 16  ;;  %vm3366_vm6 = vcmp.eq.s32.totalorder %v2894_v35, 17 }
 0x292   : > { %v3302_v19 = vsel %vm3230_vm0, %v5852_v18, %v3166_v20  ;;  %v3304_v63 = vsel %vm3232_vm4, %v5852_v18, %v3168_v58  ;;  %vm3368_vm11 = vcmp.eq.s32.totalorder %v2896_v55, 17  ;;  %vm2163_vm12 = vcmp.eq.s32.totalorder %v2099_v37, 0 }
 0x293   : > { %v3438_v9 = vsel %vm3366_vm6, %v5868_v34, %v3302_v19  ;;  %v3440_v48 = vsel %vm3368_vm11, %v5868_v34, %v3304_v63  ;;  %vm2165_vm7 = vcmp.eq.s32.totalorder %v2101_v28, 0  ;;  %v2235_v39 = vsel %vm2163_vm12, %v5888_v53, 0.0 }
 0x294   : > { %v3491_v25 = vpack.c.bf16 %v3440_v48, %v3438_v9  ;;  %v2237_v54 = vsel %vm2165_vm7, %v5888_v53, 0.0  ;;  %vm2299_vm8 = vcmp.eq.s32.totalorder %v2099_v37, 1  ;;  %vm2301_vm9 = vcmp.eq.s32.totalorder %v2101_v28, 1 }
 0x295   : > { %v2371_v44 = vsel %vm2299_vm8, %v5892_v7, %v2235_v39  ;;  %v2373_v8 = vsel %vm2301_vm9, %v5892_v7, %v2237_v54  ;;  %vm2435_vm10 = vcmp.eq.s32.totalorder %v2099_v37, 16  ;;  %vm2437_vm13 = vcmp.eq.s32.totalorder %v2101_v28, 16 }
 0x296   : > { %3542 = vmatprep.subr.bf16.mxu1 %v3491_v25  ;;  %v2507_v50 = vsel %vm2435_vm10, %v5899_v43, %v2371_v44  ;;  %v2509_v30 = vsel %vm2437_vm13, %v5899_v43, %v2373_v8  ;;  %vm2571_vm14 = vcmp.eq.s32.totalorder %v2099_v37, 17  ;;  %vm2573_vm15 = vcmp.eq.s32.totalorder %v2101_v28, 17 }
 0x297   : > { %v2643_v16 = vsel %vm2571_vm14, %v5904_v60, %v2507_v50  ;;  %v2645_v56 = vsel %vm2573_vm15, %v5904_v60, %v2509_v30  ;;  %v2895_v23 = vsub.s32 %v7099_v5, %v5910_v2  ;;  %vm2957_vm1 = vcmp.eq.s32.totalorder %v2893_v59, 0  ;;  %v4152_v50 = vld [vmem:[%s4613_s29 + $0x44] ss:$8 sps:$4 sm:$0xff]  }
 0x298   : > { %v2696_v42 = vpack.c.bf16 %v2645_v56, %v2643_v16  ;;  %v3029_v21 = vsel %vm2957_vm1, %v5914_v17, 0.0  ;;  %vm3093_vm3 = vcmp.eq.s32.totalorder %v2893_v59, 1  ;;  %vm3229_vm2 = vcmp.eq.s32.totalorder %v2893_v59, 16  ;;  %2764 = vmatprep.mubr.bf16.mxu0 %v4152_v50 }
 0x299   : > { %vm2959_vm5 = vcmp.eq.s32.totalorder %v2895_v23, 0  ;;  %vm3095_vm0 = vcmp.eq.s32.totalorder %v2895_v23, 1  ;;  %v3165_v51 = vsel %vm3093_vm3, %v5920_v3, %v3029_v21  ;;  %vm3231_vm4 = vcmp.eq.s32.totalorder %v2895_v23, 16 }
 0x29a   : > { %2749 = vmatpush1.bf16.msra.mxu0 %v2696_v42  ;;  %v3031_v22 = vsel %vm2959_vm5, %v5914_v17, 0.0  ;;  %v3301_v11 = vsel %vm3229_vm2, %v5924_v1, %v3165_v51  ;;  %vm3365_vm6 = vcmp.eq.s32.totalorder %v2893_v59, 17  ;;  %vm3367_vm11 = vcmp.eq.s32.totalorder %v2895_v23, 17  ;;  %v4155_v42 = vld [vmem:[%s4613_s29 + $0x64] ss:$8 sps:$4 sm:$0xff]  }
 0x29b   : > { %v3167_v5 = vsel %vm3095_vm0, %v5920_v3, %v3031_v22  ;;  %v3437_v13 = vsel %vm3365_vm6, %v5932_v6, %v3301_v11  ;;  %v2104_v36 = vsub.s32 %v7100_v14, %v5813_v38  ;;  %v2106_v15 = vsub.s32 %v7101_v47, %v5813_v38  ;;  %3558 = vmatprep.mubr.bf16.mxu1 %v4155_v42 }
 0x29c   : > { %v3303_v45 = vsel %vm3231_vm4, %v5924_v1, %v3167_v5  ;;  %v2898_v24 = vsub.s32 %v7100_v14, %v5840_v41  ;;  %v2900_v0 = vsub.s32 %v7101_v47, %v5840_v41  ;;  %v2103_v35 = vsub.s32 %v7100_v14, %v5872_v33 }
 0x29d   : > { %v3439_v55 = vsel %vm3367_vm11, %v5932_v6, %v3303_v45  ;;  %vm2168_vm12 = vcmp.eq.s32.totalorder %v2104_v36, 0  ;;  %vm2170_vm7 = vcmp.eq.s32.totalorder %v2106_v15, 0  ;;  %vm2304_vm8 = vcmp.eq.s32.totalorder %v2104_v36, 1 }
 0x29e   : > { %v3490_v62 = vpack.c.bf16 %v3439_v55, %v3437_v13  ;;  %v2240_v37 = vsel %vm2168_vm12, %v5817_v61, 0.0  ;;  %v2242_v28 = vsel %vm2170_vm7, %v5817_v61, 0.0  ;;  %vm2306_vm9 = vcmp.eq.s32.totalorder %v2106_v15, 1 }
 0x29f   : > { %v2376_v59 = vsel %vm2304_vm8, %v5823_v49, %v2240_v37  ;;  %v2378_v32 = vsel %vm2306_vm9, %v5823_v49, %v2242_v28  ;;  %vm2440_vm10 = vcmp.eq.s32.totalorder %v2104_v36, 16  ;;  %vm2442_vm13 = vcmp.eq.s32.totalorder %v2106_v15, 16 }
 0x2a0   : > { %3543 = vmatpush1.bf16.msra.mxu1 %v3490_v62  ;;  %v2512_v26 = vsel %vm2440_vm10, %v5827_v46, %v2376_v59  ;;  %v2514_v12 = vsel %vm2442_vm13, %v5827_v46, %v2378_v32  ;;  %vm2576_vm14 = vcmp.eq.s32.totalorder %v2104_v36, 17  ;;  %vm2578_vm15 = vcmp.eq.s32.totalorder %v2106_v15, 17  ;;  %v7102_v15 = vld [vmem:[#allocation28_spill] sm:$0xff] }
 0x2a1   : > { %v2648_v20 = vsel %vm2576_vm14, %v5835_v4, %v2512_v26  ;;  %v2650_v58 = vsel %vm2578_vm15, %v5835_v4, %v2514_v12  ;;  %vm2962_vm1 = vcmp.eq.s32.totalorder %v2898_v24, 0  ;;  %vm2964_vm3 = vcmp.eq.s32.totalorder %v2900_v0, 0 }
 0x2a2   : > { %v2699_v19 = vpack.c.bf16 %v2650_v58, %v2648_v20  ;;  %v3034_v63 = vsel %vm2962_vm1, %v5844_v57, 0.0  ;;  %v3036_v9 = vsel %vm2964_vm3, %v5844_v57, 0.0  ;;  %vm3098_vm2 = vcmp.eq.s32.totalorder %v2898_v24, 1 }
 0x2a3   : > { %vm3100_vm5 = vcmp.eq.s32.totalorder %v2900_v0, 1  ;;  %v3170_v48 = vsel %vm3098_vm2, %v5848_v10, %v3034_v63  ;;  %vm3234_vm0 = vcmp.eq.s32.totalorder %v2898_v24, 16  ;;  %vm3236_vm4 = vcmp.eq.s32.totalorder %v2900_v0, 16 }
 0x2a4   : > { %2750 = vmatprep.subr.bf16.mxu0 %v2699_v19  ;;  %v3172_v39 = vsel %vm3100_vm5, %v5848_v10, %v3036_v9  ;;  %v3306_v25 = vsel %vm3234_vm0, %v5852_v18, %v3170_v48  ;;  %vm3370_vm6 = vcmp.eq.s32.totalorder %v2898_v24, 17  ;;  %vm3372_vm11 = vcmp.eq.s32.totalorder %v2900_v0, 17  ;;  %v7103_v24 = vld [vmem:[#allocation29_spill] sm:$0xff] }
 0x2a5   : > { %v3308_v54 = vsel %vm3236_vm4, %v5852_v18, %v3172_v39  ;;  %v3442_v44 = vsel %vm3370_vm6, %v5868_v34, %v3306_v25  ;;  %v2105_v8 = vsub.s32 %v7101_v47, %v5872_v33  ;;  %vm2167_vm12 = vcmp.eq.s32.totalorder %v2103_v35, 0 }
 0x2a6   : > { %v3444_v30 = vsel %vm3372_vm11, %v5868_v34, %v3308_v54  ;;  %v2239_v16 = vsel %vm2167_vm12, %v5888_v53, 0.0  ;;  %vm2303_vm7 = vcmp.eq.s32.totalorder %v2103_v35, 1  ;;  %vm2439_vm8 = vcmp.eq.s32.totalorder %v2103_v35, 16 }
 0x2a7   : > { %v3493_v56 = vpack.c.bf16 %v3444_v30, %v3442_v44  ;;  %vm2169_vm9 = vcmp.eq.s32.totalorder %v2105_v8, 0  ;;  %vm2305_vm10 = vcmp.eq.s32.totalorder %v2105_v8, 1  ;;  %v2375_v23 = vsel %vm2303_vm7, %v5892_v7, %v2239_v16 }
 0x2a8   : > { %v2241_v21 = vsel %vm2169_vm9, %v5888_v53, 0.0  ;;  %vm2441_vm13 = vcmp.eq.s32.totalorder %v2105_v8, 16  ;;  %v2511_v51 = vsel %vm2439_vm8, %v5899_v43, %v2375_v23  ;;  %vm2575_vm14 = vcmp.eq.s32.totalorder %v2103_v35, 17 }
 0x2a9   : > { %3544 = vmatprep.subr.bf16.mxu1 %v3493_v56  ;;  %v2377_v22 = vsel %vm2305_vm10, %v5892_v7, %v2241_v21  ;;  %vm2577_vm15 = vcmp.eq.s32.totalorder %v2105_v8, 17  ;;  %v2647_v11 = vsel %vm2575_vm14, %v5904_v60, %v2511_v51  ;;  %v2897_v5 = vsub.s32 %v7100_v14, %v5910_v2 }
 0x2aa   : > { %v2513_v13 = vsel %vm2441_vm13, %v5899_v43, %v2377_v22  ;;  %v2899_v36 = vsub.s32 %v7101_v47, %v5910_v2  ;;  %v2108_v45 = vsub.s32 %v7102_v15, %v5813_v38  ;;  %v2110_v0 = vsub.s32 %v7103_v24, %v5813_v38 }
 0x2ab   : > { %v2649_v35 = vsel %vm2577_vm15, %v5904_v60, %v2513_v13  ;;  %vm2961_vm1 = vcmp.eq.s32.totalorder %v2897_v5, 0  ;;  %vm3097_vm3 = vcmp.eq.s32.totalorder %v2897_v5, 1  ;;  %vm3233_vm2 = vcmp.eq.s32.totalorder %v2897_v5, 16 }
 0x2ac   : > { %v2698_v55 = vpack.c.bf16 %v2649_v35, %v2647_v11  ;;  %vm2963_vm5 = vcmp.eq.s32.totalorder %v2899_v36, 0  ;;  %v3033_v14 = vsel %vm2961_vm1, %v5914_v17, 0.0  ;;  %vm3099_vm0 = vcmp.eq.s32.totalorder %v2899_v36, 1 }
 0x2ad   : > { %v3035_v62 = vsel %vm2963_vm5, %v5914_v17, 0.0  ;;  %v3169_v47 = vsel %vm3097_vm3, %v5920_v3, %v3033_v14  ;;  %vm3235_vm4 = vcmp.eq.s32.totalorder %v2899_v36, 16  ;;  %vm3369_vm6 = vcmp.eq.s32.totalorder %v2897_v5, 17 }
 0x2ae   : > { %2751 = vmatpush1.bf16.msra.mxu0 %v2698_v55  ;;  %v3171_v37 = vsel %vm3099_vm0, %v5920_v3, %v3035_v62  ;;  %v3305_v28 = vsel %vm3233_vm2, %v5924_v1, %v3169_v47  ;;  %vm3371_vm11 = vcmp.eq.s32.totalorder %v2899_v36, 17  ;;  %vm2172_vm12 = vcmp.eq.s32.totalorder %v2108_v45, 0 }
 0x2af   : > { %v3307_v59 = vsel %vm3235_vm4, %v5924_v1, %v3171_v37  ;;  %v3441_v32 = vsel %vm3369_vm6, %v5932_v6, %v3305_v28  ;;  %vm2174_vm7 = vcmp.eq.s32.totalorder %v2110_v0, 0  ;;  %v2244_v26 = vsel %vm2172_vm12, %v5817_v61, 0.0 }
 0x2b0   : > { %v3443_v12 = vsel %vm3371_vm11, %v5932_v6, %v3307_v59  ;;  %v2246_v20 = vsel %vm2174_vm7, %v5817_v61, 0.0  ;;  %vm2308_vm8 = vcmp.eq.s32.totalorder %v2108_v45, 1  ;;  %vm2310_vm9 = vcmp.eq.s32.totalorder %v2110_v0, 1 }
 0x2b1   : > { %v3492_v58 = vpack.c.bf16 %v3443_v12, %v3441_v32  ;;  %v2380_v19 = vsel %vm2308_vm8, %v5823_v49, %v2244_v26  ;;  %v2382_v63 = vsel %vm2310_vm9, %v5823_v49, %v2246_v20  ;;  %vm2444_vm10 = vcmp.eq.s32.totalorder %v2108_v45, 16 }
 0x2b2   : > { %vm2446_vm13 = vcmp.eq.s32.totalorder %v2110_v0, 16  ;;  %v2516_v9 = vsel %vm2444_vm10, %v5827_v46, %v2380_v19  ;;  %vm2580_vm14 = vcmp.eq.s32.totalorder %v2108_v45, 17  ;;  %vm2582_vm15 = vcmp.eq.s32.totalorder %v2110_v0, 17  ;;  %v7104_v19 = vld [vmem:[#allocation30_spill] sm:$0xff] }
 0x2b3   : > { %3545 = vmatpush1.bf16.msra.mxu1 %v3492_v58  ;;  %v2518_v48 = vsel %vm2446_vm13, %v5827_v46, %v2382_v63  ;;  %v2652_v39 = vsel %vm2580_vm14, %v5835_v4, %v2516_v9  ;;  %v2902_v25 = vsub.s32 %v7102_v15, %v5840_v41  ;;  %v2904_v54 = vsub.s32 %v7103_v24, %v5840_v41  ;;  %v7105_v9 = vld [vmem:[#allocation31_spill] sm:$0xff] }
 0x2b4   : > { %v2654_v44 = vsel %vm2582_vm15, %v5835_v4, %v2518_v48  ;;  %v2107_v8 = vsub.s32 %v7102_v15, %v5872_v33  ;;  %v2109_v50 = vsub.s32 %v7103_v24, %v5872_v33  ;;  %v2901_v30 = vsub.s32 %v7102_v15, %v5910_v2 }
 0x2b5   : > { %v2701_v16 = vpack.c.bf16 %v2654_v44, %v2652_v39  ;;  %vm2966_vm1 = vcmp.eq.s32.totalorder %v2902_v25, 0  ;;  %vm2968_vm3 = vcmp.eq.s32.totalorder %v2904_v54, 0  ;;  %vm3102_vm2 = vcmp.eq.s32.totalorder %v2902_v25, 1 }
 0x2b6   : > { %v3038_v56 = vsel %vm2966_vm1, %v5844_v57, 0.0  ;;  %v3040_v23 = vsel %vm2968_vm3, %v5844_v57, 0.0  ;;  %vm3104_vm5 = vcmp.eq.s32.totalorder %v2904_v54, 1  ;;  %vm3238_vm0 = vcmp.eq.s32.totalorder %v2902_v25, 16 }
 0x2b7   : > { %2752 = vmatprep.subr.bf16.mxu0 %v2701_v16  ;;  %v3174_v42 = vsel %vm3102_vm2, %v5848_v10, %v3038_v56  ;;  %v3176_v21 = vsel %vm3104_vm5, %v5848_v10, %v3040_v23  ;;  %vm3240_vm4 = vcmp.eq.s32.totalorder %v2904_v54, 16  ;;  %vm3374_vm6 = vcmp.eq.s32.totalorder %v2902_v25, 17 }
 0x2b8   : > { %v3310_v51 = vsel %vm3238_vm0, %v5852_v18, %v3174_v42  ;;  %v3312_v22 = vsel %vm3240_vm4, %v5852_v18, %v3176_v21  ;;  %vm3376_vm11 = vcmp.eq.s32.totalorder %v2904_v54, 17  ;;  %vm2171_vm12 = vcmp.eq.s32.totalorder %v2107_v8, 0 }
 0x2b9   : > { %v3446_v11 = vsel %vm3374_vm6, %v5868_v34, %v3310_v51  ;;  %v3448_v5 = vsel %vm3376_vm11, %v5868_v34, %v3312_v22  ;;  %vm2173_vm7 = vcmp.eq.s32.totalorder %v2109_v50, 0  ;;  %v2243_v13 = vsel %vm2171_vm12, %v5888_v53, 0.0 }
 0x2ba   : > { %v3495_v36 = vpack.c.bf16 %v3448_v5, %v3446_v11  ;;  %v2245_v15 = vsel %vm2173_vm7, %v5888_v53, 0.0  ;;  %vm2307_vm8 = vcmp.eq.s32.totalorder %v2107_v8, 1  ;;  %vm2309_vm9 = vcmp.eq.s32.totalorder %v2109_v50, 1 }
 0x2bb   : > { %v2379_v45 = vsel %vm2307_vm8, %v5892_v7, %v2243_v13  ;;  %v2381_v0 = vsel %vm2309_vm9, %v5892_v7, %v2245_v15  ;;  %vm2443_vm10 = vcmp.eq.s32.totalorder %v2107_v8, 16  ;;  %vm2445_vm13 = vcmp.eq.s32.totalorder %v2109_v50, 16 }
 0x2bc   : > { %3546 = vmatprep.subr.bf16.mxu1 %v3495_v36  ;;  %v2515_v35 = vsel %vm2443_vm10, %v5899_v43, %v2379_v45  ;;  %v2517_v55 = vsel %vm2445_vm13, %v5899_v43, %v2381_v0  ;;  %vm2579_vm14 = vcmp.eq.s32.totalorder %v2107_v8, 17  ;;  %vm2581_vm15 = vcmp.eq.s32.totalorder %v2109_v50, 17 }
 0x2bd   : > { %v2651_v14 = vsel %vm2579_vm14, %v5904_v60, %v2515_v35  ;;  %v2653_v62 = vsel %vm2581_vm15, %v5904_v60, %v2517_v55  ;;  %v2903_v47 = vsub.s32 %v7103_v24, %v5910_v2  ;;  %vm2965_vm1 = vcmp.eq.s32.totalorder %v2901_v30, 0 }
 0x2be   : > { %v2700_v37 = vpack.c.bf16 %v2653_v62, %v2651_v14  ;;  %v3037_v28 = vsel %vm2965_vm1, %v5914_v17, 0.0  ;;  %vm3101_vm3 = vcmp.eq.s32.totalorder %v2901_v30, 1  ;;  %vm3237_vm2 = vcmp.eq.s32.totalorder %v2901_v30, 16 }
 0x2bf   : > { %vm2967_vm5 = vcmp.eq.s32.totalorder %v2903_v47, 0  ;;  %vm3103_vm0 = vcmp.eq.s32.totalorder %v2903_v47, 1  ;;  %v3173_v59 = vsel %vm3101_vm3, %v5920_v3, %v3037_v28  ;;  %vm3239_vm4 = vcmp.eq.s32.totalorder %v2903_v47, 16  ;;  %v6422_v32 = vpop.f32.mrb[0].mxu0 }
 0x2c0   : > { %2753 = vmatpush1.bf16.msra.mxu0 %v2700_v37  ;;  %v3039_v26 = vsel %vm2967_vm5, %v5914_v17, 0.0  ;;  %v3309_v12 = vsel %vm3237_vm2, %v5924_v1, %v3173_v59  ;;  %vm3373_vm6 = vcmp.eq.s32.totalorder %v2901_v30, 17  ;;  %vm3375_vm11 = vcmp.eq.s32.totalorder %v2903_v47, 17  ;;  %v6426_v24 = vpop.f32.mrb[1].mxu0 }
 0x2c1   : > { %v3175_v20 = vsel %vm3103_vm0, %v5920_v3, %v3039_v26  ;;  %v3445_v58 = vsel %vm3373_vm6, %v5932_v6, %v3309_v12  ;;  %v2112_v63 = vsub.s32 %v7104_v19, %v5813_v38  ;;  %v2114_v48 = vsub.s32 %v7105_v9, %v5813_v38  ;;  %v6434_v39 = vpop.f32.mrb[2].mxu0 }
 0x2c2   : > { %v3311_v25 = vsel %vm3239_vm4, %v5924_v1, %v3175_v20  ;;  %v2906_v54 = vsub.s32 %v7104_v19, %v5840_v41  ;;  %v2908_v44 = vsub.s32 %v7105_v9, %v5840_v41  ;;  %v2111_v8 = vsub.s32 %v7104_v19, %v5872_v33  ;;  %v6443_v50 = vpop.f32.mrb[3].mxu0 }
 0x2c3   : > { %v3447_v30 = vsel %vm3375_vm11, %v5932_v6, %v3311_v25  ;;  %vm2176_vm12 = vcmp.eq.s32.totalorder %v2112_v63, 0  ;;  %vm2178_vm7 = vcmp.eq.s32.totalorder %v2114_v48, 0  ;;  %vm2312_vm8 = vcmp.eq.s32.totalorder %v2112_v63, 1 }
 0x2c4   : > { %v3494_v16 = vpack.c.bf16 %v3447_v30, %v3445_v58  ;;  %v2248_v56 = vsel %vm2176_vm12, %v5817_v61, 0.0  ;;  %v2250_v23 = vsel %vm2178_vm7, %v5817_v61, 0.0  ;;  %vm2314_vm9 = vcmp.eq.s32.totalorder %v2114_v48, 1 }
 0x2c5   : > { %v2384_v42 = vsel %vm2312_vm8, %v5823_v49, %v2248_v56  ;;  %v2386_v21 = vsel %vm2314_vm9, %v5823_v49, %v2250_v23  ;;  %vm2448_vm10 = vcmp.eq.s32.totalorder %v2112_v63, 16  ;;  %vm2450_vm13 = vcmp.eq.s32.totalorder %v2114_v48, 16  ;;  %v6450_v51 = vpop.f32.mrb[0].mxu1  ;;  %v7106_v56 = vld [vmem:[#allocation32_spill] sm:$0xff] }
 0x2c6   : > { %3547 = vmatpush1.bf16.msra.mxu1 %v3494_v16  ;;  %v2520_v22 = vsel %vm2448_vm10, %v5827_v46, %v2384_v42  ;;  %v2522_v11 = vsel %vm2450_vm13, %v5827_v46, %v2386_v21  ;;  %vm2584_vm14 = vcmp.eq.s32.totalorder %v2112_v63, 17  ;;  %vm2586_vm15 = vcmp.eq.s32.totalorder %v2114_v48, 17  ;;  %v6454_v5 = vpop.f32.mrb[1].mxu1  ;;  %v7107_v42 = vld [vmem:[#allocation33_spill] sm:$0xff] }
 0x2c7   : > { %v2656_v13 = vsel %vm2584_vm14, %v5835_v4, %v2520_v22  ;;  %v2658_v36 = vsel %vm2586_vm15, %v5835_v4, %v2522_v11  ;;  %vm2970_vm1 = vcmp.eq.s32.totalorder %v2906_v54, 0  ;;  %vm2972_vm3 = vcmp.eq.s32.totalorder %v2908_v44, 0  ;;  %v6458_v15 = vpop.f32.mrb[2].mxu1 }
 0x2c8   : > { %v2703_v45 = vpack.c.bf16 %v2658_v36, %v2656_v13  ;;  %v3042_v0 = vsel %vm2970_vm1, %v5844_v57, 0.0  ;;  %v3044_v35 = vsel %vm2972_vm3, %v5844_v57, 0.0  ;;  %vm3106_vm2 = vcmp.eq.s32.totalorder %v2906_v54, 1  ;;  %v6462_v55 = vpop.f32.mrb[3].mxu1 }
 0x2c9   : > { %vm3108_vm5 = vcmp.eq.s32.totalorder %v2908_v44, 1  ;;  %v3178_v14 = vsel %vm3106_vm2, %v5848_v10, %v3042_v0  ;;  %vm3242_vm0 = vcmp.eq.s32.totalorder %v2906_v54, 16  ;;  %vm3244_vm4 = vcmp.eq.s32.totalorder %v2908_v44, 16 }
 0x2ca   : > { %2754 = vmatprep.subr.bf16.mxu0 %v2703_v45  ;;  %v3180_v62 = vsel %vm3108_vm5, %v5848_v10, %v3044_v35  ;;  %v3314_v47 = vsel %vm3242_vm0, %v5852_v18, %v3178_v14  ;;  %vm3378_vm6 = vcmp.eq.s32.totalorder %v2906_v54, 17  ;;  %vm3380_vm11 = vcmp.eq.s32.totalorder %v2908_v44, 17 }
 0x2cb   : > { %v3316_v37 = vsel %vm3244_vm4, %v5852_v18, %v3180_v62  ;;  %v3450_v28 = vsel %vm3378_vm6, %v5868_v34, %v3314_v47  ;;  %v2113_v59 = vsub.s32 %v7105_v9, %v5872_v33  ;;  %vm2175_vm12 = vcmp.eq.s32.totalorder %v2111_v8, 0 }
 0x2cc   : > { %v3452_v26 = vsel %vm3380_vm11, %v5868_v34, %v3316_v37  ;;  %v2247_v12 = vsel %vm2175_vm12, %v5888_v53, 0.0  ;;  %vm2311_vm7 = vcmp.eq.s32.totalorder %v2111_v8, 1  ;;  %vm2447_vm8 = vcmp.eq.s32.totalorder %v2111_v8, 16 }
 0x2cd   : > { %v3497_v20 = vpack.c.bf16 %v3452_v26, %v3450_v28  ;;  %vm2177_vm9 = vcmp.eq.s32.totalorder %v2113_v59, 0  ;;  %vm2313_vm10 = vcmp.eq.s32.totalorder %v2113_v59, 1  ;;  %v2383_v58 = vsel %vm2311_vm7, %v5892_v7, %v2247_v12 }
 0x2ce   : > { %v2249_v63 = vsel %vm2177_vm9, %v5888_v53, 0.0  ;;  %vm2449_vm13 = vcmp.eq.s32.totalorder %v2113_v59, 16  ;;  %v2519_v48 = vsel %vm2447_vm8, %v5899_v43, %v2383_v58  ;;  %vm2583_vm14 = vcmp.eq.s32.totalorder %v2111_v8, 17 }
 0x2cf   : > { %3548 = vmatprep.subr.bf16.mxu1 %v3497_v20  ;;  %v2385_v25 = vsel %vm2313_vm10, %v5892_v7, %v2249_v63  ;;  %vm2585_vm15 = vcmp.eq.s32.totalorder %v2113_v59, 17  ;;  %v2655_v54 = vsel %vm2583_vm14, %v5904_v60, %v2519_v48  ;;  %v2905_v44 = vsub.s32 %v7104_v19, %v5910_v2 }
 0x2d0   : > { %v2521_v30 = vsel %vm2449_vm13, %v5899_v43, %v2385_v25  ;;  %v2907_v16 = vsub.s32 %v7105_v9, %v5910_v2  ;;  %v2116_v23 = vsub.s32 %v7106_v56, %v5813_v38  ;;  %v2118_v8 = vsub.s32 %v7107_v42, %v5813_v38 }
 0x2d1   : > { %v2657_v21 = vsel %vm2585_vm15, %v5904_v60, %v2521_v30  ;;  %vm2969_vm1 = vcmp.eq.s32.totalorder %v2905_v44, 0  ;;  %vm3105_vm3 = vcmp.eq.s32.totalorder %v2905_v44, 1  ;;  %vm3241_vm2 = vcmp.eq.s32.totalorder %v2905_v44, 16 }
 0x2d2   : > { %v2702_v22 = vpack.c.bf16 %v2657_v21, %v2655_v54  ;;  %vm2971_vm5 = vcmp.eq.s32.totalorder %v2907_v16, 0  ;;  %v3041_v19 = vsel %vm2969_vm1, %v5914_v17, 0.0  ;;  %vm3107_vm0 = vcmp.eq.s32.totalorder %v2907_v16, 1 }
 0x2d3   : > { %v3043_v11 = vsel %vm2971_vm5, %v5914_v17, 0.0  ;;  %v3177_v9 = vsel %vm3105_vm3, %v5920_v3, %v3041_v19  ;;  %vm3243_vm4 = vcmp.eq.s32.totalorder %v2907_v16, 16  ;;  %vm3377_vm6 = vcmp.eq.s32.totalorder %v2905_v44, 17 }
 0x2d4   : > { %2755 = vmatpush1.bf16.msra.mxu0 %v2702_v22  ;;  %v3179_v13 = vsel %vm3107_vm0, %v5920_v3, %v3043_v11  ;;  %v3313_v36 = vsel %vm3241_vm2, %v5924_v1, %v3177_v9  ;;  %vm3379_vm11 = vcmp.eq.s32.totalorder %v2907_v16, 17  ;;  %vm2180_vm12 = vcmp.eq.s32.totalorder %v2116_v23, 0 }
 0x2d5   : > { %v3315_v45 = vsel %vm3243_vm4, %v5924_v1, %v3179_v13  ;;  %v3449_v0 = vsel %vm3377_vm6, %v5932_v6, %v3313_v36  ;;  %vm2182_vm7 = vcmp.eq.s32.totalorder %v2118_v8, 0  ;;  %v2252_v35 = vsel %vm2180_vm12, %v5817_v61, 0.0 }
 0x2d6   : > { %v3451_v14 = vsel %vm3379_vm11, %v5932_v6, %v3315_v45  ;;  %v2254_v62 = vsel %vm2182_vm7, %v5817_v61, 0.0  ;;  %vm2316_vm8 = vcmp.eq.s32.totalorder %v2116_v23, 1  ;;  %vm2318_vm9 = vcmp.eq.s32.totalorder %v2118_v8, 1 }
 0x2d7   : > { %v3496_v47 = vpack.c.bf16 %v3451_v14, %v3449_v0  ;;  %v2388_v37 = vsel %vm2316_vm8, %v5823_v49, %v2252_v35  ;;  %v2390_v28 = vsel %vm2318_vm9, %v5823_v49, %v2254_v62  ;;  %vm2452_vm10 = vcmp.eq.s32.totalorder %v2116_v23, 16 }
 0x2d8   : > { %vm2454_vm13 = vcmp.eq.s32.totalorder %v2118_v8, 16  ;;  %v2524_v59 = vsel %vm2452_vm10, %v5827_v46, %v2388_v37  ;;  %vm2588_vm14 = vcmp.eq.s32.totalorder %v2116_v23, 17  ;;  %vm2590_vm15 = vcmp.eq.s32.totalorder %v2118_v8, 17 }
 0x2d9   : > { %3549 = vmatpush1.bf16.msra.mxu1 %v3496_v47  ;;  %v2526_v26 = vsel %vm2454_vm13, %v5827_v46, %v2390_v28  ;;  %v2660_v12 = vsel %vm2588_vm14, %v5835_v4, %v2524_v59  ;;  %v2910_v20 = vsub.s32 %v7106_v56, %v5840_v41  ;;  %v2912_v58 = vsub.s32 %v7107_v42, %v5840_v41 }
 0x2da   : > { %v2662_v63 = vsel %vm2590_vm15, %v5835_v4, %v2526_v26  ;;  %v2115_v48 = vsub.s32 %v7106_v56, %v5872_v33  ;;  %v2117_v25 = vsub.s32 %v7107_v42, %v5872_v33  ;;  %v2909_v54 = vsub.s32 %v7106_v56, %v5910_v2 }
 0x2db   : > { %v2705_v44 = vpack.c.bf16 %v2662_v63, %v2660_v12  ;;  %vm2974_vm1 = vcmp.eq.s32.totalorder %v2910_v20, 0  ;;  %vm2976_vm3 = vcmp.eq.s32.totalorder %v2912_v58, 0  ;;  %vm3110_vm2 = vcmp.eq.s32.totalorder %v2910_v20, 1 }
 0x2dc   : > { %v3046_v30 = vsel %vm2974_vm1, %v5844_v57, 0.0  ;;  %v3048_v16 = vsel %vm2976_vm3, %v5844_v57, 0.0  ;;  %vm3112_vm5 = vcmp.eq.s32.totalorder %v2912_v58, 1  ;;  %vm3246_vm0 = vcmp.eq.s32.totalorder %v2910_v20, 16 }
 0x2dd   : > { %2756 = vmatprep.subr.bf16.mxu0 %v2705_v44  ;;  %v3182_v23 = vsel %vm3110_vm2, %v5848_v10, %v3046_v30  ;;  %v3184_v8 = vsel %vm3112_vm5, %v5848_v10, %v3048_v16  ;;  %vm3248_vm4 = vcmp.eq.s32.totalorder %v2912_v58, 16  ;;  %vm3382_vm6 = vcmp.eq.s32.totalorder %v2910_v20, 17 }
 0x2de   : > { %v3318_v21 = vsel %vm3246_vm0, %v5852_v18, %v3182_v23  ;;  %v3320_v56 = vsel %vm3248_vm4, %v5852_v18, %v3184_v8  ;;  %vm3384_vm11 = vcmp.eq.s32.totalorder %v2912_v58, 17  ;;  %vm2179_vm12 = vcmp.eq.s32.totalorder %v2115_v48, 0  ;;  %v7108_v58 = vld [vmem:[#allocation34_spill] sm:$0xff] }
 0x2df   : > { %v3454_v22 = vsel %vm3382_vm6, %v5868_v34, %v3318_v21  ;;  %v3456_v19 = vsel %vm3384_vm11, %v5868_v34, %v3320_v56  ;;  %vm2181_vm7 = vcmp.eq.s32.totalorder %v2117_v25, 0  ;;  %v2251_v11 = vsel %vm2179_vm12, %v5888_v53, 0.0 }
 0x2e0   : > { %v3499_v9 = vpack.c.bf16 %v3456_v19, %v3454_v22  ;;  %v2253_v13 = vsel %vm2181_vm7, %v5888_v53, 0.0  ;;  %vm2315_vm8 = vcmp.eq.s32.totalorder %v2115_v48, 1  ;;  %vm2317_vm9 = vcmp.eq.s32.totalorder %v2117_v25, 1 }
 0x2e1   : > { %v2387_v36 = vsel %vm2315_vm8, %v5892_v7, %v2251_v11  ;;  %v2389_v45 = vsel %vm2317_vm9, %v5892_v7, %v2253_v13  ;;  %vm2451_vm10 = vcmp.eq.s32.totalorder %v2115_v48, 16  ;;  %vm2453_vm13 = vcmp.eq.s32.totalorder %v2117_v25, 16 }
 0x2e2   : > { %3550 = vmatprep.subr.bf16.mxu1 %v3499_v9  ;;  %v2523_v0 = vsel %vm2451_vm10, %v5899_v43, %v2387_v36  ;;  %v2525_v35 = vsel %vm2453_vm13, %v5899_v43, %v2389_v45  ;;  %vm2587_vm14 = vcmp.eq.s32.totalorder %v2115_v48, 17  ;;  %vm2589_vm15 = vcmp.eq.s32.totalorder %v2117_v25, 17 }
 0x2e3   : > { %v2659_v14 = vsel %vm2587_vm14, %v5904_v60, %v2523_v0  ;;  %v2661_v62 = vsel %vm2589_vm15, %v5904_v60, %v2525_v35  ;;  %v2911_v47 = vsub.s32 %v7107_v42, %v5910_v2  ;;  %vm2973_vm1 = vcmp.eq.s32.totalorder %v2909_v54, 0 }
 0x2e4   : > { %v2704_v37 = vpack.c.bf16 %v2661_v62, %v2659_v14  ;;  %v3045_v28 = vsel %vm2973_vm1, %v5914_v17, 0.0  ;;  %vm3109_vm3 = vcmp.eq.s32.totalorder %v2909_v54, 1  ;;  %vm3245_vm2 = vcmp.eq.s32.totalorder %v2909_v54, 16 }
 0x2e5   : > { %vm2975_vm5 = vcmp.eq.s32.totalorder %v2911_v47, 0  ;;  %vm3111_vm0 = vcmp.eq.s32.totalorder %v2911_v47, 1  ;;  %v3181_v59 = vsel %vm3109_vm3, %v5920_v3, %v3045_v28  ;;  %vm3247_vm4 = vcmp.eq.s32.totalorder %v2911_v47, 16 }
 0x2e6   : > { %2757 = vmatpush1.bf16.msra.mxu0 %v2704_v37  ;;  %v3047_v26 = vsel %vm2975_vm5, %v5914_v17, 0.0  ;;  %v3317_v12 = vsel %vm3245_vm2, %v5924_v1, %v3181_v59  ;;  %vm3381_vm6 = vcmp.eq.s32.totalorder %v2909_v54, 17  ;;  %vm3383_vm11 = vcmp.eq.s32.totalorder %v2911_v47, 17 }
 0x2e7   : > { %v3183_v42 = vsel %vm3111_vm0, %v5920_v3, %v3047_v26  ;;  %v3453_v20 = vsel %vm3381_vm6, %v5932_v6, %v3317_v12  ;;  %v2120_v63 = vsub.s32 %v7108_v58, %v5813_v38  ;;  %v2122_v48 = vsub.s32 %v5641_v31, %v5813_v38 }
 0x2e8   : > { %v3319_v25 = vsel %vm3247_vm4, %v5924_v1, %v3183_v42  ;;  %v2914_v44 = vsub.s32 %v7108_v58, %v5840_v41  ;;  %v2916_v30 = vsub.s32 %v5641_v31, %v5840_v41  ;;  %v2119_v54 = vsub.s32 %v7108_v58, %v5872_v33 }
 0x2e9   : > { %v3455_v16 = vsel %vm3383_vm11, %v5932_v6, %v3319_v25  ;;  %vm2184_vm12 = vcmp.eq.s32.totalorder %v2120_v63, 0  ;;  %vm2186_vm7 = vcmp.eq.s32.totalorder %v2122_v48, 0  ;;  %vm2320_vm8 = vcmp.eq.s32.totalorder %v2120_v63, 1 }
 0x2ea   : > { %v3498_v23 = vpack.c.bf16 %v3455_v16, %v3453_v20  ;;  %v2256_v8 = vsel %vm2184_vm12, %v5817_v61, 0.0  ;;  %v2258_v21 = vsel %vm2186_vm7, %v5817_v61, 0.0  ;;  %vm2322_vm9 = vcmp.eq.s32.totalorder %v2122_v48, 1 }
 0x2eb   : > { %v2392_v56 = vsel %vm2320_vm8, %v5823_v49, %v2256_v8  ;;  %v2394_v22 = vsel %vm2322_vm9, %v5823_v49, %v2258_v21  ;;  %vm2456_vm10 = vcmp.eq.s32.totalorder %v2120_v63, 16  ;;  %vm2458_vm13 = vcmp.eq.s32.totalorder %v2122_v48, 16 }
 0x2ec   : > { %3551 = vmatpush1.bf16.msra.mxu1 %v3498_v23  ;;  %v2528_v19 = vsel %vm2456_vm10, %v5827_v46, %v2392_v56  ;;  %v2530_v11 = vsel %vm2458_vm13, %v5827_v46, %v2394_v22  ;;  %vm2592_vm14 = vcmp.eq.s32.totalorder %v2120_v63, 17  ;;  %vm2594_vm15 = vcmp.eq.s32.totalorder %v2122_v48, 17 }
 0x2ed   : > { %v2664_v9 = vsel %vm2592_vm14, %v5835_v4, %v2528_v19  ;;  %v2666_v13 = vsel %vm2594_vm15, %v5835_v4, %v2530_v11  ;;  %vm2978_vm1 = vcmp.eq.s32.totalorder %v2914_v44, 0  ;;  %vm2980_vm3 = vcmp.eq.s32.totalorder %v2916_v30, 0 }
 0x2ee   : > { %v2707_v36 = vpack.c.bf16 %v2666_v13, %v2664_v9  ;;  %v3050_v45 = vsel %vm2978_vm1, %v5844_v57, 0.0  ;;  %v3052_v0 = vsel %vm2980_vm3, %v5844_v57, 0.0  ;;  %vm3114_vm2 = vcmp.eq.s32.totalorder %v2914_v44, 1 }
 0x2ef   : > { %vm3116_vm5 = vcmp.eq.s32.totalorder %v2916_v30, 1  ;;  %v3186_v35 = vsel %vm3114_vm2, %v5848_v10, %v3050_v45  ;;  %vm3250_vm0 = vcmp.eq.s32.totalorder %v2914_v44, 16  ;;  %vm3252_vm4 = vcmp.eq.s32.totalorder %v2916_v30, 16 }
 0x2f0   : > { %2758 = vmatprep.subr.bf16.mxu0 %v2707_v36  ;;  %v3188_v14 = vsel %vm3116_vm5, %v5848_v10, %v3052_v0  ;;  %v3322_v62 = vsel %vm3250_vm0, %v5852_v18, %v3186_v35  ;;  %vm3386_vm6 = vcmp.eq.s32.totalorder %v2914_v44, 17  ;;  %vm3388_vm11 = vcmp.eq.s32.totalorder %v2916_v30, 17 }
 0x2f1   : > { %v3324_v47 = vsel %vm3252_vm4, %v5852_v18, %v3188_v14  ;;  %v3458_v37 = vsel %vm3386_vm6, %v5868_v34, %v3322_v62  ;;  %v2121_v28 = vsub.s32 %v5641_v31, %v5872_v33  ;;  %vm2183_vm12 = vcmp.eq.s32.totalorder %v2119_v54, 0 }
 0x2f2   : > { %v3460_v59 = vsel %vm3388_vm11, %v5868_v34, %v3324_v47  ;;  %v2255_v26 = vsel %vm2183_vm12, %v5888_v53, 0.0  ;;  %vm2319_vm7 = vcmp.eq.s32.totalorder %v2119_v54, 1  ;;  %vm2455_vm8 = vcmp.eq.s32.totalorder %v2119_v54, 16 }
 0x2f3   : > { %v3501_v12 = vpack.c.bf16 %v3460_v59, %v3458_v37  ;;  %vm2185_vm9 = vcmp.eq.s32.totalorder %v2121_v28, 0  ;;  %vm2321_vm10 = vcmp.eq.s32.totalorder %v2121_v28, 1  ;;  %v2391_v42 = vsel %vm2319_vm7, %v5892_v7, %v2255_v26 }
 0x2f4   : > { %v2257_v20 = vsel %vm2185_vm9, %v5888_v53, 0.0  ;;  %vm2457_vm13 = vcmp.eq.s32.totalorder %v2121_v28, 16  ;;  %v2527_v63 = vsel %vm2455_vm8, %v5899_v43, %v2391_v42  ;;  %vm2591_vm14 = vcmp.eq.s32.totalorder %v2119_v54, 17 }
 0x2f5   : > { %3552 = vmatprep.subr.bf16.mxu1 %v3501_v12  ;;  %v2393_v48 = vsel %vm2321_vm10, %v5892_v7, %v2257_v20  ;;  %vm2593_vm15 = vcmp.eq.s32.totalorder %v2121_v28, 17  ;;  %v2663_v25 = vsel %vm2591_vm14, %v5904_v60, %v2527_v63  ;;  %v2913_v44 = vsub.s32 %v7108_v58, %v5910_v2 }
 0x2f6   : > { %v2529_v30 = vsel %vm2457_vm13, %v5899_v43, %v2393_v48  ;;  %v2915_v16 = vsub.s32 %v5641_v31, %v5910_v2  ;;  %v2124_v23 = vsub.s32 %v5645_v52, %v5813_v38  ;;  %v2126_v54 = vsub.s32 %v5648_v29, %v5813_v38 }
 0x2f7   : > { %v2665_v8 = vsel %vm2593_vm15, %v5904_v60, %v2529_v30  ;;  %vm2977_vm1 = vcmp.eq.s32.totalorder %v2913_v44, 0  ;;  %vm3113_vm3 = vcmp.eq.s32.totalorder %v2913_v44, 1  ;;  %vm3249_vm2 = vcmp.eq.s32.totalorder %v2913_v44, 16 }
 0x2f8   : > { %v2706_v21 = vpack.c.bf16 %v2665_v8, %v2663_v25  ;;  %vm2979_vm5 = vcmp.eq.s32.totalorder %v2915_v16, 0  ;;  %v3049_v58 = vsel %vm2977_vm1, %v5914_v17, 0.0  ;;  %vm3115_vm0 = vcmp.eq.s32.totalorder %v2915_v16, 1 }
 0x2f9   : > { %v3051_v56 = vsel %vm2979_vm5, %v5914_v17, 0.0  ;;  %v3185_v31 = vsel %vm3113_vm3, %v5920_v3, %v3049_v58  ;;  %vm3251_vm4 = vcmp.eq.s32.totalorder %v2915_v16, 16  ;;  %vm3385_vm6 = vcmp.eq.s32.totalorder %v2913_v44, 17 }
 0x2fa   : > { %2759 = vmatpush1.bf16.msra.mxu0 %v2706_v21  ;;  %v3187_v22 = vsel %vm3115_vm0, %v5920_v3, %v3051_v56  ;;  %v3321_v19 = vsel %vm3249_vm2, %v5924_v1, %v3185_v31  ;;  %vm3387_vm11 = vcmp.eq.s32.totalorder %v2915_v16, 17  ;;  %vm2188_vm12 = vcmp.eq.s32.totalorder %v2124_v23, 0 }
 0x2fb   : > { %v3323_v11 = vsel %vm3251_vm4, %v5924_v1, %v3187_v22  ;;  %v3457_v9 = vsel %vm3385_vm6, %v5932_v6, %v3321_v19  ;;  %vm2190_vm7 = vcmp.eq.s32.totalorder %v2126_v54, 0  ;;  %v2260_v13 = vsel %vm2188_vm12, %v5817_v61, 0.0 }
 0x2fc   : > { %v3459_v36 = vsel %vm3387_vm11, %v5932_v6, %v3323_v11  ;;  %v2262_v45 = vsel %vm2190_vm7, %v5817_v61, 0.0  ;;  %vm2324_vm8 = vcmp.eq.s32.totalorder %v2124_v23, 1  ;;  %vm2326_vm9 = vcmp.eq.s32.totalorder %v2126_v54, 1 }
 0x2fd   : > { %v3500_v0 = vpack.c.bf16 %v3459_v36, %v3457_v9  ;;  %v2396_v35 = vsel %vm2324_vm8, %v5823_v49, %v2260_v13  ;;  %v2398_v14 = vsel %vm2326_vm9, %v5823_v49, %v2262_v45  ;;  %vm2460_vm10 = vcmp.eq.s32.totalorder %v2124_v23, 16 }
 0x2fe   : > { %vm2462_vm13 = vcmp.eq.s32.totalorder %v2126_v54, 16  ;;  %v2532_v62 = vsel %vm2460_vm10, %v5827_v46, %v2396_v35  ;;  %vm2596_vm14 = vcmp.eq.s32.totalorder %v2124_v23, 17  ;;  %vm2598_vm15 = vcmp.eq.s32.totalorder %v2126_v54, 17 }
 0x2ff   : > { %3553 = vmatpush1.bf16.msra.mxu1 %v3500_v0  ;;  %v2534_v47 = vsel %vm2462_vm13, %v5827_v46, %v2398_v14  ;;  %v2668_v37 = vsel %vm2596_vm14, %v5835_v4, %v2532_v62  ;;  %v2918_v28 = vsub.s32 %v5645_v52, %v5840_v41  ;;  %v2920_v59 = vsub.s32 %v5648_v29, %v5840_v41 }
 0x300   : > { %v2670_v26 = vsel %vm2598_vm15, %v5835_v4, %v2534_v47  ;;  %v2123_v12 = vsub.s32 %v5645_v52, %v5872_v33  ;;  %v2125_v42 = vsub.s32 %v5648_v29, %v5872_v33  ;;  %v2917_v20 = vsub.s32 %v5645_v52, %v5910_v2 }
 0x301   : > { %v2709_v63 = vpack.c.bf16 %v2670_v26, %v2668_v37  ;;  %vm2982_vm1 = vcmp.eq.s32.totalorder %v2918_v28, 0  ;;  %vm2984_vm3 = vcmp.eq.s32.totalorder %v2920_v59, 0  ;;  %vm3118_vm2 = vcmp.eq.s32.totalorder %v2918_v28, 1 }
 0x302   : > { %v3054_v48 = vsel %vm2982_vm1, %v5844_v57, 0.0  ;;  %v3056_v25 = vsel %vm2984_vm3, %v5844_v57, 0.0  ;;  %vm3120_vm5 = vcmp.eq.s32.totalorder %v2920_v59, 1  ;;  %vm3254_vm0 = vcmp.eq.s32.totalorder %v2918_v28, 16 }
 0x303   : > { %2760 = vmatprep.subr.bf16.mxu0 %v2709_v63  ;;  %v3190_v44 = vsel %vm3118_vm2, %v5848_v10, %v3054_v48  ;;  %v3192_v30 = vsel %vm3120_vm5, %v5848_v10, %v3056_v25  ;;  %vm3256_vm4 = vcmp.eq.s32.totalorder %v2920_v59, 16  ;;  %vm3390_vm6 = vcmp.eq.s32.totalorder %v2918_v28, 17 }
 0x304   : > { %v3326_v16 = vsel %vm3254_vm0, %v5852_v18, %v3190_v44  ;;  %v3328_v52 = vsel %vm3256_vm4, %v5852_v18, %v3192_v30  ;;  %vm3392_vm11 = vcmp.eq.s32.totalorder %v2920_v59, 17  ;;  %vm2187_vm12 = vcmp.eq.s32.totalorder %v2123_v12, 0 }
 0x305   : > { %v3462_v23 = vsel %vm3390_vm6, %v5868_v34, %v3326_v16  ;;  %v3464_v54 = vsel %vm3392_vm11, %v5868_v34, %v3328_v52  ;;  %vm2189_vm7 = vcmp.eq.s32.totalorder %v2125_v42, 0  ;;  %v2259_v8 = vsel %vm2187_vm12, %v5888_v53, 0.0 }
 0x306   : > { %v3503_v21 = vpack.c.bf16 %v3464_v54, %v3462_v23  ;;  %v2261_v58 = vsel %vm2189_vm7, %v5888_v53, 0.0  ;;  %vm2323_vm8 = vcmp.eq.s32.totalorder %v2123_v12, 1  ;;  %vm2325_vm9 = vcmp.eq.s32.totalorder %v2125_v42, 1 }
 0x307   : > { %v2395_v56 = vsel %vm2323_vm8, %v5892_v7, %v2259_v8  ;;  %v2397_v31 = vsel %vm2325_vm9, %v5892_v7, %v2261_v58  ;;  %vm2459_vm10 = vcmp.eq.s32.totalorder %v2123_v12, 16  ;;  %vm2461_vm13 = vcmp.eq.s32.totalorder %v2125_v42, 16 }
 0x308   : > { %3554 = vmatprep.subr.bf16.mxu1 %v3503_v21  ;;  %v2531_v22 = vsel %vm2459_vm10, %v5899_v43, %v2395_v56  ;;  %v2533_v19 = vsel %vm2461_vm13, %v5899_v43, %v2397_v31  ;;  %vm2595_vm14 = vcmp.eq.s32.totalorder %v2123_v12, 17  ;;  %vm2597_vm15 = vcmp.eq.s32.totalorder %v2125_v42, 17 }
 0x309   : > { %v2667_v11 = vsel %vm2595_vm14, %v5904_v60, %v2531_v22  ;;  %v2669_v9 = vsel %vm2597_vm15, %v5904_v60, %v2533_v19  ;;  %v2919_v13 = vsub.s32 %v5648_v29, %v5910_v2  ;;  %vm2981_vm1 = vcmp.eq.s32.totalorder %v2917_v20, 0 }
 0x30a   : > { %v2708_v36 = vpack.c.bf16 %v2669_v9, %v2667_v11  ;;  %v3053_v45 = vsel %vm2981_vm1, %v5914_v17, 0.0  ;;  %vm3117_vm3 = vcmp.eq.s32.totalorder %v2917_v20, 1  ;;  %vm3253_vm2 = vcmp.eq.s32.totalorder %v2917_v20, 16 }
 0x30b   : > { %vm2983_vm5 = vcmp.eq.s32.totalorder %v2919_v13, 0  ;;  %vm3119_vm0 = vcmp.eq.s32.totalorder %v2919_v13, 1  ;;  %v3189_v0 = vsel %vm3117_vm3, %v5920_v3, %v3053_v45  ;;  %vm3255_vm4 = vcmp.eq.s32.totalorder %v2919_v13, 16  ;;  %v4156_v45 = vld [vmem:[%s4613_s29 + $0x54] ss:$8 sps:$4 sm:$0xff]  }
 0x30c   : > { %2761 = vmatpush1.bf16.msra.mxu0 %v2708_v36  ;;  %v3055_v35 = vsel %vm2983_vm5, %v5914_v17, 0.0  ;;  %v3325_v14 = vsel %vm3253_vm2, %v5924_v1, %v3189_v0  ;;  %vm3389_vm6 = vcmp.eq.s32.totalorder %v2917_v20, 17  ;;  %vm3391_vm11 = vcmp.eq.s32.totalorder %v2919_v13, 17 }
 0x30d   : > { %v3191_v29 = vsel %vm3119_vm0, %v5920_v3, %v3055_v35  ;;  %v3461_v62 = vsel %vm3389_vm6, %v5932_v6, %v3325_v14  ;;  %v2128_v47 = vsub.s32 %v5651_v27, %v5813_v38  ;;  %v2130_v37 = vsub.s32 %v5747_v40, %v5813_v38 }
 0x30e   : > { %v3327_v28 = vsel %vm3255_vm4, %v5924_v1, %v3191_v29  ;;  %v2922_v59 = vsub.s32 %v5651_v27, %v5840_v41  ;;  %v2924_v26 = vsub.s32 %v5747_v40, %v5840_v41  ;;  %v2127_v12 = vsub.s32 %v5651_v27, %v5872_v33 }
 0x30f   : > { %v3463_v42 = vsel %vm3391_vm11, %v5932_v6, %v3327_v28  ;;  %vm2192_vm12 = vcmp.eq.s32.totalorder %v2128_v47, 0  ;;  %vm2194_vm7 = vcmp.eq.s32.totalorder %v2130_v37, 0  ;;  %vm2328_vm8 = vcmp.eq.s32.totalorder %v2128_v47, 1 }
 0x310   : > { %v3502_v20 = vpack.c.bf16 %v3463_v42, %v3461_v62  ;;  %v2264_v63 = vsel %vm2192_vm12, %v5817_v61, 0.0  ;;  %v2266_v38 = vsel %vm2194_vm7, %v5817_v61, 0.0  ;;  %vm2330_vm9 = vcmp.eq.s32.totalorder %v2130_v37, 1 }
 0x311   : > { %v2400_v48 = vsel %vm2328_vm8, %v5823_v49, %v2264_v63  ;;  %v2402_v25 = vsel %vm2330_vm9, %v5823_v49, %v2266_v38  ;;  %vm2464_vm10 = vcmp.eq.s32.totalorder %v2128_v47, 16  ;;  %vm2466_vm13 = vcmp.eq.s32.totalorder %v2130_v37, 16 }
 0x312   : > { %3555 = vmatpush1.bf16.msra.mxu1 %v3502_v20  ;;  %v2536_v41 = vsel %vm2464_vm10, %v5827_v46, %v2400_v48  ;;  %v2538_v44 = vsel %vm2466_vm13, %v5827_v46, %v2402_v25  ;;  %vm2600_vm14 = vcmp.eq.s32.totalorder %v2128_v47, 17  ;;  %vm2602_vm15 = vcmp.eq.s32.totalorder %v2130_v37, 17  ;;  %v4158_v20 = vld [vmem:[%s4613_s29 + $0x74] ss:$8 sps:$4 sm:$0xff]  }
 0x313   : > { %v2672_v30 = vsel %vm2600_vm14, %v5835_v4, %v2536_v41  ;;  %v2674_v16 = vsel %vm2602_vm15, %v5835_v4, %v2538_v44  ;;  %vm2986_vm1 = vcmp.eq.s32.totalorder %v2922_v59, 0  ;;  %vm2988_vm3 = vcmp.eq.s32.totalorder %v2924_v26, 0  ;;  %v4160_v44 = vld [vmem:[%s4613_s29 + $0x50] ss:$8 sps:$4 sm:$0xff]  }
 0x314   : > { %v2711_v61 = vpack.c.bf16 %v2674_v16, %v2672_v30  ;;  %v3058_v49 = vsel %vm2986_vm1, %v5844_v57, 0.0  ;;  %v3060_v52 = vsel %vm2988_vm3, %v5844_v57, 0.0  ;;  %vm3122_vm2 = vcmp.eq.s32.totalorder %v2922_v59, 1 }
 0x315   : > { %vm3124_vm5 = vcmp.eq.s32.totalorder %v2924_v26, 1  ;;  %v3194_v46 = vsel %vm3122_vm2, %v5848_v10, %v3058_v49  ;;  %vm3258_vm0 = vcmp.eq.s32.totalorder %v2922_v59, 16  ;;  %vm3260_vm4 = vcmp.eq.s32.totalorder %v2924_v26, 16 }
 0x316   : > { %2762 = vmatprep.subr.bf16.mxu0 %v2711_v61  ;;  %v3196_v4 = vsel %vm3124_vm5, %v5848_v10, %v3060_v52  ;;  %v3330_v23 = vsel %vm3258_vm0, %v5852_v18, %v3194_v46  ;;  %vm3394_vm6 = vcmp.eq.s32.totalorder %v2922_v59, 17  ;;  %vm3396_vm11 = vcmp.eq.s32.totalorder %v2924_v26, 17  ;;  %v4153_v59 = vld [vmem:[%s4613_s29 + $0x60] ss:$8 sps:$4 sm:$0xff]   ;;  %v4161_v52 = vld [vmem:[%s4613_s29 + $0x70] ss:$8 sps:$4 sm:$0xff]  }
 0x317   : > { %v3332_v54 = vsel %vm3260_vm4, %v5852_v18, %v3196_v4  ;;  %v3466_v8 = vsel %vm3394_vm6, %v5868_v34, %v3330_v23  ;;  %v2129_v57 = vsub.s32 %v5747_v40, %v5872_v33  ;;  %vm2191_vm12 = vcmp.eq.s32.totalorder %v2127_v12, 0 }
 0x318   : > { %v3468_v21 = vsel %vm3396_vm11, %v5868_v34, %v3332_v54  ;;  %v2263_v58 = vsel %vm2191_vm12, %v5888_v53, 0.0  ;;  %vm2327_vm7 = vcmp.eq.s32.totalorder %v2127_v12, 1  ;;  %vm2463_vm8 = vcmp.eq.s32.totalorder %v2127_v12, 16 }
 0x319   : > { %v3505_v56 = vpack.c.bf16 %v3468_v21, %v3466_v8  ;;  %vm2193_vm9 = vcmp.eq.s32.totalorder %v2129_v57, 0  ;;  %vm2329_vm10 = vcmp.eq.s32.totalorder %v2129_v57, 1  ;;  %v2399_v10 = vsel %vm2327_vm7, %v5892_v7, %v2263_v58 }
 0x31a   : > { %v2265_v18 = vsel %vm2193_vm9, %v5888_v53, 0.0  ;;  %vm2465_vm13 = vcmp.eq.s32.totalorder %v2129_v57, 16  ;;  %v2535_v33 = vsel %vm2463_vm8, %v5899_v43, %v2399_v10  ;;  %vm2599_vm14 = vcmp.eq.s32.totalorder %v2127_v12, 17 }
 0x31b   : > { %3556 = vmatprep.subr.bf16.mxu1 %v3505_v56  ;;  %v2401_v34 = vsel %vm2329_vm10, %v5892_v7, %v2265_v18  ;;  %vm2601_vm15 = vcmp.eq.s32.totalorder %v2129_v57, 17  ;;  %v2671_v31 = vsel %vm2599_vm14, %v5904_v60, %v2535_v33  ;;  %v2921_v22 = vsub.s32 %v5651_v27, %v5910_v2 }
 0x31c   : > { %v2537_v19 = vsel %vm2465_vm13, %v5899_v43, %v2401_v34  ;;  %v2923_v53 = vsub.s32 %v5747_v40, %v5910_v2  ;;  %v6684_v11 = vstv %s6654_s7  ;;  %v6687_v9 = vstv %s6658_s9  ;;  %v4150_v2 = vld [vmem:[%s4613_s29 + $0x40] ss:$8 sps:$4 sm:$0xff]   ;;  %s6873_s29 = scalar_lea.vmem [#allocation14], %s3985_s30  ;;  %s6941_s9 = scalar_lea.hbm %s6999_s6, %s4030_s2 }
 0x31d   : > { %v2673_v13 = vsel %vm2601_vm15, %v5904_v60, %v2537_v19  ;;  %vm2985_vm1 = vcmp.eq.s32.totalorder %v2921_v22, 0  ;;  %vm3121_vm3 = vcmp.eq.s32.totalorder %v2921_v22, 1  ;;  %vm3257_vm2 = vcmp.eq.s32.totalorder %v2921_v22, 16  ;;  %s3825_s3 = sshll.u32 %s6873_s29, 4  ;;  %s6943_s3 = int_to_ptr.vmem [resolvable:$true] %s3825_s3 }
 0x31e   : > { %v2710_v7 = vpack.c.bf16 %v2673_v13, %v2671_v31  ;;  %vm2987_vm5 = vcmp.eq.s32.totalorder %v2923_v53, 0  ;;  %v3057_v27 = vsel %vm2985_vm1, %v5914_v17, 0.0  ;;  %vm3123_vm0 = vcmp.eq.s32.totalorder %v2923_v53, 1 }
 0x31f   : > { %v3059_v43 = vsel %vm2987_vm5, %v5914_v17, 0.0  ;;  %v3193_v40 = vsel %vm3121_vm3, %v5920_v3, %v3057_v27  ;;  %vm3259_vm4 = vcmp.eq.s32.totalorder %v2923_v53, 16  ;;  %vm3393_vm6 = vcmp.eq.s32.totalorder %v2921_v22, 17 }
 0x320   : > { %2763 = vmatpush1.bf16.msra.mxu0 %v2710_v7  ;;  %v3195_v60 = vsel %vm3123_vm0, %v5920_v3, %v3059_v43  ;;  %v3329_v36 = vsel %vm3257_vm2, %v5924_v1, %v3193_v40  ;;  %vm3395_vm11 = vcmp.eq.s32.totalorder %v2923_v53, 17  ;;  %v1230_v0 = vmul.f32 %v6684_v11, %v6422_v32 }
 0x321   : > { %v3331_v35 = vsel %vm3259_vm4, %v5924_v1, %v3195_v60  ;;  %v3465_v17 = vsel %vm3393_vm6, %v5932_v6, %v3329_v36  ;;  %v1248_v14 = vmul.f32 %v6687_v9, %v6422_v32  ;;  %v6704_v29 = vstv %s6670_s14  ;;  %s4267_s14 = scalar_lea.vmem %s6943_s3, 1024 }
 0x322   : > { %v3467_v62 = vsel %vm3395_vm11, %v5932_v6, %v3331_v35  ;;  %v2001_v3 = vmul.f32 %v6704_v29, %v6450_v51  ;;  %v6710_v47 = vstv %s6674_s22  ;;  %v1231_v37 = vmul.f32 %v6684_v11, %v6426_v24  ;;  %p4268_p4 = scmp.ne.s32.totalorder %s6943_s3, %s4267_s14  ;;  %s4371_s22 = smov [#allocation14]  }
 0x323   : > { %v3504_v28 = vpack.c.bf16 %v3467_v62, %v3465_v17  ;;  %2765 = vmatmul.mubr.bf16.vlgmr.msra.gmra.mrb[8].mxu0 %v4150_v2  ;;  %v2035_v1 = vmul.f32 %v6710_v47, %v6450_v51  ;;  %v1249_v32 = vmul.f32 %v6687_v9, %v6426_v24  ;;  %v2002_v6 = vmul.f32 %v6704_v29, %v6454_v5 }
 0x324   : > { %2774 = vmatprep.mubr.bf16.mxu0 %v4156_v45  ;;  %v6721_v26 = vadd.f32 %v2001_v3, %v1230_v0  ;;  %v2036_v12 = vmul.f32 %v6710_v47, %v6454_v5  ;;  %v1232_v42 = vmul.f32 %v6684_v11, %v6434_v39  ;;  %v1250_v51 = vmul.f32 %v6687_v9, %v6434_v39  ;;  %p4269_p11 = pnand %p4268_p4, %p7109_p1 }
 0x325   : > { %3557 = vmatpush1.bf16.msra.mxu1 %v3504_v28  ;;  %v6730_v24 = vadd.f32 %v2035_v1, %v1248_v14  ;;  %v6732_v63 = vadd.f32 %v2002_v6, %v1231_v37  ;;  %v2003_v38 = vmul.f32 %v6704_v29, %v6458_v15  ;;  %v2037_v48 = vmul.f32 %v6710_v47, %v6458_v15 }
 0x326   : > { %v6738_v5 = vadd.f32 %v2036_v12, %v1249_v32  ;;  %v1233_v25 = vmul.f32 %v6684_v11, %v6443_v50  ;;  %v1251_v39 = vmul.f32 %v6687_v9, %v6443_v50  ;;  %v2004_v41 = vmul.f32 %v6704_v29, %v6462_v55  ;;  %p4270_p2 = pneg %p4269_p11 }
 0x327   : > { %v6747_v30 = vadd.f32 %v2003_v38, %v1232_v42  ;;  %v6749_v16 = vadd.f32 %v2037_v48, %v1250_v51  ;;  %v2038_v61 = vmul.f32 %v6710_v47, %v6462_v55  ;;  %v6802_v28 = vstv %s4020_s5 }
 0x328   : > { %3559 = vmatmul.mubr.bf16.vlgmr.msra.gmra.mrb[8].mxu1 %v4153_v59  ;;  %v6753_v15 = vadd.f32 %v2004_v41, %v1233_v25  ;;  %v6804_v1 = vstv %s3656_s0 }
 0x329   : > { %3568 = vmatprep.mubr.bf16.mxu1 %v4158_v20  ;;  %v6755_v49 = vadd.f32 %v2038_v61, %v1251_v39  ;;  %v6816_v61 = vstv %s3647_s17 }
 0x32b   : > { %2775 = vmatmul.mubr.bf16.gmra.mrb[12].mxu0 %v4160_v44 }
 0x330   : > { %3569 = vmatmul.mubr.bf16.gmra.mrb[12].mxu1 %v4161_v52 }
 0x33f   : > { %v1982_v23 = vpop.f32.mrb[4].mxu1 }
 0x340   : > { %v2005_v8 = vmul.f32 %v6704_v29, %v1982_v23  ;;  %v2039_v55 = vmul.f32 %v6710_v47, %v1982_v23  ;;  %v1984_v58 = vpop.f32.mrb[5].mxu1  ;;  %v6827_v23 = vstv %s6794_s8 }
 0x341   : > { %v2006_v10 = vmul.f32 %v6704_v29, %v1984_v58  ;;  %v2040_v18 = vmul.f32 %v6710_v47, %v1984_v58  ;;  %v1986_v31 = vpop.f32.mrb[6].mxu1 }
 0x342   : > { %v2007_v13 = vmul.f32 %v6704_v29, %v1986_v31  ;;  %v2041_v7 = vmul.f32 %v6710_v47, %v1986_v31  ;;  %v1988_v27 = vpop.f32.mrb[7].mxu1 }
 0x343   : > { %v2008_v0 = vmul.f32 %v6704_v29, %v1988_v27  ;;  %v2042_v35 = vmul.f32 %v6710_v47, %v1988_v27  ;;  %v6800_v47 = vstv %s4019_s21 }
 0x345   : > { %v1219_v50 = vpop.f32.mrb[4].mxu0 }
 0x346   : > { %v1234_v46 = vmul.f32 %v6684_v11, %v1219_v50  ;;  %v1252_v4 = vmul.f32 %v6687_v9, %v1219_v50  ;;  %v1221_v54 = vpop.f32.mrb[5].mxu0 }
 0x347   : > { %v1235_v57 = vmul.f32 %v6684_v11, %v1221_v54  ;;  %v1253_v21 = vmul.f32 %v6687_v9, %v1221_v54  ;;  %v1223_v56 = vpop.f32.mrb[6].mxu0  ;;  %v6830_v54 = vstv %s6796_s20 }
 0x348   : > { %v1236_v33 = vmul.f32 %v6684_v11, %v1223_v56  ;;  %v1254_v34 = vmul.f32 %v6687_v9, %v1223_v56  ;;  %v1225_v22 = vpop.f32.mrb[7].mxu0  ;;  %v6768_v19 = vadd.f32 %v2005_v8, %v1234_v46  ;;  %v6770_v53 = vadd.f32 %v2039_v55, %v1252_v4 }
 0x349   : > { %v6774_v43 = vadd.f32 %v2006_v10, %v1235_v57  ;;  %v6776_v40 = vadd.f32 %v2040_v18, %v1253_v21  ;;  %v1237_v2 = vmul.f32 %v6684_v11, %v1225_v22  ;;  %v1255_v60 = vmul.f32 %v6687_v9, %v1225_v22 }
 0x34a   : > { %v6780_v36 = vadd.f32 %v2007_v13, %v1236_v33  ;;  %v6782_v45 = vadd.f32 %v2041_v7, %v1254_v34  ;;  %v6790_v11 = vstv %s4009_s12  ;;  %v6792_v9 = vstv %s4010_s19  ;;  %s4271_s12 = sshll.u32 %s4371_s22, 4  ;;  %s4272_s12 = int_to_ptr.vmem [resolvable:$false] %s4271_s12 }
 0x34b   : > { %v6786_v17 = vadd.f32 %v2008_v0, %v1237_v2  ;;  %v6788_v14 = vadd.f32 %v2042_v35, %v1255_v60  ;;  %s4273_s19 = scalar_lea.vmem %s4272_s12, 2048  ;;  %p4274_p9 = scmp.lt.s32.totalorder %s6943_s3, %s4272_s12 }
 0x34c   : > { %p4275_p8 = scmp.lt.s32.totalorder %s4273_s19, %s4267_s14 }
 0x34e   : > { %p4276_p3 = por %p4275_p8, %p4274_p9 }
 0x350   : > { %p4277_p13 = pnand %p4276_p3, %p4270_p2 }
 0x3f6   : > { %v2766_v29 = vpop.f32.mrb[8].mxu0 }
 0x3f7   : > { %v2795_v62 = vmul.f32 %v6790_v11, %v2766_v29  ;;  %v2829_v3 = vmul.f32 %v6792_v9, %v2766_v29  ;;  %v2768_v37 = vpop.f32.mrb[9].mxu0 }
 0x3f8   : > { %v2796_v32 = vmul.f32 %v6790_v11, %v2768_v37  ;;  %v2830_v6 = vmul.f32 %v6792_v9, %v2768_v37  ;;  %v2770_v59 = vpop.f32.mrb[10].mxu0 }
 0x3f9   : > { %v2803_v12 = vadd.f32 %v2795_v62, %v6721_v26  ;;  %v2837_v42 = vadd.f32 %v2829_v3, %v6730_v24  ;;  %v2797_v51 = vmul.f32 %v6790_v11, %v2770_v59  ;;  %v2831_v20 = vmul.f32 %v6792_v9, %v2770_v59  ;;  %v2772_v38 = vpop.f32.mrb[11].mxu0 }
 0x3fa   : > { %v2804_v48 = vadd.f32 %v2796_v32, %v6732_v63  ;;  %v2838_v25 = vadd.f32 %v2830_v6, %v6738_v5  ;;  %v2798_v39 = vmul.f32 %v6790_v11, %v2772_v38  ;;  %v2832_v41 = vmul.f32 %v6792_v9, %v2772_v38 }
 0x3fb   : > { %v3560_v44 = vpop.f32.mrb[8].mxu1  ;;  %v6818_v26 = vstv %s4022_s13  ;;  %v2805_v24 = vadd.f32 %v2797_v51, %v6747_v30  ;;  %v2839_v52 = vadd.f32 %v2831_v20, %v6749_v16 }
 0x3fc   : > { %v3589_v50 = vmul.f32 %v6800_v47, %v3560_v44  ;;  %v3623_v46 = vmul.f32 %v6802_v28, %v3560_v44  ;;  %v3562_v63 = vpop.f32.mrb[9].mxu1  ;;  %v2806_v5 = vadd.f32 %v2798_v39, %v6753_v15  ;;  %v2840_v4 = vadd.f32 %v2832_v41, %v6755_v49 }
 0x3fd   : > { %v3590_v8 = vmul.f32 %v6800_v47, %v3562_v63  ;;  %v3624_v55 = vmul.f32 %v6802_v28, %v3562_v63  ;;  %v3564_v30 = vpop.f32.mrb[10].mxu1 }
 0x3fe   : > { %v3597_v57 = vadd.f32 %v3589_v50, %v2803_v12  ;;  %v3631_v16 = vadd.f32 %v3623_v46, %v2837_v42  ;;  %v3591_v21 = vmul.f32 %v6800_v47, %v3564_v30  ;;  %v3625_v58 = vmul.f32 %v6802_v28, %v3564_v30  ;;  %v3566_v56 = vpop.f32.mrb[11].mxu1  ;;  %v6836_v10 = vpop.f32.mrb[12].mxu0 }
 0x3ff   : > { %v3598_v15 = vadd.f32 %v3590_v8, %v2804_v48  ;;  %v3632_v49 = vadd.f32 %v3624_v55, %v2838_v25  ;;  %v3592_v18 = vmul.f32 %v6800_v47, %v3566_v56  ;;  %v3626_v33 = vmul.f32 %v6802_v28, %v3566_v56  ;;  %v6840_v34 = vpop.f32.mrb[13].mxu0 }
 0x400   : > { %v3658_v31 = vadd.f32 %v6804_v1, %v3597_v57  ;;  %v3718_v22 = vadd.f32 %v6818_v26, %v3631_v16  ;;  %v3599_v13 = vadd.f32 %v3591_v21, %v2805_v24  ;;  %v3633_v7 = vadd.f32 %v3625_v58, %v2839_v52  ;;  %v6844_v27 = vpop.f32.mrb[14].mxu0 }
 0x401   : > { %v3659_v2 = vadd.f32 %v6804_v1, %v3598_v15  ;;  %v3719_v60 = vadd.f32 %v6818_v26, %v3632_v49  ;;  %v3600_v0 = vadd.f32 %v3592_v18, %v2806_v5  ;;  %v3634_v35 = vadd.f32 %v3626_v33, %v2840_v4  ;;  %v6848_v29 = vpop.f32.mrb[15].mxu0 }
 0x402   : > { %vm3666_vm12 = vcmp.ge.f32.partialorder %v3658_v31, 0.0  ;;  %v3674_v62 = vmul.f32 0.01, %v3658_v31  ;;  %vm3726_vm7 = vcmp.ge.f32.partialorder %v3718_v22, 0.0  ;;  %v3734_v3 = vmul.f32 0.01, %v3718_v22 }
 0x403   : > { %vm3667_vm8 = vcmp.ge.f32.partialorder %v3659_v2, 0.0  ;;  %v3675_v37 = vmul.f32 0.01, %v3659_v2  ;;  %vm3727_vm9 = vcmp.ge.f32.partialorder %v3719_v60, 0.0  ;;  %v3735_v32 = vmul.f32 0.01, %v3719_v60 }
 0x404   : > { %v3682_v6 = vsel %vm3666_vm12, %v3658_v31, %v3674_v62  ;;  %v3742_v59 = vsel %vm3726_vm7, %v3718_v22, %v3734_v3  ;;  %v3660_v12 = vadd.f32 %v6804_v1, %v3599_v13  ;;  %v3720_v42 = vadd.f32 %v6818_v26, %v3633_v7  ;;  %v3570_v51 = vpop.f32.mrb[12].mxu1 }
 0x405   : > { %v3691_v20 = vmul.f32 %v6816_v61, %v3682_v6  ;;  %v3751_v38 = vmul.f32 %v6827_v23, %v3742_v59  ;;  %v3683_v48 = vsel %vm3667_vm8, %v3659_v2, %v3675_v37  ;;  %v3743_v25 = vsel %vm3727_vm9, %v3719_v60, %v3735_v32  ;;  %v3572_v39 = vpop.f32.mrb[13].mxu1 }
 0x406   : > { %v3692_v41 = vmul.f32 %v6816_v61, %v3683_v48  ;;  %v3752_v44 = vmul.f32 %v6827_v23, %v3743_v25  ;;  %vm3668_vm10 = vcmp.ge.f32.partialorder %v3660_v12, 0.0  ;;  %v3676_v24 = vmul.f32 0.01, %v3660_v12  ;;  %v6856_v52 = vpop.f32.mrb[14].mxu1 }
 0x407   : > { %v3759_v50 = vadd.f32 %v3751_v38, %v3691_v20  ;;  %vm3728_vm13 = vcmp.ge.f32.partialorder %v3720_v42, 0.0  ;;  %v3736_v46 = vmul.f32 0.01, %v3720_v42  ;;  %v3661_v63 = vadd.f32 %v6804_v1, %v3600_v0  ;;  %v6859_v5 = vpop.f32.mrb[15].mxu1 }
 0x408   : > { %v3760_v4 = vadd.f32 %v3752_v44, %v3692_v41  ;;  %v3684_v8 = vsel %vm3668_vm10, %v3660_v12, %v3676_v24  ;;  %v3721_v55 = vadd.f32 %v6818_v26, %v3634_v35  ;;  %v2799_v30 = vmul.f32 %v6790_v11, %v6836_v10 }
 0x409   : > { %v3769_v57 = vadd.f32 %v6830_v54, %v3759_v50  ;;  %v3693_v16 = vmul.f32 %v6816_v61, %v3684_v8  ;;  %v3744_v21 = vsel %vm3728_vm13, %v3720_v42, %v3736_v46  ;;  %vm3669_vm14 = vcmp.ge.f32.partialorder %v3661_v63, 0.0 }
 0x40a   : > { %v3770_v58 = vadd.f32 %v6830_v54, %v3760_v4  ;;  %v3753_v56 = vmul.f32 %v6827_v23, %v3744_v21  ;;  %v3677_v15 = vmul.f32 0.01, %v3661_v63  ;;  %vm3729_vm15 = vcmp.ge.f32.partialorder %v3721_v55, 0.0 }
 0x40b   : > { %vm3777_vm1 = vcmp.ge.f32.partialorder %v3769_v57, 0.0  ;;  %v3785_v49 = vmul.f32 0.01, %v3769_v57  ;;  %v3737_v18 = vmul.f32 0.01, %v3721_v55  ;;  %v2807_v33 = vadd.f32 %v2799_v30, %v6768_v19 }
 0x40c   : > { %vm3778_vm3 = vcmp.ge.f32.partialorder %v3770_v58, 0.0  ;;  %v3786_v31 = vmul.f32 0.01, %v3770_v58  ;;  %v3761_v22 = vadd.f32 %v3753_v56, %v3693_v16  ;;  %v3685_v13 = vsel %vm3669_vm14, %v3661_v63, %v3677_v15 }
 0x40d   : > { %v3793_v7 = vsel %vm3777_vm1, %v3769_v57, %v3785_v49  ;;  %v3694_v2 = vmul.f32 %v6816_v61, %v3685_v13  ;;  %v3745_v60 = vsel %vm3729_vm15, %v3721_v55, %v3737_v18  ;;  %v2833_v0 = vmul.f32 %v6792_v9, %v6836_v10 }
 0x40e   : > { %3801 = vst [vmem:[%s6873_s29] sm:$0xff] %v3793_v7  ;;  %v3794_v35 = vsel %vm3778_vm3, %v3770_v58, %v3786_v31  ;;  %v3771_v62 = vadd.f32 %v6830_v54, %v3761_v22  ;;  %v3754_v19 = vmul.f32 %v6827_v23, %v3745_v60  ;;  %v3593_v3 = vmul.f32 %v6800_v47, %v3570_v51 }
 0x40f   : > { %3802 = vst [vmem:[%s6873_s29 + $0x8] sm:$0xff] %v3794_v35  ;;  %v2841_v37 = vadd.f32 %v2833_v0, %v6770_v53  ;;  %v3627_v32 = vmul.f32 %v6802_v28, %v3570_v51  ;;  %v2800_v10 = vmul.f32 %v6790_v11, %v6840_v34  ;;  %v2834_v6 = vmul.f32 %v6792_v9, %v6840_v34 }
 0x410   : > { %vm3779_vm2 = vcmp.ge.f32.partialorder %v3771_v62, 0.0  ;;  %v3787_v59 = vmul.f32 0.01, %v3771_v62  ;;  %v3762_v12 = vadd.f32 %v3754_v19, %v3694_v2  ;;  %v3601_v42 = vadd.f32 %v3593_v3, %v2807_v33 }
 0x411   : > { %v3635_v20 = vadd.f32 %v3627_v32, %v2841_v37  ;;  %v2808_v38 = vadd.f32 %v2800_v10, %v6774_v43  ;;  %v2842_v48 = vadd.f32 %v2834_v6, %v6776_v40  ;;  %v3594_v53 = vmul.f32 %v6800_v47, %v3572_v39 }
 0x412   : > { %v3795_v25 = vsel %vm3779_vm2, %v3771_v62, %v3787_v59  ;;  %v3772_v51 = vadd.f32 %v6830_v54, %v3762_v12  ;;  %v3662_v41 = vadd.f32 %v6804_v1, %v3601_v42  ;;  %v3628_v44 = vmul.f32 %v6802_v28, %v3572_v39 }
 0x413   : > { %3803 = vst [vmem:[%s6873_s29 + $0x10] sm:$0xff] %v3795_v25  ;;  %v3722_v34 = vadd.f32 %v6818_v26, %v3635_v20  ;;  %v3602_v24 = vadd.f32 %v3594_v53, %v2808_v38  ;;  %v2801_v50 = vmul.f32 %v6790_v11, %v6844_v27  ;;  %v2835_v43 = vmul.f32 %v6792_v9, %v6844_v27 }
 0x414   : > { %vm3780_vm5 = vcmp.ge.f32.partialorder %v3772_v51, 0.0  ;;  %v3788_v40 = vmul.f32 0.01, %v3772_v51  ;;  %vm3670_vm0 = vcmp.ge.f32.partialorder %v3662_v41, 0.0  ;;  %v3678_v46 = vmul.f32 0.01, %v3662_v41 }
 0x415   : > { %vm3730_vm4 = vcmp.ge.f32.partialorder %v3722_v34, 0.0  ;;  %v3738_v63 = vmul.f32 0.01, %v3722_v34  ;;  %v3636_v4 = vadd.f32 %v3628_v44, %v2842_v48  ;;  %v3663_v39 = vadd.f32 %v6804_v1, %v3602_v24 }
 0x416   : > { %v3796_v8 = vsel %vm3780_vm5, %v3772_v51, %v3788_v40  ;;  %v3686_v55 = vsel %vm3670_vm0, %v3662_v41, %v3678_v46  ;;  %v2809_v30 = vadd.f32 %v2801_v50, %v6780_v36  ;;  %v2843_v57 = vadd.f32 %v2835_v43, %v6782_v45 }
 0x417   : > { %3804 = vst [vmem:[%s6873_s29 + $0x18] sm:$0xff] %v3796_v8  ;;  %v3695_v16 = vmul.f32 %v6816_v61, %v3686_v55  ;;  %v3746_v21 = vsel %vm3730_vm4, %v3722_v34, %v3738_v63  ;;  %vm3671_vm6 = vcmp.ge.f32.partialorder %v3663_v39, 0.0  ;;  %v3679_v27 = vmul.f32 0.01, %v3663_v39 }
 0x418   : > { %v3755_v58 = vmul.f32 %v6827_v23, %v3746_v21  ;;  %v3723_v56 = vadd.f32 %v6818_v26, %v3636_v4  ;;  %v3595_v15 = vmul.f32 %v6800_v47, %v6856_v52  ;;  %v3629_v49 = vmul.f32 %v6802_v28, %v6856_v52 }
 0x419   : > { %v3687_v18 = vsel %vm3671_vm6, %v3663_v39, %v3679_v27  ;;  %v2802_v36 = vmul.f32 %v6790_v11, %v6848_v29  ;;  %v2836_v45 = vmul.f32 %v6792_v9, %v6848_v29  ;;  %v3596_v33 = vmul.f32 %v6800_v47, %v6859_v5 }
 0x41a   : > { %v3763_v31 = vadd.f32 %v3755_v58, %v3695_v16  ;;  %v3696_v22 = vmul.f32 %v6816_v61, %v3687_v18  ;;  %vm3731_vm11 = vcmp.ge.f32.partialorder %v3723_v56, 0.0  ;;  %v3739_v13 = vmul.f32 0.01, %v3723_v56 }
 0x41b   : > { %v3603_v7 = vadd.f32 %v3595_v15, %v2809_v30  ;;  %v3637_v2 = vadd.f32 %v3629_v49, %v2843_v57  ;;  %v2810_v60 = vadd.f32 %v2802_v36, %v6786_v17  ;;  %v2844_v52 = vadd.f32 %v2836_v45, %v6788_v14 }
 0x41c   : > { %v3773_v0 = vadd.f32 %v6830_v54, %v3763_v31  ;;  %v3747_v11 = vsel %vm3731_vm11, %v3723_v56, %v3739_v13  ;;  %v3630_v9 = vmul.f32 %v6802_v28, %v6859_v5 }
 0x41d   : > { %v3756_v47 = vmul.f32 %v6827_v23, %v3747_v11  ;;  %v3664_v29 = vadd.f32 %v6804_v1, %v3603_v7  ;;  %v3724_v35 = vadd.f32 %v6818_v26, %v3637_v2  ;;  %v3604_v62 = vadd.f32 %v3596_v33, %v2810_v60 }
 0x41e   : > { %vm3781_vm12 = vcmp.ge.f32.partialorder %v3773_v0, 0.0  ;;  %v3789_v19 = vmul.f32 0.01, %v3773_v0  ;;  %v3638_v3 = vadd.f32 %v3630_v9, %v2844_v52 }
 0x41f   : > { %v3764_v17 = vadd.f32 %v3756_v47, %v3696_v22  ;;  %vm3672_vm7 = vcmp.ge.f32.partialorder %v3664_v29, 0.0  ;;  %v3680_v14 = vmul.f32 0.01, %v3664_v29  ;;  %vm3732_vm8 = vcmp.ge.f32.partialorder %v3724_v35, 0.0 }
 0x420   : > { %v3797_v37 = vsel %vm3781_vm12, %v3773_v0, %v3789_v19  ;;  %v3740_v32 = vmul.f32 0.01, %v3724_v35  ;;  %v3665_v10 = vadd.f32 %v6804_v1, %v3604_v62  ;;  %v3725_v28 = vadd.f32 %v6818_v26, %v3638_v3 }
 0x421   : > { %3805 = vst [vmem:[%s6873_s29 + $0x20] sm:$0xff] %v3797_v37  ;;  %v3774_v5 = vadd.f32 %v6830_v54, %v3764_v17  ;;  %v3688_v6 = vsel %vm3672_vm7, %v3664_v29, %v3680_v14 }
 0x422   : > { %v3697_v59 = vmul.f32 %v6816_v61, %v3688_v6  ;;  %v3748_v12 = vsel %vm3732_vm8, %v3724_v35, %v3740_v32  ;;  %vm3673_vm9 = vcmp.ge.f32.partialorder %v3665_v10, 0.0  ;;  %v3681_v42 = vmul.f32 0.01, %v3665_v10 }
 0x423   : > { %vm3782_vm10 = vcmp.ge.f32.partialorder %v3774_v5, 0.0  ;;  %v3790_v20 = vmul.f32 0.01, %v3774_v5  ;;  %v3757_v38 = vmul.f32 %v6827_v23, %v3748_v12  ;;  %vm3733_vm13 = vcmp.ge.f32.partialorder %v3725_v28, 0.0 }
 0x424   : > { %v3689_v1 = vsel %vm3673_vm9, %v3665_v10, %v3681_v42  ;;  %v3741_v26 = vmul.f32 0.01, %v3725_v28 }
 0x425   : > { %v3798_v48 = vsel %vm3782_vm10, %v3774_v5, %v3790_v20  ;;  %v3765_v53 = vadd.f32 %v3757_v38, %v3697_v59  ;;  %v3698_v25 = vmul.f32 %v6816_v61, %v3689_v1 }
 0x426   : > { %3806 = vst [vmem:[%s6873_s29 + $0x28] sm:$0xff] %v3798_v48  ;;  %v3749_v51 = vsel %vm3733_vm13, %v3725_v28, %v3741_v26 }
 0x427   : > { %v3775_v41 = vadd.f32 %v6830_v54, %v3765_v53  ;;  %v3758_v44 = vmul.f32 %v6827_v23, %v3749_v51 }
 0x429   : > { %vm3783_vm14 = vcmp.ge.f32.partialorder %v3775_v41, 0.0  ;;  %v3791_v34 = vmul.f32 0.01, %v3775_v41  ;;  %v3766_v24 = vadd.f32 %v3758_v44, %v3698_v25 }
 0x42b   : > { %v3799_v50 = vsel %vm3783_vm14, %v3775_v41, %v3791_v34  ;;  %v3776_v43 = vadd.f32 %v6830_v54, %v3766_v24 }
 0x42c   : > { %3807 = vst [vmem:[%s6873_s29 + $0x30] sm:$0xff] %v3799_v50 }
 0x42d   : > { %vm3784_vm15 = vcmp.ge.f32.partialorder %v3776_v43, 0.0  ;;  %v3792_v61 = vmul.f32 0.01, %v3776_v43 }
 0x42f   : > { %v3800_v23 = vsel %vm3784_vm15, %v3776_v43, %v3792_v61 }
 0x430   : > { %3808 = vst [vmem:[%s6873_s29 + $0x38] sm:$0xff] %v3800_v23 }
 0x431   : > { %4280 = shalt.err (!%p4277_p13)
}
 0x432   : > { %s4281_s21 = scalar_lea.hbm %s6941_s9, 1024  ;;  %s4285_s17 = scalar_lea.hbm %s6999_s6, 2048 }
 0x433   : > { %p4282_p10 = scmp.ne.s32.totalorder %s6941_s9, %s4281_s21  ;;  %p4286_p5 = scmp.lt.u32.totalorder %s6941_s9, %s6999_s6 }
 0x434   : > { %p4287_p6 = scmp.lt.u32.totalorder %s4285_s17, %s4281_s21  ;;  %p4289_p4 = scmp.lt.u32.totalorder %s4281_s21, %s6941_s9 }
 0x435   : > { %p4283_p7 = pnand %p4282_p10, %p7109_p1 }
 0x436   : > { %p4288_p0 = por %p4287_p6, %p4286_p5 }
 0x437   : > { %p4284_p12 = pneg %p4283_p7 }
 0x438   : > { %p4290_p11 = por %p4289_p4, %p4288_p0 }
 0x43a   : > { %p4291_p2 = pnand %p4290_p11, %p4284_p12 }
 0x43c   : > { %4294 = shalt.err (!%p4291_p2)
}
 0x43d   : > { %s4372_s20 = smov 256   ;;  %s4373_s30 = smov 16  }
 0x43e   : > { %4051 = dma.vmem_to_hbm [thread:$0]  (%p7109_p1), %s6943_s3, 1024, %s6941_s9, %s3810_s26, %s4372_s20, %s4372_s20, %s4373_s30  }
 0x43f PF: > { %s3840_s29 = sand.u32 1, %s4341_s23   ;;  %p7110_p9 = scmp.ne.s32.totalorder %s7043_s11, 0 }
 0x440   : > { %p7111_p8 = scmp.ge.s32.totalorder %s4361_s28, 2  ;;  %s3841_s2 = scalar_lea.sflag [#allocation6], %s3840_s29 }
 0x442   : > { %p4071_p3 = pnand %p7111_p8, %p7110_p9 }
 0x444   : > { %4336 = dma.done.wait (!%p4071_p3), %s3841_s2, 1024  }
 0x445   : > { %4338 = vsyncadd (!%p4071_p3), %s3841_s2, 4294966272  ;;  %s28_s28 = sadd.s32 1, %s4361_s28   ;;  %s7112_s23 = smov %s4345_s24 }
 0x446   : > { %p25_p13 = scmp.ge.s32.totalorder %s28_s28, 4   ;;  %s7113_s24 = smov %s4349_s25 }
 0x447   : > { %s7114_s25 = smov %s4549_s16  ;;  %s7115_s26 = smov %s4357_s27 }
 0x448   : > { %s7116_s27 = smov %s7118_s18  ;;  %27 = sbr.rel (!%p25_p13) target bundleno = 16 (0x10), region = 119 }
 0x44f   :  { %3846 = vsyncpa [#allocation5], 1 }
 0x450   :  { %3848 = vsyncpa [#allocation5 + $0x1], 1 }
 0x451   :  { %3849 = vsyncpa [#allocation9], 1 }
 0x452   :  { %3851 = vsyncpa [#allocation9 + $0x1], 1 }
 0x453   :  { %3852 = vsyncpa [#allocation6], 1 }
 0x454   :  { %3854 = vsyncpa [#allocation6 + $0x1], 1 }
 0x455   :  { %3855 = vsyncpa [#allocation7], 1 }
 0x456   :  { %3857 = vsyncpa [#allocation7 + $0x1], 1 }
 0x457   :  { %3858 = vsyncpa [#allocation12], 1 }

</bundles_post_ra>
